<compile_context>
chip_gen: v6e
topology: v6e:2x2x1
jax: 0.10.0
libtpu: 0.0.40
codegen_flags: <defaults>
</compile_context>

<pallas_src>
import jax
import jax.numpy as jnp
from jax import lax
from jax.experimental import pallas as pl
from jax.experimental.pallas import tpu as pltpu

EPS = 1e-5        # torch BatchNorm default eps
C_PAD = 128       # lane-dense channel padding

_VMEM = pl.BlockSpec(memory_space=pltpu.MemorySpace.VMEM)


# --------------------------- Pallas kernels ---------------------------------

def _conv_bn_pool_relu_kernel(p_ref, w_ref, g_ref, b_ref, o_ref):
    """Fused Conv (4 pool-grouped im2col matmuls) + BatchNorm2d (batch stats)
    + AvgPool2d(2,2) + ReLU.

    p_ref: (4, M, K)  im2col patches; group d = position inside the 2x2 pool
                      window, rows ordered (n, ph, pw), cols (ki, kj, ic).
    w_ref: (K, 128)   conv weight, output channels zero-padded to 128 lanes.
    g_ref, b_ref: (1, 128)  BN gamma/beta, zero-padded.
    o_ref: (M, 128)   pooled + ReLU'd activations, rows ordered (n, ph, pw).
    """
    w = w_ref[...]
    y0 = jnp.dot(p_ref[0], w, preferred_element_type=jnp.float32)
    y1 = jnp.dot(p_ref[1], w, preferred_element_type=jnp.float32)
    y2 = jnp.dot(p_ref[2], w, preferred_element_type=jnp.float32)
    y3 = jnp.dot(p_ref[3], w, preferred_element_type=jnp.float32)

    inv_count = 1.0 / (4.0 * p_ref.shape[1])          # 1 / (N*OH*OW)
    mean = (y0.sum(axis=0, keepdims=True) + y1.sum(axis=0, keepdims=True) +
            y2.sum(axis=0, keepdims=True) + y3.sum(axis=0, keepdims=True)
            ) * inv_count
    d0, d1, d2, d3 = y0 - mean, y1 - mean, y2 - mean, y3 - mean
    var = ((d0 * d0).sum(axis=0, keepdims=True) +
           (d1 * d1).sum(axis=0, keepdims=True) +
           (d2 * d2).sum(axis=0, keepdims=True) +
           (d3 * d3).sum(axis=0, keepdims=True)) * inv_count
    scale = g_ref[...] * lax.rsqrt(var + EPS)
    pooled_centered = (d0 + d1 + d2 + d3) * 0.25      # avgpool(conv) - mean
    o_ref[...] = jnp.maximum(pooled_centered * scale + b_ref[...], 0.0)


def _classifier_kernel(h_ref, w1_ref, g1_ref, b1_ref, w2_ref, g2_ref, b2_ref,
                       w3_ref, fb3_ref, o_ref):
    """Fused Linear->BN1d->ReLU -> Linear->BN1d->ReLU -> Linear(+bias)."""
    def bn_relu(y, g, b):
        m = jnp.mean(y, axis=0, keepdims=True)
        d = y - m
        v = jnp.mean(d * d, axis=0, keepdims=True)
        return jnp.maximum(d * lax.rsqrt(v + EPS) * g + b, 0.0)

    h = jnp.dot(h_ref[...], w1_ref[...], preferred_element_type=jnp.float32)
    h = bn_relu(h, g1_ref[...], b1_ref[...])
    h = jnp.dot(h, w2_ref[...], preferred_element_type=jnp.float32)
    h = bn_relu(h, g2_ref[...], b2_ref[...])
    o_ref[...] = (jnp.dot(h, w3_ref[...], preferred_element_type=jnp.float32)
                  + fb3_ref[...])


# ------------------------------ wrappers -------------------------------------

def conv_bn_pool_relu(patches, w, gamma, beta):
    g, m, k = patches.shape
    nout = w.shape[1]
    ce = pl.CostEstimate(
        flops=2 * g * m * k * nout + 10 * g * m * nout,
        transcendentals=nout,
        bytes_accessed=4 * (patches.size + w.size + 2 * nout + m * nout))
    return pl.pallas_call(
        _conv_bn_pool_relu_kernel,
        out_shape=jax.ShapeDtypeStruct((m, nout), jnp.float32),
        in_specs=[_VMEM, _VMEM, _VMEM, _VMEM],
        out_specs=_VMEM,
        cost_estimate=ce,
    )(patches, w, gamma, beta)


def classifier_fused(h, w1, g1, b1, w2, g2, b2, w3, fb3):
    n, k1 = h.shape
    nout = w3.shape[1]
    ce = pl.CostEstimate(
        flops=2 * n * (k1 * w1.shape[1] + w2.shape[0] * w2.shape[1]
                       + w3.shape[0] * nout) + 20 * n * nout,
        transcendentals=2 * nout,
        bytes_accessed=4 * (h.size + w1.size + w2.size + w3.size
                            + 5 * nout + n * nout))
    return pl.pallas_call(
        _classifier_kernel,
        out_shape=jax.ShapeDtypeStruct((n, nout), jnp.float32),
        in_specs=[_VMEM] * 9,
        out_specs=_VMEM,
        cost_estimate=ce,
    )(h, w1, g1, b1, w2, g2, b2, w3, fb3)


# ------------------------------ glue ------------------------------------------

def im2col_pooled(x, k):
    """x: (N, H, W, C) -> patches (4, N*PH*PW, k*k*C) grouped by 2x2 pool window.

    Group d = dh*2+dw holds im2col rows of conv-output positions
    (2*ph+dh, 2*pw+dw); patch columns are (ki, kj, ic), matching the
    (KH, KW, IC, OC) weight reshape.
    """
    n, h, w, c = x.shape
    oh, ow = h - k + 1, w - k + 1
    ph, pw = oh // 2, ow // 2
    cols = [x[:, ki:ki + oh, kj:kj + ow, :] for ki in range(k) for kj in range(k)]
    pat = jnp.stack(cols, axis=3).reshape(n, oh, ow, k * k * c)
    pat = pat.reshape(n, ph, 2, pw, 2, k * k * c)
    pat = jnp.transpose(pat, (2, 4, 0, 1, 3, 5))        # (2, 2, N, PH, PW, K)
    return pat.reshape(4, n * ph * pw, k * k * c), (n, ph, pw)


def lenet5_forward(x_nchw, p):
    x = jnp.transpose(x_nchw, (0, 2, 3, 1)).astype(jnp.float32)   # NCHW -> NHWC
    n = x.shape[0]

    # features block 1: Conv(1->6,5) + BN2d + AvgPool(2) + ReLU   (one kernel)
    pat, (_, ph, pw) = im2col_pooled(x, 5)                   # (4, N*14*14, 25)
    y = conv_bn_pool_relu(pat, p["w1p"], p["g1p"], p["b1p"])       # (N*196, 128)

    # features block 2: Conv(6->16,5) + BN2d + AvgPool(2) + ReLU  (one kernel)
    y = y.reshape(n, ph, pw, C_PAD)[..., :6]                 # drop lane padding
    pat, (_, ph2, pw2) = im2col_pooled(y, 5)                 # (4, N*5*5, 150)
    y = conv_bn_pool_relu(pat, p["w2p"], p["g2p"], p["b2p"])       # (N*25, 128)

    # classifier: flatten order is folded into the fc1 weight at init
    h = y.reshape(n, ph2, pw2, C_PAD)[..., :16].reshape(n, ph2 * pw2 * 16)
    logits = classifier_fused(h, p["fw1p"], p["g3p"], p["b3p"],
                              p["fw2p"], p["g4p"], p["b4p"],
                              p["fw3p"], p["fb3p"])          # (N, 128) padded
    return logits[:, :10]


# ------------------------- deterministic parameters --------------------------

def init_params(key):
    def unif(k, shape, fan_in):
        bound = fan_in ** -0.5            # PyTorch default-style uniform init
        return jax.random.uniform(k, shape, jnp.float32, -bound, bound)

    ks = jax.random.split(key, 10)
    cw1 = unif(ks[0], (6, 1, 5, 5), 1 * 25)     # torch conv weight (OC, IC, KH, KW)
    cw2 = unif(ks[2], (16, 6, 5, 5), 6 * 25)
    fw1 = unif(ks[4], (120, 400), 400)          # torch linear weight (out, in)
    fw2 = unif(ks[6], (84, 120), 120)
    fw3 = unif(ks[8], (10, 84), 84)
    fb3 = unif(ks[9], (10,), 84)
    # cb1/cb2/fb1/fb2 are dropped: a per-channel bias feeding a training-mode
    # BatchNorm is exactly cancelled by the batch-mean subtraction.

    def pad_lanes(w):                               # pad last dim to 128
        return jnp.pad(w, ((0, 0), (0, C_PAD - w.shape[1])))

    def pad_row(v):                                 # (C,) -> (1, 128)
        return jnp.pad(v, (0, C_PAD - v.shape[0])).reshape(1, C_PAD)

    ones_p = lambda c: pad_row(jnp.ones((c,), jnp.float32))
    zeros_p = lambda c: pad_row(jnp.zeros((c,), jnp.float32))

    # conv weights -> (KH*KW*IC, OC) im2col order, OC zero-padded to 128 lanes
    w1p = pad_lanes(jnp.transpose(cw1, (2, 3, 1, 0)).reshape(25 * 1, 6))
    w2p = pad_lanes(jnp.transpose(cw2, (2, 3, 1, 0)).reshape(25 * 6, 16))

    # fc1: torch.flatten gives (c, h, w) row order; the conv block emits
    # (h, w, c) order, so permute the 400 weight rows once here.
    W1 = fw1.T.reshape(16, 5, 5, 120)            # (c, h, w, out)
    W1 = jnp.transpose(W1, (1, 2, 0, 3))         # (h, w, c, out)
    fw1p = pad_lanes(W1.reshape(400, 120))                        # (400, 128)
    fw2p = pad_lanes(jnp.pad(fw2.T, ((0, C_PAD - 120), (0, 0))))  # (128, 128)
    fw3p = pad_lanes(jnp.pad(fw3.T, ((0, C_PAD - 84), (0, 0))))   # (128, 128)

    return {
        "w1p": w1p, "g1p": ones_p(6), "b1p": zeros_p(6),
        "w2p": w2p, "g2p": ones_p(16), "b2p": zeros_p(16),
        "fw1p": fw1p, "g3p": ones_p(120), "b3p": zeros_p(120),
        "fw2p": fw2p, "g4p": ones_p(84), "b4p": zeros_p(84),
        "fw3p": fw3p, "fb3p": pad_row(fb3),
    }


if __name__ == "__main__":
    key = jax.random.PRNGKey(0)
    k_x, k_p = jax.random.split(key)
    # LeNet5 requires 32x32 inputs (flatten expects 16*5*5); batch=2, 1 channel.
    x = jax.random.normal(k_x, (2, 1, 32, 32), jnp.float32)   # NCHW, like PyTorch
    params = init_params(k_p)

    out = jax.jit(lenet5_forward)(x, params)
    out = jax.block_until_ready(out)
    assert out.shape == (2, 10) and out.dtype == jnp.float32
    print("KERNEL_OK")
</pallas_src>

<mosaic_0001>
module attributes {stable_mosaic.version = 11 : i64} {
  func.func @_conv_bn_pool_relu_kernel(%arg0: memref<4x392x25xf32, #tpu.memory_space<vmem>>, %arg1: memref<25x128xf32, #tpu.memory_space<vmem>>, %arg2: memref<1x128xf32, #tpu.memory_space<vmem>>, %arg3: memref<1x128xf32, #tpu.memory_space<vmem>>, %arg4: memref<392x128xf32, #tpu.memory_space<vmem>>) attributes {dimension_semantics = [], scalar_prefetch = 0 : i64, scratch_operands = 0 : i64, tpu.core_type = #tpu.core_type<tc>} {
    %c0 = arith.constant 0 : index
    %c0_0 = arith.constant 0 : index
    %0 = vector.load %arg1[%c0, %c0_0] : memref<25x128xf32, #tpu.memory_space<vmem>>, vector<25x128xf32>
    %c0_1 = arith.constant 0 : index
    %c0_2 = arith.constant 0 : index
    %c0_3 = arith.constant 0 : index
    %1 = vector.load %arg0[%c0_1, %c0_2, %c0_3] : memref<4x392x25xf32, #tpu.memory_space<vmem>>, vector<1x392x25xf32>
    %2 = vector.shape_cast %1 : vector<1x392x25xf32> to vector<392x25xf32>
    %cst = arith.constant dense<0.000000e+00> : vector<392x128xf32>
    %3 = tpu.matmul %2, %0, %cst {dimension_numbers = #tpu.dot_dimension_numbers<[1], [0], [0], [1], [0, 0, 1, 1], [], []>} : vector<392x25xf32>, vector<25x128xf32>, vector<392x128xf32> -> vector<392x128xf32>
    %c1 = arith.constant 1 : index
    %c0_4 = arith.constant 0 : index
    %c0_5 = arith.constant 0 : index
    %4 = vector.load %arg0[%c1, %c0_4, %c0_5] : memref<4x392x25xf32, #tpu.memory_space<vmem>>, vector<1x392x25xf32>
    %5 = vector.shape_cast %4 : vector<1x392x25xf32> to vector<392x25xf32>
    %cst_6 = arith.constant dense<0.000000e+00> : vector<392x128xf32>
    %6 = tpu.matmul %5, %0, %cst_6 {dimension_numbers = #tpu.dot_dimension_numbers<[1], [0], [0], [1], [0, 0, 1, 1], [], []>} : vector<392x25xf32>, vector<25x128xf32>, vector<392x128xf32> -> vector<392x128xf32>
    %c2 = arith.constant 2 : index
    %c0_7 = arith.constant 0 : index
    %c0_8 = arith.constant 0 : index
    %7 = vector.load %arg0[%c2, %c0_7, %c0_8] : memref<4x392x25xf32, #tpu.memory_space<vmem>>, vector<1x392x25xf32>
    %8 = vector.shape_cast %7 : vector<1x392x25xf32> to vector<392x25xf32>
    %cst_9 = arith.constant dense<0.000000e+00> : vector<392x128xf32>
    %9 = tpu.matmul %8, %0, %cst_9 {dimension_numbers = #tpu.dot_dimension_numbers<[1], [0], [0], [1], [0, 0, 1, 1], [], []>} : vector<392x25xf32>, vector<25x128xf32>, vector<392x128xf32> -> vector<392x128xf32>
    %c3 = arith.constant 3 : index
    %c0_10 = arith.constant 0 : index
    %c0_11 = arith.constant 0 : index
    %10 = vector.load %arg0[%c3, %c0_10, %c0_11] : memref<4x392x25xf32, #tpu.memory_space<vmem>>, vector<1x392x25xf32>
    %11 = vector.shape_cast %10 : vector<1x392x25xf32> to vector<392x25xf32>
    %cst_12 = arith.constant dense<0.000000e+00> : vector<392x128xf32>
    %12 = tpu.matmul %11, %0, %cst_12 {dimension_numbers = #tpu.dot_dimension_numbers<[1], [0], [0], [1], [0, 0, 1, 1], [], []>} : vector<392x25xf32>, vector<25x128xf32>, vector<392x128xf32> -> vector<392x128xf32>
    %cst_13 = arith.constant dense<0.000000e+00> : vector<128xf32>
    %13 = vector.multi_reduction <add>, %3, %cst_13 [0] : vector<392x128xf32> to vector<128xf32>
    %14 = vector.shape_cast %13 : vector<128xf32> to vector<1x128xf32>
    %cst_14 = arith.constant dense<0.000000e+00> : vector<128xf32>
    %15 = vector.multi_reduction <add>, %6, %cst_14 [0] : vector<392x128xf32> to vector<128xf32>
    %16 = vector.shape_cast %15 : vector<128xf32> to vector<1x128xf32>
    %17 = arith.addf %14, %16 : vector<1x128xf32>
    %cst_15 = arith.constant dense<0.000000e+00> : vector<128xf32>
    %18 = vector.multi_reduction <add>, %9, %cst_15 [0] : vector<392x128xf32> to vector<128xf32>
    %19 = vector.shape_cast %18 : vector<128xf32> to vector<1x128xf32>
    %20 = arith.addf %17, %19 : vector<1x128xf32>
    %cst_16 = arith.constant dense<0.000000e+00> : vector<128xf32>
    %21 = vector.multi_reduction <add>, %12, %cst_16 [0] : vector<392x128xf32> to vector<128xf32>
    %22 = vector.shape_cast %21 : vector<128xf32> to vector<1x128xf32>
    %23 = arith.addf %20, %22 : vector<1x128xf32>
    %cst_17 = arith.constant 6.37755089E-4 : f32
    %24 = vector.broadcast %cst_17 : f32 to vector<1x128xf32>
    %25 = arith.mulf %23, %24 : vector<1x128xf32>
    %26 = vector.broadcast %25 : vector<1x128xf32> to vector<392x128xf32>
    %27 = arith.subf %3, %26 : vector<392x128xf32>
    %28 = vector.broadcast %25 : vector<1x128xf32> to vector<392x128xf32>
    %29 = arith.subf %6, %28 : vector<392x128xf32>
    %30 = vector.broadcast %25 : vector<1x128xf32> to vector<392x128xf32>
    %31 = arith.subf %9, %30 : vector<392x128xf32>
    %32 = vector.broadcast %25 : vector<1x128xf32> to vector<392x128xf32>
    %33 = arith.subf %12, %32 : vector<392x128xf32>
    %34 = arith.mulf %27, %27 : vector<392x128xf32>
    %cst_18 = arith.constant dense<0.000000e+00> : vector<128xf32>
    %35 = vector.multi_reduction <add>, %34, %cst_18 [0] : vector<392x128xf32> to vector<128xf32>
    %36 = vector.shape_cast %35 : vector<128xf32> to vector<1x128xf32>
    %37 = arith.mulf %29, %29 : vector<392x128xf32>
    %cst_19 = arith.constant dense<0.000000e+00> : vector<128xf32>
    %38 = vector.multi_reduction <add>, %37, %cst_19 [0] : vector<392x128xf32> to vector<128xf32>
    %39 = vector.shape_cast %38 : vector<128xf32> to vector<1x128xf32>
    %40 = arith.addf %36, %39 : vector<1x128xf32>
    %41 = arith.mulf %31, %31 : vector<392x128xf32>
    %cst_20 = arith.constant dense<0.000000e+00> : vector<128xf32>
    %42 = vector.multi_reduction <add>, %41, %cst_20 [0] : vector<392x128xf32> to vector<128xf32>
    %43 = vector.shape_cast %42 : vector<128xf32> to vector<1x128xf32>
    %44 = arith.addf %40, %43 : vector<1x128xf32>
    %45 = arith.mulf %33, %33 : vector<392x128xf32>
    %cst_21 = arith.constant dense<0.000000e+00> : vector<128xf32>
    %46 = vector.multi_reduction <add>, %45, %cst_21 [0] : vector<392x128xf32> to vector<128xf32>
    %47 = vector.shape_cast %46 : vector<128xf32> to vector<1x128xf32>
    %48 = arith.addf %44, %47 : vector<1x128xf32>
    %cst_22 = arith.constant 6.37755089E-4 : f32
    %49 = vector.broadcast %cst_22 : f32 to vector<1x128xf32>
    %50 = arith.mulf %48, %49 : vector<1x128xf32>
    %c0_23 = arith.constant 0 : index
    %c0_24 = arith.constant 0 : index
    %51 = vector.load %arg2[%c0_23, %c0_24] : memref<1x128xf32, #tpu.memory_space<vmem>>, vector<1x128xf32>
    %cst_25 = arith.constant 9.99999974E-6 : f32
    %52 = vector.broadcast %cst_25 : f32 to vector<1x128xf32>
    %53 = arith.addf %50, %52 : vector<1x128xf32>
    %54 = math.rsqrt %53 : vector<1x128xf32>
    %55 = arith.mulf %51, %54 : vector<1x128xf32>
    %56 = arith.addf %27, %29 : vector<392x128xf32>
    %57 = arith.addf %56, %31 : vector<392x128xf32>
    %58 = arith.addf %57, %33 : vector<392x128xf32>
    %cst_26 = arith.constant 2.500000e-01 : f32
    %59 = vector.broadcast %cst_26 : f32 to vector<392x128xf32>
    %60 = arith.mulf %58, %59 : vector<392x128xf32>
    %61 = vector.broadcast %55 : vector<1x128xf32> to vector<392x128xf32>
    %62 = arith.mulf %60, %61 : vector<392x128xf32>
    %c0_27 = arith.constant 0 : index
    %c0_28 = arith.constant 0 : index
    %63 = vector.load %arg3[%c0_27, %c0_28] : memref<1x128xf32, #tpu.memory_space<vmem>>, vector<1x128xf32>
    %64 = vector.broadcast %63 : vector<1x128xf32> to vector<392x128xf32>
    %65 = arith.addf %62, %64 : vector<392x128xf32>
    %cst_29 = arith.constant 0.000000e+00 : f32
    %66 = vector.broadcast %cst_29 : f32 to vector<392x128xf32>
    %67 = arith.maximumf %65, %66 : vector<392x128xf32>
    %c0_30 = arith.constant 0 : index
    %c0_31 = arith.constant 0 : index
    %68 = vector.load %arg4[%c0_30, %c0_31] : memref<392x128xf32, #tpu.memory_space<vmem>>, vector<392x128xf32>
    tpu.vector_store %arg4[%c0_30, %c0_31], %67 {strides = array<i32>} : memref<392x128xf32, #tpu.memory_space<vmem>>, vector<392x128xf32>,
    return
  }
}

module attributes {stable_mosaic.version = 11 : i64} {
  func.func @_conv_bn_pool_relu_kernel(%arg0: memref<4x50x150xf32, #tpu.memory_space<vmem>>, %arg1: memref<150x128xf32, #tpu.memory_space<vmem>>, %arg2: memref<1x128xf32, #tpu.memory_space<vmem>>, %arg3: memref<1x128xf32, #tpu.memory_space<vmem>>, %arg4: memref<50x128xf32, #tpu.memory_space<vmem>>) attributes {dimension_semantics = [], scalar_prefetch = 0 : i64, scratch_operands = 0 : i64, tpu.core_type = #tpu.core_type<tc>} {
    %c0 = arith.constant 0 : index
    %c0_0 = arith.constant 0 : index
    %0 = vector.load %arg1[%c0, %c0_0] : memref<150x128xf32, #tpu.memory_space<vmem>>, vector<150x128xf32>
    %c0_1 = arith.constant 0 : index
    %c0_2 = arith.constant 0 : index
    %c0_3 = arith.constant 0 : index
    %1 = vector.load %arg0[%c0_1, %c0_2, %c0_3] : memref<4x50x150xf32, #tpu.memory_space<vmem>>, vector<1x50x150xf32>
    %2 = vector.shape_cast %1 : vector<1x50x150xf32> to vector<50x150xf32>
    %cst = arith.constant dense<0.000000e+00> : vector<50x128xf32>
    %3 = tpu.matmul %2, %0, %cst {dimension_numbers = #tpu.dot_dimension_numbers<[1], [0], [0], [1], [0, 0, 1, 1], [], []>} : vector<50x150xf32>, vector<150x128xf32>, vector<50x128xf32> -> vector<50x128xf32>
    %c1 = arith.constant 1 : index
    %c0_4 = arith.constant 0 : index
    %c0_5 = arith.constant 0 : index
    %4 = vector.load %arg0[%c1, %c0_4, %c0_5] : memref<4x50x150xf32, #tpu.memory_space<vmem>>, vector<1x50x150xf32>
    %5 = vector.shape_cast %4 : vector<1x50x150xf32> to vector<50x150xf32>
    %cst_6 = arith.constant dense<0.000000e+00> : vector<50x128xf32>
    %6 = tpu.matmul %5, %0, %cst_6 {dimension_numbers = #tpu.dot_dimension_numbers<[1], [0], [0], [1], [0, 0, 1, 1], [], []>} : vector<50x150xf32>, vector<150x128xf32>, vector<50x128xf32> -> vector<50x128xf32>
    %c2 = arith.constant 2 : index
    %c0_7 = arith.constant 0 : index
    %c0_8 = arith.constant 0 : index
    %7 = vector.load %arg0[%c2, %c0_7, %c0_8] : memref<4x50x150xf32, #tpu.memory_space<vmem>>, vector<1x50x150xf32>
    %8 = vector.shape_cast %7 : vector<1x50x150xf32> to vector<50x150xf32>
    %cst_9 = arith.constant dense<0.000000e+00> : vector<50x128xf32>
    %9 = tpu.matmul %8, %0, %cst_9 {dimension_numbers = #tpu.dot_dimension_numbers<[1], [0], [0], [1], [0, 0, 1, 1], [], []>} : vector<50x150xf32>, vector<150x128xf32>, vector<50x128xf32> -> vector<50x128xf32>
    %c3 = arith.constant 3 : index
    %c0_10 = arith.constant 0 : index
    %c0_11 = arith.constant 0 : index
    %10 = vector.load %arg0[%c3, %c0_10, %c0_11] : memref<4x50x150xf32, #tpu.memory_space<vmem>>, vector<1x50x150xf32>
    %11 = vector.shape_cast %10 : vector<1x50x150xf32> to vector<50x150xf32>
    %cst_12 = arith.constant dense<0.000000e+00> : vector<50x128xf32>
    %12 = tpu.matmul %11, %0, %cst_12 {dimension_numbers = #tpu.dot_dimension_numbers<[1], [0], [0], [1], [0, 0, 1, 1], [], []>} : vector<50x150xf32>, vector<150x128xf32>, vector<50x128xf32> -> vector<50x128xf32>
    %cst_13 = arith.constant dense<0.000000e+00> : vector<128xf32>
    %13 = vector.multi_reduction <add>, %3, %cst_13 [0] : vector<50x128xf32> to vector<128xf32>
    %14 = vector.shape_cast %13 : vector<128xf32> to vector<1x128xf32>
    %cst_14 = arith.constant dense<0.000000e+00> : vector<128xf32>
    %15 = vector.multi_reduction <add>, %6, %cst_14 [0] : vector<50x128xf32> to vector<128xf32>
    %16 = vector.shape_cast %15 : vector<128xf32> to vector<1x128xf32>
    %17 = arith.addf %14, %16 : vector<1x128xf32>
    %cst_15 = arith.constant dense<0.000000e+00> : vector<128xf32>
    %18 = vector.multi_reduction <add>, %9, %cst_15 [0] : vector<50x128xf32> to vector<128xf32>
    %19 = vector.shape_cast %18 : vector<128xf32> to vector<1x128xf32>
    %20 = arith.addf %17, %19 : vector<1x128xf32>
    %cst_16 = arith.constant dense<0.000000e+00> : vector<128xf32>
    %21 = vector.multi_reduction <add>, %12, %cst_16 [0] : vector<50x128xf32> to vector<128xf32>
    %22 = vector.shape_cast %21 : vector<128xf32> to vector<1x128xf32>
    %23 = arith.addf %20, %22 : vector<1x128xf32>
    %cst_17 = arith.constant 5.000000e-03 : f32
    %24 = vector.broadcast %cst_17 : f32 to vector<1x128xf32>
    %25 = arith.mulf %23, %24 : vector<1x128xf32>
    %26 = vector.broadcast %25 : vector<1x128xf32> to vector<50x128xf32>
    %27 = arith.subf %3, %26 : vector<50x128xf32>
    %28 = vector.broadcast %25 : vector<1x128xf32> to vector<50x128xf32>
    %29 = arith.subf %6, %28 : vector<50x128xf32>
    %30 = vector.broadcast %25 : vector<1x128xf32> to vector<50x128xf32>
    %31 = arith.subf %9, %30 : vector<50x128xf32>
    %32 = vector.broadcast %25 : vector<1x128xf32> to vector<50x128xf32>
    %33 = arith.subf %12, %32 : vector<50x128xf32>
    %34 = arith.mulf %27, %27 : vector<50x128xf32>
    %cst_18 = arith.constant dense<0.000000e+00> : vector<128xf32>
    %35 = vector.multi_reduction <add>, %34, %cst_18 [0] : vector<50x128xf32> to vector<128xf32>
    %36 = vector.shape_cast %35 : vector<128xf32> to vector<1x128xf32>
    %37 = arith.mulf %29, %29 : vector<50x128xf32>
    %cst_19 = arith.constant dense<0.000000e+00> : vector<128xf32>
    %38 = vector.multi_reduction <add>, %37, %cst_19 [0] : vector<50x128xf32> to vector<128xf32>
    %39 = vector.shape_cast %38 : vector<128xf32> to vector<1x128xf32>
    %40 = arith.addf %36, %39 : vector<1x128xf32>
    %41 = arith.mulf %31, %31 : vector<50x128xf32>
    %cst_20 = arith.constant dense<0.000000e+00> : vector<128xf32>
    %42 = vector.multi_reduction <add>, %41, %cst_20 [0] : vector<50x128xf32> to vector<128xf32>
    %43 = vector.shape_cast %42 : vector<128xf32> to vector<1x128xf32>
    %44 = arith.addf %40, %43 : vector<1x128xf32>
    %45 = arith.mulf %33, %33 : vector<50x128xf32>
    %cst_21 = arith.constant dense<0.000000e+00> : vector<128xf32>
    %46 = vector.multi_reduction <add>, %45, %cst_21 [0] : vector<50x128xf32> to vector<128xf32>
    %47 = vector.shape_cast %46 : vector<128xf32> to vector<1x128xf32>
    %48 = arith.addf %44, %47 : vector<1x128xf32>
    %cst_22 = arith.constant 5.000000e-03 : f32
    %49 = vector.broadcast %cst_22 : f32 to vector<1x128xf32>
    %50 = arith.mulf %48, %49 : vector<1x128xf32>
    %c0_23 = arith.constant 0 : index
    %c0_24 = arith.constant 0 : index
    %51 = vector.load %arg2[%c0_23, %c0_24] : memref<1x128xf32, #tpu.memory_space<vmem>>, vector<1x128xf32>
    %cst_25 = arith.constant 9.99999974E-6 : f32
    %52 = vector.broadcast %cst_25 : f32 to vector<1x128xf32>
    %53 = arith.addf %50, %52 : vector<1x128xf32>
    %54 = math.rsqrt %53 : vector<1x128xf32>
    %55 = arith.mulf %51, %54 : vector<1x128xf32>
    %56 = arith.addf %27, %29 : vector<50x128xf32>
    %57 = arith.addf %56, %31 : vector<50x128xf32>
    %58 = arith.addf %57, %33 : vector<50x128xf32>
    %cst_26 = arith.constant 2.500000e-01 : f32
    %59 = vector.broadcast %cst_26 : f32 to vector<50x128xf32>
    %60 = arith.mulf %58, %59 : vector<50x128xf32>
    %61 = vector.broadcast %55 : vector<1x128xf32> to vector<50x128xf32>
    %62 = arith.mulf %60, %61 : vector<50x128xf32>
    %c0_27 = arith.constant 0 : index
    %c0_28 = arith.constant 0 : index
    %63 = vector.load %arg3[%c0_27, %c0_28] : memref<1x128xf32, #tpu.memory_space<vmem>>, vector<1x128xf32>
    %64 = vector.broadcast %63 : vector<1x128xf32> to vector<50x128xf32>
    %65 = arith.addf %62, %64 : vector<50x128xf32>
    %cst_29 = arith.constant 0.000000e+00 : f32
    %66 = vector.broadcast %cst_29 : f32 to vector<50x128xf32>
    %67 = arith.maximumf %65, %66 : vector<50x128xf32>
    %c0_30 = arith.constant 0 : index
    %c0_31 = arith.constant 0 : index
    %68 = vector.load %arg4[%c0_30, %c0_31] : memref<50x128xf32, #tpu.memory_space<vmem>>, vector<50x128xf32>
    tpu.vector_store %arg4[%c0_30, %c0_31], %67 {strides = array<i32>} : memref<50x128xf32, #tpu.memory_space<vmem>>, vector<50x128xf32>,
    return
  }
}

module attributes {stable_mosaic.version = 11 : i64} {
  func.func @_classifier_kernel(%arg0: memref<2x400xf32, #tpu.memory_space<vmem>>, %arg1: memref<400x128xf32, #tpu.memory_space<vmem>>, %arg2: memref<1x128xf32, #tpu.memory_space<vmem>>, %arg3: memref<1x128xf32, #tpu.memory_space<vmem>>, %arg4: memref<128x128xf32, #tpu.memory_space<vmem>>, %arg5: memref<1x128xf32, #tpu.memory_space<vmem>>, %arg6: memref<1x128xf32, #tpu.memory_space<vmem>>, %arg7: memref<128x128xf32, #tpu.memory_space<vmem>>, %arg8: memref<1x128xf32, #tpu.memory_space<vmem>>, %arg9: memref<2x128xf32, #tpu.memory_space<vmem>>) attributes {dimension_semantics = [], scalar_prefetch = 0 : i64, scratch_operands = 0 : i64, tpu.core_type = #tpu.core_type<tc>} {
    %c0 = arith.constant 0 : index
    %c0_0 = arith.constant 0 : index
    %0 = vector.load %arg0[%c0, %c0_0] : memref<2x400xf32, #tpu.memory_space<vmem>>, vector<2x400xf32>
    %c0_1 = arith.constant 0 : index
    %c0_2 = arith.constant 0 : index
    %1 = vector.load %arg1[%c0_1, %c0_2] : memref<400x128xf32, #tpu.memory_space<vmem>>, vector<400x128xf32>
    %cst = arith.constant dense<0.000000e+00> : vector<2x128xf32>
    %2 = tpu.matmul %0, %1, %cst {dimension_numbers = #tpu.dot_dimension_numbers<[1], [0], [0], [1], [0, 0, 1, 1], [], []>} : vector<2x400xf32>, vector<400x128xf32>, vector<2x128xf32> -> vector<2x128xf32>
    %c0_3 = arith.constant 0 : index
    %c0_4 = arith.constant 0 : index
    %3 = vector.load %arg2[%c0_3, %c0_4] : memref<1x128xf32, #tpu.memory_space<vmem>>, vector<1x128xf32>
    %c0_5 = arith.constant 0 : index
    %c0_6 = arith.constant 0 : index
    %4 = vector.load %arg3[%c0_5, %c0_6] : memref<1x128xf32, #tpu.memory_space<vmem>>, vector<1x128xf32>
    %cst_7 = arith.constant dense<0.000000e+00> : vector<128xf32>
    %5 = vector.multi_reduction <add>, %2, %cst_7 [0] : vector<2x128xf32> to vector<128xf32>
    %6 = vector.shape_cast %5 : vector<128xf32> to vector<1x128xf32>
    %cst_8 = arith.constant 2.000000e+00 : f32
    %7 = vector.broadcast %cst_8 : f32 to vector<1x128xf32>
    %8 = arith.divf %6, %7 : vector<1x128xf32>
    %9 = vector.broadcast %8 : vector<1x128xf32> to vector<2x128xf32>
    %10 = arith.subf %2, %9 : vector<2x128xf32>
    %11 = arith.mulf %10, %10 : vector<2x128xf32>
    %cst_9 = arith.constant dense<0.000000e+00> : vector<128xf32>
    %12 = vector.multi_reduction <add>, %11, %cst_9 [0] : vector<2x128xf32> to vector<128xf32>
    %13 = vector.shape_cast %12 : vector<128xf32> to vector<1x128xf32>
    %cst_10 = arith.constant 2.000000e+00 : f32
    %14 = vector.broadcast %cst_10 : f32 to vector<1x128xf32>
    %15 = arith.divf %13, %14 : vector<1x128xf32>
    %cst_11 = arith.constant 9.99999974E-6 : f32
    %16 = vector.broadcast %cst_11 : f32 to vector<1x128xf32>
    %17 = arith.addf %15, %16 : vector<1x128xf32>
    %18 = math.rsqrt %17 : vector<1x128xf32>
    %19 = vector.broadcast %18 : vector<1x128xf32> to vector<2x128xf32>
    %20 = arith.mulf %10, %19 : vector<2x128xf32>
    %21 = vector.broadcast %3 : vector<1x128xf32> to vector<2x128xf32>
    %22 = arith.mulf %20, %21 : vector<2x128xf32>
    %23 = vector.broadcast %4 : vector<1x128xf32> to vector<2x128xf32>
    %24 = arith.addf %22, %23 : vector<2x128xf32>
    %cst_12 = arith.constant 0.000000e+00 : f32
    %25 = vector.broadcast %cst_12 : f32 to vector<2x128xf32>
    %26 = arith.maximumf %24, %25 : vector<2x128xf32>
    %c0_13 = arith.constant 0 : index
    %c0_14 = arith.constant 0 : index
    %27 = vector.load %arg4[%c0_13, %c0_14] : memref<128x128xf32, #tpu.memory_space<vmem>>, vector<128x128xf32>
    %cst_15 = arith.constant dense<0.000000e+00> : vector<2x128xf32>
    %28 = tpu.matmul %26, %27, %cst_15 {dimension_numbers = #tpu.dot_dimension_numbers<[1], [0], [0], [1], [0, 0, 1, 1], [], []>} : vector<2x128xf32>, vector<128x128xf32>, vector<2x128xf32> -> vector<2x128xf32>
    %c0_16 = arith.constant 0 : index
    %c0_17 = arith.constant 0 : index
    %29 = vector.load %arg5[%c0_16, %c0_17] : memref<1x128xf32, #tpu.memory_space<vmem>>, vector<1x128xf32>
    %c0_18 = arith.constant 0 : index
    %c0_19 = arith.constant 0 : index
    %30 = vector.load %arg6[%c0_18, %c0_19] : memref<1x128xf32, #tpu.memory_space<vmem>>, vector<1x128xf32>
    %cst_20 = arith.constant dense<0.000000e+00> : vector<128xf32>
    %31 = vector.multi_reduction <add>, %28, %cst_20 [0] : vector<2x128xf32> to vector<128xf32>
    %32 = vector.shape_cast %31 : vector<128xf32> to vector<1x128xf32>
    %cst_21 = arith.constant 2.000000e+00 : f32
    %33 = vector.broadcast %cst_21 : f32 to vector<1x128xf32>
    %34 = arith.divf %32, %33 : vector<1x128xf32>
    %35 = vector.broadcast %34 : vector<1x128xf32> to vector<2x128xf32>
    %36 = arith.subf %28, %35 : vector<2x128xf32>
    %37 = arith.mulf %36, %36 : vector<2x128xf32>
    %cst_22 = arith.constant dense<0.000000e+00> : vector<128xf32>
    %38 = vector.multi_reduction <add>, %37, %cst_22 [0] : vector<2x128xf32> to vector<128xf32>
    %39 = vector.shape_cast %38 : vector<128xf32> to vector<1x128xf32>
    %cst_23 = arith.constant 2.000000e+00 : f32
    %40 = vector.broadcast %cst_23 : f32 to vector<1x128xf32>
    %41 = arith.divf %39, %40 : vector<1x128xf32>
    %cst_24 = arith.constant 9.99999974E-6 : f32
    %42 = vector.broadcast %cst_24 : f32 to vector<1x128xf32>
    %43 = arith.addf %41, %42 : vector<1x128xf32>
    %44 = math.rsqrt %43 : vector<1x128xf32>
    %45 = vector.broadcast %44 : vector<1x128xf32> to vector<2x128xf32>
    %46 = arith.mulf %36, %45 : vector<2x128xf32>
    %47 = vector.broadcast %29 : vector<1x128xf32> to vector<2x128xf32>
    %48 = arith.mulf %46, %47 : vector<2x128xf32>
    %49 = vector.broadcast %30 : vector<1x128xf32> to vector<2x128xf32>
    %50 = arith.addf %48, %49 : vector<2x128xf32>
    %cst_25 = arith.constant 0.000000e+00 : f32
    %51 = vector.broadcast %cst_25 : f32 to vector<2x128xf32>
    %52 = arith.maximumf %50, %51 : vector<2x128xf32>
    %c0_26 = arith.constant 0 : index
    %c0_27 = arith.constant 0 : index
    %53 = vector.load %arg7[%c0_26, %c0_27] : memref<128x128xf32, #tpu.memory_space<vmem>>, vector<128x128xf32>
    %cst_28 = arith.constant dense<0.000000e+00> : vector<2x128xf32>
    %54 = tpu.matmul %52, %53, %cst_28 {dimension_numbers = #tpu.dot_dimension_numbers<[1], [0], [0], [1], [0, 0, 1, 1], [], []>} : vector<2x128xf32>, vector<128x128xf32>, vector<2x128xf32> -> vector<2x128xf32>
    %c0_29 = arith.constant 0 : index
    %c0_30 = arith.constant 0 : index
    %55 = vector.load %arg8[%c0_29, %c0_30] : memref<1x128xf32, #tpu.memory_space<vmem>>, vector<1x128xf32>
    %56 = vector.broadcast %55 : vector<1x128xf32> to vector<2x128xf32>
    %57 = arith.addf %54, %56 : vector<2x128xf32>
    %c0_31 = arith.constant 0 : index
    %c0_32 = arith.constant 0 : index
    %58 = vector.load %arg9[%c0_31, %c0_32] : memref<2x128xf32, #tpu.memory_space<vmem>>, vector<2x128xf32>
    tpu.vector_store %arg9[%c0_31, %c0_32], %57 {strides = array<i32>} : memref<2x128xf32, #tpu.memory_space<vmem>>, vector<2x128xf32>,
    return
  }
}

</mosaic_0001>

<bundles_post_ra>
// kernel: lenet5_forward.3
= control target key start
LH: loop header
LB: loop body
LE: loop exit
PB: predicated region body
PF: predicated region fallthrough
CT: control target
= control target key end

     0   :  { %vm218_vm0 = vcmask 1040384   ;;  %v4482_v0 = vmov 0.0   ;;  %vm70_vm1 = vcmask 203776   ;;  %vm4483_vm2 = vmmov 0   ;;  %s8268_s1 = inlined_call_operand.vmem [shape: f32[25,128], index: 1, kind: input, shape index: {}]   ;;  %s8269_s0 = inlined_call_operand.vmem [shape: f32[4,392,25], index: 0, kind: input, shape index: {}]   ;;  %s8270_s2 = inlined_call_operand.vmem [shape: f32[1,128], index: 2, kind: input, shape index: {}]   ;;  %s8271_s3 = inlined_call_operand.vmem [shape: f32[1,128], index: 3, kind: input, shape index: {}]   ;;  %s8272_s4 = inlined_call_operand.vmem [shape: f32[392,128], index: 4, kind: output, shape index: {}]  }
   0x1   :  { %3858 = vmatprep.subr.mxu0 %v4482_v0  ;;  %4013 = vmatprep.subr.mxu1 %v4482_v0  ;;  %v20_v1 = vld [vmem:[%s8268_s1 + $0x18] sm:$0x1]  ;;  %v19_v2 = vld [vmem:[%s8268_s1 + $0x10] sm:$0xff]  ;;  %v18_v3 = vld [vmem:[%s8268_s1 + $0x8] sm:$0xff] }
   0x2   :  { %3859 = vmatpush3.msk.msra.mxu0 %vm218_vm0, %v20_v1  ;;  %4014 = vmatpush3.msk.msra.mxu1 %vm218_vm0, %v20_v1  ;;  %v17_v4 = vld [vmem:[%s8268_s1] sm:$0xff]  ;;  %v3348_v6 = vld [vmem:[%s8269_s0 + $0x188] sm:$0xff]  ;;  %v3349_v8 = vld [vmem:[%s8269_s0 + $0x190] sm:$0xff] }
   0x3   :  { %3860 = vmatprep.subr.mxu0 %v4482_v0  ;;  %4015 = vmatprep.subr.mxu1 %v4482_v0  ;;  %v21_v5 = vld [vmem:[%s8269_s0] sm:$0xff]  ;;  %v22_v7 = vld [vmem:[%s8269_s0 + $0x8] sm:$0xff]  ;;  %v23_v9 = vld [vmem:[%s8269_s0 + $0x10] sm:$0xff] }
   0x4   :  { %3861 = vmatpush3.msra.mxu0 %v19_v2  ;;  %4016 = vmatpush3.msra.mxu1 %v19_v2  ;;  %v3350_v10 = vld [vmem:[%s8269_s0 + $0x198] sm:$0xff]  ;;  %v3351_v12 = vld [vmem:[%s8269_s0 + $0x1a0] sm:$0xff]  ;;  %v3352_v14 = vld [vmem:[%s8269_s0 + $0x1a8] sm:$0xff] }
   0x5   :  { %3862 = vmatprep.subr.mxu0 %v4482_v0  ;;  %4017 = vmatprep.subr.mxu1 %v4482_v0  ;;  %v24_v11 = vld [vmem:[%s8269_s0 + $0x18] sm:$0xff]  ;;  %v25_v13 = vld [vmem:[%s8269_s0 + $0x20] sm:$0xff]  ;;  %v26_v15 = vld [vmem:[%s8269_s0 + $0x28] sm:$0xff] }
   0x6   :  { %3863 = vmatpush3.msra.mxu0 %v18_v3  ;;  %4018 = vmatpush3.msra.mxu1 %v18_v3  ;;  %v3353_v16 = vld [vmem:[%s8269_s0 + $0x1b0] sm:$0xff]  ;;  %v3354_v18 = vld [vmem:[%s8269_s0 + $0x1b8] sm:$0xff]  ;;  %v3355_v20 = vld [vmem:[%s8269_s0 + $0x1c0] sm:$0xff] }
   0x7   :  { %3864 = vmatprep.subr.mxu0 %v4482_v0  ;;  %4019 = vmatprep.subr.mxu1 %v4482_v0  ;;  %v27_v17 = vld [vmem:[%s8269_s0 + $0x30] sm:$0xff]  ;;  %v28_v19 = vld [vmem:[%s8269_s0 + $0x38] sm:$0xff]  ;;  %v29_v21 = vld [vmem:[%s8269_s0 + $0x40] sm:$0xff] }
   0x8   :  { %3865 = vmatpush3.msra.mxu0 %v17_v4  ;;  %3866 = vmatprep.mubr.msk.f32.mxu0 %vm4483_vm2, %v4482_v0  ;;  %v3356_v22 = vld [vmem:[%s8269_s0 + $0x1c8] sm:$0xff]  ;;  %v3357_v24 = vld [vmem:[%s8269_s0 + $0x1d0] sm:$0xff]  ;;  %v3358_v26 = vld [vmem:[%s8269_s0 + $0x1d8] sm:$0xff] }
   0x9   :  { %4020 = vmatpush3.msra.mxu1 %v17_v4  ;;  %4021 = vmatprep.mubr.msk.f32.mxu1 %vm4483_vm2, %v4482_v0  ;;  %v30_v23 = vld [vmem:[%s8269_s0 + $0x48] sm:$0xff]  ;;  %v31_v25 = vld [vmem:[%s8269_s0 + $0x50] sm:$0xff]  ;;  %v32_v27 = vld [vmem:[%s8269_s0 + $0x58] sm:$0xff] }
   0xa   :  { %3867 = vmatmul.mubr.msk.f32.vlgmr.msra.gmra.mxu0 %vm70_vm1, %v21_v5  ;;  %4022 = vmatmul.mubr.msk.f32.vlgmr.msra.gmra.mxu1 %vm70_vm1, %v3348_v6  ;;  %v3359_v28 = vld [vmem:[%s8269_s0 + $0x1e0] sm:$0xff]  ;;  %v3360_v30 = vld [vmem:[%s8269_s0 + $0x1e8] sm:$0xff]  ;;  %v3361_v32 = vld [vmem:[%s8269_s0 + $0x1f0] sm:$0xff] }
   0xb   :  { %4168 = vmatprep.subr.mxu0 %v4482_v0  ;;  %4323 = vmatprep.subr.mxu1 %v4482_v0  ;;  %v33_v29 = vld [vmem:[%s8269_s0 + $0x60] sm:$0xff]  ;;  %v34_v31 = vld [vmem:[%s8269_s0 + $0x68] sm:$0xff]  ;;  %v35_v33 = vld [vmem:[%s8269_s0 + $0x70] sm:$0xff] }
   0xc   :  { %4169 = vmatpush3.msk.msra.mxu0 %vm218_vm0, %v20_v1  ;;  %3869 = vmatprep.mubr.msk.f32.mxu0 %vm4483_vm2, %v4482_v0  ;;  %v3362_v34 = vld [vmem:[%s8269_s0 + $0x1f8] sm:$0xff]  ;;  %v3363_v36 = vld [vmem:[%s8269_s0 + $0x200] sm:$0xff]  ;;  %v3364_v38 = vld [vmem:[%s8269_s0 + $0x208] sm:$0xff] }
   0xd   :  { %4024 = vmatprep.mubr.msk.f32.mxu1 %vm4483_vm2, %v4482_v0  ;;  %4324 = vmatpush3.msk.msra.mxu1 %vm218_vm0, %v20_v1  ;;  %v36_v35 = vld [vmem:[%s8269_s0 + $0x78] sm:$0xff]  ;;  %v37_v37 = vld [vmem:[%s8269_s0 + $0x80] sm:$0xff]  ;;  %v38_v39 = vld [vmem:[%s8269_s0 + $0x88] sm:$0xff] }
   0xe   :  { %3870 = vmatmul.mubr.msk.f32.gmra.mxu0 %vm70_vm1, %v22_v7  ;;  %4025 = vmatmul.mubr.msk.f32.gmra.mxu1 %vm70_vm1, %v3349_v8  ;;  %v3365_v40 = vld [vmem:[%s8269_s0 + $0x210] sm:$0xff]  ;;  %v3366_v42 = vld [vmem:[%s8269_s0 + $0x218] sm:$0xff]  ;;  %v3367_v44 = vld [vmem:[%s8269_s0 + $0x220] sm:$0xff] }
   0xf   :  { %3872 = vmatprep.mubr.msk.f32.mxu0 %vm4483_vm2, %v4482_v0  ;;  %4027 = vmatprep.mubr.msk.f32.mxu1 %vm4483_vm2, %v4482_v0  ;;  %v39_v41 = vld [vmem:[%s8269_s0 + $0x90] sm:$0xff]  ;;  %v40_v43 = vld [vmem:[%s8269_s0 + $0x98] sm:$0xff]  ;;  %v41_v45 = vld [vmem:[%s8269_s0 + $0xa0] sm:$0xff] }
  0x10   :  { %4170 = vmatprep.subr.mxu0 %v4482_v0  ;;  %4325 = vmatprep.subr.mxu1 %v4482_v0  ;;  %v3368_v46 = vld [vmem:[%s8269_s0 + $0x228] sm:$0xff]  ;;  %v3369_v48 = vld [vmem:[%s8269_s0 + $0x230] sm:$0xff]  ;;  %v3370_v50 = vld [vmem:[%s8269_s0 + $0x238] sm:$0xff] }
  0x11   :  { %4171 = vmatpush3.msra.mxu0 %v19_v2  ;;  %4326 = vmatpush3.msra.mxu1 %v19_v2  ;;  %v42_v47 = vld [vmem:[%s8269_s0 + $0xa8] sm:$0xff]  ;;  %v43_v49 = vld [vmem:[%s8269_s0 + $0xb0] sm:$0xff]  ;;  %v44_v51 = vld [vmem:[%s8269_s0 + $0xb8] sm:$0xff] }
  0x12   :  { %3873 = vmatmul.mubr.msk.f32.gmra.mxu0 %vm70_vm1, %v23_v9  ;;  %4028 = vmatmul.mubr.msk.f32.gmra.mxu1 %vm70_vm1, %v3350_v10  ;;  %v3371_v52 = vld [vmem:[%s8269_s0 + $0x240] sm:$0xff]  ;;  %v3372_v54 = vld [vmem:[%s8269_s0 + $0x248] sm:$0xff]  ;;  %v3373_v56 = vld [vmem:[%s8269_s0 + $0x250] sm:$0xff] }
  0x13   :  { %3875 = vmatprep.mubr.msk.f32.mxu0 %vm4483_vm2, %v4482_v0  ;;  %4030 = vmatprep.mubr.msk.f32.mxu1 %vm4483_vm2, %v4482_v0  ;;  %v45_v53 = vld [vmem:[%s8269_s0 + $0xc0] sm:$0xff]  ;;  %v46_v55 = vld [vmem:[%s8269_s0 + $0xc8] sm:$0xff]  ;;  %v47_v57 = vld [vmem:[%s8269_s0 + $0xd0] sm:$0xff] }
  0x14   :  { %4172 = vmatprep.subr.mxu0 %v4482_v0  ;;  %4327 = vmatprep.subr.mxu1 %v4482_v0  ;;  %v3374_v58 = vld [vmem:[%s8269_s0 + $0x258] sm:$0xff]  ;;  %v3375_v60 = vld [vmem:[%s8269_s0 + $0x260] sm:$0xff]  ;;  %v3376_v62 = vld [vmem:[%s8269_s0 + $0x268] sm:$0xff] }
  0x15   :  { %4173 = vmatpush3.msra.mxu0 %v18_v3  ;;  %4328 = vmatpush3.msra.mxu1 %v18_v3  ;;  %v48_v59 = vld [vmem:[%s8269_s0 + $0xd8] sm:$0xff]  ;;  %v49_v61 = vld [vmem:[%s8269_s0 + $0xe0] sm:$0xff]  ;;  %v50_v63 = vld [vmem:[%s8269_s0 + $0xe8] sm:$0xff] }
  0x16   :  { %3876 = vmatmul.mubr.msk.f32.gmra.mxu0 %vm70_vm1, %v24_v11  ;;  %4031 = vmatmul.mubr.msk.f32.gmra.mxu1 %vm70_vm1, %v3351_v12  ;;  %v3377_v1 = vld [vmem:[%s8269_s0 + $0x270] sm:$0xff]  ;;  %v3378_v3 = vld [vmem:[%s8269_s0 + $0x278] sm:$0xff]  ;;  %v3379_v5 = vld [vmem:[%s8269_s0 + $0x280] sm:$0xff] }
  0x17   :  { %3878 = vmatprep.mubr.msk.f32.mxu0 %vm4483_vm2, %v4482_v0  ;;  %4033 = vmatprep.mubr.msk.f32.mxu1 %vm4483_vm2, %v4482_v0  ;;  %v51_v2 = vld [vmem:[%s8269_s0 + $0xf0] sm:$0xff]  ;;  %v53_v6 = vld [vmem:[%s8269_s0 + $0x100] sm:$0xff]  ;;  %v3380_v7 = vld [vmem:[%s8269_s0 + $0x288] sm:$0xff] }
  0x18   :  { %4174 = vmatprep.subr.mxu0 %v4482_v0  ;;  %4329 = vmatprep.subr.mxu1 %v4482_v0  ;;  %v54_v8 = vld [vmem:[%s8269_s0 + $0x108] sm:$0xff]  ;;  %v3381_v9 = vld [vmem:[%s8269_s0 + $0x290] sm:$0xff]  ;;  %v3382_v11 = vld [vmem:[%s8269_s0 + $0x298] sm:$0xff] }
  0x19   :  { %4175 = vmatpush3.msra.mxu0 %v17_v4  ;;  %4330 = vmatpush3.msra.mxu1 %v17_v4  ;;  %v52_v4 = vld [vmem:[%s8269_s0 + $0xf8] sm:$0xff]  ;;  %v55_v10 = vld [vmem:[%s8269_s0 + $0x110] sm:$0xff] }
  0x1a   :  { %3879 = vmatmul.mubr.msk.f32.gmra.mxu0 %vm70_vm1, %v25_v13  ;;  %4034 = vmatmul.mubr.msk.f32.gmra.mxu1 %vm70_vm1, %v3352_v14  ;;  %v56_v12 = vld [vmem:[%s8269_s0 + $0x118] sm:$0xff]  ;;  %v3383_v13 = vld [vmem:[%s8269_s0 + $0x2a0] sm:$0xff] }
  0x1b   :  { %3881 = vmatprep.mubr.msk.f32.mxu0 %vm4483_vm2, %v4482_v0  ;;  %4036 = vmatprep.mubr.msk.f32.mxu1 %vm4483_vm2, %v4482_v0  ;;  %v57_v14 = vld [vmem:[%s8269_s0 + $0x120] sm:$0xff] }
  0x1e   :  { %3882 = vmatmul.mubr.msk.f32.gmra.mxu0 %vm70_vm1, %v26_v15  ;;  %4037 = vmatmul.mubr.msk.f32.gmra.mxu1 %vm70_vm1, %v3353_v16  ;;  %v3384_v15 = vld [vmem:[%s8269_s0 + $0x2a8] sm:$0xff] }
  0x1f   :  { %3884 = vmatprep.mubr.msk.f32.mxu0 %vm4483_vm2, %v4482_v0  ;;  %4039 = vmatprep.mubr.msk.f32.mxu1 %vm4483_vm2, %v4482_v0  ;;  %v58_v16 = vld [vmem:[%s8269_s0 + $0x128] sm:$0xff] }
  0x22   :  { %3885 = vmatmul.mubr.msk.f32.gmra.mxu0 %vm70_vm1, %v27_v17  ;;  %4040 = vmatmul.mubr.msk.f32.gmra.mxu1 %vm70_vm1, %v3354_v18  ;;  %v3385_v17 = vld [vmem:[%s8269_s0 + $0x2b0] sm:$0xff] }
  0x23   :  { %3887 = vmatprep.mubr.msk.f32.mxu0 %vm4483_vm2, %v4482_v0  ;;  %4042 = vmatprep.mubr.msk.f32.mxu1 %vm4483_vm2, %v4482_v0  ;;  %v59_v18 = vld [vmem:[%s8269_s0 + $0x130] sm:$0xff] }
  0x26   :  { %3888 = vmatmul.mubr.msk.f32.gmra.mxu0 %vm70_vm1, %v28_v19  ;;  %4043 = vmatmul.mubr.msk.f32.gmra.mxu1 %vm70_vm1, %v3355_v20  ;;  %v3386_v19 = vld [vmem:[%s8269_s0 + $0x2b8] sm:$0xff] }
  0x27   :  { %3890 = vmatprep.mubr.msk.f32.mxu0 %vm4483_vm2, %v4482_v0  ;;  %4045 = vmatprep.mubr.msk.f32.mxu1 %vm4483_vm2, %v4482_v0  ;;  %v60_v20 = vld [vmem:[%s8269_s0 + $0x138] sm:$0xff] }
  0x2a   :  { %3891 = vmatmul.mubr.msk.f32.gmra.mxu0 %vm70_vm1, %v29_v21  ;;  %4046 = vmatmul.mubr.msk.f32.gmra.mxu1 %vm70_vm1, %v3356_v22  ;;  %v3387_v21 = vld [vmem:[%s8269_s0 + $0x2c0] sm:$0xff] }
  0x2b   :  { %3893 = vmatprep.mubr.msk.f32.mxu0 %vm4483_vm2, %v4482_v0  ;;  %4048 = vmatprep.mubr.msk.f32.mxu1 %vm4483_vm2, %v4482_v0  ;;  %v61_v22 = vld [vmem:[%s8269_s0 + $0x140] sm:$0xff] }
  0x2e   :  { %3894 = vmatmul.mubr.msk.f32.gmra.mxu0 %vm70_vm1, %v30_v23  ;;  %4049 = vmatmul.mubr.msk.f32.gmra.mxu1 %vm70_vm1, %v3357_v24  ;;  %v3388_v23 = vld [vmem:[%s8269_s0 + $0x2c8] sm:$0xff] }
  0x2f   :  { %3896 = vmatprep.mubr.msk.f32.mxu0 %vm4483_vm2, %v4482_v0  ;;  %4051 = vmatprep.mubr.msk.f32.mxu1 %vm4483_vm2, %v4482_v0  ;;  %v62_v24 = vld [vmem:[%s8269_s0 + $0x148] sm:$0xff] }
  0x32   :  { %3897 = vmatmul.mubr.msk.f32.gmra.mxu0 %vm70_vm1, %v31_v25  ;;  %4052 = vmatmul.mubr.msk.f32.gmra.mxu1 %vm70_vm1, %v3358_v26  ;;  %v3389_v25 = vld [vmem:[%s8269_s0 + $0x2d0] sm:$0xff] }
  0x33   :  { %3899 = vmatprep.mubr.msk.f32.mxu0 %vm4483_vm2, %v4482_v0  ;;  %4054 = vmatprep.mubr.msk.f32.mxu1 %vm4483_vm2, %v4482_v0  ;;  %v63_v26 = vld [vmem:[%s8269_s0 + $0x150] sm:$0xff] }
  0x36   :  { %3900 = vmatmul.mubr.msk.f32.gmra.mxu0 %vm70_vm1, %v32_v27  ;;  %4055 = vmatmul.mubr.msk.f32.gmra.mxu1 %vm70_vm1, %v3359_v28  ;;  %v3390_v27 = vld [vmem:[%s8269_s0 + $0x2d8] sm:$0xff] }
  0x37   :  { %3902 = vmatprep.mubr.msk.f32.mxu0 %vm4483_vm2, %v4482_v0  ;;  %4057 = vmatprep.mubr.msk.f32.mxu1 %vm4483_vm2, %v4482_v0  ;;  %v64_v28 = vld [vmem:[%s8269_s0 + $0x158] sm:$0xff] }
  0x3a   :  { %3903 = vmatmul.mubr.msk.f32.gmra.mxu0 %vm70_vm1, %v33_v29  ;;  %4058 = vmatmul.mubr.msk.f32.gmra.mxu1 %vm70_vm1, %v3360_v30  ;;  %v3391_v29 = vld [vmem:[%s8269_s0 + $0x2e0] sm:$0xff] }
  0x3b   :  { %3905 = vmatprep.mubr.msk.f32.mxu0 %vm4483_vm2, %v4482_v0  ;;  %4060 = vmatprep.mubr.msk.f32.mxu1 %vm4483_vm2, %v4482_v0  ;;  %v65_v30 = vld [vmem:[%s8269_s0 + $0x160] sm:$0xff] }
  0x3e   :  { %3906 = vmatmul.mubr.msk.f32.gmra.mxu0 %vm70_vm1, %v34_v31  ;;  %4061 = vmatmul.mubr.msk.f32.gmra.mxu1 %vm70_vm1, %v3361_v32  ;;  %v3392_v31 = vld [vmem:[%s8269_s0 + $0x2e8] sm:$0xff] }
  0x3f   :  { %3908 = vmatprep.mubr.msk.f32.mxu0 %vm4483_vm2, %v4482_v0  ;;  %4063 = vmatprep.mubr.msk.f32.mxu1 %vm4483_vm2, %v4482_v0  ;;  %v66_v32 = vld [vmem:[%s8269_s0 + $0x168] sm:$0xff] }
  0x42   :  { %3909 = vmatmul.mubr.msk.f32.gmra.mxu0 %vm70_vm1, %v35_v33  ;;  %4064 = vmatmul.mubr.msk.f32.gmra.mxu1 %vm70_vm1, %v3362_v34  ;;  %v3393_v33 = vld [vmem:[%s8269_s0 + $0x2f0] sm:$0xff] }
  0x43   :  { %3911 = vmatprep.mubr.msk.f32.mxu0 %vm4483_vm2, %v4482_v0  ;;  %4066 = vmatprep.mubr.msk.f32.mxu1 %vm4483_vm2, %v4482_v0  ;;  %v67_v34 = vld [vmem:[%s8269_s0 + $0x170] sm:$0xff] }
  0x46   :  { %3912 = vmatmul.mubr.msk.f32.gmra.mxu0 %vm70_vm1, %v36_v35  ;;  %4067 = vmatmul.mubr.msk.f32.gmra.mxu1 %vm70_vm1, %v3363_v36  ;;  %v3394_v35 = vld [vmem:[%s8269_s0 + $0x2f8] sm:$0xff] }
  0x47   :  { %3914 = vmatprep.mubr.msk.f32.mxu0 %vm4483_vm2, %v4482_v0  ;;  %4069 = vmatprep.mubr.msk.f32.mxu1 %vm4483_vm2, %v4482_v0  ;;  %v68_v36 = vld [vmem:[%s8269_s0 + $0x178] sm:$0xff] }
  0x4a   :  { %3915 = vmatmul.mubr.msk.f32.gmra.mxu0 %vm70_vm1, %v37_v37  ;;  %4070 = vmatmul.mubr.msk.f32.gmra.mxu1 %vm70_vm1, %v3364_v38  ;;  %v3395_v37 = vld [vmem:[%s8269_s0 + $0x300] sm:$0xff] }
  0x4b   :  { %3917 = vmatprep.mubr.msk.f32.mxu0 %vm4483_vm2, %v4482_v0  ;;  %4072 = vmatprep.mubr.msk.f32.mxu1 %vm4483_vm2, %v4482_v0  ;;  %v69_v38 = vld [vmem:[%s8269_s0 + $0x180] sm:$0xff] }
  0x4e   :  { %3918 = vmatmul.mubr.msk.f32.gmra.mxu0 %vm70_vm1, %v38_v39  ;;  %4073 = vmatmul.mubr.msk.f32.gmra.mxu1 %vm70_vm1, %v3365_v40  ;;  %v3396_v39 = vld [vmem:[%s8269_s0 + $0x308] sm:$0xff] }
  0x4f   :  { %3920 = vmatprep.mubr.msk.f32.mxu0 %vm4483_vm2, %v4482_v0  ;;  %4075 = vmatprep.mubr.msk.f32.mxu1 %vm4483_vm2, %v4482_v0 }
  0x52   :  { %3921 = vmatmul.mubr.msk.f32.gmra.mxu0 %vm70_vm1, %v39_v41  ;;  %4076 = vmatmul.mubr.msk.f32.gmra.mxu1 %vm70_vm1, %v3366_v42  ;;  %v3447_v42 = vld [vmem:[%s8269_s0 + $0x310] sm:$0xff] }
  0x53   :  { %3923 = vmatprep.mubr.msk.f32.mxu0 %vm4483_vm2, %v4482_v0  ;;  %4078 = vmatprep.mubr.msk.f32.mxu1 %vm4483_vm2, %v4482_v0 }
  0x56   :  { %3924 = vmatmul.mubr.msk.f32.gmra.mxu0 %vm70_vm1, %v40_v43  ;;  %4079 = vmatmul.mubr.msk.f32.gmra.mxu1 %vm70_vm1, %v3367_v44  ;;  %v3546_v43 = vld [vmem:[%s8269_s0 + $0x498] sm:$0xff] }
  0x57   :  { %3926 = vmatprep.mubr.msk.f32.mxu0 %vm4483_vm2, %v4482_v0  ;;  %4081 = vmatprep.mubr.msk.f32.mxu1 %vm4483_vm2, %v4482_v0 }
  0x5a   :  { %3927 = vmatmul.mubr.msk.f32.gmra.mxu0 %vm70_vm1, %v41_v45  ;;  %4082 = vmatmul.mubr.msk.f32.gmra.mxu1 %vm70_vm1, %v3368_v46 }
  0x5b   :  { %3929 = vmatprep.mubr.msk.f32.mxu0 %vm4483_vm2, %v4482_v0  ;;  %4084 = vmatprep.mubr.msk.f32.mxu1 %vm4483_vm2, %v4482_v0 }
  0x5e   :  { %3930 = vmatmul.mubr.msk.f32.gmra.mxu0 %vm70_vm1, %v42_v47  ;;  %4085 = vmatmul.mubr.msk.f32.gmra.mxu1 %vm70_vm1, %v3369_v48  ;;  %v3448_v48 = vld [vmem:[%s8269_s0 + $0x318] sm:$0xff] }
  0x5f   :  { %3932 = vmatprep.mubr.msk.f32.mxu0 %vm4483_vm2, %v4482_v0  ;;  %4087 = vmatprep.mubr.msk.f32.mxu1 %vm4483_vm2, %v4482_v0 }
  0x62   :  { %3933 = vmatmul.mubr.msk.f32.gmra.mxu0 %vm70_vm1, %v43_v49  ;;  %4088 = vmatmul.mubr.msk.f32.gmra.mxu1 %vm70_vm1, %v3370_v50  ;;  %v3547_v49 = vld [vmem:[%s8269_s0 + $0x4a0] sm:$0xff] }
  0x63   :  { %3935 = vmatprep.mubr.msk.f32.mxu0 %vm4483_vm2, %v4482_v0  ;;  %4090 = vmatprep.mubr.msk.f32.mxu1 %vm4483_vm2, %v4482_v0 }
  0x66   :  { %3936 = vmatmul.mubr.msk.f32.gmra.mxu0 %vm70_vm1, %v44_v51  ;;  %4091 = vmatmul.mubr.msk.f32.gmra.mxu1 %vm70_vm1, %v3371_v52 }
  0x67   :  { %3938 = vmatprep.mubr.msk.f32.mxu0 %vm4483_vm2, %v4482_v0  ;;  %4093 = vmatprep.mubr.msk.f32.mxu1 %vm4483_vm2, %v4482_v0 }
  0x6a   :  { %3939 = vmatmul.mubr.msk.f32.gmra.mxu0 %vm70_vm1, %v45_v53  ;;  %4094 = vmatmul.mubr.msk.f32.gmra.mxu1 %vm70_vm1, %v3372_v54  ;;  %v3449_v54 = vld [vmem:[%s8269_s0 + $0x320] sm:$0xff] }
  0x6b   :  { %3941 = vmatprep.mubr.msk.f32.mxu0 %vm4483_vm2, %v4482_v0  ;;  %4096 = vmatprep.mubr.msk.f32.mxu1 %vm4483_vm2, %v4482_v0 }
  0x6e   :  { %3942 = vmatmul.mubr.msk.f32.gmra.mxu0 %vm70_vm1, %v46_v55  ;;  %4097 = vmatmul.mubr.msk.f32.gmra.mxu1 %vm70_vm1, %v3373_v56  ;;  %v3548_v55 = vld [vmem:[%s8269_s0 + $0x4a8] sm:$0xff] }
  0x6f   :  { %3944 = vmatprep.mubr.msk.f32.mxu0 %vm4483_vm2, %v4482_v0  ;;  %4099 = vmatprep.mubr.msk.f32.mxu1 %vm4483_vm2, %v4482_v0 }
  0x72   :  { %3945 = vmatmul.mubr.msk.f32.gmra.mxu0 %vm70_vm1, %v47_v57  ;;  %4100 = vmatmul.mubr.msk.f32.gmra.mxu1 %vm70_vm1, %v3374_v58 }
  0x73   :  { %3947 = vmatprep.mubr.msk.f32.mxu0 %vm4483_vm2, %v4482_v0  ;;  %4102 = vmatprep.mubr.msk.f32.mxu1 %vm4483_vm2, %v4482_v0 }
  0x76   :  { %3948 = vmatmul.mubr.msk.f32.gmra.mxu0 %vm70_vm1, %v48_v59  ;;  %4103 = vmatmul.mubr.msk.f32.gmra.mxu1 %vm70_vm1, %v3375_v60  ;;  %v3450_v60 = vld [vmem:[%s8269_s0 + $0x328] sm:$0xff] }
  0x77   :  { %3950 = vmatprep.mubr.msk.f32.mxu0 %vm4483_vm2, %v4482_v0  ;;  %4105 = vmatprep.mubr.msk.f32.mxu1 %vm4483_vm2, %v4482_v0 }
  0x7a   :  { %3951 = vmatmul.mubr.msk.f32.gmra.mxu0 %vm70_vm1, %v49_v61  ;;  %4106 = vmatmul.mubr.msk.f32.gmra.mxu1 %vm70_vm1, %v3376_v62  ;;  %v3549_v61 = vld [vmem:[%s8269_s0 + $0x4b0] sm:$0xff] }
  0x7b   :  { %3953 = vmatprep.mubr.msk.f32.mxu0 %vm4483_vm2, %v4482_v0  ;;  %4108 = vmatprep.mubr.msk.f32.mxu1 %vm4483_vm2, %v4482_v0 }
  0x7e   :  { %3954 = vmatmul.mubr.msk.f32.gmra.mxu0 %vm70_vm1, %v50_v63  ;;  %4109 = vmatmul.mubr.msk.f32.gmra.mxu1 %vm70_vm1, %v3377_v1 }
  0x7f   :  { %3956 = vmatprep.mubr.msk.f32.mxu0 %vm4483_vm2, %v4482_v0  ;;  %4111 = vmatprep.mubr.msk.f32.mxu1 %vm4483_vm2, %v4482_v0 }
  0x82   :  { %3957 = vmatmul.mubr.msk.f32.gmra.mxu0 %vm70_vm1, %v51_v2  ;;  %4112 = vmatmul.mubr.msk.f32.gmra.mxu1 %vm70_vm1, %v3378_v3  ;;  %v3451_v3 = vld [vmem:[%s8269_s0 + $0x330] sm:$0xff] }
  0x83   :  { %3959 = vmatprep.mubr.msk.f32.mxu0 %vm4483_vm2, %v4482_v0  ;;  %4114 = vmatprep.mubr.msk.f32.mxu1 %vm4483_vm2, %v4482_v0 }
  0x86   :  { %3960 = vmatmul.mubr.msk.f32.gmra.mxu0 %vm70_vm1, %v52_v4  ;;  %4115 = vmatmul.mubr.msk.f32.gmra.mxu1 %vm70_vm1, %v3379_v5  ;;  %v3550_v4 = vld [vmem:[%s8269_s0 + $0x4b8] sm:$0xff] }
  0x87   :  { %3962 = vmatprep.mubr.msk.f32.mxu0 %vm4483_vm2, %v4482_v0  ;;  %4117 = vmatprep.mubr.msk.f32.mxu1 %vm4483_vm2, %v4482_v0 }
  0x8a   :  { %3963 = vmatmul.mubr.msk.f32.gmra.mxu0 %vm70_vm1, %v53_v6  ;;  %4118 = vmatmul.mubr.msk.f32.gmra.mxu1 %vm70_vm1, %v3380_v7 }
  0x8b   :  { %3965 = vmatprep.mubr.msk.f32.mxu0 %vm4483_vm2, %v4482_v0  ;;  %4120 = vmatprep.mubr.msk.f32.mxu1 %vm4483_vm2, %v4482_v0 }
  0x8e   :  { %3966 = vmatmul.mubr.msk.f32.gmra.mxu0 %vm70_vm1, %v54_v8  ;;  %4121 = vmatmul.mubr.msk.f32.gmra.mxu1 %vm70_vm1, %v3381_v9  ;;  %v3452_v9 = vld [vmem:[%s8269_s0 + $0x338] sm:$0xff] }
  0x8f   :  { %3968 = vmatprep.mubr.msk.f32.mxu0 %vm4483_vm2, %v4482_v0  ;;  %4123 = vmatprep.mubr.msk.f32.mxu1 %vm4483_vm2, %v4482_v0 }
  0x92   :  { %3969 = vmatmul.mubr.msk.f32.gmra.mxu0 %vm70_vm1, %v55_v10  ;;  %4124 = vmatmul.mubr.msk.f32.gmra.mxu1 %vm70_vm1, %v3382_v11  ;;  %v3551_v10 = vld [vmem:[%s8269_s0 + $0x4c0] sm:$0xff] }
  0x93   :  { %3971 = vmatprep.mubr.msk.f32.mxu0 %vm4483_vm2, %v4482_v0  ;;  %4126 = vmatprep.mubr.msk.f32.mxu1 %vm4483_vm2, %v4482_v0 }
  0x96   :  { %3972 = vmatmul.mubr.msk.f32.gmra.mxu0 %vm70_vm1, %v56_v12  ;;  %4127 = vmatmul.mubr.msk.f32.gmra.mxu1 %vm70_vm1, %v3383_v13 }
  0x97   :  { %3974 = vmatprep.mubr.msk.f32.mxu0 %vm4483_vm2, %v4482_v0  ;;  %4129 = vmatprep.mubr.msk.f32.mxu1 %vm4483_vm2, %v4482_v0 }
  0x9a   :  { %3975 = vmatmul.mubr.msk.f32.gmra.mxu0 %vm70_vm1, %v57_v14  ;;  %4130 = vmatmul.mubr.msk.f32.gmra.mxu1 %vm70_vm1, %v3384_v15  ;;  %v3453_v15 = vld [vmem:[%s8269_s0 + $0x340] sm:$0xff] }
  0x9b   :  { %3977 = vmatprep.mubr.msk.f32.mxu0 %vm4483_vm2, %v4482_v0  ;;  %4132 = vmatprep.mubr.msk.f32.mxu1 %vm4483_vm2, %v4482_v0 }
  0x9e   :  { %3978 = vmatmul.mubr.msk.f32.gmra.mxu0 %vm70_vm1, %v58_v16  ;;  %4133 = vmatmul.mubr.msk.f32.gmra.mxu1 %vm70_vm1, %v3385_v17  ;;  %v3552_v16 = vld [vmem:[%s8269_s0 + $0x4c8] sm:$0xff] }
  0x9f   :  { %3980 = vmatprep.mubr.msk.f32.mxu0 %vm4483_vm2, %v4482_v0  ;;  %4135 = vmatprep.mubr.msk.f32.mxu1 %vm4483_vm2, %v4482_v0 }
  0xa2   :  { %3981 = vmatmul.mubr.msk.f32.gmra.mxu0 %vm70_vm1, %v59_v18  ;;  %4136 = vmatmul.mubr.msk.f32.gmra.mxu1 %vm70_vm1, %v3386_v19 }
  0xa3   :  { %3983 = vmatprep.mubr.msk.f32.mxu0 %vm4483_vm2, %v4482_v0  ;;  %4138 = vmatprep.mubr.msk.f32.mxu1 %vm4483_vm2, %v4482_v0 }
  0xa6   :  { %3984 = vmatmul.mubr.msk.f32.gmra.mxu0 %vm70_vm1, %v60_v20  ;;  %4139 = vmatmul.mubr.msk.f32.gmra.mxu1 %vm70_vm1, %v3387_v21  ;;  %v3454_v21 = vld [vmem:[%s8269_s0 + $0x348] sm:$0xff] }
  0xa7   :  { %3986 = vmatprep.mubr.msk.f32.mxu0 %vm4483_vm2, %v4482_v0  ;;  %4141 = vmatprep.mubr.msk.f32.mxu1 %vm4483_vm2, %v4482_v0 }
  0xaa   :  { %3987 = vmatmul.mubr.msk.f32.gmra.mxu0 %vm70_vm1, %v61_v22  ;;  %4142 = vmatmul.mubr.msk.f32.gmra.mxu1 %vm70_vm1, %v3388_v23  ;;  %v3553_v22 = vld [vmem:[%s8269_s0 + $0x4d0] sm:$0xff] }
  0xab   :  { %3989 = vmatprep.mubr.msk.f32.mxu0 %vm4483_vm2, %v4482_v0  ;;  %4144 = vmatprep.mubr.msk.f32.mxu1 %vm4483_vm2, %v4482_v0 }
  0xae   :  { %3990 = vmatmul.mubr.msk.f32.gmra.mxu0 %vm70_vm1, %v62_v24  ;;  %4145 = vmatmul.mubr.msk.f32.gmra.mxu1 %vm70_vm1, %v3389_v25 }
  0xaf   :  { %3992 = vmatprep.mubr.msk.f32.mxu0 %vm4483_vm2, %v4482_v0  ;;  %4147 = vmatprep.mubr.msk.f32.mxu1 %vm4483_vm2, %v4482_v0 }
  0xb2   :  { %3993 = vmatmul.mubr.msk.f32.gmra.mxu0 %vm70_vm1, %v63_v26  ;;  %4148 = vmatmul.mubr.msk.f32.gmra.mxu1 %vm70_vm1, %v3390_v27  ;;  %v3455_v27 = vld [vmem:[%s8269_s0 + $0x350] sm:$0xff] }
  0xb3   :  { %3995 = vmatprep.mubr.msk.f32.mxu0 %vm4483_vm2, %v4482_v0  ;;  %4150 = vmatprep.mubr.msk.f32.mxu1 %vm4483_vm2, %v4482_v0 }
  0xb6   :  { %3996 = vmatmul.mubr.msk.f32.gmra.mxu0 %vm70_vm1, %v64_v28  ;;  %4151 = vmatmul.mubr.msk.f32.gmra.mxu1 %vm70_vm1, %v3391_v29  ;;  %v3554_v28 = vld [vmem:[%s8269_s0 + $0x4d8] sm:$0xff] }
  0xb7   :  { %3998 = vmatprep.mubr.msk.f32.mxu0 %vm4483_vm2, %v4482_v0  ;;  %4153 = vmatprep.mubr.msk.f32.mxu1 %vm4483_vm2, %v4482_v0 }
  0xba   :  { %3999 = vmatmul.mubr.msk.f32.gmra.mxu0 %vm70_vm1, %v65_v30  ;;  %4154 = vmatmul.mubr.msk.f32.gmra.mxu1 %vm70_vm1, %v3392_v31 }
  0xbb   :  { %4001 = vmatprep.mubr.msk.f32.mxu0 %vm4483_vm2, %v4482_v0  ;;  %4156 = vmatprep.mubr.msk.f32.mxu1 %vm4483_vm2, %v4482_v0 }
  0xbe   :  { %4002 = vmatmul.mubr.msk.f32.gmra.mxu0 %vm70_vm1, %v66_v32  ;;  %4157 = vmatmul.mubr.msk.f32.gmra.mxu1 %vm70_vm1, %v3393_v33  ;;  %v3456_v33 = vld [vmem:[%s8269_s0 + $0x358] sm:$0xff] }
  0xbf   :  { %4004 = vmatprep.mubr.msk.f32.mxu0 %vm4483_vm2, %v4482_v0  ;;  %4159 = vmatprep.mubr.msk.f32.mxu1 %vm4483_vm2, %v4482_v0 }
  0xc2   :  { %4005 = vmatmul.mubr.msk.f32.gmra.mxu0 %vm70_vm1, %v67_v34  ;;  %4160 = vmatmul.mubr.msk.f32.gmra.mxu1 %vm70_vm1, %v3394_v35  ;;  %v3555_v34 = vld [vmem:[%s8269_s0 + $0x4e0] sm:$0xff] }
  0xc3   :  { %4007 = vmatprep.mubr.msk.f32.mxu0 %vm4483_vm2, %v4482_v0  ;;  %4162 = vmatprep.mubr.msk.f32.mxu1 %vm4483_vm2, %v4482_v0 }
  0xc6   :  { %4008 = vmatmul.mubr.msk.f32.gmra.mxu0 %vm70_vm1, %v68_v36  ;;  %4163 = vmatmul.mubr.msk.f32.gmra.mxu1 %vm70_vm1, %v3395_v37 }
  0xc7   :  { %4010 = vmatprep.mubr.msk.f32.mxu0 %vm4483_vm2, %v4482_v0  ;;  %4165 = vmatprep.mubr.msk.f32.mxu1 %vm4483_vm2, %v4482_v0 }
  0xca   :  { %v5127_v40 = vpop.f32.mrf.mxu0  ;;  %4011 = vmatmul.mubr.msk.f32.gmra.mxu0 %vm70_vm1, %v69_v38  ;;  %v5130_v41 = vpop.f32.mrf.mxu1  ;;  %4166 = vmatmul.mubr.msk.f32.gmra.mxu1 %vm70_vm1, %v3396_v39  ;;  %v3457_v39 = vld [vmem:[%s8269_s0 + $0x360] sm:$0xff] }
  0xcb   :  { %8628 = vst [vmem:[#allocation2_spill] sm:$0xff] %v5130_v41  ;;  %4176 = vmatprep.mubr.msk.f32.mxu0 %vm4483_vm2, %v4482_v0  ;;  %4331 = vmatprep.mubr.msk.f32.mxu1 %vm4483_vm2, %v4482_v0 }
  0xcc   :  { %v3868_v44 = vpop.f32.mrf.mxu0  ;;  %v4023_v45 = vpop.f32.mrf.mxu1 }
  0xce   :  { %v5143_v46 = vpop.f32.mrf.mxu0  ;;  %v5145_v47 = vpop.f32.mrf.mxu1  ;;  %4177 = vmatmul.mubr.msk.f32.vlgmr.msra.gmra.mxu0 %vm70_vm1, %v3447_v42  ;;  %4332 = vmatmul.mubr.msk.f32.vlgmr.msra.gmra.mxu1 %vm70_vm1, %v3546_v43  ;;  %v3556_v42 = vld [vmem:[%s8269_s0 + $0x4e8] sm:$0xff] }
  0xcf   :  { %8629 = vst [vmem:[#allocation3_spill] sm:$0xff] %v5145_v47  ;;  %4179 = vmatprep.mubr.msk.f32.mxu0 %vm4483_vm2, %v4482_v0  ;;  %4334 = vmatprep.mubr.msk.f32.mxu1 %vm4483_vm2, %v4482_v0 }
  0xd0   :  { %v3871_v50 = vpop.f32.mrf.mxu0  ;;  %v4026_v51 = vpop.f32.mrf.mxu1 }
  0xd1   :  { %v3557_v50 = vld [vmem:[%s8269_s0 + $0x4f0] sm:$0xff] }
  0xd2   :  { %v5159_v52 = vpop.f32.mrf.mxu0  ;;  %v5161_v53 = vpop.f32.mrf.mxu1  ;;  %4180 = vmatmul.mubr.msk.f32.gmra.mxu0 %vm70_vm1, %v3448_v48  ;;  %4335 = vmatmul.mubr.msk.f32.gmra.mxu1 %vm70_vm1, %v3547_v49  ;;  %v3458_v49 = vld [vmem:[%s8269_s0 + $0x368] sm:$0xff] }
  0xd3   :  { %8630 = vst [vmem:[#allocation4_spill] sm:$0xff] %v5161_v53  ;;  %4182 = vmatprep.mubr.msk.f32.mxu0 %vm4483_vm2, %v4482_v0  ;;  %4337 = vmatprep.mubr.msk.f32.mxu1 %vm4483_vm2, %v4482_v0 }
  0xd4   :  { %v3874_v56 = vpop.f32.mrf.mxu0  ;;  %v4029_v57 = vpop.f32.mrf.mxu1 }
  0xd5   :  { %v3459_v57 = vld [vmem:[%s8269_s0 + $0x370] sm:$0xff] }
  0xd6   :  { %v5175_v58 = vpop.f32.mrf.mxu0  ;;  %v5177_v59 = vpop.f32.mrf.mxu1  ;;  %4183 = vmatmul.mubr.msk.f32.gmra.mxu0 %vm70_vm1, %v3449_v54  ;;  %4338 = vmatmul.mubr.msk.f32.gmra.mxu1 %vm70_vm1, %v3548_v55 }
  0xd7   :  { %8631 = vst [vmem:[#allocation5_spill] sm:$0xff] %v5177_v59  ;;  %4185 = vmatprep.mubr.msk.f32.mxu0 %vm4483_vm2, %v4482_v0  ;;  %4340 = vmatprep.mubr.msk.f32.mxu1 %vm4483_vm2, %v4482_v0 }
  0xd8   :  { %v3877_v62 = vpop.f32.mrf.mxu0  ;;  %v4032_v63 = vpop.f32.mrf.mxu1 }
  0xda   :  { %v5191_v1 = vpop.f32.mrf.mxu0  ;;  %v5193_v2 = vpop.f32.mrf.mxu1  ;;  %4186 = vmatmul.mubr.msk.f32.gmra.mxu0 %vm70_vm1, %v3450_v60  ;;  %4341 = vmatmul.mubr.msk.f32.gmra.mxu1 %vm70_vm1, %v3549_v61  ;;  %v3558_v60 = vld [vmem:[%s8269_s0 + $0x4f8] sm:$0xff] }
  0xdb   :  { %8632 = vst [vmem:[#allocation6_spill] sm:$0xff] %v5193_v2  ;;  %4188 = vmatprep.mubr.msk.f32.mxu0 %vm4483_vm2, %v4482_v0  ;;  %4343 = vmatprep.mubr.msk.f32.mxu1 %vm4483_vm2, %v4482_v0 }
  0xdc   :  { %v3880_v5 = vpop.f32.mrf.mxu0  ;;  %v4035_v6 = vpop.f32.mrf.mxu1 }
  0xdd   :  { %v3559_v5 = vld [vmem:[%s8269_s0 + $0x500] sm:$0xff] }
  0xde   :  { %v5207_v7 = vpop.f32.mrf.mxu0  ;;  %v5209_v8 = vpop.f32.mrf.mxu1  ;;  %4189 = vmatmul.mubr.msk.f32.gmra.mxu0 %vm70_vm1, %v3451_v3  ;;  %4344 = vmatmul.mubr.msk.f32.gmra.mxu1 %vm70_vm1, %v3550_v4  ;;  %v3460_v4 = vld [vmem:[%s8269_s0 + $0x378] sm:$0xff] }
  0xdf   :  { %8633 = vst [vmem:[#allocation7_spill] sm:$0xff] %v5209_v8  ;;  %4191 = vmatprep.mubr.msk.f32.mxu0 %vm4483_vm2, %v4482_v0  ;;  %4346 = vmatprep.mubr.msk.f32.mxu1 %vm4483_vm2, %v4482_v0 }
  0xe0   :  { %v3883_v11 = vpop.f32.mrf.mxu0  ;;  %v4038_v12 = vpop.f32.mrf.mxu1 }
  0xe1   :  { %v3461_v12 = vld [vmem:[%s8269_s0 + $0x380] sm:$0xff] }
  0xe2   :  { %v5223_v13 = vpop.f32.mrf.mxu0  ;;  %v5225_v14 = vpop.f32.mrf.mxu1  ;;  %4192 = vmatmul.mubr.msk.f32.gmra.mxu0 %vm70_vm1, %v3452_v9  ;;  %4347 = vmatmul.mubr.msk.f32.gmra.mxu1 %vm70_vm1, %v3551_v10 }
  0xe3   :  { %8634 = vst [vmem:[#allocation8_spill] sm:$0xff] %v5225_v14  ;;  %4194 = vmatprep.mubr.msk.f32.mxu0 %vm4483_vm2, %v4482_v0  ;;  %4349 = vmatprep.mubr.msk.f32.mxu1 %vm4483_vm2, %v4482_v0 }
  0xe4   :  { %v3886_v17 = vpop.f32.mrf.mxu0  ;;  %v4041_v18 = vpop.f32.mrf.mxu1 }
  0xe6   :  { %v5239_v19 = vpop.f32.mrf.mxu0  ;;  %v5241_v20 = vpop.f32.mrf.mxu1  ;;  %4195 = vmatmul.mubr.msk.f32.gmra.mxu0 %vm70_vm1, %v3453_v15  ;;  %4350 = vmatmul.mubr.msk.f32.gmra.mxu1 %vm70_vm1, %v3552_v16  ;;  %v3560_v15 = vld [vmem:[%s8269_s0 + $0x508] sm:$0xff] }
  0xe7   :  { %8635 = vst [vmem:[#allocation9_spill] sm:$0xff] %v5241_v20  ;;  %4197 = vmatprep.mubr.msk.f32.mxu0 %vm4483_vm2, %v4482_v0  ;;  %4352 = vmatprep.mubr.msk.f32.mxu1 %vm4483_vm2, %v4482_v0 }
  0xe8   :  { %v3889_v23 = vpop.f32.mrf.mxu0  ;;  %v4044_v24 = vpop.f32.mrf.mxu1 }
  0xe9   :  { %v3561_v23 = vld [vmem:[%s8269_s0 + $0x510] sm:$0xff] }
  0xea   :  { %v5255_v25 = vpop.f32.mrf.mxu0  ;;  %v5257_v26 = vpop.f32.mrf.mxu1  ;;  %4198 = vmatmul.mubr.msk.f32.gmra.mxu0 %vm70_vm1, %v3454_v21  ;;  %4353 = vmatmul.mubr.msk.f32.gmra.mxu1 %vm70_vm1, %v3553_v22  ;;  %v3462_v22 = vld [vmem:[%s8269_s0 + $0x388] sm:$0xff] }
  0xeb   :  { %8636 = vst [vmem:[#allocation10_spill] sm:$0xff] %v5257_v26  ;;  %4200 = vmatprep.mubr.msk.f32.mxu0 %vm4483_vm2, %v4482_v0  ;;  %4355 = vmatprep.mubr.msk.f32.mxu1 %vm4483_vm2, %v4482_v0 }
  0xec   :  { %v3892_v29 = vpop.f32.mrf.mxu0  ;;  %v4047_v30 = vpop.f32.mrf.mxu1 }
  0xed   :  { %v3463_v30 = vld [vmem:[%s8269_s0 + $0x390] sm:$0xff] }
  0xee   :  { %v5271_v31 = vpop.f32.mrf.mxu0  ;;  %v5273_v32 = vpop.f32.mrf.mxu1  ;;  %4201 = vmatmul.mubr.msk.f32.gmra.mxu0 %vm70_vm1, %v3455_v27  ;;  %4356 = vmatmul.mubr.msk.f32.gmra.mxu1 %vm70_vm1, %v3554_v28 }
  0xef   :  { %8637 = vst [vmem:[#allocation11_spill] sm:$0xff] %v5273_v32  ;;  %4203 = vmatprep.mubr.msk.f32.mxu0 %vm4483_vm2, %v4482_v0  ;;  %4358 = vmatprep.mubr.msk.f32.mxu1 %vm4483_vm2, %v4482_v0 }
  0xf0   :  { %v3895_v35 = vpop.f32.mrf.mxu0  ;;  %v4050_v36 = vpop.f32.mrf.mxu1 }
  0xf2   :  { %v5287_v37 = vpop.f32.mrf.mxu0  ;;  %v5289_v38 = vpop.f32.mrf.mxu1  ;;  %4204 = vmatmul.mubr.msk.f32.gmra.mxu0 %vm70_vm1, %v3456_v33  ;;  %4359 = vmatmul.mubr.msk.f32.gmra.mxu1 %vm70_vm1, %v3555_v34  ;;  %v3562_v33 = vld [vmem:[%s8269_s0 + $0x518] sm:$0xff] }
  0xf3   :  { %8638 = vst [vmem:[#allocation12_spill] sm:$0xff] %v5289_v38  ;;  %4206 = vmatprep.mubr.msk.f32.mxu0 %vm4483_vm2, %v4482_v0  ;;  %4361 = vmatprep.mubr.msk.f32.mxu1 %vm4483_vm2, %v4482_v0 }
  0xf4   :  { %v3898_v43 = vpop.f32.mrf.mxu0  ;;  %v4053_v44 = vpop.f32.mrf.mxu1 }
  0xf5   :  { %v3563_v43 = vld [vmem:[%s8269_s0 + $0x520] sm:$0xff] }
  0xf6   :  { %v5303_v45 = vpop.f32.mrf.mxu0  ;;  %v5305_v48 = vpop.f32.mrf.mxu1  ;;  %4207 = vmatmul.mubr.msk.f32.gmra.mxu0 %vm70_vm1, %v3457_v39  ;;  %4362 = vmatmul.mubr.msk.f32.gmra.mxu1 %vm70_vm1, %v3556_v42  ;;  %v3464_v42 = vld [vmem:[%s8269_s0 + $0x398] sm:$0xff] }
  0xf7   :  { %8639 = vst [vmem:[#allocation13_spill] sm:$0xff] %v5305_v48  ;;  %4209 = vmatprep.mubr.msk.f32.mxu0 %vm4483_vm2, %v4482_v0  ;;  %4364 = vmatprep.mubr.msk.f32.mxu1 %vm4483_vm2, %v4482_v0 }
  0xf8   :  { %v3901_v51 = vpop.f32.mrf.mxu0  ;;  %v4056_v54 = vpop.f32.mrf.mxu1 }
  0xf9   :  { %v3465_v54 = vld [vmem:[%s8269_s0 + $0x3a0] sm:$0xff] }
  0xfa   :  { %v5319_v55 = vpop.f32.mrf.mxu0  ;;  %v5321_v56 = vpop.f32.mrf.mxu1  ;;  %4210 = vmatmul.mubr.msk.f32.gmra.mxu0 %vm70_vm1, %v3458_v49  ;;  %4365 = vmatmul.mubr.msk.f32.gmra.mxu1 %vm70_vm1, %v3557_v50 }
  0xfb   :  { %8640 = vst [vmem:[#allocation14_spill] sm:$0xff] %v5321_v56  ;;  %4212 = vmatprep.mubr.msk.f32.mxu0 %vm4483_vm2, %v4482_v0  ;;  %4367 = vmatprep.mubr.msk.f32.mxu1 %vm4483_vm2, %v4482_v0 }
  0xfc   :  { %v3904_v61 = vpop.f32.mrf.mxu0  ;;  %v4059_v62 = vpop.f32.mrf.mxu1 }
  0xfe   :  { %v5335_v63 = vpop.f32.mrf.mxu0  ;;  %v5337_v3 = vpop.f32.mrf.mxu1  ;;  %4213 = vmatmul.mubr.msk.f32.gmra.mxu0 %vm70_vm1, %v3459_v57  ;;  %4368 = vmatmul.mubr.msk.f32.gmra.mxu1 %vm70_vm1, %v3558_v60  ;;  %v3564_v57 = vld [vmem:[%s8269_s0 + $0x528] sm:$0xff] }
  0xff   :  { %8641 = vst [vmem:[#allocation15_spill] sm:$0xff] %v5335_v63  ;;  %8642 = vst [vmem:[#allocation16_spill] sm:$0xff] %v5337_v3  ;;  %4215 = vmatprep.mubr.msk.f32.mxu0 %vm4483_vm2, %v4482_v0  ;;  %4370 = vmatprep.mubr.msk.f32.mxu1 %vm4483_vm2, %v4482_v0 }
 0x100   :  { %v3907_v6 = vpop.f32.mrf.mxu0  ;;  %v4062_v9 = vpop.f32.mrf.mxu1 }
 0x101   :  { %v3565_v6 = vld [vmem:[%s8269_s0 + $0x530] sm:$0xff] }
 0x102   :  { %v5351_v10 = vpop.f32.mrf.mxu0  ;;  %v5353_v11 = vpop.f32.mrf.mxu1  ;;  %4216 = vmatmul.mubr.msk.f32.gmra.mxu0 %vm70_vm1, %v3460_v4  ;;  %4371 = vmatmul.mubr.msk.f32.gmra.mxu1 %vm70_vm1, %v3559_v5  ;;  %v3466_v5 = vld [vmem:[%s8269_s0 + $0x3a8] sm:$0xff] }
 0x103   :  { %8643 = vst [vmem:[#allocation17_spill] sm:$0xff] %v5351_v10  ;;  %8644 = vst [vmem:[#allocation18_spill] sm:$0xff] %v5353_v11  ;;  %4218 = vmatprep.mubr.msk.f32.mxu0 %vm4483_vm2, %v4482_v0  ;;  %4373 = vmatprep.mubr.msk.f32.mxu1 %vm4483_vm2, %v4482_v0 }
 0x104   :  { %v3910_v16 = vpop.f32.mrf.mxu0  ;;  %v4065_v17 = vpop.f32.mrf.mxu1 }
 0x105   :  { %v3467_v17 = vld [vmem:[%s8269_s0 + $0x3b0] sm:$0xff] }
 0x106   :  { %v5367_v18 = vpop.f32.mrf.mxu0  ;;  %v5369_v21 = vpop.f32.mrf.mxu1  ;;  %4219 = vmatmul.mubr.msk.f32.gmra.mxu0 %vm70_vm1, %v3461_v12  ;;  %4374 = vmatmul.mubr.msk.f32.gmra.mxu1 %vm70_vm1, %v3560_v15 }
 0x107   :  { %8645 = vst [vmem:[#allocation19_spill] sm:$0xff] %v5367_v18  ;;  %8646 = vst [vmem:[#allocation20_spill] sm:$0xff] %v5369_v21  ;;  %4221 = vmatprep.mubr.msk.f32.mxu0 %vm4483_vm2, %v4482_v0  ;;  %4376 = vmatprep.mubr.msk.f32.mxu1 %vm4483_vm2, %v4482_v0 }
 0x108   :  { %v3913_v24 = vpop.f32.mrf.mxu0  ;;  %v4068_v27 = vpop.f32.mrf.mxu1 }
 0x10a   :  { %v5383_v28 = vpop.f32.mrf.mxu0  ;;  %v5385_v29 = vpop.f32.mrf.mxu1  ;;  %4222 = vmatmul.mubr.msk.f32.gmra.mxu0 %vm70_vm1, %v3462_v22  ;;  %4377 = vmatmul.mubr.msk.f32.gmra.mxu1 %vm70_vm1, %v3561_v23  ;;  %v3566_v22 = vld [vmem:[%s8269_s0 + $0x538] sm:$0xff] }
 0x10b   :  { %8647 = vst [vmem:[#allocation21_spill] sm:$0xff] %v5383_v28  ;;  %8648 = vst [vmem:[#allocation22_spill] sm:$0xff] %v5385_v29  ;;  %4224 = vmatprep.mubr.msk.f32.mxu0 %vm4483_vm2, %v4482_v0  ;;  %4379 = vmatprep.mubr.msk.f32.mxu1 %vm4483_vm2, %v4482_v0 }
 0x10c   :  { %v3916_v34 = vpop.f32.mrf.mxu0  ;;  %v4071_v35 = vpop.f32.mrf.mxu1 }
 0x10d   :  { %v3567_v34 = vld [vmem:[%s8269_s0 + $0x540] sm:$0xff] }
 0x10e   :  { %v5399_v36 = vpop.f32.mrf.mxu0  ;;  %v5401_v39 = vpop.f32.mrf.mxu1  ;;  %4225 = vmatmul.mubr.msk.f32.gmra.mxu0 %vm70_vm1, %v3463_v30  ;;  %4380 = vmatmul.mubr.msk.f32.gmra.mxu1 %vm70_vm1, %v3562_v33  ;;  %v3468_v33 = vld [vmem:[%s8269_s0 + $0x3b8] sm:$0xff] }
 0x10f   :  { %8649 = vst [vmem:[#allocation23_spill] sm:$0xff] %v5399_v36  ;;  %8650 = vst [vmem:[#allocation24_spill] sm:$0xff] %v5401_v39  ;;  %4227 = vmatprep.mubr.msk.f32.mxu0 %vm4483_vm2, %v4482_v0  ;;  %4382 = vmatprep.mubr.msk.f32.mxu1 %vm4483_vm2, %v4482_v0 }
 0x110   :  { %v3919_v44 = vpop.f32.mrf.mxu0  ;;  %v4074_v49 = vpop.f32.mrf.mxu1 }
 0x111   :  { %v3469_v49 = vld [vmem:[%s8269_s0 + $0x3c0] sm:$0xff] }
 0x112   :  { %v5415_v50 = vpop.f32.mrf.mxu0  ;;  %v5417_v51 = vpop.f32.mrf.mxu1  ;;  %4228 = vmatmul.mubr.msk.f32.gmra.mxu0 %vm70_vm1, %v3464_v42  ;;  %4383 = vmatmul.mubr.msk.f32.gmra.mxu1 %vm70_vm1, %v3563_v43 }
 0x113   :  { %8651 = vst [vmem:[#allocation25_spill] sm:$0xff] %v5415_v50  ;;  %8652 = vst [vmem:[#allocation26_spill] sm:$0xff] %v5417_v51  ;;  %4230 = vmatprep.mubr.msk.f32.mxu0 %vm4483_vm2, %v4482_v0  ;;  %4385 = vmatprep.mubr.msk.f32.mxu1 %vm4483_vm2, %v4482_v0 }
 0x114   :  { %v3922_v60 = vpop.f32.mrf.mxu0  ;;  %v4077_v61 = vpop.f32.mrf.mxu1 }
 0x116   :  { %v5431_v62 = vpop.f32.mrf.mxu0  ;;  %v5433_v4 = vpop.f32.mrf.mxu1  ;;  %4231 = vmatmul.mubr.msk.f32.gmra.mxu0 %vm70_vm1, %v3465_v54  ;;  %4386 = vmatmul.mubr.msk.f32.gmra.mxu1 %vm70_vm1, %v3564_v57  ;;  %v3568_v54 = vld [vmem:[%s8269_s0 + $0x548] sm:$0xff] }
 0x117   :  { %8653 = vst [vmem:[#allocation27_spill] sm:$0xff] %v5431_v62  ;;  %8654 = vst [vmem:[#allocation28_spill] sm:$0xff] %v5433_v4  ;;  %4233 = vmatprep.mubr.msk.f32.mxu0 %vm4483_vm2, %v4482_v0  ;;  %4388 = vmatprep.mubr.msk.f32.mxu1 %vm4483_vm2, %v4482_v0 }
 0x118   :  { %v3925_v9 = vpop.f32.mrf.mxu0  ;;  %v4080_v12 = vpop.f32.mrf.mxu1 }
 0x119   :  { %v3569_v9 = vld [vmem:[%s8269_s0 + $0x550] sm:$0xff] }
 0x11a   :  { %v5447_v15 = vpop.f32.mrf.mxu0  ;;  %v5449_v16 = vpop.f32.mrf.mxu1  ;;  %4234 = vmatmul.mubr.msk.f32.gmra.mxu0 %vm70_vm1, %v3466_v5  ;;  %4389 = vmatmul.mubr.msk.f32.gmra.mxu1 %vm70_vm1, %v3565_v6  ;;  %v3470_v6 = vld [vmem:[%s8269_s0 + $0x3c8] sm:$0xff] }
 0x11b   :  { %8655 = vst [vmem:[#allocation29_spill] sm:$0xff] %v5447_v15  ;;  %8656 = vst [vmem:[#allocation30_spill] sm:$0xff] %v5449_v16  ;;  %4236 = vmatprep.mubr.msk.f32.mxu0 %vm4483_vm2, %v4482_v0  ;;  %4391 = vmatprep.mubr.msk.f32.mxu1 %vm4483_vm2, %v4482_v0 }
 0x11c   :  { %v3928_v23 = vpop.f32.mrf.mxu0  ;;  %v4083_v24 = vpop.f32.mrf.mxu1 }
 0x11d   :  { %v3471_v24 = vld [vmem:[%s8269_s0 + $0x3d0] sm:$0xff] }
 0x11e   :  { %v5463_v27 = vpop.f32.mrf.mxu0  ;;  %v5465_v30 = vpop.f32.mrf.mxu1  ;;  %4237 = vmatmul.mubr.msk.f32.gmra.mxu0 %vm70_vm1, %v3467_v17  ;;  %4392 = vmatmul.mubr.msk.f32.gmra.mxu1 %vm70_vm1, %v3566_v22 }
 0x11f   :  { %8657 = vst [vmem:[#allocation31_spill] sm:$0xff] %v5463_v27  ;;  %8658 = vst [vmem:[#allocation32_spill] sm:$0xff] %v5465_v30  ;;  %4239 = vmatprep.mubr.msk.f32.mxu0 %vm4483_vm2, %v4482_v0  ;;  %4394 = vmatprep.mubr.msk.f32.mxu1 %vm4483_vm2, %v4482_v0 }
 0x120   :  { %v3931_v35 = vpop.f32.mrf.mxu0  ;;  %v4086_v42 = vpop.f32.mrf.mxu1 }
 0x122   :  { %v5479_v43 = vpop.f32.mrf.mxu0  ;;  %v5481_v44 = vpop.f32.mrf.mxu1  ;;  %4240 = vmatmul.mubr.msk.f32.gmra.mxu0 %vm70_vm1, %v3468_v33  ;;  %4395 = vmatmul.mubr.msk.f32.gmra.mxu1 %vm70_vm1, %v3567_v34  ;;  %v3570_v33 = vld [vmem:[%s8269_s0 + $0x558] sm:$0xff] }
 0x123   :  { %8659 = vst [vmem:[#allocation33_spill] sm:$0xff] %v5479_v43  ;;  %8660 = vst [vmem:[#allocation34_spill] sm:$0xff] %v5481_v44  ;;  %4242 = vmatprep.mubr.msk.f32.mxu0 %vm4483_vm2, %v4482_v0  ;;  %4397 = vmatprep.mubr.msk.f32.mxu1 %vm4483_vm2, %v4482_v0 }
 0x124   :  { %v3934_v57 = vpop.f32.mrf.mxu0  ;;  %v4089_v60 = vpop.f32.mrf.mxu1 }
 0x125   :  { %v3571_v57 = vld [vmem:[%s8269_s0 + $0x560] sm:$0xff] }
 0x126   :  { %v5495_v61 = vpop.f32.mrf.mxu0  ;;  %v5497_v5 = vpop.f32.mrf.mxu1  ;;  %4243 = vmatmul.mubr.msk.f32.gmra.mxu0 %vm70_vm1, %v3469_v49  ;;  %4398 = vmatmul.mubr.msk.f32.gmra.mxu1 %vm70_vm1, %v3568_v54  ;;  %v3472_v54 = vld [vmem:[%s8269_s0 + $0x3d8] sm:$0xff] }
 0x127   :  { %8661 = vst [vmem:[#allocation35_spill] sm:$0xff] %v5495_v61  ;;  %8662 = vst [vmem:[#allocation36_spill] sm:$0xff] %v5497_v5  ;;  %4245 = vmatprep.mubr.msk.f32.mxu0 %vm4483_vm2, %v4482_v0  ;;  %4400 = vmatprep.mubr.msk.f32.mxu1 %vm4483_vm2, %v4482_v0 }
 0x128   :  { %v3937_v12 = vpop.f32.mrf.mxu0  ;;  %v4092_v17 = vpop.f32.mrf.mxu1 }
 0x129   :  { %v3473_v17 = vld [vmem:[%s8269_s0 + $0x3e0] sm:$0xff] }
 0x12a   :  { %v5511_v22 = vpop.f32.mrf.mxu0  ;;  %v5513_v23 = vpop.f32.mrf.mxu1  ;;  %4246 = vmatmul.mubr.msk.f32.gmra.mxu0 %vm70_vm1, %v3470_v6  ;;  %4401 = vmatmul.mubr.msk.f32.gmra.mxu1 %vm70_vm1, %v3569_v9 }
 0x12b   :  { %8663 = vst [vmem:[#allocation37_spill] sm:$0xff] %v5511_v22  ;;  %8664 = vst [vmem:[#allocation38_spill] sm:$0xff] %v5513_v23  ;;  %4248 = vmatprep.mubr.msk.f32.mxu0 %vm4483_vm2, %v4482_v0  ;;  %4403 = vmatprep.mubr.msk.f32.mxu1 %vm4483_vm2, %v4482_v0 }
 0x12c   :  { %v3940_v34 = vpop.f32.mrf.mxu0  ;;  %v4095_v35 = vpop.f32.mrf.mxu1 }
 0x12e   :  { %v5527_v42 = vpop.f32.mrf.mxu0  ;;  %v5529_v49 = vpop.f32.mrf.mxu1  ;;  %4249 = vmatmul.mubr.msk.f32.gmra.mxu0 %vm70_vm1, %v3471_v24  ;;  %4404 = vmatmul.mubr.msk.f32.gmra.mxu1 %vm70_vm1, %v3570_v33  ;;  %v3572_v24 = vld [vmem:[%s8269_s0 + $0x568] sm:$0xff] }
 0x12f   :  { %8665 = vst [vmem:[#allocation39_spill] sm:$0xff] %v5527_v42  ;;  %8666 = vst [vmem:[#allocation40_spill] sm:$0xff] %v5529_v49  ;;  %4251 = vmatprep.mubr.msk.f32.mxu0 %vm4483_vm2, %v4482_v0  ;;  %4406 = vmatprep.mubr.msk.f32.mxu1 %vm4483_vm2, %v4482_v0 }
 0x130   :  { %v3943_v60 = vpop.f32.mrf.mxu0  ;;  %v4098_v6 = vpop.f32.mrf.mxu1 }
 0x131   :  { %v3573_v60 = vld [vmem:[%s8269_s0 + $0x570] sm:$0xff] }
 0x132   :  { %v5543_v9 = vpop.f32.mrf.mxu0  ;;  %v5545_v12 = vpop.f32.mrf.mxu1  ;;  %4252 = vmatmul.mubr.msk.f32.gmra.mxu0 %vm70_vm1, %v3472_v54  ;;  %4407 = vmatmul.mubr.msk.f32.gmra.mxu1 %vm70_vm1, %v3571_v57  ;;  %v3474_v57 = vld [vmem:[%s8269_s0 + $0x3e8] sm:$0xff] }
 0x133   :  { %8667 = vst [vmem:[#allocation41_spill] sm:$0xff] %v5543_v9  ;;  %8668 = vst [vmem:[#allocation42_spill] sm:$0xff] %v5545_v12  ;;  %4254 = vmatprep.mubr.msk.f32.mxu0 %vm4483_vm2, %v4482_v0  ;;  %4409 = vmatprep.mubr.msk.f32.mxu1 %vm4483_vm2, %v4482_v0 }
 0x134   :  { %v3946_v33 = vpop.f32.mrf.mxu0  ;;  %v4101_v34 = vpop.f32.mrf.mxu1 }
 0x136   :  { %v5559_v35 = vpop.f32.mrf.mxu0  ;;  %v5561_v54 = vpop.f32.mrf.mxu1  ;;  %4255 = vmatmul.mubr.msk.f32.gmra.mxu0 %vm70_vm1, %v3473_v17  ;;  %4410 = vmatmul.mubr.msk.f32.gmra.mxu1 %vm70_vm1, %v3572_v24  ;;  %v3475_v24 = vld [vmem:[%s8269_s0 + $0x3f0] sm:$0xff] }
 0x137   :  { %8669 = vst [vmem:[#allocation43_spill] sm:$0xff] %v5559_v35  ;;  %8670 = vst [vmem:[#allocation44_spill] sm:$0xff] %v5561_v54  ;;  %4257 = vmatprep.mubr.msk.f32.mxu0 %vm4483_vm2, %v4482_v0  ;;  %4412 = vmatprep.mubr.msk.f32.mxu1 %vm4483_vm2, %v4482_v0 }
 0x138   :  { %v3949_v6 = vpop.f32.mrf.mxu0  ;;  %v4104_v33 = vpop.f32.mrf.mxu1 }
 0x139   :  { %v3574_v6 = vld [vmem:[%s8269_s0 + $0x578] sm:$0xff] }
 0x13a   :  { %v5575_v34 = vpop.f32.mrf.mxu0  ;;  %v5577_v17 = vpop.f32.mrf.mxu1  ;;  %4258 = vmatmul.mubr.msk.f32.gmra.mxu0 %vm70_vm1, %v3474_v57  ;;  %4413 = vmatmul.mubr.msk.f32.gmra.mxu1 %vm70_vm1, %v3573_v60  ;;  %v3476_v60 = vld [vmem:[%s8269_s0 + $0x3f8] sm:$0xff] }
 0x13b   :  { %8671 = vst [vmem:[#allocation45_spill] sm:$0xff] %v5575_v34  ;;  %8672 = vst [vmem:[#allocation46_spill] sm:$0xff] %v5577_v17  ;;  %4260 = vmatprep.mubr.msk.f32.mxu0 %vm4483_vm2, %v4482_v0  ;;  %4415 = vmatprep.mubr.msk.f32.mxu1 %vm4483_vm2, %v4482_v0 }
 0x13c   :  { %v3952_v33 = vpop.f32.mrf.mxu0  ;;  %v4107_v17 = vpop.f32.mrf.mxu1 }
 0x13d   :  { %v3575_v17 = vld [vmem:[%s8269_s0 + $0x580] sm:$0xff] }
 0x13e   :  { %v5591_v34 = vpop.f32.mrf.mxu0  ;;  %v5593_v57 = vpop.f32.mrf.mxu1  ;;  %4261 = vmatmul.mubr.msk.f32.gmra.mxu0 %vm70_vm1, %v3475_v24  ;;  %4416 = vmatmul.mubr.msk.f32.gmra.mxu1 %vm70_vm1, %v3574_v6  ;;  %v3477_v6 = vld [vmem:[%s8269_s0 + $0x400] sm:$0xff] }
 0x13f   :  { %8673 = vst [vmem:[#allocation47_spill] sm:$0xff] %v5591_v34  ;;  %8674 = vst [vmem:[#allocation48_spill] sm:$0xff] %v5593_v57  ;;  %4263 = vmatprep.mubr.msk.f32.mxu0 %vm4483_vm2, %v4482_v0  ;;  %4418 = vmatprep.mubr.msk.f32.mxu1 %vm4483_vm2, %v4482_v0 }
 0x140   :  { %v3955_v33 = vpop.f32.mrf.mxu0  ;;  %v4110_v57 = vpop.f32.mrf.mxu1 }
 0x141   :  { %v3576_v57 = vld [vmem:[%s8269_s0 + $0x588] sm:$0xff] }
 0x142   :  { %v5607_v34 = vpop.f32.mrf.mxu0  ;;  %v5609_v24 = vpop.f32.mrf.mxu1  ;;  %4264 = vmatmul.mubr.msk.f32.gmra.mxu0 %vm70_vm1, %v3476_v60  ;;  %4419 = vmatmul.mubr.msk.f32.gmra.mxu1 %vm70_vm1, %v3575_v17  ;;  %v3478_v17 = vld [vmem:[%s8269_s0 + $0x408] sm:$0xff] }
 0x143   :  { %8675 = vst [vmem:[#allocation49_spill] sm:$0xff] %v5607_v34  ;;  %8676 = vst [vmem:[#allocation50_spill] sm:$0xff] %v5609_v24  ;;  %4266 = vmatprep.mubr.msk.f32.mxu0 %vm4483_vm2, %v4482_v0  ;;  %4421 = vmatprep.mubr.msk.f32.mxu1 %vm4483_vm2, %v4482_v0 }
 0x144   :  { %v3958_v33 = vpop.f32.mrf.mxu0  ;;  %v4113_v24 = vpop.f32.mrf.mxu1 }
 0x145   :  { %v3577_v24 = vld [vmem:[%s8269_s0 + $0x590] sm:$0xff] }
 0x146   :  { %v5623_v34 = vpop.f32.mrf.mxu0  ;;  %v5625_v60 = vpop.f32.mrf.mxu1  ;;  %4267 = vmatmul.mubr.msk.f32.gmra.mxu0 %vm70_vm1, %v3477_v6  ;;  %4422 = vmatmul.mubr.msk.f32.gmra.mxu1 %vm70_vm1, %v3576_v57  ;;  %v3479_v57 = vld [vmem:[%s8269_s0 + $0x410] sm:$0xff] }
 0x147   :  { %8677 = vst [vmem:[#allocation51_spill] sm:$0xff] %v5623_v34  ;;  %8678 = vst [vmem:[#allocation52_spill] sm:$0xff] %v5625_v60  ;;  %4269 = vmatprep.mubr.msk.f32.mxu0 %vm4483_vm2, %v4482_v0  ;;  %4424 = vmatprep.mubr.msk.f32.mxu1 %vm4483_vm2, %v4482_v0 }
 0x148   :  { %v3961_v33 = vpop.f32.mrf.mxu0  ;;  %v4116_v60 = vpop.f32.mrf.mxu1 }
 0x149   :  { %v3578_v60 = vld [vmem:[%s8269_s0 + $0x598] sm:$0xff] }
 0x14a   :  { %v5639_v34 = vpop.f32.mrf.mxu0  ;;  %v5641_v6 = vpop.f32.mrf.mxu1  ;;  %4270 = vmatmul.mubr.msk.f32.gmra.mxu0 %vm70_vm1, %v3478_v17  ;;  %4425 = vmatmul.mubr.msk.f32.gmra.mxu1 %vm70_vm1, %v3577_v24  ;;  %v3480_v24 = vld [vmem:[%s8269_s0 + $0x418] sm:$0xff] }
 0x14b   :  { %8679 = vst [vmem:[#allocation53_spill] sm:$0xff] %v5639_v34  ;;  %8680 = vst [vmem:[#allocation54_spill] sm:$0xff] %v5641_v6  ;;  %4272 = vmatprep.mubr.msk.f32.mxu0 %vm4483_vm2, %v4482_v0  ;;  %4427 = vmatprep.mubr.msk.f32.mxu1 %vm4483_vm2, %v4482_v0 }
 0x14c   :  { %v3964_v33 = vpop.f32.mrf.mxu0  ;;  %v4119_v6 = vpop.f32.mrf.mxu1 }
 0x14d   :  { %v3579_v6 = vld [vmem:[%s8269_s0 + $0x5a0] sm:$0xff] }
 0x14e   :  { %v5655_v34 = vpop.f32.mrf.mxu0  ;;  %v5657_v17 = vpop.f32.mrf.mxu1  ;;  %4273 = vmatmul.mubr.msk.f32.gmra.mxu0 %vm70_vm1, %v3479_v57  ;;  %4428 = vmatmul.mubr.msk.f32.gmra.mxu1 %vm70_vm1, %v3578_v60  ;;  %v3481_v60 = vld [vmem:[%s8269_s0 + $0x420] sm:$0xff] }
 0x14f   :  { %8681 = vst [vmem:[#allocation55_spill] sm:$0xff] %v5655_v34  ;;  %8682 = vst [vmem:[#allocation56_spill] sm:$0xff] %v5657_v17  ;;  %4275 = vmatprep.mubr.msk.f32.mxu0 %vm4483_vm2, %v4482_v0  ;;  %4430 = vmatprep.mubr.msk.f32.mxu1 %vm4483_vm2, %v4482_v0 }
 0x150   :  { %v3967_v33 = vpop.f32.mrf.mxu0  ;;  %v4122_v17 = vpop.f32.mrf.mxu1 }
 0x151   :  { %v3580_v17 = vld [vmem:[%s8269_s0 + $0x5a8] sm:$0xff] }
 0x152   :  { %v5671_v34 = vpop.f32.mrf.mxu0  ;;  %v5673_v57 = vpop.f32.mrf.mxu1  ;;  %4276 = vmatmul.mubr.msk.f32.gmra.mxu0 %vm70_vm1, %v3480_v24  ;;  %4431 = vmatmul.mubr.msk.f32.gmra.mxu1 %vm70_vm1, %v3579_v6  ;;  %v3482_v6 = vld [vmem:[%s8269_s0 + $0x428] sm:$0xff] }
 0x153   :  { %8683 = vst [vmem:[#allocation57_spill] sm:$0xff] %v5671_v34  ;;  %8684 = vst [vmem:[#allocation58_spill] sm:$0xff] %v5673_v57  ;;  %4278 = vmatprep.mubr.msk.f32.mxu0 %vm4483_vm2, %v4482_v0  ;;  %4433 = vmatprep.mubr.msk.f32.mxu1 %vm4483_vm2, %v4482_v0 }
 0x154   :  { %v3970_v33 = vpop.f32.mrf.mxu0  ;;  %v4125_v57 = vpop.f32.mrf.mxu1 }
 0x155   :  { %v3581_v57 = vld [vmem:[%s8269_s0 + $0x5b0] sm:$0xff] }
 0x156   :  { %v5687_v34 = vpop.f32.mrf.mxu0  ;;  %v5689_v24 = vpop.f32.mrf.mxu1  ;;  %4279 = vmatmul.mubr.msk.f32.gmra.mxu0 %vm70_vm1, %v3481_v60  ;;  %4434 = vmatmul.mubr.msk.f32.gmra.mxu1 %vm70_vm1, %v3580_v17  ;;  %v3483_v17 = vld [vmem:[%s8269_s0 + $0x430] sm:$0xff] }
 0x157   :  { %8685 = vst [vmem:[#allocation59_spill] sm:$0xff] %v5687_v34  ;;  %8686 = vst [vmem:[#allocation60_spill] sm:$0xff] %v5689_v24  ;;  %4281 = vmatprep.mubr.msk.f32.mxu0 %vm4483_vm2, %v4482_v0  ;;  %4436 = vmatprep.mubr.msk.f32.mxu1 %vm4483_vm2, %v4482_v0 }
 0x158   :  { %v3973_v33 = vpop.f32.mrf.mxu0  ;;  %v4128_v24 = vpop.f32.mrf.mxu1 }
 0x159   :  { %v3582_v24 = vld [vmem:[%s8269_s0 + $0x5b8] sm:$0xff] }
 0x15a   :  { %v5703_v34 = vpop.f32.mrf.mxu0  ;;  %v5705_v60 = vpop.f32.mrf.mxu1  ;;  %4282 = vmatmul.mubr.msk.f32.gmra.mxu0 %vm70_vm1, %v3482_v6  ;;  %4437 = vmatmul.mubr.msk.f32.gmra.mxu1 %vm70_vm1, %v3581_v57  ;;  %v3484_v57 = vld [vmem:[%s8269_s0 + $0x438] sm:$0xff] }
 0x15b   :  { %8687 = vst [vmem:[#allocation61_spill] sm:$0xff] %v5703_v34  ;;  %8688 = vst [vmem:[#allocation62_spill] sm:$0xff] %v5705_v60  ;;  %4284 = vmatprep.mubr.msk.f32.mxu0 %vm4483_vm2, %v4482_v0  ;;  %4439 = vmatprep.mubr.msk.f32.mxu1 %vm4483_vm2, %v4482_v0 }
 0x15c   :  { %v3976_v33 = vpop.f32.mrf.mxu0  ;;  %v4131_v60 = vpop.f32.mrf.mxu1 }
 0x15d   :  { %v3583_v60 = vld [vmem:[%s8269_s0 + $0x5c0] sm:$0xff] }
 0x15e   :  { %v5719_v34 = vpop.f32.mrf.mxu0  ;;  %v5721_v6 = vpop.f32.mrf.mxu1  ;;  %4285 = vmatmul.mubr.msk.f32.gmra.mxu0 %vm70_vm1, %v3483_v17  ;;  %4440 = vmatmul.mubr.msk.f32.gmra.mxu1 %vm70_vm1, %v3582_v24  ;;  %v3485_v24 = vld [vmem:[%s8269_s0 + $0x440] sm:$0xff] }
 0x15f   :  { %8689 = vst [vmem:[#allocation63_spill] sm:$0xff] %v5719_v34  ;;  %8690 = vst [vmem:[#allocation64_spill] sm:$0xff] %v5721_v6  ;;  %4287 = vmatprep.mubr.msk.f32.mxu0 %vm4483_vm2, %v4482_v0  ;;  %4442 = vmatprep.mubr.msk.f32.mxu1 %vm4483_vm2, %v4482_v0 }
 0x160   :  { %v3979_v33 = vpop.f32.mrf.mxu0  ;;  %v4134_v6 = vpop.f32.mrf.mxu1 }
 0x161   :  { %v3584_v6 = vld [vmem:[%s8269_s0 + $0x5c8] sm:$0xff] }
 0x162   :  { %v5735_v34 = vpop.f32.mrf.mxu0  ;;  %v5737_v17 = vpop.f32.mrf.mxu1  ;;  %4288 = vmatmul.mubr.msk.f32.gmra.mxu0 %vm70_vm1, %v3484_v57  ;;  %4443 = vmatmul.mubr.msk.f32.gmra.mxu1 %vm70_vm1, %v3583_v60  ;;  %v3486_v60 = vld [vmem:[%s8269_s0 + $0x448] sm:$0xff] }
 0x163   :  { %8691 = vst [vmem:[#allocation65_spill] sm:$0xff] %v5735_v34  ;;  %8692 = vst [vmem:[#allocation66_spill] sm:$0xff] %v5737_v17  ;;  %4290 = vmatprep.mubr.msk.f32.mxu0 %vm4483_vm2, %v4482_v0  ;;  %4445 = vmatprep.mubr.msk.f32.mxu1 %vm4483_vm2, %v4482_v0 }
 0x164   :  { %v3982_v33 = vpop.f32.mrf.mxu0  ;;  %v4137_v17 = vpop.f32.mrf.mxu1 }
 0x165   :  { %v3585_v17 = vld [vmem:[%s8269_s0 + $0x5d0] sm:$0xff] }
 0x166   :  { %v5751_v34 = vpop.f32.mrf.mxu0  ;;  %v5753_v57 = vpop.f32.mrf.mxu1  ;;  %4291 = vmatmul.mubr.msk.f32.gmra.mxu0 %vm70_vm1, %v3485_v24  ;;  %4446 = vmatmul.mubr.msk.f32.gmra.mxu1 %vm70_vm1, %v3584_v6  ;;  %v3487_v6 = vld [vmem:[%s8269_s0 + $0x450] sm:$0xff] }
 0x167   :  { %8693 = vst [vmem:[#allocation67_spill] sm:$0xff] %v5751_v34  ;;  %8694 = vst [vmem:[#allocation68_spill] sm:$0xff] %v5753_v57  ;;  %4293 = vmatprep.mubr.msk.f32.mxu0 %vm4483_vm2, %v4482_v0  ;;  %4448 = vmatprep.mubr.msk.f32.mxu1 %vm4483_vm2, %v4482_v0 }
 0x168   :  { %v3985_v33 = vpop.f32.mrf.mxu0  ;;  %v4140_v57 = vpop.f32.mrf.mxu1 }
 0x169   :  { %v3586_v57 = vld [vmem:[%s8269_s0 + $0x5d8] sm:$0xff] }
 0x16a   :  { %v5767_v34 = vpop.f32.mrf.mxu0  ;;  %v5769_v24 = vpop.f32.mrf.mxu1  ;;  %4294 = vmatmul.mubr.msk.f32.gmra.mxu0 %vm70_vm1, %v3486_v60  ;;  %4449 = vmatmul.mubr.msk.f32.gmra.mxu1 %vm70_vm1, %v3585_v17  ;;  %v3488_v17 = vld [vmem:[%s8269_s0 + $0x458] sm:$0xff] }
 0x16b   :  { %8695 = vst [vmem:[#allocation69_spill] sm:$0xff] %v5767_v34  ;;  %8696 = vst [vmem:[#allocation70_spill] sm:$0xff] %v5769_v24  ;;  %4296 = vmatprep.mubr.msk.f32.mxu0 %vm4483_vm2, %v4482_v0  ;;  %4451 = vmatprep.mubr.msk.f32.mxu1 %vm4483_vm2, %v4482_v0 }
 0x16c   :  { %v3988_v33 = vpop.f32.mrf.mxu0  ;;  %v4143_v24 = vpop.f32.mrf.mxu1 }
 0x16d   :  { %v3587_v24 = vld [vmem:[%s8269_s0 + $0x5e0] sm:$0xff] }
 0x16e   :  { %v5783_v34 = vpop.f32.mrf.mxu0  ;;  %v5785_v60 = vpop.f32.mrf.mxu1  ;;  %4297 = vmatmul.mubr.msk.f32.gmra.mxu0 %vm70_vm1, %v3487_v6  ;;  %4452 = vmatmul.mubr.msk.f32.gmra.mxu1 %vm70_vm1, %v3586_v57  ;;  %v3489_v57 = vld [vmem:[%s8269_s0 + $0x460] sm:$0xff] }
 0x16f   :  { %8697 = vst [vmem:[#allocation71_spill] sm:$0xff] %v5783_v34  ;;  %8698 = vst [vmem:[#allocation72_spill] sm:$0xff] %v5785_v60  ;;  %4299 = vmatprep.mubr.msk.f32.mxu0 %vm4483_vm2, %v4482_v0  ;;  %4454 = vmatprep.mubr.msk.f32.mxu1 %vm4483_vm2, %v4482_v0 }
 0x170   :  { %v3991_v33 = vpop.f32.mrf.mxu0  ;;  %v4146_v60 = vpop.f32.mrf.mxu1 }
 0x171   :  { %v3588_v60 = vld [vmem:[%s8269_s0 + $0x5e8] sm:$0xff] }
 0x172   :  { %v5799_v34 = vpop.f32.mrf.mxu0  ;;  %v5801_v6 = vpop.f32.mrf.mxu1  ;;  %4300 = vmatmul.mubr.msk.f32.gmra.mxu0 %vm70_vm1, %v3488_v17  ;;  %4455 = vmatmul.mubr.msk.f32.gmra.mxu1 %vm70_vm1, %v3587_v24  ;;  %v3490_v24 = vld [vmem:[%s8269_s0 + $0x468] sm:$0xff] }
 0x173   :  { %8699 = vst [vmem:[#allocation73_spill] sm:$0xff] %v5799_v34  ;;  %8700 = vst [vmem:[#allocation74_spill] sm:$0xff] %v5801_v6  ;;  %4302 = vmatprep.mubr.msk.f32.mxu0 %vm4483_vm2, %v4482_v0  ;;  %4457 = vmatprep.mubr.msk.f32.mxu1 %vm4483_vm2, %v4482_v0 }
 0x174   :  { %v3994_v33 = vpop.f32.mrf.mxu0  ;;  %v4149_v6 = vpop.f32.mrf.mxu1 }
 0x175   :  { %v3589_v6 = vld [vmem:[%s8269_s0 + $0x5f0] sm:$0xff] }
 0x176   :  { %v5815_v34 = vpop.f32.mrf.mxu0  ;;  %v5817_v17 = vpop.f32.mrf.mxu1  ;;  %4303 = vmatmul.mubr.msk.f32.gmra.mxu0 %vm70_vm1, %v3489_v57  ;;  %4458 = vmatmul.mubr.msk.f32.gmra.mxu1 %vm70_vm1, %v3588_v60  ;;  %v3491_v60 = vld [vmem:[%s8269_s0 + $0x470] sm:$0xff] }
 0x177   :  { %8701 = vst [vmem:[#allocation75_spill] sm:$0xff] %v5815_v34  ;;  %8702 = vst [vmem:[#allocation76_spill] sm:$0xff] %v5817_v17  ;;  %4305 = vmatprep.mubr.msk.f32.mxu0 %vm4483_vm2, %v4482_v0  ;;  %4460 = vmatprep.mubr.msk.f32.mxu1 %vm4483_vm2, %v4482_v0 }
 0x178   :  { %v3997_v33 = vpop.f32.mrf.mxu0  ;;  %v4152_v17 = vpop.f32.mrf.mxu1 }
 0x179   :  { %v3590_v17 = vld [vmem:[%s8269_s0 + $0x5f8] sm:$0xff] }
 0x17a   :  { %v5831_v34 = vpop.f32.mrf.mxu0  ;;  %v5833_v57 = vpop.f32.mrf.mxu1  ;;  %4306 = vmatmul.mubr.msk.f32.gmra.mxu0 %vm70_vm1, %v3490_v24  ;;  %4461 = vmatmul.mubr.msk.f32.gmra.mxu1 %vm70_vm1, %v3589_v6  ;;  %v3492_v6 = vld [vmem:[%s8269_s0 + $0x478] sm:$0xff] }
 0x17b   :  { %8703 = vst [vmem:[#allocation77_spill] sm:$0xff] %v5831_v34  ;;  %8704 = vst [vmem:[#allocation78_spill] sm:$0xff] %v5833_v57  ;;  %4308 = vmatprep.mubr.msk.f32.mxu0 %vm4483_vm2, %v4482_v0  ;;  %4463 = vmatprep.mubr.msk.f32.mxu1 %vm4483_vm2, %v4482_v0 }
 0x17c   :  { %v4000_v33 = vpop.f32.mrf.mxu0  ;;  %v4155_v57 = vpop.f32.mrf.mxu1 }
 0x17d   :  { %v3591_v57 = vld [vmem:[%s8269_s0 + $0x600] sm:$0xff] }
 0x17e   :  { %v5847_v34 = vpop.f32.mrf.mxu0  ;;  %v5849_v24 = vpop.f32.mrf.mxu1  ;;  %4309 = vmatmul.mubr.msk.f32.gmra.mxu0 %vm70_vm1, %v3491_v60  ;;  %4464 = vmatmul.mubr.msk.f32.gmra.mxu1 %vm70_vm1, %v3590_v17  ;;  %v3493_v17 = vld [vmem:[%s8269_s0 + $0x480] sm:$0xff] }
 0x17f   :  { %8705 = vst [vmem:[#allocation79_spill] sm:$0xff] %v5847_v34  ;;  %8706 = vst [vmem:[#allocation80_spill] sm:$0xff] %v5849_v24  ;;  %4311 = vmatprep.mubr.msk.f32.mxu0 %vm4483_vm2, %v4482_v0  ;;  %4466 = vmatprep.mubr.msk.f32.mxu1 %vm4483_vm2, %v4482_v0 }
 0x180   :  { %v4003_v33 = vpop.f32.mrf.mxu0  ;;  %v4158_v24 = vpop.f32.mrf.mxu1 }
 0x181   :  { %v3592_v24 = vld [vmem:[%s8269_s0 + $0x608] sm:$0xff] }
 0x182   :  { %v5863_v34 = vpop.f32.mrf.mxu0  ;;  %v5865_v60 = vpop.f32.mrf.mxu1  ;;  %4312 = vmatmul.mubr.msk.f32.gmra.mxu0 %vm70_vm1, %v3492_v6  ;;  %4467 = vmatmul.mubr.msk.f32.gmra.mxu1 %vm70_vm1, %v3591_v57  ;;  %v3494_v57 = vld [vmem:[%s8269_s0 + $0x488] sm:$0xff] }
 0x183   :  { %8707 = vst [vmem:[#allocation81_spill] sm:$0xff] %v5863_v34  ;;  %8708 = vst [vmem:[#allocation82_spill] sm:$0xff] %v5865_v60  ;;  %4314 = vmatprep.mubr.msk.f32.mxu0 %vm4483_vm2, %v4482_v0  ;;  %4469 = vmatprep.mubr.msk.f32.mxu1 %vm4483_vm2, %v4482_v0 }
 0x184   :  { %v4006_v33 = vpop.f32.mrf.mxu0  ;;  %v4161_v60 = vpop.f32.mrf.mxu1 }
 0x185   :  { %v3593_v60 = vld [vmem:[%s8269_s0 + $0x610] sm:$0xff] }
 0x186   :  { %v5879_v34 = vpop.f32.mrf.mxu0  ;;  %v5881_v6 = vpop.f32.mrf.mxu1  ;;  %4315 = vmatmul.mubr.msk.f32.gmra.mxu0 %vm70_vm1, %v3493_v17  ;;  %4470 = vmatmul.mubr.msk.f32.gmra.mxu1 %vm70_vm1, %v3592_v24  ;;  %v3495_v24 = vld [vmem:[%s8269_s0 + $0x490] sm:$0xff] }
 0x187   :  { %8709 = vst [vmem:[#allocation83_spill] sm:$0xff] %v5879_v34  ;;  %8710 = vst [vmem:[#allocation84_spill] sm:$0xff] %v5881_v6  ;;  %4317 = vmatprep.mubr.msk.f32.mxu0 %vm4483_vm2, %v4482_v0  ;;  %4472 = vmatprep.mubr.msk.f32.mxu1 %vm4483_vm2, %v4482_v0 }
 0x188   :  { %v4009_v33 = vpop.f32.mrf.mxu0  ;;  %v4164_v6 = vpop.f32.mrf.mxu1 }
 0x189   :  { %v3594_v6 = vld [vmem:[%s8269_s0 + $0x618] sm:$0xff] }
 0x18a   :  { %v5895_v34 = vpop.f32.mrf.mxu0  ;;  %v5897_v17 = vpop.f32.mrf.mxu1  ;;  %4318 = vmatmul.mubr.msk.f32.gmra.mxu0 %vm70_vm1, %v3494_v57  ;;  %4473 = vmatmul.mubr.msk.f32.gmra.mxu1 %vm70_vm1, %v3593_v60 }
 0x18b   :  { %8711 = vst [vmem:[#allocation85_spill] sm:$0xff] %v5895_v34  ;;  %8712 = vst [vmem:[#allocation86_spill] sm:$0xff] %v5897_v17  ;;  %4320 = vmatprep.mubr.msk.f32.mxu0 %vm4483_vm2, %v4482_v0  ;;  %4475 = vmatprep.mubr.msk.f32.mxu1 %vm4483_vm2, %v4482_v0 }
 0x18c   :  { %v4012_v33 = vpop.f32.mrf.mxu0  ;;  %v4167_v17 = vpop.f32.mrf.mxu1 }
 0x18e   :  { %v5911_v34 = vpop.f32.mrf.mxu0  ;;  %4321 = vmatmul.mubr.msk.f32.gmra.mxu0 %vm70_vm1, %v3495_v24  ;;  %v5914_v57 = vpop.f32.mrf.mxu1  ;;  %4476 = vmatmul.mubr.msk.f32.gmra.mxu1 %vm70_vm1, %v3594_v6 }
 0x18f   :  { %8713 = vst [vmem:[#allocation87_spill] sm:$0xff] %v5911_v34  ;;  %8714 = vst [vmem:[#allocation88_spill] sm:$0xff] %v5914_v57 }
 0x190   :  { %v4178_v60 = vpop.f32.mrf.mxu0  ;;  %v4333_v0 = vpop.f32.mrf.mxu1 }
 0x192   :  { %v5917_v54 = vpop.f32.mrf.mxu0  ;;  %v5919_v35 = vpop.f32.mrf.mxu1 }
 0x193   :  { %8715 = vst [vmem:[#allocation89_spill] sm:$0xff] %v5917_v54  ;;  %8716 = vst [vmem:[#allocation90_spill] sm:$0xff] %v5919_v35 }
 0x194   :  { %v4181_v12 = vpop.f32.mrf.mxu0  ;;  %v4336_v9 = vpop.f32.mrf.mxu1 }
 0x196   :  { %v5921_v49 = vpop.f32.mrf.mxu0  ;;  %v5923_v33 = vpop.f32.mrf.mxu1 }
 0x197   :  { %8717 = vst [vmem:[#allocation91_spill] sm:$0xff] %v5921_v49  ;;  %8718 = vst [vmem:[#allocation92_spill] sm:$0xff] %v5923_v33 }
 0x198   :  { %v4184_v17 = vpop.f32.mrf.mxu0  ;;  %v4339_v42 = vpop.f32.mrf.mxu1 }
 0x19a   :  { %v5925_v23 = vpop.f32.mrf.mxu0  ;;  %v5927_v24 = vpop.f32.mrf.mxu1 }
 0x19b   :  { %8719 = vst [vmem:[#allocation93_spill] sm:$0xff] %v5925_v23  ;;  %8720 = vst [vmem:[#allocation94_spill] sm:$0xff] %v5927_v24 }
 0x19c   :  { %v4187_v22 = vpop.f32.mrf.mxu0  ;;  %v4342_v6 = vpop.f32.mrf.mxu1 }
 0x19e   :  { %v5929_v60 = vpop.f32.mrf.mxu0  ;;  %v5931_v0 = vpop.f32.mrf.mxu1 }
 0x19f   :  { %8721 = vst [vmem:[#allocation95_spill] sm:$0xff] %v5929_v60  ;;  %8722 = vst [vmem:[#allocation96_spill] sm:$0xff] %v5931_v0 }
 0x1a0   :  { %v4190_v5 = vpop.f32.mrf.mxu0  ;;  %v4345_v61 = vpop.f32.mrf.mxu1 }
 0x1a2   :  { %v5933_v12 = vpop.f32.mrf.mxu0  ;;  %v5935_v9 = vpop.f32.mrf.mxu1 }
 0x1a3   :  { %8723 = vst [vmem:[#allocation97_spill] sm:$0xff] %v5933_v12  ;;  %8724 = vst [vmem:[#allocation98_spill] sm:$0xff] %v5935_v9 }
 0x1a4   :  { %v4193_v44 = vpop.f32.mrf.mxu0  ;;  %v4348_v43 = vpop.f32.mrf.mxu1 }
 0x1a6   :  { %v5937_v17 = vpop.f32.mrf.mxu0  ;;  %v5939_v42 = vpop.f32.mrf.mxu1 }
 0x1a7   :  { %8725 = vst [vmem:[#allocation99_spill] sm:$0xff] %v5937_v17  ;;  %8726 = vst [vmem:[#allocation100_spill] sm:$0xff] %v5939_v42 }
 0x1a8   :  { %v4196_v30 = vpop.f32.mrf.mxu0  ;;  %v4351_v27 = vpop.f32.mrf.mxu1 }
 0x1aa   :  { %v5941_v22 = vpop.f32.mrf.mxu0  ;;  %v5943_v6 = vpop.f32.mrf.mxu1 }
 0x1ab   :  { %8727 = vst [vmem:[#allocation101_spill] sm:$0xff] %v5941_v22  ;;  %8728 = vst [vmem:[#allocation102_spill] sm:$0xff] %v5943_v6 }
 0x1ac   :  { %v4199_v16 = vpop.f32.mrf.mxu0  ;;  %v4354_v15 = vpop.f32.mrf.mxu1 }
 0x1ae   :  { %v5945_v5 = vpop.f32.mrf.mxu0  ;;  %v5947_v61 = vpop.f32.mrf.mxu1 }
 0x1af   :  { %8729 = vst [vmem:[#allocation103_spill] sm:$0xff] %v5945_v5  ;;  %8730 = vst [vmem:[#allocation104_spill] sm:$0xff] %v5947_v61 }
 0x1b0   :  { %v4202_v4 = vpop.f32.mrf.mxu0  ;;  %v4357_v62 = vpop.f32.mrf.mxu1 }
 0x1b2   :  { %v5949_v44 = vpop.f32.mrf.mxu0  ;;  %v5951_v43 = vpop.f32.mrf.mxu1 }
 0x1b3   :  { %8731 = vst [vmem:[#allocation105_spill] sm:$0xff] %v5949_v44  ;;  %8732 = vst [vmem:[#allocation106_spill] sm:$0xff] %v5951_v43 }
 0x1b4   :  { %v4205_v51 = vpop.f32.mrf.mxu0  ;;  %v4360_v50 = vpop.f32.mrf.mxu1 }
 0x1b6   :  { %v5953_v30 = vpop.f32.mrf.mxu0  ;;  %v5955_v27 = vpop.f32.mrf.mxu1 }
 0x1b7   :  { %8733 = vst [vmem:[#allocation107_spill] sm:$0xff] %v5953_v30  ;;  %8734 = vst [vmem:[#allocation108_spill] sm:$0xff] %v5955_v27 }
 0x1b8   :  { %v4208_v39 = vpop.f32.mrf.mxu0  ;;  %v4363_v36 = vpop.f32.mrf.mxu1 }
 0x1ba   :  { %v5957_v16 = vpop.f32.mrf.mxu0  ;;  %v5959_v15 = vpop.f32.mrf.mxu1 }
 0x1bb   :  { %8735 = vst [vmem:[#allocation109_spill] sm:$0xff] %v5957_v16  ;;  %8736 = vst [vmem:[#allocation110_spill] sm:$0xff] %v5959_v15 }
 0x1bc   :  { %v4211_v29 = vpop.f32.mrf.mxu0  ;;  %v4366_v28 = vpop.f32.mrf.mxu1 }
 0x1be   :  { %v5961_v4 = vpop.f32.mrf.mxu0  ;;  %v5963_v62 = vpop.f32.mrf.mxu1 }
 0x1bf   :  { %8737 = vst [vmem:[#allocation111_spill] sm:$0xff] %v5961_v4  ;;  %8738 = vst [vmem:[#allocation112_spill] sm:$0xff] %v5963_v62 }
 0x1c0   :  { %v4214_v21 = vpop.f32.mrf.mxu0  ;;  %v4369_v18 = vpop.f32.mrf.mxu1 }
 0x1c2   :  { %v5965_v51 = vpop.f32.mrf.mxu0  ;;  %v5967_v50 = vpop.f32.mrf.mxu1 }
 0x1c3   :  { %8739 = vst [vmem:[#allocation113_spill] sm:$0xff] %v5965_v51  ;;  %8740 = vst [vmem:[#allocation114_spill] sm:$0xff] %v5967_v50 }
 0x1c4   :  { %v4217_v11 = vpop.f32.mrf.mxu0  ;;  %v4372_v27 = vpop.f32.mrf.mxu1 }
 0x1c6   :  { %v5969_v39 = vpop.f32.mrf.mxu0  ;;  %v5971_v36 = vpop.f32.mrf.mxu1 }
 0x1c7   :  { %8741 = vst [vmem:[#allocation115_spill] sm:$0xff] %v5969_v39  ;;  %8742 = vst [vmem:[#allocation116_spill] sm:$0xff] %v5971_v36 }
 0x1c8   :  { %v4220_v10 = vpop.f32.mrf.mxu0  ;;  %v4375_v15 = vpop.f32.mrf.mxu1 }
 0x1ca   :  { %v5973_v29 = vpop.f32.mrf.mxu0  ;;  %v5975_v28 = vpop.f32.mrf.mxu1 }
 0x1cb   :  { %8743 = vst [vmem:[#allocation117_spill] sm:$0xff] %v5973_v29  ;;  %8744 = vst [vmem:[#allocation118_spill] sm:$0xff] %v5975_v28 }
 0x1cc   :  { %v4223_v43 = vpop.f32.mrf.mxu0  ;;  %v4378_v62 = vpop.f32.mrf.mxu1 }
 0x1ce   :  { %v5977_v21 = vpop.f32.mrf.mxu0  ;;  %v5979_v18 = vpop.f32.mrf.mxu1 }
 0x1cf   :  { %8745 = vst [vmem:[#allocation119_spill] sm:$0xff] %v5977_v21  ;;  %8746 = vst [vmem:[#allocation120_spill] sm:$0xff] %v5979_v18 }
 0x1d0   :  { %v4226_v3 = vpop.f32.mrf.mxu0  ;;  %v4381_v50 = vpop.f32.mrf.mxu1 }
 0x1d2   :  { %v5981_v11 = vpop.f32.mrf.mxu0  ;;  %v5983_v27 = vpop.f32.mrf.mxu1 }
 0x1d3   :  { %8747 = vst [vmem:[#allocation121_spill] sm:$0xff] %v5981_v11  ;;  %8748 = vst [vmem:[#allocation122_spill] sm:$0xff] %v5983_v27 }
 0x1d4   :  { %v4229_v63 = vpop.f32.mrf.mxu0  ;;  %v4384_v36 = vpop.f32.mrf.mxu1 }
 0x1d6   :  { %v5985_v10 = vpop.f32.mrf.mxu0  ;;  %v5987_v15 = vpop.f32.mrf.mxu1 }
 0x1d7   :  { %8749 = vst [vmem:[#allocation123_spill] sm:$0xff] %v5985_v10  ;;  %8750 = vst [vmem:[#allocation124_spill] sm:$0xff] %v5987_v15 }
 0x1d8   :  { %v4232_v61 = vpop.f32.mrf.mxu0  ;;  %v4387_v28 = vpop.f32.mrf.mxu1 }
 0x1da   :  { %v5989_v43 = vpop.f32.mrf.mxu0  ;;  %v5991_v62 = vpop.f32.mrf.mxu1 }
 0x1db   :  { %8751 = vst [vmem:[#allocation125_spill] sm:$0xff] %v5989_v43  ;;  %8752 = vst [vmem:[#allocation126_spill] sm:$0xff] %v5991_v62 }
 0x1dc   :  { %v4235_v21 = vpop.f32.mrf.mxu0  ;;  %v4390_v18 = vpop.f32.mrf.mxu1 }
 0x1de   :  { %v5993_v3 = vpop.f32.mrf.mxu0  ;;  %v5995_v50 = vpop.f32.mrf.mxu1 }
 0x1df   :  { %8753 = vst [vmem:[#allocation127_spill] sm:$0xff] %v5993_v3  ;;  %8754 = vst [vmem:[#allocation128_spill] sm:$0xff] %v5995_v50 }
 0x1e0   :  { %v4238_v11 = vpop.f32.mrf.mxu0  ;;  %v4393_v27 = vpop.f32.mrf.mxu1 }
 0x1e2   :  { %v5997_v63 = vpop.f32.mrf.mxu0  ;;  %v5999_v36 = vpop.f32.mrf.mxu1 }
 0x1e3   :  { %8755 = vst [vmem:[#allocation129_spill] sm:$0xff] %v5997_v63  ;;  %8756 = vst [vmem:[#allocation130_spill] sm:$0xff] %v5999_v36 }
 0x1e4   :  { %v4241_v10 = vpop.f32.mrf.mxu0  ;;  %v4396_v15 = vpop.f32.mrf.mxu1 }
 0x1e5   :  { %v2162_v10 = vadd.f32 %v5917_v54, %v5911_v34  ;;  %v2107_v54 = vadd.f32 %v5145_v47, %v5130_v41 }
 0x1e6   :  { %v6001_v61 = vpop.f32.mrf.mxu0  ;;  %v6003_v28 = vpop.f32.mrf.mxu1 }
 0x1e7   :  { %8757 = vst [vmem:[#allocation131_spill] sm:$0xff] %v6001_v61  ;;  %8758 = vst [vmem:[#allocation132_spill] sm:$0xff] %v6003_v28  ;;  %v2163_v61 = vadd.f32 %v2162_v10, %v5921_v49 }
 0x1e8   :  { %v4244_v43 = vpop.f32.mrf.mxu0  ;;  %v4399_v62 = vpop.f32.mrf.mxu1 }
 0x1e9   :  { %v2164_v62 = vadd.f32 %v2163_v61, %v5925_v23  ;;  %v2108_v61 = vadd.f32 %v2107_v54, %v5161_v53 }
 0x1ea   :  { %v6005_v21 = vpop.f32.mrf.mxu0  ;;  %v6007_v18 = vpop.f32.mrf.mxu1 }
 0x1eb   :  { %8759 = vst [vmem:[#allocation133_spill] sm:$0xff] %v6005_v21  ;;  %8760 = vst [vmem:[#allocation134_spill] sm:$0xff] %v6007_v18  ;;  %v2109_v23 = vadd.f32 %v2108_v61, %v5177_v59  ;;  %v2217_v61 = vadd.f32 %v5919_v35, %v5914_v57 }
 0x1ec   :  { %v4247_v3 = vpop.f32.mrf.mxu0  ;;  %v4402_v50 = vpop.f32.mrf.mxu1 }
 0x1ed   :  { %v2165_v50 = vadd.f32 %v2164_v62, %v5929_v60 }
 0x1ee   :  { %v6009_v11 = vpop.f32.mrf.mxu0  ;;  %v6011_v27 = vpop.f32.mrf.mxu1 }
 0x1ef   :  { %8761 = vst [vmem:[#allocation135_spill] sm:$0xff] %v6009_v11  ;;  %8762 = vst [vmem:[#allocation136_spill] sm:$0xff] %v6011_v27  ;;  %v2053_v27 = vadd.f32 %v5143_v46, %v5127_v40  ;;  %v2166_v10 = vadd.f32 %v2165_v50, %v5933_v12 }
 0x1f0   :  { %v4250_v15 = vpop.f32.mrf.mxu0  ;;  %v4405_v36 = vpop.f32.mrf.mxu1 }
 0x1f1   :  { %v2054_v49 = vadd.f32 %v2053_v27, %v5159_v52  ;;  %v2167_v62 = vadd.f32 %v2166_v10, %v5937_v17  ;;  %v2110_v27 = vadd.f32 %v2109_v23, %v5193_v2 }
 0x1f2   :  { %v6016_v28 = vpop.f32.mrf.mxu0  ;;  %v6018_v43 = vpop.f32.mrf.mxu1 }
 0x1f3   :  { %8763 = vst [vmem:[#allocation137_spill] sm:$0xff] %v6016_v28  ;;  %8764 = vst [vmem:[#allocation138_spill] sm:$0xff] %v6018_v43  ;;  %v2055_v60 = vadd.f32 %v2054_v49, %v5175_v58  ;;  %v2168_v41 = vadd.f32 %v2167_v62, %v5941_v22  ;;  %v2111_v49 = vadd.f32 %v2110_v27, %v5209_v8 }
 0x1f4   :  { %v4253_v18 = vpop.f32.mrf.mxu0  ;;  %v4408_v3 = vpop.f32.mrf.mxu1 }
 0x1f5   :  { %v2056_v50 = vadd.f32 %v2055_v60, %v5191_v1  ;;  %v2112_v23 = vadd.f32 %v2111_v49, %v5225_v14 }
 0x1f6   :  { %v6026_v15 = vpop.f32.mrf.mxu0  ;;  %v6028_v36 = vpop.f32.mrf.mxu1 }
 0x1f7   :  { %8765 = vst [vmem:[#allocation139_spill] sm:$0xff] %v6026_v15  ;;  %8766 = vst [vmem:[#allocation140_spill] sm:$0xff] %v6028_v36  ;;  %v2057_v10 = vadd.f32 %v2056_v50, %v5207_v7  ;;  %v2113_v35 = vadd.f32 %v2112_v23, %v5241_v20 }
 0x1f8   :  { %v4256_v18 = vpop.f32.mrf.mxu0  ;;  %v4411_v3 = vpop.f32.mrf.mxu1 }
 0x1f9   :  { %v2169_v18 = vadd.f32 %v2168_v41, %v5945_v5  ;;  %v2058_v60 = vadd.f32 %v2057_v10, %v5223_v13  ;;  %v2114_v49 = vadd.f32 %v2113_v35, %v5257_v26  ;;  %v8799_v26 = vld [vmem:[#allocation23_spill] sm:$0xff] }
 0x1fa   :  { %v6036_v34 = vpop.f32.mrf.mxu0  ;;  %v6038_v47 = vpop.f32.mrf.mxu1 }
 0x1fb   :  { %8767 = vst [vmem:[#allocation141_spill] sm:$0xff] %v6036_v34  ;;  %8768 = vst [vmem:[#allocation142_spill] sm:$0xff] %v6038_v47  ;;  %v2170_v62 = vadd.f32 %v2169_v18, %v5949_v44  ;;  %v2059_v27 = vadd.f32 %v2058_v60, %v5239_v19  ;;  %v8786_v44 = vld [vmem:[#allocation18_spill] sm:$0xff] }
 0x1fc   :  { %v4259_v12 = vpop.f32.mrf.mxu0  ;;  %v4414_v54 = vpop.f32.mrf.mxu1 }
 0x1fd   :  { %v2218_v12 = vadd.f32 %v2217_v61, %v5923_v33  ;;  %v2171_v50 = vadd.f32 %v2170_v62, %v5953_v30  ;;  %v2060_v10 = vadd.f32 %v2059_v27, %v5255_v25 }
 0x1fe   :  { %v6048_v3 = vpop.f32.mrf.mxu0  ;;  %v6050_v17 = vpop.f32.mrf.mxu1 }
 0x1ff   :  { %8769 = vst [vmem:[#allocation143_spill] sm:$0xff] %v6048_v3  ;;  %8770 = vst [vmem:[#allocation144_spill] sm:$0xff] %v6050_v17  ;;  %v2219_v57 = vadd.f32 %v2218_v12, %v5927_v24  ;;  %v2172_v18 = vadd.f32 %v2171_v50, %v5957_v16  ;;  %v2061_v23 = vadd.f32 %v2060_v10, %v5271_v31 }
 0x200   :  { %v4262_v41 = vpop.f32.mrf.mxu0  ;;  %v4417_v54 = vpop.f32.mrf.mxu1  ;;  %v2115_v12 = vadd.f32 %v2114_v49, %v5273_v32 }
 0x201   :  { %v2220_v61 = vadd.f32 %v2219_v57, %v5931_v0  ;;  %v2173_v60 = vadd.f32 %v2172_v18, %v5961_v4  ;;  %v2062_v35 = vadd.f32 %v2061_v23, %v5287_v37 }
 0x202   :  { %v6060_v5 = vpop.f32.mrf.mxu0  ;;  %v6062_v22 = vpop.f32.mrf.mxu1  ;;  %v2116_v57 = vadd.f32 %v2115_v12, %v5289_v38 }
 0x203   :  { %8771 = vst [vmem:[#allocation145_spill] sm:$0xff] %v6060_v5  ;;  %8772 = vst [vmem:[#allocation146_spill] sm:$0xff] %v6062_v22  ;;  %v2221_v54 = vadd.f32 %v2220_v61, %v5935_v9  ;;  %v2174_v50 = vadd.f32 %v2173_v60, %v5965_v51  ;;  %v2063_v49 = vadd.f32 %v2062_v35, %v5303_v45  ;;  %v8780_v51 = vld [vmem:[#allocation16_spill] sm:$0xff] }
 0x204   :  { %v4265_v41 = vpop.f32.mrf.mxu0  ;;  %v4420_v62 = vpop.f32.mrf.mxu1  ;;  %v2117_v61 = vadd.f32 %v2116_v57, %v5305_v48 }
 0x205   :  { %v2222_v27 = vadd.f32 %v2221_v54, %v5939_v42  ;;  %v2175_v10 = vadd.f32 %v2174_v50, %v5969_v39  ;;  %v2064_v23 = vadd.f32 %v2063_v49, %v5319_v55  ;;  %v8777_v54 = vld [vmem:[#allocation104_spill] sm:$0xff]  ;;  %v8778_v42 = vld [vmem:[#allocation119_spill] sm:$0xff] }
 0x206   :  { %v6072_v24 = vpop.f32.mrf.mxu0  ;;  %v6074_v33 = vpop.f32.mrf.mxu1  ;;  %v2118_v12 = vadd.f32 %v2117_v61, %v5321_v56  ;;  %v8779_v39 = vld [vmem:[#allocation15_spill] sm:$0xff] }
 0x207   :  { %8773 = vst [vmem:[#allocation147_spill] sm:$0xff] %v6072_v24  ;;  %8774 = vst [vmem:[#allocation148_spill] sm:$0xff] %v6074_v33  ;;  %v2223_v62 = vadd.f32 %v2222_v27, %v5943_v6  ;;  %v2176_v60 = vadd.f32 %v2175_v10, %v5973_v29  ;;  %v2065_v57 = vadd.f32 %v2064_v23, %v8779_v39  ;;  %v8781_v6 = vld [vmem:[#allocation106_spill] sm:$0xff]  ;;  %v8784_v10 = vld [vmem:[#allocation121_spill] sm:$0xff] }
 0x208   :  { %v4268_v41 = vpop.f32.mrf.mxu0  ;;  %v4423_v18 = vpop.f32.mrf.mxu1  ;;  %v2119_v27 = vadd.f32 %v2118_v12, %v8780_v51  ;;  %v8785_v29 = vld [vmem:[#allocation17_spill] sm:$0xff]  ;;  %v8789_v56 = vld [vmem:[#allocation19_spill] sm:$0xff]  ;;  %v8790_v51 = vld [vmem:[#allocation20_spill] sm:$0xff] }
 0x209   :  { %v2224_v41 = vadd.f32 %v2223_v62, %v8777_v54  ;;  %v2177_v35 = vadd.f32 %v2176_v60, %v8778_v42  ;;  %v2066_v61 = vadd.f32 %v2065_v57, %v8785_v29  ;;  %v8788_v42 = vld [vmem:[#allocation123_spill] sm:$0xff] }
 0x20a   :  { %v6084_v9 = vpop.f32.mrf.mxu0  ;;  %v6086_v0 = vpop.f32.mrf.mxu1  ;;  %v2120_v62 = vadd.f32 %v2119_v27, %v8786_v44  ;;  %v8796_v44 = vld [vmem:[#allocation22_spill] sm:$0xff] }
 0x20b   :  { %8775 = vst [vmem:[#allocation149_spill] sm:$0xff] %v6084_v9  ;;  %8776 = vst [vmem:[#allocation150_spill] sm:$0xff] %v6086_v0  ;;  %v2225_v4 = vadd.f32 %v2224_v41, %v8781_v6  ;;  %v2178_v49 = vadd.f32 %v2177_v35, %v8784_v10  ;;  %v2067_v12 = vadd.f32 %v2066_v61, %v8789_v56  ;;  %v8791_v6 = vld [vmem:[#allocation110_spill] sm:$0xff]  ;;  %v8794_v35 = vld [vmem:[#allocation125_spill] sm:$0xff] }
 0x20c   :  { %v4271_v18 = vpop.f32.mrf.mxu0  ;;  %v4426_v50 = vpop.f32.mrf.mxu1  ;;  %v2121_v41 = vadd.f32 %v2120_v62, %v8790_v51  ;;  %v8795_v10 = vld [vmem:[#allocation21_spill] sm:$0xff]  ;;  %v8800_v51 = vld [vmem:[#allocation24_spill] sm:$0xff] }
 0x20d   :  { %v8787_v18 = vld [vmem:[#allocation108_spill] sm:$0xff]  ;;  %v2179_v23 = vadd.f32 %v2178_v49, %v8788_v42  ;;  %v2068_v27 = vadd.f32 %v2067_v12, %v8795_v10  ;;  %v8798_v42 = vld [vmem:[#allocation127_spill] sm:$0xff]  ;;  %v8804_v12 = vld [vmem:[#allocation25_spill] sm:$0xff] }
 0x20e   :  { %v6096_v16 = vpop.f32.mrf.mxu0  ;;  %v6098_v30 = vpop.f32.mrf.mxu1  ;;  %v2226_v50 = vadd.f32 %v2225_v4, %v8787_v18  ;;  %v2122_v4 = vadd.f32 %v2121_v41, %v8796_v44  ;;  %v8808_v44 = vld [vmem:[#allocation27_spill] sm:$0xff] }
 0x20f   :  { %8782 = vst [vmem:[#allocation15_spill] sm:$0xff] %v6096_v16  ;;  %8783 = vst [vmem:[#allocation151_spill] sm:$0xff] %v6098_v30  ;;  %v2180_v57 = vadd.f32 %v2179_v23, %v8794_v35  ;;  %v2069_v62 = vadd.f32 %v2068_v27, %v8799_v26  ;;  %v8805_v35 = vld [vmem:[#allocation26_spill] sm:$0xff] }
 0x210   :  { %v4274_v54 = vpop.f32.mrf.mxu0  ;;  %v4429_v60 = vpop.f32.mrf.mxu1  ;;  %v2227_v48 = vadd.f32 %v2226_v50, %v8791_v6  ;;  %v2123_v50 = vadd.f32 %v2122_v4, %v8800_v51  ;;  %v8801_v6 = vld [vmem:[#allocation114_spill] sm:$0xff]  ;;  %v8809_v51 = vld [vmem:[#allocation28_spill] sm:$0xff] }
 0x211   :  { %v8797_v54 = vld [vmem:[#allocation112_spill] sm:$0xff]  ;;  %v2181_v61 = vadd.f32 %v2180_v57, %v8798_v42  ;;  %v2070_v41 = vadd.f32 %v2069_v62, %v8804_v12  ;;  %v8807_v42 = vld [vmem:[#allocation131_spill] sm:$0xff]  ;;  %v8813_v62 = vld [vmem:[#allocation29_spill] sm:$0xff] }
 0x212   :  { %v6108_v38 = vpop.f32.mrf.mxu0  ;;  %v6110_v32 = vpop.f32.mrf.mxu1  ;;  %v2228_v60 = vadd.f32 %v2227_v48, %v8797_v54  ;;  %v2124_v48 = vadd.f32 %v2123_v50, %v8805_v35 }
 0x213   :  { %8792 = vst [vmem:[#allocation17_spill] sm:$0xff] %v6108_v38  ;;  %8793 = vst [vmem:[#allocation19_spill] sm:$0xff] %v6110_v32  ;;  %v2182_v23 = vadd.f32 %v2181_v61, %v5997_v63  ;;  %v2071_v4 = vadd.f32 %v2070_v41, %v8808_v44  ;;  %v8814_v63 = vld [vmem:[#allocation30_spill] sm:$0xff] }
 0x214   :  { %v4277_v18 = vpop.f32.mrf.mxu0  ;;  %v4432_v49 = vpop.f32.mrf.mxu1  ;;  %v2229_v20 = vadd.f32 %v2228_v60, %v8801_v6  ;;  %v2125_v60 = vadd.f32 %v2124_v48, %v8809_v51  ;;  %v8810_v6 = vld [vmem:[#allocation118_spill] sm:$0xff]  ;;  %v8817_v51 = vld [vmem:[#allocation32_spill] sm:$0xff] }
 0x215   :  { %v8806_v18 = vld [vmem:[#allocation116_spill] sm:$0xff]  ;;  %v2183_v27 = vadd.f32 %v2182_v23, %v8807_v42  ;;  %v2072_v50 = vadd.f32 %v2071_v4, %v8813_v62  ;;  %v8816_v42 = vld [vmem:[#allocation31_spill] sm:$0xff]  ;;  %v8821_v4 = vld [vmem:[#allocation33_spill] sm:$0xff] }
 0x216   :  { %v6120_v14 = vpop.f32.mrf.mxu0  ;;  %v6122_v8 = vpop.f32.mrf.mxu1  ;;  %v2230_v49 = vadd.f32 %v2229_v20, %v8806_v18  ;;  %v2126_v20 = vadd.f32 %v2125_v60, %v8814_v63 }
 0x217   :  { %8802 = vst [vmem:[#allocation21_spill] sm:$0xff] %v6120_v14  ;;  %8803 = vst [vmem:[#allocation23_spill] sm:$0xff] %v6122_v8  ;;  %v2184_v61 = vadd.f32 %v2183_v27, %v6005_v21  ;;  %v2073_v48 = vadd.f32 %v2072_v50, %v8816_v42  ;;  %v8822_v21 = vld [vmem:[#allocation34_spill] sm:$0xff] }
 0x218   :  { %v4280_v54 = vpop.f32.mrf.mxu0  ;;  %v4435_v57 = vpop.f32.mrf.mxu1  ;;  %v2231_v2 = vadd.f32 %v2230_v49, %v8810_v6  ;;  %v2127_v49 = vadd.f32 %v2126_v20, %v8817_v51  ;;  %v8818_v6 = vld [vmem:[#allocation122_spill] sm:$0xff]  ;;  %v8825_v51 = vld [vmem:[#allocation36_spill] sm:$0xff] }
 0x219   :  { %v8815_v54 = vld [vmem:[#allocation120_spill] sm:$0xff]  ;;  %v2185_v41 = vadd.f32 %v2184_v61, %v6009_v11  ;;  %v2074_v60 = vadd.f32 %v2073_v48, %v8821_v4  ;;  %v8824_v11 = vld [vmem:[#allocation35_spill] sm:$0xff]  ;;  %v8829_v48 = vld [vmem:[#allocation37_spill] sm:$0xff] }
 0x21a   :  { %v6132_v59 = vpop.f32.mrf.mxu0  ;;  %v6134_v53 = vpop.f32.mrf.mxu1  ;;  %v2232_v57 = vadd.f32 %v2231_v2, %v8815_v54  ;;  %v2128_v2 = vadd.f32 %v2127_v49, %v8822_v21 }
 0x21b   :  { %8811 = vst [vmem:[#allocation152_spill] sm:$0xff] %v6132_v59  ;;  %8812 = vst [vmem:[#allocation153_spill] sm:$0xff] %v6134_v53  ;;  %v2186_v27 = vadd.f32 %v2185_v41, %v6016_v28  ;;  %v2075_v20 = vadd.f32 %v2074_v60, %v8824_v11  ;;  %v8830_v28 = vld [vmem:[#allocation38_spill] sm:$0xff] }
 0x21c   :  { %v4283_v18 = vpop.f32.mrf.mxu0  ;;  %v4438_v23 = vpop.f32.mrf.mxu1  ;;  %v2233_v35 = vadd.f32 %v2232_v57, %v8818_v6  ;;  %v2129_v57 = vadd.f32 %v2128_v2, %v8825_v51  ;;  %v8826_v6 = vld [vmem:[#allocation126_spill] sm:$0xff]  ;;  %v8833_v51 = vld [vmem:[#allocation40_spill] sm:$0xff] }
 0x21d   :  { %v8823_v18 = vld [vmem:[#allocation124_spill] sm:$0xff]  ;;  %v2187_v50 = vadd.f32 %v2186_v27, %v6026_v15  ;;  %v2076_v49 = vadd.f32 %v2075_v20, %v8829_v48  ;;  %v8832_v15 = vld [vmem:[#allocation39_spill] sm:$0xff]  ;;  %v8837_v20 = vld [vmem:[#allocation41_spill] sm:$0xff] }
 0x21e   :  { %v6144_v44 = vpop.f32.mrf.mxu0  ;;  %v6146_v12 = vpop.f32.mrf.mxu1  ;;  %v2234_v23 = vadd.f32 %v2233_v35, %v8823_v18  ;;  %v2130_v35 = vadd.f32 %v2129_v57, %v8830_v28 }
 0x21f   :  { %8819 = vst [vmem:[#allocation154_spill] sm:$0xff] %v6144_v44  ;;  %8820 = vst [vmem:[#allocation155_spill] sm:$0xff] %v6146_v12  ;;  %v2188_v41 = vadd.f32 %v2187_v50, %v6036_v34  ;;  %v2077_v2 = vadd.f32 %v2076_v49, %v8832_v15  ;;  %v8838_v34 = vld [vmem:[#allocation42_spill] sm:$0xff] }
 0x220   :  { %v4286_v54 = vpop.f32.mrf.mxu0  ;;  %v4441_v61 = vpop.f32.mrf.mxu1  ;;  %v2235_v63 = vadd.f32 %v2234_v23, %v8826_v6  ;;  %v2131_v23 = vadd.f32 %v2130_v35, %v8833_v51  ;;  %v8834_v6 = vld [vmem:[#allocation130_spill] sm:$0xff]  ;;  %v8841_v51 = vld [vmem:[#allocation44_spill] sm:$0xff] }
 0x221   :  { %v8831_v54 = vld [vmem:[#allocation128_spill] sm:$0xff]  ;;  %v2189_v60 = vadd.f32 %v2188_v41, %v6048_v3  ;;  %v2078_v57 = vadd.f32 %v2077_v2, %v8837_v20  ;;  %v8840_v3 = vld [vmem:[#allocation43_spill] sm:$0xff]  ;;  %v8845_v2 = vld [vmem:[#allocation45_spill] sm:$0xff] }
 0x222   :  { %v6156_v42 = vpop.f32.mrf.mxu0  ;;  %v6158_v62 = vpop.f32.mrf.mxu1  ;;  %v2236_v61 = vadd.f32 %v2235_v63, %v8831_v54  ;;  %v2132_v63 = vadd.f32 %v2131_v23, %v8838_v34 }
 0x223   :  { %8827 = vst [vmem:[#allocation156_spill] sm:$0xff] %v6156_v42  ;;  %8828 = vst [vmem:[#allocation157_spill] sm:$0xff] %v6158_v62  ;;  %v2190_v50 = vadd.f32 %v2189_v60, %v6060_v5  ;;  %v2079_v35 = vadd.f32 %v2078_v57, %v8840_v3  ;;  %v8846_v5 = vld [vmem:[#allocation46_spill] sm:$0xff] }
 0x224   :  { %v4289_v18 = vpop.f32.mrf.mxu0  ;;  %v4444_v27 = vpop.f32.mrf.mxu1  ;;  %v2237_v21 = vadd.f32 %v2236_v61, %v8834_v6  ;;  %v2133_v61 = vadd.f32 %v2132_v63, %v8841_v51  ;;  %v8842_v6 = vld [vmem:[#allocation134_spill] sm:$0xff]  ;;  %v8849_v51 = vld [vmem:[#allocation48_spill] sm:$0xff] }
 0x225   :  { %v8839_v18 = vld [vmem:[#allocation132_spill] sm:$0xff]  ;;  %v2191_v49 = vadd.f32 %v2190_v50, %v6072_v24  ;;  %v2080_v23 = vadd.f32 %v2079_v35, %v8845_v2  ;;  %v8848_v24 = vld [vmem:[#allocation47_spill] sm:$0xff]  ;;  %v8852_v35 = vld [vmem:[#allocation49_spill] sm:$0xff] }
 0x226   :  { %v6168_v11 = vpop.f32.mrf.mxu0  ;;  %v6170_v4 = vpop.f32.mrf.mxu1  ;;  %v2238_v27 = vadd.f32 %v2237_v21, %v8839_v18  ;;  %v2134_v21 = vadd.f32 %v2133_v61, %v8846_v5 }
 0x227   :  { %8835 = vst [vmem:[#allocation158_spill] sm:$0xff] %v6168_v11  ;;  %8836 = vst [vmem:[#allocation159_spill] sm:$0xff] %v6170_v4  ;;  %v2192_v60 = vadd.f32 %v2191_v49, %v6084_v9  ;;  %v2081_v63 = vadd.f32 %v2080_v23, %v8848_v24  ;;  %v8853_v9 = vld [vmem:[#allocation50_spill] sm:$0xff] }
 0x228   :  { %v4292_v54 = vpop.f32.mrf.mxu0  ;;  %v4447_v41 = vpop.f32.mrf.mxu1  ;;  %v2239_v28 = vadd.f32 %v2238_v27, %v8842_v6  ;;  %v2135_v27 = vadd.f32 %v2134_v21, %v8849_v51 }
 0x229   :  { %v8847_v54 = vld [vmem:[#allocation136_spill] sm:$0xff]  ;;  %v2193_v57 = vadd.f32 %v2192_v60, %v6096_v16  ;;  %v2082_v61 = vadd.f32 %v2081_v63, %v8852_v35  ;;  %v8858_v63 = vld [vmem:[#allocation53_spill] sm:$0xff] }
 0x22a   :  { %v6180_v15 = vpop.f32.mrf.mxu0  ;;  %v6182_v48 = vpop.f32.mrf.mxu1  ;;  %v2240_v41 = vadd.f32 %v2239_v28, %v8847_v54  ;;  %v2136_v28 = vadd.f32 %v2135_v27, %v8853_v9  ;;  %v8854_v54 = vld [vmem:[#allocation51_spill] sm:$0xff]  ;;  %v8855_v16 = vld [vmem:[#allocation52_spill] sm:$0xff] }
 0x22b   :  { %8843 = vst [vmem:[#allocation41_spill] sm:$0xff] %v6180_v15  ;;  %8844 = vst [vmem:[#allocation160_spill] sm:$0xff] %v6182_v48  ;;  %v2194_v49 = vadd.f32 %v2193_v57, %v6108_v38  ;;  %v2083_v21 = vadd.f32 %v2082_v61, %v8854_v54  ;;  %v8859_v38 = vld [vmem:[#allocation54_spill] sm:$0xff] }
 0x22c   :  { %v4295_v18 = vpop.f32.mrf.mxu0  ;;  %v4450_v50 = vpop.f32.mrf.mxu1  ;;  %v2241_v6 = vadd.f32 %v2240_v41, %v6018_v43  ;;  %v2137_v41 = vadd.f32 %v2136_v28, %v8855_v16 }
 0x22d   :  { %v2195_v23 = vadd.f32 %v2194_v49, %v6120_v14  ;;  %v2084_v27 = vadd.f32 %v2083_v21, %v8858_v63  ;;  %v8861_v14 = vld [vmem:[#allocation56_spill] sm:$0xff]  ;;  %v8864_v21 = vld [vmem:[#allocation57_spill] sm:$0xff] }
 0x22e   :  { %v6192_v34 = vpop.f32.mrf.mxu0  ;;  %v6194_v3 = vpop.f32.mrf.mxu1  ;;  %v2242_v18 = vadd.f32 %v2241_v6, %v6028_v36  ;;  %v2138_v6 = vadd.f32 %v2137_v41, %v8859_v38  ;;  %v8860_v36 = vld [vmem:[#allocation55_spill] sm:$0xff] }
 0x22f   :  { %8850 = vst [vmem:[#allocation45_spill] sm:$0xff] %v6192_v34  ;;  %8851 = vst [vmem:[#allocation47_spill] sm:$0xff] %v6194_v3  ;;  %v2196_v57 = vadd.f32 %v2195_v23, %v6132_v59  ;;  %v2085_v28 = vadd.f32 %v2084_v27, %v8860_v36  ;;  %v8865_v59 = vld [vmem:[#allocation58_spill] sm:$0xff] }
 0x230   :  { %v4298_v50 = vpop.f32.mrf.mxu0  ;;  %v4453_v60 = vpop.f32.mrf.mxu1  ;;  %v2243_v43 = vadd.f32 %v2242_v18, %v6038_v47  ;;  %v2139_v18 = vadd.f32 %v2138_v6, %v8861_v14 }
 0x231   :  { %v2197_v61 = vadd.f32 %v2196_v57, %v6144_v44  ;;  %v2086_v41 = vadd.f32 %v2085_v28, %v8864_v21  ;;  %v8867_v44 = vld [vmem:[#allocation60_spill] sm:$0xff]  ;;  %v8870_v28 = vld [vmem:[#allocation61_spill] sm:$0xff] }
 0x232   :  { %v6204_v51 = vpop.f32.mrf.mxu0  ;;  %v6206_v5 = vpop.f32.mrf.mxu1  ;;  %v2244_v50 = vadd.f32 %v2243_v43, %v6050_v17  ;;  %v2140_v43 = vadd.f32 %v2139_v18, %v8865_v59  ;;  %v8866_v17 = vld [vmem:[#allocation59_spill] sm:$0xff] }
 0x233   :  { %8856 = vst [vmem:[#allocation49_spill] sm:$0xff] %v6204_v51  ;;  %8857 = vst [vmem:[#allocation51_spill] sm:$0xff] %v6206_v5  ;;  %v2198_v23 = vadd.f32 %v2197_v61, %v6156_v42  ;;  %v2087_v6 = vadd.f32 %v2086_v41, %v8866_v17  ;;  %v8871_v42 = vld [vmem:[#allocation62_spill] sm:$0xff] }
 0x234   :  { %v4301_v60 = vpop.f32.mrf.mxu0  ;;  %v4456_v49 = vpop.f32.mrf.mxu1  ;;  %v2245_v47 = vadd.f32 %v2244_v50, %v6062_v22  ;;  %v2141_v50 = vadd.f32 %v2140_v43, %v8867_v44 }
 0x235   :  { %v2199_v27 = vadd.f32 %v2198_v23, %v6168_v11  ;;  %v2088_v18 = vadd.f32 %v2087_v6, %v8870_v28  ;;  %v8873_v11 = vld [vmem:[#allocation64_spill] sm:$0xff]  ;;  %v8876_v6 = vld [vmem:[#allocation65_spill] sm:$0xff] }
 0x236   :  { %v6216_v16 = vpop.f32.mrf.mxu0  ;;  %v6218_v9 = vpop.f32.mrf.mxu1  ;;  %v2246_v60 = vadd.f32 %v2245_v47, %v6074_v33  ;;  %v2142_v47 = vadd.f32 %v2141_v50, %v8871_v42  ;;  %v8872_v33 = vld [vmem:[#allocation63_spill] sm:$0xff] }
 0x237   :  { %8862 = vst [vmem:[#allocation53_spill] sm:$0xff] %v6216_v16  ;;  %8863 = vst [vmem:[#allocation55_spill] sm:$0xff] %v6218_v9  ;;  %v2200_v61 = vadd.f32 %v2199_v27, %v6180_v15  ;;  %v2089_v43 = vadd.f32 %v2088_v18, %v8872_v33  ;;  %v8877_v15 = vld [vmem:[#allocation66_spill] sm:$0xff] }
 0x238   :  { %v4304_v49 = vpop.f32.mrf.mxu0  ;;  %v4459_v57 = vpop.f32.mrf.mxu1  ;;  %v2247_v22 = vadd.f32 %v2246_v60, %v6086_v0  ;;  %v2143_v60 = vadd.f32 %v2142_v47, %v8873_v11 }
 0x239   :  { %v2201_v41 = vadd.f32 %v2200_v61, %v6192_v34  ;;  %v2090_v50 = vadd.f32 %v2089_v43, %v8876_v6  ;;  %v8879_v34 = vld [vmem:[#allocation68_spill] sm:$0xff]  ;;  %v8882_v43 = vld [vmem:[#allocation69_spill] sm:$0xff] }
 0x23a   :  { %v6228_v14 = vpop.f32.mrf.mxu0  ;;  %v6230_v38 = vpop.f32.mrf.mxu1  ;;  %v2248_v49 = vadd.f32 %v2247_v22, %v6098_v30  ;;  %v2144_v22 = vadd.f32 %v2143_v60, %v8877_v15  ;;  %v8878_v30 = vld [vmem:[#allocation67_spill] sm:$0xff] }
 0x23b   :  { %8868 = vst [vmem:[#allocation57_spill] sm:$0xff] %v6228_v14  ;;  %8869 = vst [vmem:[#allocation59_spill] sm:$0xff] %v6230_v38  ;;  %v2202_v27 = vadd.f32 %v2201_v41, %v6204_v51  ;;  %v2091_v47 = vadd.f32 %v2090_v50, %v8878_v30  ;;  %v8883_v51 = vld [vmem:[#allocation70_spill] sm:$0xff] }
 0x23c   :  { %v4307_v57 = vpop.f32.mrf.mxu0  ;;  %v4462_v23 = vpop.f32.mrf.mxu1  ;;  %v2249_v0 = vadd.f32 %v2248_v49, %v6110_v32  ;;  %v2145_v49 = vadd.f32 %v2144_v22, %v8879_v34 }
 0x23d   :  { %v2203_v18 = vadd.f32 %v2202_v27, %v6216_v16  ;;  %v2092_v60 = vadd.f32 %v2091_v47, %v8882_v43  ;;  %v8885_v16 = vld [vmem:[#allocation72_spill] sm:$0xff]  ;;  %v8887_v47 = vld [vmem:[#allocation73_spill] sm:$0xff] }
 0x23e   :  { %v6240_v44 = vpop.f32.mrf.mxu0  ;;  %v6242_v59 = vpop.f32.mrf.mxu1  ;;  %v2250_v57 = vadd.f32 %v2249_v0, %v6122_v8  ;;  %v2146_v0 = vadd.f32 %v2145_v49, %v8883_v51  ;;  %v8884_v8 = vld [vmem:[#allocation71_spill] sm:$0xff] }
 0x23f   :  { %8874 = vst [vmem:[#allocation61_spill] sm:$0xff] %v6240_v44  ;;  %8875 = vst [vmem:[#allocation63_spill] sm:$0xff] %v6242_v59  ;;  %v2204_v41 = vadd.f32 %v2203_v18, %v6228_v14  ;;  %v2093_v22 = vadd.f32 %v2092_v60, %v8884_v8  ;;  %v8888_v14 = vld [vmem:[#allocation74_spill] sm:$0xff] }
 0x240   :  { %v4310_v23 = vpop.f32.mrf.mxu0  ;;  %v4465_v61 = vpop.f32.mrf.mxu1  ;;  %v2251_v32 = vadd.f32 %v2250_v57, %v6134_v53  ;;  %v2147_v57 = vadd.f32 %v2146_v0, %v8885_v16 }
 0x241   :  { %v2205_v50 = vadd.f32 %v2204_v41, %v6240_v44  ;;  %v2094_v49 = vadd.f32 %v2093_v22, %v8887_v47  ;;  %v8890_v44 = vld [vmem:[#allocation76_spill] sm:$0xff]  ;;  %v8892_v22 = vld [vmem:[#allocation77_spill] sm:$0xff] }
 0x242   :  { %v6252_v11 = vpop.f32.mrf.mxu0  ;;  %v6254_v42 = vpop.f32.mrf.mxu1  ;;  %v2252_v23 = vadd.f32 %v2251_v32, %v6146_v12  ;;  %v2148_v32 = vadd.f32 %v2147_v57, %v8888_v14  ;;  %v8889_v12 = vld [vmem:[#allocation75_spill] sm:$0xff]  ;;  %v8895_v14 = vld [vmem:[#allocation80_spill] sm:$0xff] }
 0x243   :  { %8880 = vst [vmem:[#allocation65_spill] sm:$0xff] %v6252_v11  ;;  %8881 = vst [vmem:[#allocation67_spill] sm:$0xff] %v6254_v42  ;;  %v2206_v18 = vadd.f32 %v2205_v50, %v6252_v11  ;;  %v2095_v0 = vadd.f32 %v2094_v49, %v8889_v12  ;;  %v8893_v11 = vld [vmem:[#allocation78_spill] sm:$0xff]  ;;  %v8897_v12 = vld [vmem:[#allocation81_spill] sm:$0xff] }
 0x244   :  { %v4313_v61 = vpop.f32.mrf.mxu0  ;;  %v4468_v27 = vpop.f32.mrf.mxu1  ;;  %v2253_v53 = vadd.f32 %v2252_v23, %v6158_v62  ;;  %v2149_v23 = vadd.f32 %v2148_v32, %v8890_v44 }
 0x245   :  { %v2096_v57 = vadd.f32 %v2095_v0, %v8892_v22  ;;  %v8898_v22 = vld [vmem:[#allocation82_spill] sm:$0xff] }
 0x246   :  { %v6264_v34 = vpop.f32.mrf.mxu0  ;;  %v6266_v15 = vpop.f32.mrf.mxu1  ;;  %v2254_v61 = vadd.f32 %v2253_v53, %v6170_v4  ;;  %v2150_v53 = vadd.f32 %v2149_v23, %v8893_v11  ;;  %v8894_v4 = vld [vmem:[#allocation79_spill] sm:$0xff]  ;;  %v8900_v11 = vld [vmem:[#allocation84_spill] sm:$0xff] }
 0x247   :  { %8886 = vst [vmem:[#allocation69_spill] sm:$0xff] %v6266_v15  ;;  %v2207_v60 = vadd.f32 %v2206_v18, %v6264_v34  ;;  %v2097_v49 = vadd.f32 %v2096_v57, %v8894_v4  ;;  %v8902_v4 = vld [vmem:[#allocation86_spill] sm:$0xff] }
 0x248   :  { %v4316_v27 = vpop.f32.mrf.mxu0  ;;  %v4471_v41 = vpop.f32.mrf.mxu1  ;;  %v2255_v62 = vadd.f32 %v2254_v61, %v6182_v48  ;;  %v2151_v32 = vadd.f32 %v2150_v53, %v8895_v14 }
 0x249   :  { %v2098_v0 = vadd.f32 %v2097_v49, %v8897_v12 }
 0x24a   :  { %v6276_v16 = vpop.f32.mrf.mxu0  ;;  %v6278_v51 = vpop.f32.mrf.mxu1  ;;  %v2256_v27 = vadd.f32 %v2255_v62, %v6194_v3  ;;  %v2152_v23 = vadd.f32 %v2151_v32, %v8898_v22  ;;  %v8899_v3 = vld [vmem:[#allocation83_spill] sm:$0xff] }
 0x24b   :  { %8891 = vst [vmem:[#allocation71_spill] sm:$0xff] %v6278_v51  ;;  %v2208_v50 = vadd.f32 %v2207_v60, %v6276_v16  ;;  %v2099_v57 = vadd.f32 %v2098_v0, %v8899_v3 }
 0x24c   :  { %v4319_v41 = vpop.f32.mrf.mxu0  ;;  %v4474_v18 = vpop.f32.mrf.mxu1  ;;  %v2257_v61 = vadd.f32 %v2256_v27, %v6206_v5  ;;  %v2153_v53 = vadd.f32 %v2152_v23, %v8900_v11  ;;  %v8901_v5 = vld [vmem:[#allocation85_spill] sm:$0xff] }
 0x24d   :  { %v2100_v14 = vadd.f32 %v2099_v57, %v8901_v5 }
 0x24e   :  { %v6287_v48 = vpop.f32.mrf.mxu0  ;;  %v6289_v44 = vpop.f32.mrf.mxu1  ;;  %v2258_v62 = vadd.f32 %v2257_v61, %v6218_v9  ;;  %v2154_v47 = vadd.f32 %v2153_v53, %v8902_v4 }
 0x24f   :  { %8896 = vst [vmem:[#allocation161_spill] sm:$0xff] %v6289_v44  ;;  %v2209_v60 = vadd.f32 %v2208_v50, %v6287_v48  ;;  %v2101_v12 = vrot.slane %v2100_v14, 4 }
 0x250   :  { %v4322_v41 = vpop.f32.mrf.mxu0  ;;  %v4477_v18 = vpop.f32.mrf.mxu1  ;;  %v2259_v27 = vadd.f32 %v2258_v62, %v6230_v38  ;;  %v2155_v32 = vrot.slane %v2154_v47, 4 }
 0x251   :  { %v2210_v18 = vrot.slane %v2209_v60, 4  ;;  %v2102_v0 = vadd.f32 %v2101_v12, %v2100_v14 }
 0x252   :  { %v2260_v50 = vadd.f32 %v2259_v27, %v6242_v59  ;;  %v2156_v9 = vadd.f32 %v2155_v32, %v2154_v47 }
 0x253   :  { %v2211_v62 = vadd.f32 %v2210_v18, %v2209_v60  ;;  %v2103_v38 = vrot.slane %v2102_v0, 2 }
 0x254   :  { %v2261_v49 = vadd.f32 %v2260_v50, %v6254_v42  ;;  %v2157_v57 = vrot.slane %v2156_v9, 2 }
 0x255   :  { %v2212_v53 = vrot.slane %v2211_v62, 2  ;;  %v2104_v4 = vadd.f32 %v2103_v38, %v2102_v0  ;;  %v8927_v0 = vld [vmem:[#allocation35_spill] sm:$0xff] }
 0x256   :  { %v2262_v61 = vadd.f32 %v2261_v49, %v6266_v15  ;;  %v2158_v27 = vadd.f32 %v2157_v57, %v2156_v9 }
 0x257   :  { %v2213_v50 = vadd.f32 %v2212_v53, %v2211_v62  ;;  %v2105_v42 = vrot.slane %v2104_v4, 1  ;;  %v8929_v62 = vld [vmem:[#allocation37_spill] sm:$0xff]  ;;  %v8931_v53 = vld [vmem:[#allocation39_spill] sm:$0xff] }
 0x258   :  { %v2263_v41 = vadd.f32 %v2262_v61, %v6278_v51  ;;  %v2159_v22 = vrot.slane %v2158_v27, 1 }
 0x259   :  { %v2214_v49 = vrot.slane %v2213_v50, 1  ;;  %v2106_v15 = vadd.f32 %v2105_v42, %v2104_v4  ;;  %v8923_v4 = vld [vmem:[#allocation31_spill] sm:$0xff] }
 0x25a   :  { %v2264_v23 = vadd.f32 %v2263_v41, %v6289_v44  ;;  %v2160_v61 = vadd.f32 %v2159_v22, %v2158_v27  ;;  %v8925_v22 = vld [vmem:[#allocation33_spill] sm:$0xff]  ;;  %v8971_v44 = vld [vmem:[#allocation7_spill] sm:$0xff] }
 0x25b   :  { %v2215_v14 = vadd.f32 %v2214_v49, %v2213_v50  ;;  %v8934_v49 = vld [vmem:[#allocation43_spill] sm:$0xff] }
 0x25c   :  { %v2265_v11 = vrot.slane %v2264_v23, 4  ;;  %v2161_v12 = vadd.f32 %v2160_v61, %v2106_v15  ;;  %v8921_v15 = vld [vmem:[#allocation29_spill] sm:$0xff] }
 0x25e   :  { %v2266_v59 = vadd.f32 %v2265_v11, %v2264_v23  ;;  %v2216_v32 = vadd.f32 %v2215_v14, %v2161_v12  ;;  %v8919_v11 = vld [vmem:[#allocation27_spill] sm:$0xff] }
 0x260   :  { %v2267_v5 = vrot.slane %v2266_v59, 2 }
 0x262   :  { %v2268_v51 = vadd.f32 %v2267_v5, %v2266_v59 }
 0x264   :  { %v2269_v47 = vrot.slane %v2268_v51, 1 }
 0x266   :  { %v2270_v60 = vadd.f32 %v2269_v47, %v2268_v51  ;;  %v8917_v51 = vld [vmem:[#allocation25_spill] sm:$0xff] }
 0x268   :  { %v2271_v41 = vadd.f32 %v2270_v60, %v2216_v32  ;;  %v8953_v60 = vld [vmem:[#allocation73_spill] sm:$0xff] }
 0x26a   :  { %v6305_v18 = vmul.f32 0.0006377551, %v2271_v41  ;;  %v8955_v41 = vld [vmem:[#allocation75_spill] sm:$0xff] }
 0x26c   :  { %8903 = vst [vmem:[#allocation83_spill] sm:$0xff] %v6305_v18  ;;  %v6309_v38 = vsub.f32 %v5127_v40, %v6305_v18  ;;  %v6313_v9 = vsub.f32 %v5143_v46, %v6305_v18  ;;  %v6317_v42 = vsub.f32 %v5159_v52, %v6305_v18  ;;  %v6321_v59 = vsub.f32 %v5175_v58, %v6305_v18 }
 0x26d   :  { %v6325_v5 = vsub.f32 %v5191_v1, %v6305_v18  ;;  %v6329_v40 = vsub.f32 %v5207_v7, %v6305_v18  ;;  %v6333_v46 = vsub.f32 %v5223_v13, %v6305_v18  ;;  %v6337_v52 = vsub.f32 %v5239_v19, %v6305_v18 }
 0x26e   :  { %8904 = vst [vmem:[#allocation162_spill] sm:$0xff] %v6309_v38  ;;  %8905 = vst [vmem:[#allocation163_spill] sm:$0xff] %v6313_v9  ;;  %v6341_v58 = vsub.f32 %v5255_v25, %v6305_v18  ;;  %v6345_v1 = vsub.f32 %v5271_v31, %v6305_v18  ;;  %v6349_v7 = vsub.f32 %v5287_v37, %v6305_v18 }
 0x26f   :  { %8906 = vst [vmem:[#allocation164_spill] sm:$0xff] %v6317_v42  ;;  %8907 = vst [vmem:[#allocation165_spill] sm:$0xff] %v6321_v59  ;;  %v6353_v13 = vsub.f32 %v5303_v45, %v6305_v18  ;;  %v6357_v19 = vsub.f32 %v5319_v55, %v6305_v18  ;;  %v6361_v25 = vsub.f32 %v8779_v39, %v6305_v18 }
 0x270   :  { %8908 = vst [vmem:[#allocation166_spill] sm:$0xff] %v6325_v5  ;;  %8909 = vst [vmem:[#allocation167_spill] sm:$0xff] %v6337_v52  ;;  %v6365_v31 = vsub.f32 %v8785_v29, %v6305_v18  ;;  %v6369_v37 = vsub.f32 %v8789_v56, %v6305_v18  ;;  %v6373_v45 = vsub.f32 %v8795_v10, %v6305_v18 }
 0x271   :  { %8910 = vst [vmem:[#allocation168_spill] sm:$0xff] %v6353_v13  ;;  %8911 = vst [vmem:[#allocation169_spill] sm:$0xff] %v6357_v19  ;;  %v6377_v55 = vsub.f32 %v8799_v26, %v6305_v18  ;;  %v6381_v39 = vsub.f32 %v8917_v51, %v6305_v18  ;;  %v6385_v29 = vsub.f32 %v8919_v11, %v6305_v18  ;;  %v8957_v51 = vld [vmem:[#allocation77_spill] sm:$0xff]  ;;  %v8959_v11 = vld [vmem:[#allocation79_spill] sm:$0xff] }
 0x272   :  { %8912 = vst [vmem:[#allocation170_spill] sm:$0xff] %v6361_v25  ;;  %8913 = vst [vmem:[#allocation171_spill] sm:$0xff] %v6365_v31  ;;  %v6389_v56 = vsub.f32 %v8921_v15, %v6305_v18  ;;  %v6393_v10 = vsub.f32 %v8923_v4, %v6305_v18  ;;  %v6397_v26 = vsub.f32 %v8925_v22, %v6305_v18  ;;  %v8961_v15 = vld [vmem:[#allocation81_spill] sm:$0xff] }
 0x273   :  { %8914 = vst [vmem:[#allocation172_spill] sm:$0xff] %v6369_v37  ;;  %8915 = vst [vmem:[#allocation173_spill] sm:$0xff] %v6373_v45  ;;  %v6401_v23 = vsub.f32 %v8927_v0, %v6305_v18  ;;  %v6405_v57 = vsub.f32 %v8929_v62, %v6305_v18  ;;  %v6409_v27 = vsub.f32 %v8931_v53, %v6305_v18  ;;  %v8964_v22 = vld [vmem:[#allocation85_spill] sm:$0xff]  ;;  %v8966_v62 = vld [vmem:[#allocation2_spill] sm:$0xff] }
 0x274   :  { %8916 = vst [vmem:[#allocation174_spill] sm:$0xff] %v6377_v55  ;;  %8918 = vst [vmem:[#allocation25_spill] sm:$0xff] %v6381_v39  ;;  %v6413_v50 = vsub.f32 %v8837_v20, %v6305_v18  ;;  %v6417_v61 = vsub.f32 %v8934_v49, %v6305_v18  ;;  %v6421_v14 = vsub.f32 %v8845_v2, %v6305_v18  ;;  %v8967_v49 = vld [vmem:[#allocation3_spill] sm:$0xff] }
 0x275   :  { %8920 = vst [vmem:[#allocation27_spill] sm:$0xff] %v6385_v29  ;;  %8922 = vst [vmem:[#allocation29_spill] sm:$0xff] %v6389_v56  ;;  %v6425_v12 = vsub.f32 %v8848_v24, %v6305_v18  ;;  %v6429_v47 = vsub.f32 %v8852_v35, %v6305_v18  ;;  %v6433_v20 = vsub.f32 %v8854_v54, %v6305_v18 }
 0x276   :  { %8924 = vst [vmem:[#allocation31_spill] sm:$0xff] %v6393_v10  ;;  %8926 = vst [vmem:[#allocation33_spill] sm:$0xff] %v6397_v26  ;;  %v6437_v32 = vsub.f32 %v8858_v63, %v6305_v18  ;;  %v6441_v2 = vsub.f32 %v8860_v36, %v6305_v18  ;;  %v6445_v24 = vsub.f32 %v8864_v21, %v6305_v18 }
 0x277   :  { %8928 = vst [vmem:[#allocation35_spill] sm:$0xff] %v6401_v23  ;;  %8930 = vst [vmem:[#allocation37_spill] sm:$0xff] %v6405_v57  ;;  %v6449_v35 = vsub.f32 %v8866_v17, %v6305_v18  ;;  %v6453_v54 = vsub.f32 %v8870_v28, %v6305_v18  ;;  %v6457_v63 = vsub.f32 %v6264_v34, %v6305_v18 }
 0x278   :  { %8932 = vst [vmem:[#allocation39_spill] sm:$0xff] %v6409_v27  ;;  %8933 = vst [vmem:[#allocation175_spill] sm:$0xff] %v6413_v50  ;;  %v6461_v36 = vsub.f32 %v6276_v16, %v6305_v18  ;;  %v6465_v21 = vsub.f32 %v6287_v48, %v6305_v18  ;;  %v6469_v17 = vsub.f32 %v8872_v33, %v6305_v18 }
 0x279   :  { %8935 = vst [vmem:[#allocation43_spill] sm:$0xff] %v6417_v61  ;;  %8936 = vst [vmem:[#allocation176_spill] sm:$0xff] %v6421_v14  ;;  %v6473_v28 = vsub.f32 %v8876_v6, %v6305_v18  ;;  %v6477_v34 = vsub.f32 %v8878_v30, %v6305_v18  ;;  %v6481_v16 = vsub.f32 %v8882_v43, %v6305_v18 }
 0x27a   :  { %8937 = vst [vmem:[#allocation177_spill] sm:$0xff] %v6425_v12  ;;  %8938 = vst [vmem:[#allocation178_spill] sm:$0xff] %v6429_v47  ;;  %v6485_v48 = vsub.f32 %v8884_v8, %v6305_v18  ;;  %v6489_v33 = vsub.f32 %v8953_v60, %v6305_v18  ;;  %v6493_v6 = vsub.f32 %v8955_v41, %v6305_v18  ;;  %v8968_v41 = vld [vmem:[#allocation4_spill] sm:$0xff] }
 0x27b   :  { %8939 = vst [vmem:[#allocation179_spill] sm:$0xff] %v6433_v20  ;;  %8940 = vst [vmem:[#allocation180_spill] sm:$0xff] %v6437_v32  ;;  %v6497_v30 = vsub.f32 %v8957_v51, %v6305_v18  ;;  %v6501_v43 = vsub.f32 %v8959_v11, %v6305_v18  ;;  %v6505_v8 = vsub.f32 %v8961_v15, %v6305_v18  ;;  %v8969_v11 = vld [vmem:[#allocation5_spill] sm:$0xff]  ;;  %v8970_v15 = vld [vmem:[#allocation6_spill] sm:$0xff] }
 0x27c   :  { %8941 = vst [vmem:[#allocation181_spill] sm:$0xff] %v6441_v2  ;;  %8942 = vst [vmem:[#allocation182_spill] sm:$0xff] %v6445_v24  ;;  %v6509_v4 = vsub.f32 %v8899_v3, %v6305_v18  ;;  %v6513_v0 = vsub.f32 %v8964_v22, %v6305_v18  ;;  %v6517_v53 = vsub.f32 %v8966_v62, %v6305_v18 }
 0x27d   :  { %8943 = vst [vmem:[#allocation183_spill] sm:$0xff] %v6449_v35  ;;  %8944 = vst [vmem:[#allocation184_spill] sm:$0xff] %v6453_v54  ;;  %v6521_v60 = vsub.f32 %v8967_v49, %v6305_v18  ;;  %v6525_v51 = vsub.f32 %v8968_v41, %v6305_v18  ;;  %v6529_v3 = vsub.f32 %v8969_v11, %v6305_v18 }
 0x27e   :  { %8945 = vst [vmem:[#allocation185_spill] sm:$0xff] %v6457_v63  ;;  %8946 = vst [vmem:[#allocation186_spill] sm:$0xff] %v6461_v36  ;;  %v6533_v22 = vsub.f32 %v8970_v15, %v6305_v18  ;;  %v6537_v62 = vsub.f32 %v8971_v44, %v6305_v18  ;;  %v8973_v36 = vld [vmem:[#allocation9_spill] sm:$0xff]  ;;  %v8974_v63 = vld [vmem:[#allocation10_spill] sm:$0xff] }
 0x27f   :  { %8947 = vst [vmem:[#allocation187_spill] sm:$0xff] %v6465_v21  ;;  %8948 = vst [vmem:[#allocation188_spill] sm:$0xff] %v6469_v17  ;;  %v8972_v21 = vld [vmem:[#allocation8_spill] sm:$0xff]  ;;  %v6545_v41 = vsub.f32 %v8973_v36, %v6305_v18  ;;  %v6549_v11 = vsub.f32 %v8974_v63, %v6305_v18 }
 0x280   :  { %8949 = vst [vmem:[#allocation189_spill] sm:$0xff] %v6473_v28  ;;  %8950 = vst [vmem:[#allocation190_spill] sm:$0xff] %v6477_v34  ;;  %v6541_v49 = vsub.f32 %v8972_v21, %v6305_v18 }
 0x281   :  { %8951 = vst [vmem:[#allocation191_spill] sm:$0xff] %v6481_v16  ;;  %8952 = vst [vmem:[#allocation192_spill] sm:$0xff] %v6485_v48 }
 0x282   :  { %8954 = vst [vmem:[#allocation73_spill] sm:$0xff] %v6489_v33  ;;  %8956 = vst [vmem:[#allocation75_spill] sm:$0xff] %v6493_v6  ;;  %v8985_v6 = vld [vmem:[#allocation18_spill] sm:$0xff] }
 0x283   :  { %8958 = vst [vmem:[#allocation77_spill] sm:$0xff] %v6497_v30  ;;  %8960 = vst [vmem:[#allocation79_spill] sm:$0xff] %v6501_v43  ;;  %v8981_v43 = vld [vmem:[#allocation14_spill] sm:$0xff]  ;;  %v8983_v30 = vld [vmem:[#allocation16_spill] sm:$0xff] }
 0x284   :  { %8962 = vst [vmem:[#allocation81_spill] sm:$0xff] %v6505_v8  ;;  %8963 = vst [vmem:[#allocation193_spill] sm:$0xff] %v6509_v4  ;;  %v8977_v4 = vld [vmem:[#allocation12_spill] sm:$0xff]  ;;  %v8979_v8 = vld [vmem:[#allocation13_spill] sm:$0xff]  ;;  %v6565_v36 = vsub.f32 %v8981_v43, %v6305_v18  ;;  %v6569_v63 = vsub.f32 %v8983_v30, %v6305_v18 }
 0x285   :  { %8965 = vst [vmem:[#allocation85_spill] sm:$0xff] %v6513_v0  ;;  %v8975_v0 = vld [vmem:[#allocation11_spill] sm:$0xff]  ;;  %v6557_v44 = vsub.f32 %v8977_v4, %v6305_v18  ;;  %v6561_v21 = vsub.f32 %v8979_v8, %v6305_v18 }
 0x286   :  { %v6553_v15 = vsub.f32 %v8975_v0, %v6305_v18  ;;  %8982 = vst [vmem:[#allocation5_spill] sm:$0xff] %v6565_v36  ;;  %8984 = vst [vmem:[#allocation6_spill] sm:$0xff] %v6569_v63  ;;  %v6573_v0 = vsub.f32 %v8985_v6, %v6305_v18  ;;  %v8993_v36 = vld [vmem:[#allocation26_spill] sm:$0xff]  ;;  %v8995_v63 = vld [vmem:[#allocation28_spill] sm:$0xff] }
 0x287   :  { %8978 = vst [vmem:[#allocation3_spill] sm:$0xff] %v6557_v44  ;;  %8980 = vst [vmem:[#allocation4_spill] sm:$0xff] %v6561_v21  ;;  %v8989_v44 = vld [vmem:[#allocation22_spill] sm:$0xff]  ;;  %v8991_v21 = vld [vmem:[#allocation24_spill] sm:$0xff]  ;;  %v6589_v30 = vsub.f32 %v8993_v36, %v6305_v18  ;;  %v6593_v6 = vsub.f32 %v8995_v63, %v6305_v18 }
 0x288   :  { %8976 = vst [vmem:[#allocation2_spill] sm:$0xff] %v6553_v15  ;;  %8986 = vst [vmem:[#allocation7_spill] sm:$0xff] %v6573_v0  ;;  %v8987_v15 = vld [vmem:[#allocation20_spill] sm:$0xff]  ;;  %v6581_v8 = vsub.f32 %v8989_v44, %v6305_v18  ;;  %v6585_v43 = vsub.f32 %v8991_v21, %v6305_v18  ;;  %v8997_v0 = vld [vmem:[#allocation30_spill] sm:$0xff] }
 0x289   :  { %v6577_v4 = vsub.f32 %v8987_v15, %v6305_v18  ;;  %8994 = vst [vmem:[#allocation11_spill] sm:$0xff] %v6589_v30  ;;  %8996 = vst [vmem:[#allocation12_spill] sm:$0xff] %v6593_v6  ;;  %v6597_v15 = vsub.f32 %v8997_v0, %v6305_v18  ;;  %v9005_v30 = vld [vmem:[#allocation38_spill] sm:$0xff]  ;;  %v9007_v6 = vld [vmem:[#allocation40_spill] sm:$0xff] }
 0x28a   :  { %8990 = vst [vmem:[#allocation9_spill] sm:$0xff] %v6581_v8  ;;  %8992 = vst [vmem:[#allocation10_spill] sm:$0xff] %v6585_v43  ;;  %v9001_v8 = vld [vmem:[#allocation34_spill] sm:$0xff]  ;;  %v9003_v43 = vld [vmem:[#allocation36_spill] sm:$0xff]  ;;  %v6613_v63 = vsub.f32 %v9005_v30, %v6305_v18  ;;  %v6617_v0 = vsub.f32 %v9007_v6, %v6305_v18 }
 0x28b   :  { %8988 = vst [vmem:[#allocation8_spill] sm:$0xff] %v6577_v4  ;;  %8998 = vst [vmem:[#allocation13_spill] sm:$0xff] %v6597_v15  ;;  %v8999_v4 = vld [vmem:[#allocation32_spill] sm:$0xff]  ;;  %v6605_v21 = vsub.f32 %v9001_v8, %v6305_v18  ;;  %v6609_v36 = vsub.f32 %v9003_v43, %v6305_v18  ;;  %v9009_v15 = vld [vmem:[#allocation42_spill] sm:$0xff] }
 0x28c   :  { %v6601_v44 = vsub.f32 %v8999_v4, %v6305_v18  ;;  %9006 = vst [vmem:[#allocation20_spill] sm:$0xff] %v6613_v63  ;;  %9008 = vst [vmem:[#allocation22_spill] sm:$0xff] %v6617_v0  ;;  %v6621_v4 = vsub.f32 %v9009_v15, %v6305_v18  ;;  %v9017_v63 = vld [vmem:[#allocation50_spill] sm:$0xff]  ;;  %v9019_v0 = vld [vmem:[#allocation52_spill] sm:$0xff] }
 0x28d   :  { %9002 = vst [vmem:[#allocation16_spill] sm:$0xff] %v6605_v21  ;;  %9004 = vst [vmem:[#allocation18_spill] sm:$0xff] %v6609_v36  ;;  %v9013_v21 = vld [vmem:[#allocation46_spill] sm:$0xff]  ;;  %v9015_v36 = vld [vmem:[#allocation48_spill] sm:$0xff]  ;;  %v6637_v6 = vsub.f32 %v9017_v63, %v6305_v18  ;;  %v6641_v15 = vsub.f32 %v9019_v0, %v6305_v18 }
 0x28e   :  { %9000 = vst [vmem:[#allocation14_spill] sm:$0xff] %v6601_v44  ;;  %9010 = vst [vmem:[#allocation24_spill] sm:$0xff] %v6621_v4  ;;  %v9011_v44 = vld [vmem:[#allocation44_spill] sm:$0xff]  ;;  %v6629_v43 = vsub.f32 %v9013_v21, %v6305_v18  ;;  %v6633_v30 = vsub.f32 %v9015_v36, %v6305_v18  ;;  %v9021_v4 = vld [vmem:[#allocation54_spill] sm:$0xff] }
 0x28f   :  { %v6625_v8 = vsub.f32 %v9011_v44, %v6305_v18  ;;  %9018 = vst [vmem:[#allocation32_spill] sm:$0xff] %v6637_v6  ;;  %9020 = vst [vmem:[#allocation34_spill] sm:$0xff] %v6641_v15  ;;  %v6645_v44 = vsub.f32 %v9021_v4, %v6305_v18  ;;  %v9029_v6 = vld [vmem:[#allocation62_spill] sm:$0xff]  ;;  %v9031_v15 = vld [vmem:[#allocation64_spill] sm:$0xff] }
 0x290   :  { %9014 = vst [vmem:[#allocation28_spill] sm:$0xff] %v6629_v43  ;;  %9016 = vst [vmem:[#allocation30_spill] sm:$0xff] %v6633_v30  ;;  %v9025_v43 = vld [vmem:[#allocation58_spill] sm:$0xff]  ;;  %v9027_v30 = vld [vmem:[#allocation60_spill] sm:$0xff]  ;;  %v6661_v0 = vsub.f32 %v9029_v6, %v6305_v18  ;;  %v6665_v4 = vsub.f32 %v9031_v15, %v6305_v18 }
 0x291   :  { %9012 = vst [vmem:[#allocation26_spill] sm:$0xff] %v6625_v8  ;;  %9022 = vst [vmem:[#allocation36_spill] sm:$0xff] %v6645_v44  ;;  %v9023_v8 = vld [vmem:[#allocation56_spill] sm:$0xff]  ;;  %v6653_v36 = vsub.f32 %v9025_v43, %v6305_v18  ;;  %v6657_v63 = vsub.f32 %v9027_v30, %v6305_v18  ;;  %v9033_v44 = vld [vmem:[#allocation66_spill] sm:$0xff] }
 0x292   :  { %v6649_v21 = vsub.f32 %v9023_v8, %v6305_v18  ;;  %9030 = vst [vmem:[#allocation44_spill] sm:$0xff] %v6661_v0  ;;  %9032 = vst [vmem:[#allocation46_spill] sm:$0xff] %v6665_v4  ;;  %v6669_v8 = vsub.f32 %v9033_v44, %v6305_v18  ;;  %v9041_v0 = vld [vmem:[#allocation74_spill] sm:$0xff]  ;;  %v9043_v4 = vld [vmem:[#allocation76_spill] sm:$0xff] }
 0x293   :  { %9026 = vst [vmem:[#allocation40_spill] sm:$0xff] %v6653_v36  ;;  %9028 = vst [vmem:[#allocation42_spill] sm:$0xff] %v6657_v63  ;;  %v9037_v36 = vld [vmem:[#allocation70_spill] sm:$0xff]  ;;  %v9039_v63 = vld [vmem:[#allocation72_spill] sm:$0xff]  ;;  %v6685_v15 = vsub.f32 %v9041_v0, %v6305_v18  ;;  %v6689_v44 = vsub.f32 %v9043_v4, %v6305_v18 }
 0x294   :  { %9024 = vst [vmem:[#allocation38_spill] sm:$0xff] %v6649_v21  ;;  %9034 = vst [vmem:[#allocation48_spill] sm:$0xff] %v6669_v8  ;;  %v9035_v21 = vld [vmem:[#allocation68_spill] sm:$0xff]  ;;  %v6677_v30 = vsub.f32 %v9037_v36, %v6305_v18  ;;  %v6681_v6 = vsub.f32 %v9039_v63, %v6305_v18  ;;  %v9045_v8 = vld [vmem:[#allocation78_spill] sm:$0xff] }
 0x295   :  { %v6673_v43 = vsub.f32 %v9035_v21, %v6305_v18  ;;  %9042 = vst [vmem:[#allocation56_spill] sm:$0xff] %v6685_v15  ;;  %9044 = vst [vmem:[#allocation58_spill] sm:$0xff] %v6689_v44  ;;  %v6693_v21 = vsub.f32 %v9045_v8, %v6305_v18  ;;  %v9053_v15 = vld [vmem:[#allocation86_spill] sm:$0xff]  ;;  %v9055_v44 = vld [vmem:[#allocation87_spill] sm:$0xff] }
 0x296   :  { %9038 = vst [vmem:[#allocation52_spill] sm:$0xff] %v6677_v30  ;;  %9040 = vst [vmem:[#allocation54_spill] sm:$0xff] %v6681_v6  ;;  %v9049_v30 = vld [vmem:[#allocation82_spill] sm:$0xff]  ;;  %v9051_v6 = vld [vmem:[#allocation84_spill] sm:$0xff]  ;;  %v6709_v4 = vsub.f32 %v9053_v15, %v6305_v18  ;;  %v6713_v8 = vsub.f32 %v9055_v44, %v6305_v18 }
 0x297   :  { %9036 = vst [vmem:[#allocation50_spill] sm:$0xff] %v6673_v43  ;;  %9046 = vst [vmem:[#allocation60_spill] sm:$0xff] %v6693_v21  ;;  %v9047_v43 = vld [vmem:[#allocation80_spill] sm:$0xff]  ;;  %v6701_v63 = vsub.f32 %v9049_v30, %v6305_v18  ;;  %v6705_v0 = vsub.f32 %v9051_v6, %v6305_v18  ;;  %v9057_v21 = vld [vmem:[#allocation89_spill] sm:$0xff] }
 0x298   :  { %v6697_v36 = vsub.f32 %v9047_v43, %v6305_v18  ;;  %9054 = vst [vmem:[#allocation68_spill] sm:$0xff] %v6709_v4  ;;  %9056 = vst [vmem:[#allocation70_spill] sm:$0xff] %v6713_v8  ;;  %v6717_v43 = vsub.f32 %v9057_v21, %v6305_v18  ;;  %v9065_v4 = vld [vmem:[#allocation97_spill] sm:$0xff]  ;;  %v9067_v8 = vld [vmem:[#allocation99_spill] sm:$0xff] }
 0x299   :  { %9050 = vst [vmem:[#allocation64_spill] sm:$0xff] %v6701_v63  ;;  %9052 = vst [vmem:[#allocation66_spill] sm:$0xff] %v6705_v0  ;;  %v9061_v63 = vld [vmem:[#allocation93_spill] sm:$0xff]  ;;  %v9063_v0 = vld [vmem:[#allocation95_spill] sm:$0xff]  ;;  %v6733_v44 = vsub.f32 %v9065_v4, %v6305_v18  ;;  %v6737_v21 = vsub.f32 %v9067_v8, %v6305_v18 }
 0x29a   :  { %9048 = vst [vmem:[#allocation62_spill] sm:$0xff] %v6697_v36  ;;  %9058 = vst [vmem:[#allocation72_spill] sm:$0xff] %v6717_v43  ;;  %v9059_v36 = vld [vmem:[#allocation91_spill] sm:$0xff]  ;;  %v6725_v6 = vsub.f32 %v9061_v63, %v6305_v18  ;;  %v6729_v15 = vsub.f32 %v9063_v0, %v6305_v18  ;;  %v9069_v43 = vld [vmem:[#allocation101_spill] sm:$0xff] }
 0x29b   :  { %v6721_v30 = vsub.f32 %v9059_v36, %v6305_v18  ;;  %9066 = vst [vmem:[#allocation80_spill] sm:$0xff] %v6733_v44  ;;  %9068 = vst [vmem:[#allocation82_spill] sm:$0xff] %v6737_v21  ;;  %v6741_v36 = vsub.f32 %v9069_v43, %v6305_v18  ;;  %v9077_v44 = vld [vmem:[#allocation109_spill] sm:$0xff]  ;;  %v9079_v21 = vld [vmem:[#allocation111_spill] sm:$0xff] }
 0x29c   :  { %9062 = vst [vmem:[#allocation76_spill] sm:$0xff] %v6725_v6  ;;  %9064 = vst [vmem:[#allocation78_spill] sm:$0xff] %v6729_v15  ;;  %v9073_v6 = vld [vmem:[#allocation105_spill] sm:$0xff]  ;;  %v9075_v15 = vld [vmem:[#allocation107_spill] sm:$0xff]  ;;  %v6757_v8 = vsub.f32 %v9077_v44, %v6305_v18  ;;  %v6761_v43 = vsub.f32 %v9079_v21, %v6305_v18 }
 0x29d   :  { %9060 = vst [vmem:[#allocation74_spill] sm:$0xff] %v6721_v30  ;;  %9070 = vst [vmem:[#allocation84_spill] sm:$0xff] %v6741_v36  ;;  %v9071_v30 = vld [vmem:[#allocation103_spill] sm:$0xff]  ;;  %v6749_v0 = vsub.f32 %v9073_v6, %v6305_v18  ;;  %v6753_v4 = vsub.f32 %v9075_v15, %v6305_v18  ;;  %v9081_v36 = vld [vmem:[#allocation113_spill] sm:$0xff] }
 0x29e   :  { %v6745_v63 = vsub.f32 %v9071_v30, %v6305_v18  ;;  %9078 = vst [vmem:[#allocation91_spill] sm:$0xff] %v6757_v8  ;;  %9080 = vst [vmem:[#allocation93_spill] sm:$0xff] %v6761_v43  ;;  %v6765_v30 = vsub.f32 %v9081_v36, %v6305_v18  ;;  %v9089_v8 = vld [vmem:[#allocation121_spill] sm:$0xff]  ;;  %v9091_v43 = vld [vmem:[#allocation123_spill] sm:$0xff] }
 0x29f   :  { %9074 = vst [vmem:[#allocation87_spill] sm:$0xff] %v6749_v0  ;;  %9076 = vst [vmem:[#allocation89_spill] sm:$0xff] %v6753_v4  ;;  %v9085_v0 = vld [vmem:[#allocation117_spill] sm:$0xff]  ;;  %v9087_v4 = vld [vmem:[#allocation119_spill] sm:$0xff]  ;;  %v6781_v21 = vsub.f32 %v9089_v8, %v6305_v18  ;;  %v6785_v36 = vsub.f32 %v9091_v43, %v6305_v18 }
 0x2a0   :  { %9072 = vst [vmem:[#allocation86_spill] sm:$0xff] %v6745_v63  ;;  %9082 = vst [vmem:[#allocation95_spill] sm:$0xff] %v6765_v30  ;;  %v9083_v63 = vld [vmem:[#allocation115_spill] sm:$0xff]  ;;  %v6773_v15 = vsub.f32 %v9085_v0, %v6305_v18  ;;  %v6777_v44 = vsub.f32 %v9087_v4, %v6305_v18  ;;  %v9093_v30 = vld [vmem:[#allocation125_spill] sm:$0xff]  ;;  %v2469_v4 = vmul.f32 %v6309_v38, %v6309_v38 }
 0x2a1   :  { %v6769_v6 = vsub.f32 %v9083_v63, %v6305_v18  ;;  %9090 = vst [vmem:[#allocation103_spill] sm:$0xff] %v6781_v21  ;;  %9092 = vst [vmem:[#allocation105_spill] sm:$0xff] %v6785_v36  ;;  %v6789_v63 = vsub.f32 %v9093_v30, %v6305_v18  ;;  %v9097_v8 = vld [vmem:[#allocation129_spill] sm:$0xff]  ;;  %v9099_v43 = vld [vmem:[#allocation131_spill] sm:$0xff] }
 0x2a2   :  { %9086 = vst [vmem:[#allocation99_spill] sm:$0xff] %v6773_v15  ;;  %9088 = vst [vmem:[#allocation101_spill] sm:$0xff] %v6777_v44  ;;  %v2470_v44 = vmul.f32 %v6313_v9, %v6313_v9  ;;  %v6801_v21 = vsub.f32 %v9097_v8, %v6305_v18  ;;  %v6805_v36 = vsub.f32 %v9099_v43, %v6305_v18  ;;  %v9101_v30 = vld [vmem:[#allocation133_spill] sm:$0xff]  ;;  %v9107_v9 = vld [vmem:[#allocation139_spill] sm:$0xff] }
 0x2a3   :  { %9084 = vst [vmem:[#allocation97_spill] sm:$0xff] %v6769_v6  ;;  %9094 = vst [vmem:[#allocation107_spill] sm:$0xff] %v6789_v63  ;;  %v9095_v6 = vld [vmem:[#allocation127_spill] sm:$0xff]  ;;  %v6809_v63 = vsub.f32 %v9101_v30, %v6305_v18  ;;  %v9105_v38 = vld [vmem:[#allocation137_spill] sm:$0xff]  ;;  %v6821_v8 = vsub.f32 %v9107_v9, %v6305_v18 }
 0x2a4   :  { %v6793_v0 = vsub.f32 %v9095_v6, %v6305_v18  ;;  %9098 = vst [vmem:[#allocation111_spill] sm:$0xff] %v6801_v21  ;;  %9100 = vst [vmem:[#allocation113_spill] sm:$0xff] %v6805_v36  ;;  %v9103_v6 = vld [vmem:[#allocation135_spill] sm:$0xff]  ;;  %v6817_v15 = vsub.f32 %v9105_v38, %v6305_v18  ;;  %v9109_v21 = vld [vmem:[#allocation141_spill] sm:$0xff] }
 0x2a5   :  { %9102 = vst [vmem:[#allocation115_spill] sm:$0xff] %v6809_v63  ;;  %9108 = vst [vmem:[#allocation121_spill] sm:$0xff] %v6821_v8  ;;  %v6825_v43 = vsub.f32 %v9109_v21, %v6305_v18  ;;  %v9111_v36 = vld [vmem:[#allocation143_spill] sm:$0xff]  ;;  %v9113_v63 = vld [vmem:[#allocation145_spill] sm:$0xff] }
 0x2a6   :  { %9096 = vst [vmem:[#allocation109_spill] sm:$0xff] %v6793_v0  ;;  %v6813_v0 = vsub.f32 %v9103_v6, %v6305_v18  ;;  %9106 = vst [vmem:[#allocation119_spill] sm:$0xff] %v6817_v15  ;;  %v6829_v30 = vsub.f32 %v9111_v36, %v6305_v18  ;;  %v6833_v6 = vsub.f32 %v9113_v63, %v6305_v18  ;;  %v9117_v15 = vld [vmem:[#allocation149_spill] sm:$0xff]  ;;  %v9119_v8 = vld [vmem:[#allocation15_spill] sm:$0xff] }
 0x2a7   :  { %9110 = vst [vmem:[#allocation123_spill] sm:$0xff] %v6825_v43  ;;  %v6841_v9 = vsub.f32 %v9117_v15, %v6305_v18  ;;  %v6845_v21 = vsub.f32 %v9119_v8, %v6305_v18  ;;  %v9121_v43 = vld [vmem:[#allocation17_spill] sm:$0xff] }
 0x2a8   :  { %9104 = vst [vmem:[#allocation117_spill] sm:$0xff] %v6813_v0  ;;  %9112 = vst [vmem:[#allocation125_spill] sm:$0xff] %v6829_v30  ;;  %v9115_v0 = vld [vmem:[#allocation147_spill] sm:$0xff]  ;;  %v6849_v36 = vsub.f32 %v9121_v43, %v6305_v18  ;;  %v9123_v30 = vld [vmem:[#allocation21_spill] sm:$0xff] }
 0x2a9   :  { %9114 = vst [vmem:[#allocation127_spill] sm:$0xff] %v6833_v6  ;;  %v6837_v38 = vsub.f32 %v9115_v0, %v6305_v18  ;;  %9118 = vst [vmem:[#allocation131_spill] sm:$0xff] %v6841_v9  ;;  %v6853_v63 = vsub.f32 %v9123_v30, %v6305_v18  ;;  %v2471_v0 = vmul.f32 %v6317_v42, %v6317_v42  ;;  %v9125_v6 = vld [vmem:[#allocation152_spill] sm:$0xff]  ;;  %v9127_v9 = vld [vmem:[#allocation154_spill] sm:$0xff] }
 0x2aa   :  { %9120 = vst [vmem:[#allocation133_spill] sm:$0xff] %v6845_v21  ;;  %9122 = vst [vmem:[#allocation135_spill] sm:$0xff] %v6849_v36  ;;  %v6859_v15 = vsub.f32 %v9125_v6, %v6305_v18  ;;  %v6863_v8 = vsub.f32 %v9127_v9, %v6305_v18  ;;  %v9129_v21 = vld [vmem:[#allocation156_spill] sm:$0xff]  ;;  %v9131_v36 = vld [vmem:[#allocation158_spill] sm:$0xff]  ;;  %v2472_v6 = vmul.f32 %v6321_v59, %v6321_v59 }
 0x2ab   :  { %9116 = vst [vmem:[#allocation129_spill] sm:$0xff] %v6837_v38  ;;  %9124 = vst [vmem:[#allocation137_spill] sm:$0xff] %v6853_v63  ;;  %v2518_v38 = vadd.f32 %v2470_v44, %v2469_v4  ;;  %v6867_v43 = vsub.f32 %v9129_v21, %v6305_v18  ;;  %v6871_v30 = vsub.f32 %v9131_v36, %v6305_v18  ;;  %v9133_v63 = vld [vmem:[#allocation41_spill] sm:$0xff]  ;;  %v9149_v59 = vld [vmem:[#allocation100_spill] sm:$0xff] }
 0x2ac   :  { %9126 = vst [vmem:[#allocation139_spill] sm:$0xff] %v6859_v15  ;;  %9128 = vst [vmem:[#allocation141_spill] sm:$0xff] %v6863_v8  ;;  %v6875_v42 = vsub.f32 %v9133_v63, %v6305_v18  ;;  %v9135_v44 = vld [vmem:[#allocation45_spill] sm:$0xff]  ;;  %v9137_v8 = vld [vmem:[#allocation88_spill] sm:$0xff] }
 0x2ad   :  { %9130 = vst [vmem:[#allocation143_spill] sm:$0xff] %v6867_v43  ;;  %9132 = vst [vmem:[#allocation145_spill] sm:$0xff] %v6871_v30  ;;  %v6879_v4 = vsub.f32 %v9135_v44, %v6305_v18  ;;  %v2519_v9 = vadd.f32 %v2518_v38, %v2471_v0  ;;  %v6885_v21 = vsub.f32 %v9137_v8, %v6305_v18  ;;  %v9139_v43 = vld [vmem:[#allocation90_spill] sm:$0xff]  ;;  %v9141_v30 = vld [vmem:[#allocation92_spill] sm:$0xff] }
 0x2ae   :  { %9134 = vst [vmem:[#allocation147_spill] sm:$0xff] %v6875_v42  ;;  %v6889_v36 = vsub.f32 %v9139_v43, %v6305_v18  ;;  %v6893_v63 = vsub.f32 %v9141_v30, %v6305_v18  ;;  %v9143_v15 = vld [vmem:[#allocation94_spill] sm:$0xff]  ;;  %v2473_v8 = vmul.f32 %v6325_v5, %v6325_v5  ;;  %v6911_v30 = vsub.f32 %v9149_v59, %v6305_v18 }
 0x2af   :  { %9136 = vst [vmem:[#allocation149_spill] sm:$0xff] %v6879_v4  ;;  %9138 = vst [vmem:[#allocation15_spill] sm:$0xff] %v6885_v21  ;;  %v6897_v44 = vsub.f32 %v9143_v15, %v6305_v18  ;;  %v9145_v4 = vld [vmem:[#allocation96_spill] sm:$0xff]  ;;  %v9147_v38 = vld [vmem:[#allocation98_spill] sm:$0xff]  ;;  %v2520_v43 = vadd.f32 %v2519_v9, %v2472_v6  ;;  %v2474_v9 = vmul.f32 %v6329_v40, %v6329_v40 }
 0x2b0   :  { %9140 = vst [vmem:[#allocation17_spill] sm:$0xff] %v6889_v36  ;;  %9142 = vst [vmem:[#allocation21_spill] sm:$0xff] %v6893_v63  ;;  %v6901_v42 = vsub.f32 %v9145_v4, %v6305_v18  ;;  %v6905_v0 = vsub.f32 %v9147_v38, %v6305_v18  ;;  %v9151_v63 = vld [vmem:[#allocation102_spill] sm:$0xff] }
 0x2b1   :  { %9144 = vst [vmem:[#allocation152_spill] sm:$0xff] %v6897_v44  ;;  %9150 = vst [vmem:[#allocation158_spill] sm:$0xff] %v6911_v30  ;;  %v6915_v15 = vsub.f32 %v9151_v63, %v6305_v18  ;;  %v9153_v44 = vld [vmem:[#allocation104_spill] sm:$0xff]  ;;  %v9159_v6 = vld [vmem:[#allocation110_spill] sm:$0xff]  ;;  %v2521_v63 = vadd.f32 %v2520_v43, %v2473_v8 }
 0x2b2   :  { %9146 = vst [vmem:[#allocation154_spill] sm:$0xff] %v6901_v42  ;;  %9148 = vst [vmem:[#allocation156_spill] sm:$0xff] %v6905_v0  ;;  %v6919_v4 = vsub.f32 %v9153_v44, %v6305_v18  ;;  %v9155_v42 = vld [vmem:[#allocation106_spill] sm:$0xff]  ;;  %v9157_v0 = vld [vmem:[#allocation108_spill] sm:$0xff]  ;;  %v6931_v59 = vsub.f32 %v9159_v6, %v6305_v18 }
 0x2b3   :  { %9152 = vst [vmem:[#allocation41_spill] sm:$0xff] %v6915_v15  ;;  %v6923_v38 = vsub.f32 %v9155_v42, %v6305_v18  ;;  %v6927_v5 = vsub.f32 %v9157_v0, %v6305_v18  ;;  %v9161_v15 = vld [vmem:[#allocation112_spill] sm:$0xff]  ;;  %v9171_v8 = vld [vmem:[#allocation122_spill] sm:$0xff] }
 0x2b4   :  { %9154 = vst [vmem:[#allocation45_spill] sm:$0xff] %v6919_v4  ;;  %9160 = vst [vmem:[#allocation92_spill] sm:$0xff] %v6931_v59  ;;  %v6937_v44 = vsub.f32 %v9161_v15, %v6305_v18  ;;  %v9163_v4 = vld [vmem:[#allocation114_spill] sm:$0xff]  ;;  %v9169_v59 = vld [vmem:[#allocation120_spill] sm:$0xff]  ;;  %v6957_v43 = vsub.f32 %v9171_v8, %v6305_v18  ;;  %v2475_v15 = vmul.f32 %v6333_v46, %v6333_v46 }
 0x2b5   :  { %9156 = vst [vmem:[#allocation88_spill] sm:$0xff] %v6923_v38  ;;  %9158 = vst [vmem:[#allocation90_spill] sm:$0xff] %v6927_v5  ;;  %v6941_v42 = vsub.f32 %v9163_v4, %v6305_v18  ;;  %v9165_v38 = vld [vmem:[#allocation116_spill] sm:$0xff]  ;;  %v9167_v5 = vld [vmem:[#allocation118_spill] sm:$0xff]  ;;  %v6953_v30 = vsub.f32 %v9169_v59, %v6305_v18  ;;  %v2522_v4 = vadd.f32 %v2521_v63, %v2474_v9 }
 0x2b6   :  { %9162 = vst [vmem:[#allocation94_spill] sm:$0xff] %v6937_v44  ;;  %v6945_v0 = vsub.f32 %v9165_v38, %v6305_v18  ;;  %v6949_v6 = vsub.f32 %v9167_v5, %v6305_v18  ;;  %9172 = vst [vmem:[#allocation104_spill] sm:$0xff] %v6957_v43  ;;  %v2476_v43 = vmul.f32 %v6337_v52, %v6337_v52  ;;  %v9189_v52 = vld [vmem:[#allocation140_spill] sm:$0xff]  ;;  %v9191_v44 = vld [vmem:[#allocation142_spill] sm:$0xff] }
 0x2b7   :  { %9164 = vst [vmem:[#allocation96_spill] sm:$0xff] %v6941_v42  ;;  %9170 = vst [vmem:[#allocation102_spill] sm:$0xff] %v6953_v30  ;;  %v9173_v42 = vld [vmem:[#allocation124_spill] sm:$0xff]  ;;  %v9179_v30 = vld [vmem:[#allocation130_spill] sm:$0xff]  ;;  %v2523_v9 = vadd.f32 %v2522_v4, %v2475_v15  ;;  %v2572_v63 = vmul.f32 %v6517_v53, %v6517_v53 }
 0x2b8   :  { %9166 = vst [vmem:[#allocation98_spill] sm:$0xff] %v6945_v0  ;;  %9168 = vst [vmem:[#allocation100_spill] sm:$0xff] %v6949_v6  ;;  %v6963_v38 = vsub.f32 %v9173_v42, %v6305_v18  ;;  %v9175_v0 = vld [vmem:[#allocation126_spill] sm:$0xff]  ;;  %v9177_v6 = vld [vmem:[#allocation128_spill] sm:$0xff]  ;;  %v6975_v8 = vsub.f32 %v9179_v30, %v6305_v18  ;;  %v2573_v42 = vmul.f32 %v6521_v60, %v6521_v60 }
 0x2b9   :  { %v6967_v5 = vsub.f32 %v9175_v0, %v6305_v18  ;;  %v6971_v59 = vsub.f32 %v9177_v6, %v6305_v18  ;;  %v9181_v0 = vld [vmem:[#allocation132_spill] sm:$0xff]  ;;  %v9183_v6 = vld [vmem:[#allocation134_spill] sm:$0xff] }
 0x2ba   :  { %9174 = vst [vmem:[#allocation106_spill] sm:$0xff] %v6963_v38  ;;  %9180 = vst [vmem:[#allocation112_spill] sm:$0xff] %v6975_v8  ;;  %v9185_v30 = vld [vmem:[#allocation136_spill] sm:$0xff]  ;;  %v9187_v15 = vld [vmem:[#allocation138_spill] sm:$0xff]  ;;  %v7001_v38 = vsub.f32 %v9189_v52, %v6305_v18  ;;  %v2478_v52 = vmul.f32 %v6345_v1, %v6345_v1 }
 0x2bb   :  { %9176 = vst [vmem:[#allocation108_spill] sm:$0xff] %v6967_v5  ;;  %9178 = vst [vmem:[#allocation110_spill] sm:$0xff] %v6971_v59  ;;  %v6985_v5 = vsub.f32 %v9181_v0, %v6305_v18  ;;  %v6989_v59 = vsub.f32 %v9183_v6, %v6305_v18  ;;  %v6993_v8 = vsub.f32 %v9185_v30, %v6305_v18 }
 0x2bc   :  { %v6997_v4 = vsub.f32 %v9187_v15, %v6305_v18  ;;  %9190 = vst [vmem:[#allocation122_spill] sm:$0xff] %v7001_v38  ;;  %v7005_v0 = vsub.f32 %v9191_v44, %v6305_v18  ;;  %v2477_v6 = vmul.f32 %v6341_v58, %v6341_v58  ;;  %v2479_v38 = vmul.f32 %v6349_v7, %v6349_v7 }
 0x2bd   :  { %9182 = vst [vmem:[#allocation114_spill] sm:$0xff] %v6985_v5  ;;  %9184 = vst [vmem:[#allocation116_spill] sm:$0xff] %v6989_v59  ;;  %v2524_v59 = vadd.f32 %v2523_v9, %v2476_v43  ;;  %v9193_v5 = vld [vmem:[#allocation144_spill] sm:$0xff]  ;;  %v2480_v44 = vmul.f32 %v6353_v13, %v6353_v13  ;;  %v2574_v43 = vmul.f32 %v6525_v51, %v6525_v51 }
 0x2be   :  { %9186 = vst [vmem:[#allocation118_spill] sm:$0xff] %v6993_v8  ;;  %9188 = vst [vmem:[#allocation120_spill] sm:$0xff] %v6997_v4  ;;  %v7011_v30 = vsub.f32 %v9193_v5, %v6305_v18  ;;  %v9195_v8 = vld [vmem:[#allocation146_spill] sm:$0xff]  ;;  %v2621_v9 = vadd.f32 %v2573_v42, %v2572_v63  ;;  %v2481_v5 = vmul.f32 %v6357_v19, %v6357_v19 }
 0x2bf   :  { %9192 = vst [vmem:[#allocation124_spill] sm:$0xff] %v7005_v0  ;;  %v7015_v15 = vsub.f32 %v9195_v8, %v6305_v18  ;;  %v2525_v0 = vadd.f32 %v2524_v59, %v2477_v6  ;;  %v2482_v8 = vmul.f32 %v6361_v25, %v6361_v25  ;;  %v2485_v18 = vmul.f32 %v6373_v45, %v6373_v45  ;;  %v9223_v45 = vld [vmem:[#allocation8_spill] sm:$0xff]  ;;  %v9225_v25 = vld [vmem:[#allocation10_spill] sm:$0xff] }
 0x2c0   :  { %9194 = vst [vmem:[#allocation126_spill] sm:$0xff] %v7011_v30  ;;  %v2484_v30 = vmul.f32 %v6369_v37, %v6369_v37  ;;  %v2575_v6 = vmul.f32 %v6529_v3, %v6529_v3  ;;  %v2622_v63 = vadd.f32 %v2621_v9, %v2574_v43  ;;  %v2486_v42 = vmul.f32 %v6377_v55, %v6377_v55  ;;  %v9222_v55 = vld [vmem:[#allocation74_spill] sm:$0xff] }
 0x2c1   :  { %9196 = vst [vmem:[#allocation128_spill] sm:$0xff] %v7015_v15  ;;  %v2483_v15 = vmul.f32 %v6365_v31, %v6365_v31  ;;  %v2526_v59 = vadd.f32 %v2525_v0, %v2478_v52  ;;  %v7041_v4 = vmul.f32 %v6381_v39, %v6381_v39  ;;  %v7045_v31 = vmul.f32 %v6385_v29, %v6385_v29 }
 0x2c2   :  { %v7049_v37 = vmul.f32 %v6389_v56, %v6389_v56  ;;  %v7053_v0 = vmul.f32 %v6393_v10, %v6393_v10  ;;  %v2576_v43 = vmul.f32 %v6533_v22, %v6533_v22  ;;  %v2623_v9 = vadd.f32 %v2622_v63, %v2575_v6 }
 0x2c3   :  { %v2527_v52 = vadd.f32 %v2526_v59, %v2479_v38  ;;  %v7059_v39 = vmul.f32 %v6397_v26, %v6397_v26  ;;  %v7063_v29 = vmul.f32 %v6401_v23, %v6401_v23  ;;  %v7067_v56 = vmul.f32 %v6405_v57, %v6405_v57 }
 0x2c4   :  { %v7071_v10 = vmul.f32 %v6409_v27, %v6409_v27  ;;  %v7075_v38 = vmul.f32 %v6413_v50, %v6413_v50  ;;  %v2577_v6 = vmul.f32 %v6537_v62, %v6537_v62  ;;  %v2624_v63 = vadd.f32 %v2623_v9, %v2576_v43  ;;  %v9217_v27 = vld [vmem:[#allocation3_spill] sm:$0xff] }
 0x2c5   :  { %v2528_v59 = vadd.f32 %v2527_v52, %v2480_v44  ;;  %v7081_v23 = vmul.f32 %v6417_v61, %v6417_v61  ;;  %v7085_v57 = vmul.f32 %v6421_v14, %v6421_v14  ;;  %v7089_v26 = vmul.f32 %v6425_v12, %v6425_v12  ;;  %v9206_v61 = vld [vmem:[#allocation70_spill] sm:$0xff] }
 0x2c6   :  { %v7093_v50 = vmul.f32 %v6429_v47, %v6429_v47  ;;  %v7097_v44 = vmul.f32 %v6433_v20, %v6433_v20  ;;  %v2578_v43 = vmul.f32 %v6541_v49, %v6541_v49  ;;  %v2625_v9 = vadd.f32 %v2624_v63, %v2577_v6 }
 0x2c7   :  { %v2529_v52 = vadd.f32 %v2528_v59, %v2481_v5  ;;  %v7103_v14 = vmul.f32 %v6437_v32, %v6437_v32  ;;  %v7107_v12 = vmul.f32 %v6441_v2, %v6441_v2  ;;  %v7111_v47 = vmul.f32 %v6445_v24, %v6445_v24 }
 0x2c8   :  { %v7115_v20 = vmul.f32 %v6449_v35, %v6449_v35  ;;  %v7119_v5 = vmul.f32 %v6453_v54, %v6453_v54  ;;  %v2579_v6 = vmul.f32 %v6545_v41, %v6545_v41  ;;  %v2626_v63 = vadd.f32 %v2625_v9, %v2578_v43 }
 0x2c9   :  { %v2530_v59 = vadd.f32 %v2529_v52, %v2482_v8  ;;  %v7125_v2 = vmul.f32 %v6469_v17, %v6469_v17  ;;  %v7129_v24 = vmul.f32 %v6473_v28, %v6473_v28  ;;  %v7133_v35 = vmul.f32 %v6477_v34, %v6477_v34  ;;  %v9204_v17 = vld [vmem:[#allocation75_spill] sm:$0xff] }
 0x2ca   :  { %9197 = vst [vmem:[#allocation130_spill] sm:$0xff] %v7119_v5  ;;  %v7137_v54 = vmul.f32 %v6481_v16, %v6481_v16  ;;  %v7141_v8 = vmul.f32 %v6485_v48, %v6485_v48  ;;  %v2580_v43 = vmul.f32 %v6549_v11, %v6549_v11  ;;  %v2627_v9 = vadd.f32 %v2626_v63, %v2579_v6  ;;  %v9210_v6 = vld [vmem:[#allocation2_spill] sm:$0xff] }
 0x2cb   :  { %9198 = vst [vmem:[#allocation132_spill] sm:$0xff] %v7125_v2  ;;  %9199 = vst [vmem:[#allocation134_spill] sm:$0xff] %v7129_v24  ;;  %v2531_v52 = vadd.f32 %v2530_v59, %v2483_v15  ;;  %v7147_v28 = vmul.f32 %v6489_v33, %v6489_v33  ;;  %v7151_v32 = vmul.f32 %v9204_v17, %v9204_v17  ;;  %v9213_v17 = vld [vmem:[#allocation81_spill] sm:$0xff] }
 0x2cc   :  { %9200 = vst [vmem:[#allocation136_spill] sm:$0xff] %v7133_v35  ;;  %9201 = vst [vmem:[#allocation138_spill] sm:$0xff] %v7137_v54  ;;  %v2676_v16 = vmul.f32 %v9206_v61, %v9206_v61  ;;  %v9207_v54 = vld [vmem:[#allocation72_spill] sm:$0xff]  ;;  %v2581_v63 = vmul.f32 %v9210_v6, %v9210_v6  ;;  %v2628_v33 = vadd.f32 %v2627_v9, %v2580_v43  ;;  %v9215_v61 = vld [vmem:[#allocation193_spill] sm:$0xff] }
 0x2cd   :  { %9202 = vst [vmem:[#allocation140_spill] sm:$0xff] %v7141_v8  ;;  %9203 = vst [vmem:[#allocation142_spill] sm:$0xff] %v7147_v28  ;;  %v2677_v48 = vmul.f32 %v9207_v54, %v9207_v54  ;;  %v9208_v8 = vld [vmem:[#allocation77_spill] sm:$0xff]  ;;  %v2532_v59 = vadd.f32 %v2531_v52, %v2484_v30  ;;  %v9211_v28 = vld [vmem:[#allocation79_spill] sm:$0xff]  ;;  %v7173_v54 = vmul.f32 %v9215_v61, %v9215_v61 }
 0x2ce   :  { %9205 = vst [vmem:[#allocation144_spill] sm:$0xff] %v7151_v32  ;;  %v7159_v15 = vmul.f32 %v9208_v8, %v9208_v8  ;;  %v7165_v35 = vmul.f32 %v9211_v28, %v9211_v28  ;;  %v7169_v32 = vmul.f32 %v9213_v17, %v9213_v17  ;;  %v2582_v8 = vmul.f32 %v9217_v27, %v9217_v27  ;;  %v9218_v52 = vld [vmem:[#allocation4_spill] sm:$0xff]  ;;  %v9219_v43 = vld [vmem:[#allocation5_spill] sm:$0xff]  ;;  %v9221_v17 = vld [vmem:[#allocation7_spill] sm:$0xff] }
 0x2cf   :  { %9216 = vst [vmem:[#allocation195_spill] sm:$0xff] %v7173_v54  ;;  %v2533_v30 = vadd.f32 %v2532_v59, %v2485_v18  ;;  %v2584_v9 = vmul.f32 %v9219_v43, %v9219_v43  ;;  %v2629_v28 = vadd.f32 %v2628_v33, %v2581_v63  ;;  %v2678_v61 = vmul.f32 %v9222_v55, %v9222_v55  ;;  %v9224_v59 = vld [vmem:[#allocation9_spill] sm:$0xff]  ;;  %v9226_v63 = vld [vmem:[#allocation11_spill] sm:$0xff]  ;;  %v9227_v43 = vld [vmem:[#allocation76_spill] sm:$0xff] }
 0x2d0   :  { %9209 = vst [vmem:[#allocation146_spill] sm:$0xff] %v7159_v15  ;;  %9212 = vst [vmem:[#allocation2_spill] sm:$0xff] %v7165_v35  ;;  %v2583_v15 = vmul.f32 %v9218_v52, %v9218_v52  ;;  %v9220_v35 = vld [vmem:[#allocation6_spill] sm:$0xff]  ;;  %v2725_v54 = vadd.f32 %v2677_v48, %v2676_v16  ;;  %v2587_v18 = vmul.f32 %v9223_v45, %v9223_v45  ;;  %v9228_v48 = vld [vmem:[#allocation12_spill] sm:$0xff] }
 0x2d1   :  { %9214 = vst [vmem:[#allocation194_spill] sm:$0xff] %v7169_v32  ;;  %v2585_v24 = vmul.f32 %v9220_v35, %v9220_v35  ;;  %v2586_v32 = vmul.f32 %v9221_v17, %v9221_v17  ;;  %v2534_v2 = vadd.f32 %v2533_v30, %v2486_v42  ;;  %v2588_v34 = vmul.f32 %v9224_v59, %v9224_v59  ;;  %v9229_v30 = vld [vmem:[#allocation13_spill] sm:$0xff] }
 0x2d2   :  { %v2630_v5 = vadd.f32 %v2629_v28, %v2582_v8  ;;  %v2589_v33 = vmul.f32 %v9225_v25, %v9225_v25  ;;  %v2590_v35 = vmul.f32 %v9226_v63, %v9226_v63  ;;  %v2679_v17 = vmul.f32 %v9227_v43, %v9227_v43  ;;  %v9230_v8 = vld [vmem:[#allocation14_spill] sm:$0xff]  ;;  %v9231_v63 = vld [vmem:[#allocation16_spill] sm:$0xff] }
 0x2d3   :  { %v2726_v19 = vadd.f32 %v2725_v54, %v2678_v61  ;;  %v2535_v16 = vadd.f32 %v2534_v2, %v7041_v4  ;;  %v7200_v42 = vmul.f32 %v9228_v48, %v9228_v48  ;;  %v7204_v55 = vmul.f32 %v9229_v30, %v9229_v30  ;;  %v9232_v61 = vld [vmem:[#allocation78_spill] sm:$0xff]  ;;  %v9234_v30 = vld [vmem:[#allocation20_spill] sm:$0xff] }
 0x2d4   :  { %v2631_v28 = vadd.f32 %v2630_v5, %v2583_v15  ;;  %v7208_v25 = vmul.f32 %v9230_v8, %v9230_v8  ;;  %v7212_v59 = vmul.f32 %v9231_v63, %v9231_v63  ;;  %v2680_v2 = vmul.f32 %v9232_v61, %v9232_v61  ;;  %v9233_v43 = vld [vmem:[#allocation18_spill] sm:$0xff]  ;;  %v9236_v63 = vld [vmem:[#allocation24_spill] sm:$0xff] }
 0x2d5   :  { %v2727_v54 = vadd.f32 %v2726_v19, %v2679_v17  ;;  %v2536_v4 = vadd.f32 %v2535_v16, %v7045_v31  ;;  %v7219_v48 = vmul.f32 %v9233_v43, %v9233_v43  ;;  %v7223_v5 = vmul.f32 %v9234_v30, %v9234_v30  ;;  %v9235_v8 = vld [vmem:[#allocation22_spill] sm:$0xff]  ;;  %v9237_v19 = vld [vmem:[#allocation80_spill] sm:$0xff] }
 0x2d6   :  { %v2632_v15 = vadd.f32 %v2631_v28, %v2584_v9  ;;  %v7227_v45 = vmul.f32 %v9235_v8, %v9235_v8  ;;  %v7231_v52 = vmul.f32 %v9236_v63, %v9236_v63  ;;  %v2681_v31 = vmul.f32 %v9237_v19, %v9237_v19  ;;  %v9238_v43 = vld [vmem:[#allocation26_spill] sm:$0xff]  ;;  %v9239_v30 = vld [vmem:[#allocation28_spill] sm:$0xff] }
 0x2d7   :  { %v2728_v17 = vadd.f32 %v2727_v54, %v2680_v2  ;;  %v2537_v16 = vadd.f32 %v2536_v4, %v7049_v37  ;;  %v7238_v61 = vmul.f32 %v9238_v43, %v9238_v43  ;;  %v7242_v9 = vmul.f32 %v9239_v30, %v9239_v30  ;;  %v9240_v8 = vld [vmem:[#allocation30_spill] sm:$0xff]  ;;  %v9242_v63 = vld [vmem:[#allocation32_spill] sm:$0xff] }
 0x2d8   :  { %v2633_v28 = vadd.f32 %v2632_v15, %v2585_v24  ;;  %v7246_v13 = vmul.f32 %v9240_v8, %v9240_v8  ;;  %v7250_v27 = vmul.f32 %v9242_v63, %v9242_v63  ;;  %v9244_v2 = vld [vmem:[#allocation82_spill] sm:$0xff]  ;;  %v9247_v30 = vld [vmem:[#allocation36_spill] sm:$0xff] }
 0x2d9   :  { %v2682_v37 = vmul.f32 %v9244_v2, %v9244_v2  ;;  %v2729_v54 = vadd.f32 %v2728_v17, %v2681_v31  ;;  %v2538_v4 = vadd.f32 %v2537_v16, %v7053_v0  ;;  %v9245_v43 = vld [vmem:[#allocation34_spill] sm:$0xff]  ;;  %v7261_v24 = vmul.f32 %v9247_v30, %v9247_v30  ;;  %v9251_v63 = vld [vmem:[#allocation40_spill] sm:$0xff] }
 0x2da   :  { %9241 = vst [vmem:[#allocation196_spill] sm:$0xff] %v7246_v13  ;;  %9243 = vst [vmem:[#allocation197_spill] sm:$0xff] %v7250_v27  ;;  %v7257_v19 = vmul.f32 %v9245_v43, %v9245_v43  ;;  %v2634_v15 = vadd.f32 %v2633_v28, %v2586_v32  ;;  %v9249_v8 = vld [vmem:[#allocation38_spill] sm:$0xff]  ;;  %v7269_v27 = vmul.f32 %v9251_v63, %v9251_v63  ;;  %v9253_v31 = vld [vmem:[#allocation84_spill] sm:$0xff] }
 0x2db   :  { %9248 = vst [vmem:[#allocation199_spill] sm:$0xff] %v7261_v24  ;;  %v7265_v13 = vmul.f32 %v9249_v8, %v9249_v8  ;;  %v2683_v0 = vmul.f32 %v9253_v31, %v9253_v31  ;;  %v2730_v17 = vadd.f32 %v2729_v54, %v2682_v37  ;;  %v2539_v16 = vadd.f32 %v2538_v4, %v7059_v39  ;;  %v9254_v43 = vld [vmem:[#allocation42_spill] sm:$0xff]  ;;  %v9256_v30 = vld [vmem:[#allocation44_spill] sm:$0xff] }
 0x2dc   :  { %9246 = vst [vmem:[#allocation198_spill] sm:$0xff] %v7257_v19  ;;  %9252 = vst [vmem:[#allocation201_spill] sm:$0xff] %v7269_v27  ;;  %v7276_v2 = vmul.f32 %v9254_v43, %v9254_v43  ;;  %v7280_v32 = vmul.f32 %v9256_v30, %v9256_v30  ;;  %v2635_v28 = vadd.f32 %v2634_v15, %v2587_v18  ;;  %v9258_v8 = vld [vmem:[#allocation46_spill] sm:$0xff]  ;;  %v9260_v63 = vld [vmem:[#allocation48_spill] sm:$0xff] }
 0x2dd   :  { %9250 = vst [vmem:[#allocation200_spill] sm:$0xff] %v7265_v13  ;;  %v7284_v13 = vmul.f32 %v9258_v8, %v9258_v8  ;;  %v7288_v27 = vmul.f32 %v9260_v63, %v9260_v63  ;;  %v9262_v37 = vld [vmem:[#allocation86_spill] sm:$0xff]  ;;  %v2731_v54 = vadd.f32 %v2730_v17, %v2683_v0  ;;  %v2540_v4 = vadd.f32 %v2539_v16, %v7063_v29  ;;  %v9265_v15 = vld [vmem:[#allocation91_spill] sm:$0xff]  ;;  %v9268_v16 = vld [vmem:[#allocation97_spill] sm:$0xff] }
 0x2de   :  { %9255 = vst [vmem:[#allocation202_spill] sm:$0xff] %v7276_v2  ;;  %9257 = vst [vmem:[#allocation203_spill] sm:$0xff] %v7280_v32  ;;  %v2684_v39 = vmul.f32 %v9262_v37, %v9262_v37  ;;  %v2636_v43 = vadd.f32 %v2635_v28, %v2588_v34  ;;  %v9263_v2 = vld [vmem:[#allocation87_spill] sm:$0xff]  ;;  %v9264_v32 = vld [vmem:[#allocation89_spill] sm:$0xff]  ;;  %v2687_v8 = vmul.f32 %v9265_v15, %v9265_v15 }
 0x2df   :  { %9259 = vst [vmem:[#allocation204_spill] sm:$0xff] %v7284_v13  ;;  %9261 = vst [vmem:[#allocation205_spill] sm:$0xff] %v7288_v27  ;;  %v2685_v30 = vmul.f32 %v9263_v2, %v9263_v2  ;;  %v2686_v18 = vmul.f32 %v9264_v32, %v9264_v32  ;;  %v9266_v13 = vld [vmem:[#allocation93_spill] sm:$0xff]  ;;  %v9267_v27 = vld [vmem:[#allocation95_spill] sm:$0xff]  ;;  %v2541_v0 = vadd.f32 %v2540_v4, %v7067_v56 }
 0x2e0   :  { %v2688_v63 = vmul.f32 %v9266_v13, %v9266_v13  ;;  %v2689_v31 = vmul.f32 %v9267_v27, %v9267_v27  ;;  %v2732_v37 = vadd.f32 %v2731_v54, %v2684_v39  ;;  %v2637_v29 = vadd.f32 %v2636_v43, %v2589_v33  ;;  %v9269_v15 = vld [vmem:[#allocation99_spill] sm:$0xff]  ;;  %v9270_v13 = vld [vmem:[#allocation101_spill] sm:$0xff]  ;;  %v9277_v24 = vld [vmem:[#allocation162_spill] sm:$0xff] }
 0x2e1   :  { %v2780_v34 = vmul.f32 %v6885_v21, %v6885_v21  ;;  %v2781_v17 = vmul.f32 %v6889_v36, %v6889_v36  ;;  %v2690_v28 = vmul.f32 %v9268_v16, %v9268_v16  ;;  %v2691_v32 = vmul.f32 %v9269_v15, %v9269_v15  ;;  %v9271_v43 = vld [vmem:[#allocation103_spill] sm:$0xff]  ;;  %v9272_v54 = vld [vmem:[#allocation105_spill] sm:$0xff] }
 0x2e2   :  { %v2692_v2 = vmul.f32 %v9270_v13, %v9270_v13  ;;  %v2733_v27 = vadd.f32 %v2732_v37, %v2685_v30  ;;  %v2542_v39 = vadd.f32 %v2541_v0, %v7071_v10  ;;  %v2638_v56 = vadd.f32 %v2637_v29, %v2590_v35  ;;  %v9273_v36 = vld [vmem:[#allocation107_spill] sm:$0xff]  ;;  %v9274_v16 = vld [vmem:[#allocation109_spill] sm:$0xff]  ;;  %v9276_v0 = vld [vmem:[#allocation152_spill] sm:$0xff] }
 0x2e3   :  { %v2693_v33 = vmul.f32 %v9271_v43, %v9271_v43  ;;  %v7319_v4 = vmul.f32 %v9272_v54, %v9272_v54  ;;  %v7323_v21 = vmul.f32 %v9273_v36, %v9273_v36  ;;  %v7327_v15 = vmul.f32 %v9274_v16, %v9274_v16  ;;  %v9275_v30 = vld [vmem:[#allocation21_spill] sm:$0xff]  ;;  %v9278_v19 = vld [vmem:[#allocation163_spill] sm:$0xff] }
 0x2e4   :  { %v2734_v13 = vadd.f32 %v2733_v27, %v2686_v18  ;;  %v2782_v10 = vmul.f32 %v9275_v30, %v9275_v30  ;;  %v2543_v35 = vadd.f32 %v2542_v39, %v7075_v38  ;;  %v2639_v37 = vadd.f32 %v2638_v56, %v7200_v42  ;;  %v9279_v27 = vld [vmem:[#allocation164_spill] sm:$0xff]  ;;  %v9280_v56 = vld [vmem:[#allocation165_spill] sm:$0xff]  ;;  %v9297_v30 = vld [vmem:[#allocation90_spill] sm:$0xff] }
 0x2e5   :  { %v2783_v29 = vmul.f32 %v9276_v0, %v9276_v0  ;;  %v2829_v54 = vadd.f32 %v2781_v17, %v2780_v34  ;;  %v7337_v36 = vadd.f32 %v6517_v53, %v9277_v24  ;;  %v7341_v16 = vadd.f32 %v6521_v60, %v9278_v19  ;;  %v9281_v53 = vld [vmem:[#allocation166_spill] sm:$0xff]  ;;  %v9283_v34 = vld [vmem:[#allocation111_spill] sm:$0xff]  ;;  %v9284_v17 = vld [vmem:[#allocation113_spill] sm:$0xff] }
 0x2e6   :  { %v2735_v43 = vadd.f32 %v2734_v13, %v2687_v8  ;;  %v7345_v18 = vadd.f32 %v6525_v51, %v9279_v27  ;;  %v2544_v38 = vadd.f32 %v2543_v35, %v7081_v23  ;;  %v2640_v42 = vadd.f32 %v2639_v37, %v7204_v55  ;;  %v9282_v19 = vld [vmem:[#allocation154_spill] sm:$0xff]  ;;  %v9287_v35 = vld [vmem:[#allocation117_spill] sm:$0xff] }
 0x2e7   :  { %v2830_v39 = vadd.f32 %v2829_v54, %v2782_v10  ;;  %v7351_v13 = vadd.f32 %v6529_v3, %v9280_v56  ;;  %v7355_v24 = vadd.f32 %v6533_v22, %v9281_v53  ;;  %v7359_v60 = vadd.f32 %v6537_v62, %v6329_v40  ;;  %v9285_v62 = vld [vmem:[#allocation115_spill] sm:$0xff] }
 0x2e8   :  { %v2736_v8 = vadd.f32 %v2735_v43, %v2688_v63  ;;  %v7363_v51 = vadd.f32 %v6541_v49, %v6333_v46  ;;  %v2545_v55 = vadd.f32 %v2544_v38, %v7085_v57  ;;  %v2641_v23 = vadd.f32 %v2640_v42, %v7208_v25  ;;  %v9286_v43 = vld [vmem:[#allocation156_spill] sm:$0xff]  ;;  %v9289_v38 = vld [vmem:[#allocation121_spill] sm:$0xff]  ;;  %v9291_v53 = vld [vmem:[#allocation123_spill] sm:$0xff] }
 0x2e9   :  { %v2784_v3 = vmul.f32 %v9282_v19, %v9282_v19  ;;  %v2831_v63 = vadd.f32 %v2830_v39, %v2783_v29  ;;  %v7371_v22 = vmul.f32 %v9283_v34, %v9283_v34  ;;  %v7375_v40 = vmul.f32 %v9284_v17, %v9284_v17  ;;  %v9288_v29 = vld [vmem:[#allocation119_spill] sm:$0xff]  ;;  %v9290_v39 = vld [vmem:[#allocation158_spill] sm:$0xff]  ;;  %v9296_v19 = vld [vmem:[#allocation88_spill] sm:$0xff] }
 0x2ea   :  { %v7379_v46 = vmul.f32 %v9285_v62, %v9285_v62  ;;  %v2737_v49 = vadd.f32 %v2736_v8, %v2689_v31  ;;  %v2546_v57 = vadd.f32 %v2545_v55, %v7089_v26  ;;  %v2642_v25 = vadd.f32 %v2641_v23, %v7212_v59  ;;  %v9292_v23 = vld [vmem:[#allocation125_spill] sm:$0xff] }
 0x2eb   :  { %v2785_v54 = vmul.f32 %v9286_v43, %v9286_v43  ;;  %v2832_v10 = vadd.f32 %v2831_v63, %v2784_v3  ;;  %v7387_v37 = vmul.f32 %v9287_v35, %v9287_v35  ;;  %v7391_v27 = vmul.f32 %v9288_v29, %v9288_v29  ;;  %v9293_v63 = vld [vmem:[#allocation127_spill] sm:$0xff] }
 0x2ec   :  { %v7395_v42 = vmul.f32 %v9289_v38, %v9289_v38  ;;  %v2738_v31 = vadd.f32 %v2737_v49, %v2690_v28  ;;  %v2547_v26 = vadd.f32 %v2546_v57, %v7093_v50  ;;  %v2643_v59 = vadd.f32 %v2642_v25, %v7219_v48  ;;  %v9294_v49 = vld [vmem:[#allocation41_spill] sm:$0xff] }
 0x2ed   :  { %v2786_v56 = vmul.f32 %v9290_v39, %v9290_v39  ;;  %v2833_v8 = vadd.f32 %v2832_v10, %v2785_v54  ;;  %v7403_v55 = vmul.f32 %v9291_v53, %v9291_v53  ;;  %v7407_v3 = vmul.f32 %v9292_v23, %v9292_v23  ;;  %v9295_v10 = vld [vmem:[#allocation45_spill] sm:$0xff] }
 0x2ee   :  { %v7411_v43 = vmul.f32 %v9293_v63, %v9293_v63  ;;  %v2739_v28 = vadd.f32 %v2738_v31, %v2691_v32  ;;  %v2548_v50 = vadd.f32 %v2547_v26, %v7097_v44  ;;  %v2644_v48 = vadd.f32 %v2643_v59, %v7223_v5  ;;  %v9298_v31 = vld [vmem:[#allocation92_spill] sm:$0xff] }
 0x2ef   :  { %v2787_v57 = vmul.f32 %v9294_v49, %v9294_v49  ;;  %v2834_v25 = vadd.f32 %v2833_v8, %v2786_v56  ;;  %v2788_v39 = vmul.f32 %v9295_v10, %v9295_v10  ;;  %v2789_v0 = vmul.f32 %v9296_v19, %v9296_v19  ;;  %v9299_v56 = vld [vmem:[#allocation94_spill] sm:$0xff]  ;;  %v9300_v8 = vld [vmem:[#allocation96_spill] sm:$0xff] }
 0x2f0   :  { %v2740_v54 = vadd.f32 %v2739_v28, %v2692_v2  ;;  %v2790_v63 = vmul.f32 %v9297_v30, %v9297_v30  ;;  %v2549_v32 = vadd.f32 %v2548_v50, %v7103_v14  ;;  %v2645_v44 = vadd.f32 %v2644_v48, %v7227_v45  ;;  %v9301_v10 = vld [vmem:[#allocation98_spill] sm:$0xff]  ;;  %v9302_v50 = vld [vmem:[#allocation100_spill] sm:$0xff] }
 0x2f1   :  { %v2791_v5 = vmul.f32 %v9298_v31, %v9298_v31  ;;  %v2835_v26 = vadd.f32 %v2834_v25, %v2787_v57  ;;  %v2792_v2 = vmul.f32 %v9299_v56, %v9299_v56  ;;  %v2793_v28 = vmul.f32 %v9300_v8, %v9300_v8  ;;  %v9305_v8 = vld [vmem:[#allocation106_spill] sm:$0xff]  ;;  %v9324_v31 = vld [vmem:[#allocation9_spill] sm:$0xff] }
 0x2f2   :  { %v2741_v59 = vadd.f32 %v2740_v54, %v2693_v33  ;;  %v2794_v19 = vmul.f32 %v9301_v10, %v9301_v10  ;;  %v2550_v30 = vadd.f32 %v2549_v32, %v7107_v12  ;;  %v2646_v14 = vadd.f32 %v2645_v44, %v7231_v52  ;;  %v9303_v33 = vld [vmem:[#allocation102_spill] sm:$0xff]  ;;  %v9304_v54 = vld [vmem:[#allocation104_spill] sm:$0xff] }
 0x2f3   :  { %v2795_v45 = vmul.f32 %v9302_v50, %v9302_v50  ;;  %v2836_v48 = vadd.f32 %v2835_v26, %v2788_v39  ;;  %v2796_v25 = vmul.f32 %v9303_v33, %v9303_v33  ;;  %v7442_v56 = vmul.f32 %v9304_v54, %v9304_v54  ;;  %v9306_v32 = vld [vmem:[#allocation108_spill] sm:$0xff]  ;;  %v9307_v26 = vld [vmem:[#allocation167_spill] sm:$0xff] }
 0x2f4   :  { %v2742_v57 = vadd.f32 %v2741_v59, %v7319_v4  ;;  %v7446_v10 = vmul.f32 %v9305_v8, %v9305_v8  ;;  %v2551_v12 = vadd.f32 %v2550_v30, %v7111_v47  ;;  %v2647_v52 = vadd.f32 %v2646_v14, %v7238_v61  ;;  %v9308_v14 = vld [vmem:[#allocation3_spill] sm:$0xff] }
 0x2f5   :  { %v7452_v39 = vmul.f32 %v9306_v32, %v9306_v32  ;;  %v2837_v4 = vadd.f32 %v2836_v48, %v2789_v0  ;;  %v2896_v59 = vadd.f32 %v6545_v41, %v9307_v26  ;;  %v2897_v54 = vadd.f32 %v6549_v11, %v6341_v58  ;;  %v9310_v48 = vld [vmem:[#allocation4_spill] sm:$0xff]  ;;  %v9311_v41 = vld [vmem:[#allocation169_spill] sm:$0xff]  ;;  %v9313_v58 = vld [vmem:[#allocation170_spill] sm:$0xff] }
 0x2f6   :  { %v2743_v44 = vadd.f32 %v2742_v57, %v7323_v21  ;;  %v2898_v8 = vadd.f32 %v9210_v6, %v6345_v1  ;;  %v2552_v47 = vadd.f32 %v2551_v12, %v7115_v20  ;;  %v2648_v61 = vadd.f32 %v2647_v52, %v7242_v9  ;;  %v9309_v21 = vld [vmem:[#allocation168_spill] sm:$0xff]  ;;  %v9312_v26 = vld [vmem:[#allocation5_spill] sm:$0xff]  ;;  %v9314_v11 = vld [vmem:[#allocation6_spill] sm:$0xff] }
 0x2f7   :  { %v2838_v30 = vadd.f32 %v2837_v4, %v2790_v63  ;;  %v2899_v32 = vadd.f32 %v9308_v14, %v6349_v7  ;;  %v2900_v57 = vadd.f32 %v9310_v48, %v9309_v21  ;;  %v2901_v33 = vadd.f32 %v9312_v26, %v9311_v41  ;;  %v9315_v1 = vld [vmem:[#allocation130_spill] sm:$0xff]  ;;  %v9316_v20 = vld [vmem:[#allocation196_spill] sm:$0xff]  ;;  %v9323_v26 = vld [vmem:[#allocation173_spill] sm:$0xff] }
 0x2f8   :  { %v2744_v0 = vadd.f32 %v2743_v44, %v7327_v15  ;;  %v2902_v50 = vadd.f32 %v9314_v11, %v9313_v58  ;;  %v2553_v6 = vadd.f32 %v2552_v47, %v9315_v1  ;;  %v2649_v12 = vadd.f32 %v2648_v61, %v9316_v20  ;;  %v9317_v63 = vld [vmem:[#allocation190_spill] sm:$0xff]  ;;  %v9319_v15 = vld [vmem:[#allocation171_spill] sm:$0xff]  ;;  %v9321_v21 = vld [vmem:[#allocation172_spill] sm:$0xff] }
 0x2f9   :  { %v2839_v9 = vadd.f32 %v2838_v30, %v2791_v5  ;;  %v9318_v52 = vld [vmem:[#allocation50_spill] sm:$0xff]  ;;  %v9320_v44 = vld [vmem:[#allocation7_spill] sm:$0xff]  ;;  %v9322_v48 = vld [vmem:[#allocation8_spill] sm:$0xff]  ;;  %v2905_v58 = vadd.f32 %v9324_v31, %v9323_v26 }
 0x2fa   :  { %v7476_v4 = vadd.f32 %v9318_v52, %v9317_v63  ;;  %v2745_v7 = vadd.f32 %v2744_v0, %v7371_v22  ;;  %v2903_v14 = vadd.f32 %v9320_v44, %v9319_v15  ;;  %v2904_v41 = vadd.f32 %v9322_v48, %v9321_v21  ;;  %v9325_v11 = vld [vmem:[#allocation132_spill] sm:$0xff]  ;;  %v9326_v1 = vld [vmem:[#allocation197_spill] sm:$0xff]  ;;  %v9327_v30 = vld [vmem:[#allocation174_spill] sm:$0xff] }
 0x2fb   :  { %v2554_v47 = vadd.f32 %v2553_v6, %v9325_v11  ;;  %v2650_v61 = vadd.f32 %v2649_v12, %v9326_v1  ;;  %v2840_v5 = vadd.f32 %v2839_v9, %v2792_v2  ;;  %v9328_v20 = vld [vmem:[#allocation10_spill] sm:$0xff]  ;;  %v9329_v22 = vld [vmem:[#allocation25_spill] sm:$0xff]  ;;  %v9330_v0 = vld [vmem:[#allocation11_spill] sm:$0xff] }
 0x2fc   :  { %v2906_v63 = vadd.f32 %v9328_v20, %v9327_v30  ;;  %v2746_v49 = vadd.f32 %v2745_v7, %v7375_v40  ;;  %v2907_v23 = vadd.f32 %v9330_v0, %v9329_v22  ;;  %v9331_v15 = vld [vmem:[#allocation27_spill] sm:$0xff]  ;;  %v9332_v44 = vld [vmem:[#allocation12_spill] sm:$0xff]  ;;  %v9333_v21 = vld [vmem:[#allocation29_spill] sm:$0xff] }
 0x2fd   :  { %v2908_v53 = vadd.f32 %v9332_v44, %v9331_v15  ;;  %v9334_v48 = vld [vmem:[#allocation13_spill] sm:$0xff]  ;;  %v9335_v31 = vld [vmem:[#allocation134_spill] sm:$0xff]  ;;  %v2841_v12 = vadd.f32 %v2840_v5, %v2793_v28  ;;  %v9337_v2 = vld [vmem:[#allocation31_spill] sm:$0xff] }
 0x2fe   :  { %v2909_v38 = vadd.f32 %v9334_v48, %v9333_v21  ;;  %v2555_v26 = vadd.f32 %v2554_v47, %v9335_v31  ;;  %v9336_v6 = vld [vmem:[#allocation198_spill] sm:$0xff]  ;;  %v2747_v30 = vadd.f32 %v2746_v49, %v7379_v46  ;;  %v9339_v40 = vld [vmem:[#allocation39_spill] sm:$0xff]  ;;  %v9342_v15 = vld [vmem:[#allocation72_spill] sm:$0xff] }
 0x2ff   :  { %v2651_v11 = vadd.f32 %v2650_v61, %v9336_v6  ;;  %v9338_v9 = vld [vmem:[#allocation14_spill] sm:$0xff]  ;;  %v7509_v44 = vadd.f32 %v7341_v16, %v9342_v15  ;;  %v9343_v47 = vld [vmem:[#allocation136_spill] sm:$0xff]  ;;  %v9344_v61 = vld [vmem:[#allocation199_spill] sm:$0xff]  ;;  %v2842_v5 = vadd.f32 %v2841_v12, %v2794_v19 }
 0x300   :  { %v2910_v1 = vadd.f32 %v9338_v9, %v9337_v2  ;;  %v9340_v7 = vld [vmem:[#allocation22_spill] sm:$0xff]  ;;  %v2556_v21 = vadd.f32 %v2555_v26, %v9343_v47  ;;  %v2748_v46 = vadd.f32 %v2747_v30, %v7387_v37  ;;  %v9346_v49 = vld [vmem:[#allocation76_spill] sm:$0xff]  ;;  %v9358_v15 = vld [vmem:[#allocation87_spill] sm:$0xff] }
 0x301   :  { %v2914_v20 = vadd.f32 %v9340_v7, %v9339_v40  ;;  %v9341_v22 = vld [vmem:[#allocation70_spill] sm:$0xff]  ;;  %v2652_v28 = vadd.f32 %v2651_v11, %v9344_v61  ;;  %v7520_v6 = vadd.f32 %v7351_v13, %v9346_v49  ;;  %v9348_v16 = vld [vmem:[#allocation80_spill] sm:$0xff]  ;;  %v9361_v61 = vld [vmem:[#allocation201_spill] sm:$0xff] }
 0x302   :  { %v7505_v0 = vadd.f32 %v7337_v36, %v9341_v22  ;;  %v9345_v48 = vld [vmem:[#allocation74_spill] sm:$0xff]  ;;  %v7528_v26 = vadd.f32 %v7359_v60, %v9348_v16  ;;  %v9351_v12 = vld [vmem:[#allocation200_spill] sm:$0xff]  ;;  %v2749_v13 = vadd.f32 %v2748_v46, %v7391_v27  ;;  %v7544_v60 = vadd.f32 %v2898_v8, %v9358_v15  ;;  %v9364_v27 = vld [vmem:[#allocation91_spill] sm:$0xff] }
 0x303   :  { %v7515_v31 = vadd.f32 %v7345_v18, %v9345_v48  ;;  %v9347_v36 = vld [vmem:[#allocation78_spill] sm:$0xff]  ;;  %v2653_v9 = vadd.f32 %v2652_v28, %v9351_v12  ;;  %v2843_v18 = vadd.f32 %v2842_v5, %v2795_v45  ;;  %v9354_v30 = vld [vmem:[#allocation84_spill] sm:$0xff]  ;;  %v9362_v5 = vld [vmem:[#allocation89_spill] sm:$0xff]  ;;  %v7553_v46 = vadd.f32 %v2900_v57, %v9364_v27 }
 0x304   :  { %v7524_v2 = vadd.f32 %v7355_v24, %v9347_v36  ;;  %9349 = vst [vmem:[#allocation162_spill] sm:$0xff] %v7528_v26  ;;  %v9350_v11 = vld [vmem:[#allocation138_spill] sm:$0xff]  ;;  %v7538_v7 = vadd.f32 %v2896_v59, %v9354_v30  ;;  %9359 = vst [vmem:[#allocation166_spill] sm:$0xff] %v7544_v60  ;;  %v9360_v47 = vld [vmem:[#allocation140_spill] sm:$0xff]  ;;  %v7549_v48 = vadd.f32 %v2899_v32, %v9362_v5 }
 0x305   :  { %v2557_v19 = vadd.f32 %v2556_v21, %v9350_v11  ;;  %v9352_v40 = vld [vmem:[#allocation82_spill] sm:$0xff]  ;;  %v2654_v28 = vadd.f32 %v2653_v9, %v9361_v61  ;;  %v2844_v45 = vadd.f32 %v2843_v18, %v2796_v25  ;;  %9365 = vst [vmem:[#allocation113_spill] sm:$0xff] %v7553_v46  ;;  %v9366_v59 = vld [vmem:[#allocation93_spill] sm:$0xff]  ;;  %v9374_v9 = vld [vmem:[#allocation99_spill] sm:$0xff] }
 0x306   :  { %v7534_v37 = vadd.f32 %v7363_v51, %v9352_v40  ;;  %9355 = vst [vmem:[#allocation164_spill] sm:$0xff] %v7538_v7  ;;  %v9356_v24 = vld [vmem:[#allocation86_spill] sm:$0xff]  ;;  %9363 = vst [vmem:[#allocation111_spill] sm:$0xff] %v7549_v48  ;;  %v2750_v51 = vadd.f32 %v2749_v13, %v7395_v42  ;;  %v7556_v49 = vadd.f32 %v2901_v33, %v9366_v59  ;;  %v9372_v12 = vld [vmem:[#allocation97_spill] sm:$0xff] }
 0x307   :  { %v7541_v22 = vadd.f32 %v2897_v54, %v9356_v24  ;;  %v2558_v21 = vadd.f32 %v2557_v19, %v9360_v47  ;;  %v9368_v54 = vld [vmem:[#allocation95_spill] sm:$0xff]  ;;  %v9370_v8 = vld [vmem:[#allocation142_spill] sm:$0xff]  ;;  %v2845_v25 = vadd.f32 %v2844_v45, %v7442_v56  ;;  %v7565_v32 = vadd.f32 %v2903_v14, %v9372_v12  ;;  %v9376_v18 = vld [vmem:[#allocation101_spill] sm:$0xff] }
 0x308   :  { %9353 = vst [vmem:[#allocation163_spill] sm:$0xff] %v7534_v37  ;;  %9367 = vst [vmem:[#allocation115_spill] sm:$0xff] %v7556_v49  ;;  %v7559_v36 = vadd.f32 %v2902_v50, %v9368_v54  ;;  %v9371_v11 = vld [vmem:[#allocation202_spill] sm:$0xff]  ;;  %v2751_v42 = vadd.f32 %v2750_v51, %v7403_v55  ;;  %v7569_v57 = vadd.f32 %v2904_v41, %v9374_v9  ;;  %v9378_v40 = vld [vmem:[#allocation103_spill] sm:$0xff] }
 0x309   :  { %9357 = vst [vmem:[#allocation165_spill] sm:$0xff] %v7541_v22  ;;  %v2559_v16 = vadd.f32 %v2558_v21, %v9370_v8  ;;  %v2655_v19 = vadd.f32 %v2654_v28, %v9371_v11  ;;  %9373 = vst [vmem:[#allocation119_spill] sm:$0xff] %v7565_v32  ;;  %v7572_v33 = vadd.f32 %v2905_v58, %v9376_v18  ;;  %v9380_v13 = vld [vmem:[#allocation144_spill] sm:$0xff]  ;;  %v9381_v24 = vld [vmem:[#allocation203_spill] sm:$0xff] }
 0x30a   :  { %9369 = vst [vmem:[#allocation117_spill] sm:$0xff] %v7559_v36  ;;  %9375 = vst [vmem:[#allocation167_spill] sm:$0xff] %v7569_v57  ;;  %v7575_v50 = vadd.f32 %v2906_v63, %v9378_v40  ;;  %v2846_v56 = vadd.f32 %v2845_v25, %v7446_v10  ;;  %v9382_v47 = vld [vmem:[#allocation105_spill] sm:$0xff]  ;;  %v2752_v55 = vadd.f32 %v2751_v42, %v7407_v3  ;;  %v9384_v21 = vld [vmem:[#allocation107_spill] sm:$0xff] }
 0x30b   :  { %9377 = vst [vmem:[#allocation3_spill] sm:$0xff] %v7572_v33  ;;  %v2560_v30 = vadd.f32 %v2559_v16, %v9380_v13  ;;  %v2656_v15 = vadd.f32 %v2655_v19, %v9381_v24  ;;  %v7581_v14 = vadd.f32 %v2907_v23, %v9382_v47  ;;  %v7585_v41 = vadd.f32 %v2908_v53, %v9384_v21  ;;  %v9386_v61 = vld [vmem:[#allocation109_spill] sm:$0xff]  ;;  %v9389_v28 = vld [vmem:[#allocation146_spill] sm:$0xff]  ;;  %v9390_v5 = vld [vmem:[#allocation204_spill] sm:$0xff] }
 0x30c   :  { %9379 = vst [vmem:[#allocation168_spill] sm:$0xff] %v7575_v50  ;;  %v7588_v58 = vadd.f32 %v2909_v38, %v9386_v61  ;;  %v7591_v63 = vadd.f32 %v2910_v1, %v9283_v34  ;;  %v9391_v27 = vld [vmem:[#allocation110_spill] sm:$0xff]  ;;  %v2847_v23 = vadd.f32 %v2846_v56, %v7452_v39  ;;  %v2611_v3 = vmul.f32 %v9318_v52, %v9318_v52  ;;  %v9392_v53 = vld [vmem:[#allocation129_spill] sm:$0xff]  ;;  %v9396_v11 = vld [vmem:[#allocation112_spill] sm:$0xff] }
 0x30d   :  { %9383 = vst [vmem:[#allocation4_spill] sm:$0xff] %v7581_v14  ;;  %9385 = vst [vmem:[#allocation169_spill] sm:$0xff] %v7585_v41  ;;  %v2561_v45 = vadd.f32 %v2560_v30, %v9389_v28  ;;  %v2657_v51 = vadd.f32 %v2656_v15, %v9390_v5  ;;  %v2800_v10 = vmul.f32 %v9391_v27, %v9391_v27  ;;  %v9394_v1 = vld [vmem:[#allocation2_spill] sm:$0xff]  ;;  %v9395_v8 = vld [vmem:[#allocation205_spill] sm:$0xff] }
 0x30e   :  { %9387 = vst [vmem:[#allocation5_spill] sm:$0xff] %v7588_v58  ;;  %9388 = vst [vmem:[#allocation170_spill] sm:$0xff] %v7591_v63  ;;  %v2706_v59 = vmul.f32 %v9392_v53, %v9392_v53  ;;  %v2753_v38 = vadd.f32 %v2752_v55, %v7411_v43  ;;  %v7604_v34 = vadd.f32 %v2914_v20, %v9288_v29  ;;  %v9397_v39 = vld [vmem:[#allocation85_spill] sm:$0xff]  ;;  %v9398_v52 = vld [vmem:[#allocation52_spill] sm:$0xff] }
 0x30f   :  { %v2562_v54 = vadd.f32 %v2561_v45, %v9394_v1  ;;  %v2658_v16 = vadd.f32 %v2657_v51, %v9395_v8  ;;  %v2801_v19 = vmul.f32 %v9396_v11, %v9396_v11  ;;  %v2848_v25 = vadd.f32 %v2847_v23, %v2800_v10  ;;  %v9399_v9 = vld [vmem:[#allocation131_spill] sm:$0xff]  ;;  %v9400_v29 = vld [vmem:[#allocation194_spill] sm:$0xff]  ;;  %v9403_v47 = vld [vmem:[#allocation56_spill] sm:$0xff] }
 0x310   :  { %9393 = vst [vmem:[#allocation6_spill] sm:$0xff] %v7604_v34  ;;  %v2517_v12 = vmul.f32 %v9397_v39, %v9397_v39  ;;  %v2612_v42 = vmul.f32 %v9398_v52, %v9398_v52  ;;  %v2707_v43 = vmul.f32 %v9399_v9, %v9399_v9  ;;  %v2754_v18 = vadd.f32 %v2753_v38, %v2706_v59  ;;  %v9401_v13 = vld [vmem:[#allocation114_spill] sm:$0xff]  ;;  %v9404_v21 = vld [vmem:[#allocation133_spill] sm:$0xff]  ;;  %v9405_v45 = vld [vmem:[#allocation195_spill] sm:$0xff] }
 0x311   :  { %v2563_v20 = vadd.f32 %v2562_v54, %v9400_v29  ;;  %v2659_v40 = vadd.f32 %v2658_v16, %v2611_v3  ;;  %v2802_v30 = vmul.f32 %v9401_v13, %v9401_v13  ;;  %v2849_v24 = vadd.f32 %v2848_v25, %v2801_v19  ;;  %v9402_v15 = vld [vmem:[#allocation54_spill] sm:$0xff]  ;;  %v9406_v10 = vld [vmem:[#allocation116_spill] sm:$0xff]  ;;  %v9407_v59 = vld [vmem:[#allocation135_spill] sm:$0xff] }
 0x312   :  { %v2613_v56 = vmul.f32 %v9402_v15, %v9402_v15  ;;  %v2614_v55 = vmul.f32 %v9403_v47, %v9403_v47  ;;  %v2708_v61 = vmul.f32 %v9404_v21, %v9404_v21  ;;  %v2755_v28 = vadd.f32 %v2754_v18, %v2707_v43  ;;  %v9408_v1 = vld [vmem:[#allocation137_spill] sm:$0xff]  ;;  %v9409_v16 = vld [vmem:[#allocation118_spill] sm:$0xff]  ;;  %v9415_v13 = vld [vmem:[#allocation147_spill] sm:$0xff] }
 0x313   :  { %v2564_v5 = vadd.f32 %v2563_v20, %v9405_v45  ;;  %v2660_v51 = vadd.f32 %v2659_v40, %v2612_v42  ;;  %v2803_v23 = vmul.f32 %v9406_v10, %v9406_v10  ;;  %v2850_v3 = vadd.f32 %v2849_v24, %v2802_v30  ;;  %v9410_v18 = vld [vmem:[#allocation81_spill] sm:$0xff]  ;;  %v9411_v20 = vld [vmem:[#allocation64_spill] sm:$0xff]  ;;  %v9413_v34 = vld [vmem:[#allocation66_spill] sm:$0xff] }
 0x314   :  { %v2709_v38 = vmul.f32 %v9407_v59, %v9407_v59  ;;  %v2710_v54 = vmul.f32 %v9408_v1, %v9408_v1  ;;  %v2756_v8 = vadd.f32 %v2755_v28, %v2708_v61  ;;  %v2804_v19 = vmul.f32 %v9409_v16, %v9409_v16  ;;  %v9412_v45 = vld [vmem:[#allocation193_spill] sm:$0xff]  ;;  %v9414_v24 = vld [vmem:[#allocation68_spill] sm:$0xff]  ;;  %v9416_v61 = vld [vmem:[#allocation58_spill] sm:$0xff] }
 0x315   :  { %v2565_v25 = vadd.f32 %v2564_v5, %v2517_v12  ;;  %v2661_v29 = vadd.f32 %v2660_v51, %v2613_v56  ;;  %v2851_v43 = vadd.f32 %v2850_v3, %v2803_v23  ;;  %v2935_v42 = vadd.f32 %v9411_v20, %v9410_v18  ;;  %v9417_v56 = vld [vmem:[#allocation120_spill] sm:$0xff]  ;;  %v9421_v58 = vld [vmem:[#allocation185_spill] sm:$0xff]  ;;  %v9424_v41 = vld [vmem:[#allocation187_spill] sm:$0xff] }
 0x316   :  { %v2757_v40 = vadd.f32 %v2756_v8, %v2709_v38  ;;  %v2936_v30 = vadd.f32 %v9413_v34, %v9412_v45  ;;  %v2937_v10 = vadd.f32 %v9414_v24, %v9397_v39  ;;  %v7642_v63 = vadd.f32 %v7476_v4, %v9415_v13  ;;  %v9418_v23 = vld [vmem:[#allocation60_spill] sm:$0xff]  ;;  %v9419_v38 = vld [vmem:[#allocation139_spill] sm:$0xff]  ;;  %v9420_v39 = vld [vmem:[#allocation122_spill] sm:$0xff] }
 0x317   :  { %v2615_v28 = vmul.f32 %v9416_v61, %v9416_v61  ;;  %v2662_v12 = vadd.f32 %v2661_v29, %v2614_v55  ;;  %v2805_v5 = vmul.f32 %v9417_v56, %v9417_v56  ;;  %v2852_v51 = vadd.f32 %v2851_v43, %v2804_v19  ;;  %v9422_v55 = vld [vmem:[#allocation141_spill] sm:$0xff]  ;;  %v9423_v43 = vld [vmem:[#allocation186_spill] sm:$0xff]  ;;  %v9426_v50 = vld [vmem:[#allocation124_spill] sm:$0xff] }
 0x318   :  { %v2616_v3 = vmul.f32 %v9418_v23, %v9418_v23  ;;  %v2711_v8 = vmul.f32 %v9419_v38, %v9419_v38  ;;  %v2758_v18 = vadd.f32 %v2757_v40, %v2710_v54  ;;  %v2806_v45 = vmul.f32 %v9420_v39, %v9420_v39  ;;  %v9425_v54 = vld [vmem:[#allocation62_spill] sm:$0xff]  ;;  %v9435_v36 = vld [vmem:[#allocation145_spill] sm:$0xff]  ;;  %v9458_v22 = vld [vmem:[#allocation71_spill] sm:$0xff] }
 0x319   :  { %v2566_v4 = vrot.slane %v2565_v25, 4  ;;  %v2663_v16 = vadd.f32 %v2662_v12, %v2615_v28  ;;  %v2853_v11 = vadd.f32 %v2852_v51, %v2805_v5  ;;  %v7655_v27 = vadd.f32 %v2935_v42, %v9421_v58  ;;  %v9427_v42 = vld [vmem:[#allocation83_spill] sm:$0xff]  ;;  %v9428_v5 = vld [vmem:[#allocation148_spill] sm:$0xff]  ;;  %v9431_v32 = vld [vmem:[#allocation126_spill] sm:$0xff] }
 0x31a   :  { %v2712_v29 = vmul.f32 %v9422_v55, %v9422_v55  ;;  %v2759_v19 = vadd.f32 %v2758_v18, %v2711_v8  ;;  %v7660_v56 = vadd.f32 %v2936_v30, %v9423_v43  ;;  %v7663_v14 = vadd.f32 %v2937_v10, %v9424_v41  ;;  %v9430_v30 = vld [vmem:[#allocation143_spill] sm:$0xff] }
 0x31b   :  { %v2617_v40 = vmul.f32 %v9425_v54, %v9425_v54  ;;  %v2664_v39 = vadd.f32 %v2663_v16, %v2616_v3  ;;  %v2807_v28 = vmul.f32 %v9426_v50, %v9426_v50  ;;  %v2854_v12 = vadd.f32 %v2853_v11, %v2806_v45  ;;  %v9432_v50 = vld [vmem:[#allocation49_spill] sm:$0xff]  ;;  %v9433_v45 = vld [vmem:[#allocation150_spill] sm:$0xff] }
 0x31c   :  { %v7671_v51 = vsub.f32 %v9428_v5, %v9427_v42  ;;  %v2618_v8 = vmul.f32 %v9411_v20, %v9411_v20  ;;  %v2713_v18 = vmul.f32 %v9430_v30, %v9430_v30  ;;  %v2760_v10 = vadd.f32 %v2759_v19, %v2712_v29 }
 0x31d   :  { %v2567_v33 = vadd.f32 %v2566_v4, %v2565_v25  ;;  %v2665_v57 = vadd.f32 %v2664_v39, %v2617_v40  ;;  %v2808_v16 = vmul.f32 %v9431_v32, %v9431_v32  ;;  %v2855_v3 = vadd.f32 %v2854_v12, %v2807_v28  ;;  %v9436_v4 = vld [vmem:[#allocation128_spill] sm:$0xff]  ;;  %v9437_v40 = vld [vmem:[#allocation151_spill] sm:$0xff] }
 0x31e   :  { %9429 = vst [vmem:[#allocation130_spill] sm:$0xff] %v7671_v51  ;;  %v7681_v11 = vsub.f32 %v9432_v50, %v9427_v42  ;;  %v7685_v5 = vsub.f32 %v9433_v45, %v9427_v42  ;;  %v2714_v20 = vmul.f32 %v9435_v36, %v9435_v36  ;;  %v2761_v49 = vadd.f32 %v2760_v10, %v2713_v18 }
 0x31f   :  { %v2619_v25 = vmul.f32 %v9413_v34, %v9413_v34  ;;  %v2666_v39 = vadd.f32 %v2665_v57, %v2618_v8  ;;  %v2809_v29 = vmul.f32 %v9436_v4, %v9436_v4  ;;  %v2856_v19 = vadd.f32 %v2855_v3, %v2808_v16  ;;  %v9439_v8 = vld [vmem:[#allocation53_spill] sm:$0xff] }
 0x320   :  { %9434 = vst [vmem:[#allocation196_spill] sm:$0xff] %v7685_v5  ;;  %v7695_v50 = vsub.f32 %v9437_v40, %v9427_v42  ;;  %v2620_v28 = vmul.f32 %v9414_v24, %v9414_v24  ;;  %v2715_v12 = vmul.f32 %v9415_v13, %v9415_v13  ;;  %v2762_v45 = vadd.f32 %v2761_v49, %v2714_v20  ;;  %v9440_v3 = vld [vmem:[#allocation57_spill] sm:$0xff]  ;;  %v9442_v49 = vld [vmem:[#allocation19_spill] sm:$0xff] }
 0x321   :  { %v2568_v18 = vrot.slane %v2567_v33, 2  ;;  %v2667_v10 = vadd.f32 %v2666_v39, %v2619_v25  ;;  %v2810_v57 = vmul.f32 %v7671_v51, %v7671_v51  ;;  %v2857_v34 = vadd.f32 %v2856_v19, %v2809_v29  ;;  %v9441_v4 = vld [vmem:[#allocation149_spill] sm:$0xff] }
 0x322   :  { %9438 = vst [vmem:[#allocation190_spill] sm:$0xff] %v7695_v50  ;;  %v7705_v16 = vsub.f32 %v9439_v8, %v9427_v42  ;;  %v7709_v40 = vsub.f32 %v9440_v3, %v9427_v42  ;;  %v2716_v24 = vmul.f32 %v9441_v4, %v9441_v4  ;;  %v2763_v32 = vadd.f32 %v2762_v45, %v2715_v12  ;;  %v9444_v29 = vld [vmem:[#allocation61_spill] sm:$0xff]  ;;  %v9445_v8 = vld [vmem:[#allocation23_spill] sm:$0xff] }
 0x323   :  { %v7715_v13 = vsub.f32 %v9442_v49, %v9427_v42  ;;  %v2668_v20 = vadd.f32 %v2667_v10, %v2620_v28  ;;  %v2811_v25 = vmul.f32 %v7685_v5, %v7685_v5  ;;  %v2858_v39 = vadd.f32 %v2857_v34, %v2810_v57  ;;  %v9447_v57 = vld [vmem:[#allocation65_spill] sm:$0xff] }
 0x324   :  { %v7721_v19 = vsub.f32 %v9444_v29, %v9427_v42  ;;  %v7725_v3 = vsub.f32 %v9445_v8, %v9427_v42  ;;  %v2717_v12 = vmul.f32 %v7681_v11, %v7681_v11  ;;  %v2764_v45 = vadd.f32 %v2763_v32, %v2716_v24  ;;  %v9448_v29 = vld [vmem:[#allocation153_spill] sm:$0xff]  ;;  %v9450_v32 = vld [vmem:[#allocation155_spill] sm:$0xff] }
 0x325   :  { %9443 = vst [vmem:[#allocation50_spill] sm:$0xff] %v7715_v13  ;;  %v2569_v51 = vadd.f32 %v2568_v18, %v2567_v33  ;;  %v2669_v49 = vrot.slane %v2668_v20, 4  ;;  %v2812_v28 = vmul.f32 %v7695_v50, %v7695_v50  ;;  %v2859_v10 = vadd.f32 %v2858_v39, %v2811_v25  ;;  %v9452_v39 = vld [vmem:[#allocation157_spill] sm:$0xff] }
 0x326   :  { %9446 = vst [vmem:[#allocation171_spill] sm:$0xff] %v7725_v3  ;;  %v7733_v34 = vsub.f32 %v9447_v57, %v9427_v42  ;;  %v7737_v5 = vsub.f32 %v9448_v29, %v9427_v42  ;;  %v2718_v8 = vmul.f32 %v7705_v16, %v7705_v16  ;;  %v2765_v46 = vadd.f32 %v2764_v45, %v2717_v12  ;;  %v9454_v29 = vld [vmem:[#allocation159_spill] sm:$0xff] }
 0x327   :  { %v7743_v33 = vsub.f32 %v9450_v32, %v9427_v42  ;;  %v2670_v18 = vadd.f32 %v2669_v49, %v2668_v20  ;;  %v2813_v24 = vmul.f32 %v7715_v13, %v7715_v13  ;;  %v2860_v25 = vadd.f32 %v2859_v10, %v2812_v28  ;;  %v9456_v28 = vld [vmem:[#allocation160_spill] sm:$0xff] }
 0x328   :  { %9449 = vst [vmem:[#allocation7_spill] sm:$0xff] %v7737_v5  ;;  %v7749_v57 = vsub.f32 %v9452_v39, %v9427_v42  ;;  %v7753_v50 = vsub.f32 %v9454_v29, %v9427_v42  ;;  %v2719_v12 = vmul.f32 %v7709_v40, %v7709_v40  ;;  %v2766_v45 = vadd.f32 %v2765_v46, %v2718_v8  ;;  %v9457_v39 = vld [vmem:[#allocation69_spill] sm:$0xff] }
 0x329   :  { %9451 = vst [vmem:[#allocation172_spill] sm:$0xff] %v7743_v33  ;;  %v2570_v48 = vrot.slane %v2569_v51, 1  ;;  %v2671_v32 = vrot.slane %v2670_v18, 2  ;;  %v2814_v20 = vmul.f32 %v7725_v3, %v7725_v3  ;;  %v2861_v49 = vadd.f32 %v2860_v25, %v2813_v24  ;;  %v9459_v24 = vld [vmem:[#allocation161_spill] sm:$0xff] }
 0x32a   :  { %9453 = vst [vmem:[#allocation8_spill] sm:$0xff] %v7749_v57  ;;  %9455 = vst [vmem:[#allocation173_spill] sm:$0xff] %v7753_v50  ;;  %v2459_v10 = vsub.f32 %v9456_v28, %v9427_v42  ;;  %v2466_v13 = vsub.f32 %v9457_v39, %v9427_v42  ;;  %v2720_v29 = vmul.f32 %v7721_v19, %v7721_v19 }
 0x32b   :  { %v2767_v60 = vadd.f32 %v2766_v45, %v2719_v12  ;;  %v2467_v7 = vsub.f32 %v9458_v22, %v9427_v42  ;;  %v2672_v46 = vadd.f32 %v2671_v32, %v2670_v18  ;;  %v2815_v8 = vmul.f32 %v7737_v5, %v7737_v5  ;;  %v9563_v5 = vld [vmem:[#allocation124_spill] sm:$0xff] }
 0x32c   :  { %v2862_v37 = vadd.f32 %v2861_v49, %v2814_v20  ;;  %v2468_v25 = vsub.f32 %v9459_v24, %v9427_v42  ;;  %v2721_v28 = vmul.f32 %v7733_v34, %v7733_v34  ;;  %v7774_v39 = vadd.f32 %v7642_v63, %v2459_v10 }
 0x32d   :  { %v2768_v3 = vadd.f32 %v2767_v60, %v2720_v29  ;;  %v2571_v26 = vadd.f32 %v2570_v48, %v2569_v51  ;;  %v2673_v12 = vrot.slane %v2672_v46, 1  ;;  %v2816_v22 = vmul.f32 %v7743_v33, %v7743_v33 }
 0x32e   :  { %9460 = vst [vmem:[#allocation9_spill] sm:$0xff] %v7774_v39  ;;  %v2863_v18 = vadd.f32 %v2862_v37, %v2815_v8  ;;  %v2722_v45 = vmul.f32 %v9421_v58, %v9421_v58  ;;  %v2817_v20 = vmul.f32 %v7749_v57, %v7749_v57  ;;  %v7783_v49 = vadd.f32 %v7655_v27, %v2466_v13  ;;  %v9464_v58 = vld [vmem:[#allocation47_spill] sm:$0xff]  ;;  %v9479_v39 = vld [vmem:[#allocation18_spill] sm:$0xff] }
 0x32f   :  { %v2769_v32 = vadd.f32 %v2768_v3, %v2721_v28  ;;  %v2674_v60 = vadd.f32 %v2673_v12, %v2672_v46  ;;  %v7786_v63 = vadd.f32 %v7660_v56, %v2467_v7  ;;  %v7789_v48 = vadd.f32 %v7663_v14, %v2468_v25  ;;  %v9466_v14 = vld [vmem:[#allocation51_spill] sm:$0xff] }
 0x330   :  { %9461 = vst [vmem:[#allocation132_spill] sm:$0xff] %v7783_v49  ;;  %v2864_v29 = vadd.f32 %v2863_v18, %v2816_v22  ;;  %v2723_v37 = vmul.f32 %v9423_v43, %v9423_v43  ;;  %v7795_v3 = vsub.f32 %v9464_v58, %v9427_v42  ;;  %v2818_v27 = vmul.f32 %v7753_v50, %v7753_v50  ;;  %v9468_v18 = vld [vmem:[#allocation55_spill] sm:$0xff] }
 0x331   :  { %9462 = vst [vmem:[#allocation197_spill] sm:$0xff] %v7786_v63  ;;  %9463 = vst [vmem:[#allocation174_spill] sm:$0xff] %v7789_v48  ;;  %v2770_v51 = vadd.f32 %v2769_v32, %v2722_v45  ;;  %v2675_v8 = vadd.f32 %v2674_v60, %v2571_v26  ;;  %v2724_v56 = vmul.f32 %v9424_v41, %v9424_v41  ;;  %v9470_v60 = vld [vmem:[#allocation59_spill] sm:$0xff] }
 0x332   :  { %9465 = vst [vmem:[#allocation10_spill] sm:$0xff] %v7795_v3  ;;  %v2865_v46 = vadd.f32 %v2864_v29, %v2817_v20  ;;  %v7803_v28 = vsub.f32 %v9466_v14, %v9427_v42  ;;  %v2819_v12 = vmul.f32 %v2459_v10, %v2459_v10  ;;  %v7807_v45 = vsub.f32 %v9468_v18, %v9427_v42 }
 0x333   :  { %v2771_v24 = vadd.f32 %v2770_v51, %v2723_v37  ;;  %v2820_v26 = vmul.f32 %v7795_v3, %v7795_v3  ;;  %v7813_v41 = vsub.f32 %v9470_v60, %v9427_v42  ;;  %v9472_v51 = vld [vmem:[#allocation63_spill] sm:$0xff]  ;;  %v2828_v63 = vmul.f32 %v2468_v25, %v2468_v25 }
 0x334   :  { %9467 = vst [vmem:[#allocation25_spill] sm:$0xff] %v7803_v28  ;;  %v2866_v43 = vadd.f32 %v2865_v46, %v2818_v27  ;;  %9469 = vst [vmem:[#allocation11_spill] sm:$0xff] %v7807_v45  ;;  %v2821_v29 = vmul.f32 %v7803_v28, %v7803_v28  ;;  %v7819_v58 = vsub.f32 %v9472_v51, %v9427_v42 }
 0x335   :  { %v2772_v22 = vadd.f32 %v2771_v24, %v2724_v56  ;;  %9471 = vst [vmem:[#allocation27_spill] sm:$0xff] %v7813_v41  ;;  %v2822_v27 = vmul.f32 %v7807_v45, %v7807_v45  ;;  %v9474_v24 = vld [vmem:[#allocation67_spill] sm:$0xff] }
 0x336   :  { %v2867_v32 = vadd.f32 %v2866_v43, %v2819_v12  ;;  %9473 = vst [vmem:[#allocation12_spill] sm:$0xff] %v7819_v58  ;;  %v7825_v14 = vsub.f32 %v9474_v24, %v9427_v42  ;;  %v2823_v12 = vmul.f32 %v7813_v41, %v7813_v41  ;;  %v2827_v42 = vmul.f32 %v2467_v7, %v2467_v7  ;;  %v9481_v41 = vld [vmem:[#allocation20_spill] sm:$0xff] }
 0x337   :  { %v2773_v20 = vrot.slane %v2772_v22, 4  ;;  %v9486_v7 = vld [vmem:[#allocation176_spill] sm:$0xff] }
 0x338   :  { %v2868_v37 = vadd.f32 %v2867_v32, %v2820_v26  ;;  %9475 = vst [vmem:[#allocation29_spill] sm:$0xff] %v7825_v14 }
 0x339   :  { %v2774_v10 = vadd.f32 %v2773_v20, %v2772_v22  ;;  %v2824_v22 = vmul.f32 %v7819_v58, %v7819_v58  ;;  %v2825_v20 = vmul.f32 %v7825_v14, %v7825_v14  ;;  %v9480_v58 = vld [vmem:[#allocation37_spill] sm:$0xff] }
 0x33a   :  { %v2869_v46 = vadd.f32 %v2868_v37, %v2821_v29  ;;  %v2826_v37 = vmul.f32 %v2466_v13, %v2466_v13  ;;  %v2913_v14 = vadd.f32 %v9481_v41, %v9480_v58  ;;  %v9494_v41 = vld [vmem:[#allocation180_spill] sm:$0xff] }
 0x33b   :  { %v2775_v56 = vrot.slane %v2774_v10, 2  ;;  %v9495_v58 = vld [vmem:[#allocation36_spill] sm:$0xff] }
 0x33c   :  { %v2870_v43 = vadd.f32 %v2869_v46, %v2822_v27  ;;  %v9476_v27 = vld [vmem:[#allocation33_spill] sm:$0xff] }
 0x33d   :  { %v2776_v18 = vadd.f32 %v2775_v56, %v2774_v10  ;;  %v9477_v10 = vld [vmem:[#allocation16_spill] sm:$0xff]  ;;  %v9478_v56 = vld [vmem:[#allocation35_spill] sm:$0xff] }
 0x33e   :  { %v2871_v26 = vadd.f32 %v2870_v43, %v2823_v12  ;;  %v2911_v46 = vadd.f32 %v9477_v10, %v9476_v27  ;;  %v2912_v12 = vadd.f32 %v9479_v39, %v9478_v56  ;;  %v9492_v39 = vld [vmem:[#allocation179_spill] sm:$0xff]  ;;  %v2921_v10 = vadd.f32 %v9495_v58, %v9494_v41  ;;  %v9496_v56 = vld [vmem:[#allocation181_spill] sm:$0xff] }
 0x33f   :  { %v2777_v32 = vrot.slane %v2776_v18, 1  ;;  %v9508_v41 = vld [vmem:[#allocation191_spill] sm:$0xff] }
 0x340   :  { %v2872_v60 = vadd.f32 %v2871_v26, %v2824_v22  ;;  %v9482_v22 = vld [vmem:[#allocation175_spill] sm:$0xff]  ;;  %v2929_v58 = vadd.f32 %v9398_v52, %v9508_v41  ;;  %v2961_v52 = vadd.f32 %v2912_v12, %v9285_v62 }
 0x341   :  { %v2778_v29 = vadd.f32 %v2777_v32, %v2776_v18  ;;  %v9483_v18 = vld [vmem:[#allocation24_spill] sm:$0xff]  ;;  %v9484_v26 = vld [vmem:[#allocation43_spill] sm:$0xff] }
 0x342   :  { %v2873_v51 = vadd.f32 %v2872_v60, %v2825_v20  ;;  %v2915_v13 = vadd.f32 %v9483_v18, %v9482_v22  ;;  %v9487_v20 = vld [vmem:[#allocation28_spill] sm:$0xff]  ;;  %v9488_v60 = vld [vmem:[#allocation177_spill] sm:$0xff]  ;;  %v9497_v22 = vld [vmem:[#allocation38_spill] sm:$0xff] }
 0x343   :  { %v7833_v48 = vadd.f32 %v2778_v29, %v2675_v8  ;;  %v9485_v8 = vld [vmem:[#allocation26_spill] sm:$0xff]  ;;  %v2917_v25 = vadd.f32 %v9487_v20, %v9486_v7  ;;  %v2922_v18 = vadd.f32 %v9497_v22, %v9496_v56  ;;  %v9500_v7 = vld [vmem:[#allocation183_spill] sm:$0xff]  ;;  %v9509_v56 = vld [vmem:[#allocation192_spill] sm:$0xff] }
 0x344   :  { %v2874_v24 = vadd.f32 %v2873_v51, %v2826_v37  ;;  %v2916_v32 = vadd.f32 %v9485_v8, %v9484_v26  ;;  %v9489_v29 = vld [vmem:[#allocation30_spill] sm:$0xff]  ;;  %v9499_v8 = vld [vmem:[#allocation40_spill] sm:$0xff]  ;;  %v2930_v22 = vadd.f32 %v9402_v15, %v9509_v56  ;;  %v9514_v15 = vld [vmem:[#allocation121_spill] sm:$0xff] }
 0x345   :  { %v2918_v37 = vadd.f32 %v9489_v29, %v9488_v60  ;;  %v9490_v51 = vld [vmem:[#allocation178_spill] sm:$0xff]  ;;  %v9502_v60 = vld [vmem:[#allocation184_spill] sm:$0xff]  ;;  %v9515_v41 = vld [vmem:[#allocation123_spill] sm:$0xff] }
 0x346   :  { %v2875_v49 = vadd.f32 %v2874_v24, %v2827_v42  ;;  %v9491_v42 = vld [vmem:[#allocation32_spill] sm:$0xff]  ;;  %v9498_v26 = vld [vmem:[#allocation182_spill] sm:$0xff]  ;;  %v9516_v56 = vld [vmem:[#allocation125_spill] sm:$0xff] }
 0x347   :  { %v2919_v24 = vadd.f32 %v9491_v42, %v9490_v51  ;;  %v2923_v45 = vadd.f32 %v9499_v8, %v9498_v26  ;;  %v9501_v20 = vld [vmem:[#allocation42_spill] sm:$0xff]  ;;  %v9503_v29 = vld [vmem:[#allocation44_spill] sm:$0xff]  ;;  %v9510_v26 = vld [vmem:[#allocation73_spill] sm:$0xff] }
 0x348   :  { %v2876_v43 = vadd.f32 %v2875_v49, %v2828_v63  ;;  %v9493_v49 = vld [vmem:[#allocation34_spill] sm:$0xff]  ;;  %v2924_v28 = vadd.f32 %v9501_v20, %v9500_v7  ;;  %v2925_v3 = vadd.f32 %v9503_v29, %v9502_v60  ;;  %v9504_v51 = vld [vmem:[#allocation188_spill] sm:$0xff]  ;;  %v2931_v8 = vadd.f32 %v9403_v47, %v9510_v26  ;;  %v9511_v7 = vld [vmem:[#allocation75_spill] sm:$0xff] }
 0x349   :  { %v2920_v63 = vadd.f32 %v9493_v49, %v9492_v39  ;;  %v9505_v42 = vld [vmem:[#allocation46_spill] sm:$0xff]  ;;  %v9506_v39 = vld [vmem:[#allocation189_spill] sm:$0xff]  ;;  %v9507_v49 = vld [vmem:[#allocation48_spill] sm:$0xff]  ;;  %v2932_v20 = vadd.f32 %v9416_v61, %v9511_v7  ;;  %v2965_v47 = vadd.f32 %v2916_v32, %v9515_v41  ;;  %v2966_v26 = vadd.f32 %v2917_v25, %v9516_v56 }
 0x34a   :  { %v2877_v27 = vrot.slane %v2876_v43, 4  ;;  %v2926_v50 = vadd.f32 %v9505_v42, %v9504_v51  ;;  %v2927_v57 = vadd.f32 %v9507_v49, %v9506_v39  ;;  %v9512_v60 = vld [vmem:[#allocation77_spill] sm:$0xff]  ;;  %v9513_v51 = vld [vmem:[#allocation79_spill] sm:$0xff]  ;;  %v2962_v39 = vadd.f32 %v2913_v14, %v9287_v35  ;;  %v9539_v56 = vld [vmem:[#allocation96_spill] sm:$0xff] }
 0x34b   :  { %v2933_v29 = vadd.f32 %v9418_v23, %v9512_v60  ;;  %v2934_v42 = vadd.f32 %v9425_v54, %v9513_v51  ;;  %v2964_v49 = vadd.f32 %v2915_v13, %v9514_v15  ;;  %v9517_v61 = vld [vmem:[#allocation127_spill] sm:$0xff]  ;;  %v2968_v23 = vadd.f32 %v2919_v24, %v9392_v53  ;;  %v9527_v24 = vld [vmem:[#allocation41_spill] sm:$0xff] }
 0x34c   :  { %v2878_v33 = vadd.f32 %v2877_v27, %v2876_v43  ;;  %v2960_v43 = vadd.f32 %v2911_v46, %v9284_v17  ;;  %v2967_v7 = vadd.f32 %v2918_v37, %v9517_v61  ;;  %v2969_v54 = vadd.f32 %v2920_v63, %v9399_v9  ;;  %v9526_v25 = vld [vmem:[#allocation163_spill] sm:$0xff]  ;;  %v9528_v63 = vld [vmem:[#allocation164_spill] sm:$0xff]  ;;  %v9536_v51 = vld [vmem:[#allocation113_spill] sm:$0xff] }
 0x34d   :  { %v2970_v17 = vadd.f32 %v2921_v10, %v9404_v21  ;;  %v2971_v46 = vadd.f32 %v2922_v18, %v9407_v59  ;;  %v2972_v62 = vadd.f32 %v2923_v45, %v9408_v1  ;;  %v2973_v35 = vadd.f32 %v2924_v28, %v9419_v38  ;;  %v9518_v28 = vld [vmem:[#allocation15_spill] sm:$0xff]  ;;  %v9529_v10 = vld [vmem:[#allocation45_spill] sm:$0xff] }
 0x34e   :  { %v2879_v27 = vrot.slane %v2878_v33, 2  ;;  %v2974_v14 = vadd.f32 %v2925_v3, %v9422_v55  ;;  %v2975_v12 = vadd.f32 %v2926_v50, %v9430_v30  ;;  %v2976_v32 = vadd.f32 %v2927_v57, %v9435_v36  ;;  %v9519_v30 = vld [vmem:[#allocation17_spill] sm:$0xff]  ;;  %v9521_v57 = vld [vmem:[#allocation152_spill] sm:$0xff]  ;;  %v9538_v15 = vld [vmem:[#allocation115_spill] sm:$0xff] }
 0x34f   :  { %v2978_v53 = vadd.f32 %v2929_v58, %v9441_v4  ;;  %v2980_v9 = vadd.f32 %v2931_v8, %v7705_v16  ;;  %v2981_v21 = vadd.f32 %v2932_v20, %v7709_v40  ;;  %v2982_v59 = vadd.f32 %v2933_v29, %v7721_v19  ;;  %v9520_v36 = vld [vmem:[#allocation21_spill] sm:$0xff]  ;;  %v9522_v16 = vld [vmem:[#allocation154_spill] sm:$0xff]  ;;  %v9523_v3 = vld [vmem:[#allocation156_spill] sm:$0xff] }
 0x350   :  { %v2880_v60 = vadd.f32 %v2879_v27, %v2878_v33  ;;  %v2979_v33 = vadd.f32 %v2930_v22, %v7681_v11  ;;  %v2983_v1 = vadd.f32 %v2934_v42, %v7733_v34  ;;  %v2987_v55 = vadd.f32 %v7505_v0, %v9518_v28  ;;  %v9524_v19 = vld [vmem:[#allocation162_spill] sm:$0xff]  ;;  %v9530_v18 = vld [vmem:[#allocation165_spill] sm:$0xff]  ;;  %v9531_v58 = vld [vmem:[#allocation88_spill] sm:$0xff] }
 0x351   :  { %v2988_v50 = vadd.f32 %v7509_v44, %v9519_v30  ;;  %v2989_v4 = vadd.f32 %v7515_v31, %v9520_v36  ;;  %v2990_v11 = vadd.f32 %v7520_v6, %v9521_v57  ;;  %v2991_v40 = vadd.f32 %v7524_v2, %v9522_v16  ;;  %v9525_v34 = vld [vmem:[#allocation158_spill] sm:$0xff]  ;;  %v9534_v20 = vld [vmem:[#allocation111_spill] sm:$0xff]  ;;  %v9535_v29 = vld [vmem:[#allocation92_spill] sm:$0xff] }
 0x352   :  { %v2881_v13 = vrot.slane %v2880_v60, 1  ;;  %v2992_v45 = vadd.f32 %v9524_v19, %v9523_v3  ;;  %v2993_v37 = vadd.f32 %v9526_v25, %v9525_v34  ;;  %v2994_v44 = vadd.f32 %v9528_v63, %v9527_v24  ;;  %v9532_v22 = vld [vmem:[#allocation166_spill] sm:$0xff]  ;;  %v9543_v30 = vld [vmem:[#allocation100_spill] sm:$0xff]  ;;  %v9544_v36 = vld [vmem:[#allocation167_spill] sm:$0xff] }
 0x353   :  { %v2995_v31 = vadd.f32 %v9530_v18, %v9529_v10  ;;  %v2996_v6 = vadd.f32 %v9532_v22, %v9531_v58  ;;  %v9533_v8 = vld [vmem:[#allocation90_spill] sm:$0xff]  ;;  %v2998_v42 = vadd.f32 %v9536_v51, %v9535_v29  ;;  %v3002_v57 = vadd.f32 %v9544_v36, %v9543_v30  ;;  %v9546_v3 = vld [vmem:[#allocation3_spill] sm:$0xff]  ;;  %v9547_v34 = vld [vmem:[#allocation104_spill] sm:$0xff] }
 0x354   :  { %v2882_v38 = vadd.f32 %v2881_v13, %v2880_v60  ;;  %v2997_v2 = vadd.f32 %v9534_v20, %v9533_v8  ;;  %v9537_v27 = vld [vmem:[#allocation94_spill] sm:$0xff]  ;;  %v9548_v25 = vld [vmem:[#allocation168_spill] sm:$0xff]  ;;  %v9552_v22 = vld [vmem:[#allocation169_spill] sm:$0xff] }
 0x355   :  { %v2999_v41 = vadd.f32 %v9538_v15, %v9537_v27  ;;  %v9541_v13 = vld [vmem:[#allocation98_spill] sm:$0xff]  ;;  %v3004_v24 = vadd.f32 %v9548_v25, %v9547_v34  ;;  %v9550_v10 = vld [vmem:[#allocation4_spill] sm:$0xff] }
 0x356   :  { %v2883_v0 = vadd.f32 %v2882_v38, %v7833_v48  ;;  %v9540_v48 = vld [vmem:[#allocation117_spill] sm:$0xff]  ;;  %v9542_v38 = vld [vmem:[#allocation119_spill] sm:$0xff]  ;;  %v9545_v16 = vld [vmem:[#allocation102_spill] sm:$0xff] }
 0x357   :  { %v3000_v61 = vadd.f32 %v9540_v48, %v9539_v56  ;;  %v3001_v28 = vadd.f32 %v9542_v38, %v9541_v13  ;;  %v3003_v19 = vadd.f32 %v9546_v3, %v9545_v16  ;;  %v9549_v63 = vld [vmem:[#allocation106_spill] sm:$0xff]  ;;  %v9551_v58 = vld [vmem:[#allocation108_spill] sm:$0xff] }
 0x358   :  { %v2884_v60 = vmul.f32 0.0006377551, %v2883_v0  ;;  %v3005_v18 = vadd.f32 %v9550_v10, %v9549_v63  ;;  %v3006_v8 = vadd.f32 %v9552_v22, %v9551_v58  ;;  %v9553_v20 = vld [vmem:[#allocation110_spill] sm:$0xff]  ;;  %v9554_v0 = vld [vmem:[#allocation5_spill] sm:$0xff]  ;;  %v9555_v27 = vld [vmem:[#allocation112_spill] sm:$0xff]  ;;  %v3014_v58 = vadd.f32 %v2965_v47, %v9563_v5 }
 0x359   :  { %v3007_v29 = vadd.f32 %v9554_v0, %v9553_v20  ;;  %v9556_v15 = vld [vmem:[#allocation170_spill] sm:$0xff]  ;;  %v9558_v38 = vld [vmem:[#allocation116_spill] sm:$0xff] }
 0x35a   :  { %v2886_v51 = vadd.f32 1e-05, %v2884_v60  ;;  %v3008_v56 = vadd.f32 %v9556_v15, %v9555_v27  ;;  %v9557_v48 = vld [vmem:[#allocation114_spill] sm:$0xff]  ;;  %v3010_v30 = vadd.f32 %v2961_v52, %v9558_v38  ;;  %v9560_v3 = vld [vmem:[#allocation120_spill] sm:$0xff] }
 0x35b   :  { %v3009_v13 = vadd.f32 %v2960_v43, %v9557_v48  ;;  %v9559_v36 = vld [vmem:[#allocation118_spill] sm:$0xff]  ;;  %v9565_v60 = vld [vmem:[#allocation128_spill] sm:$0xff] }
 0x35c   :  { %v3011_v16 = vadd.f32 %v2962_v39, %v9559_v36  ;;  %v9561_v34 = vld [vmem:[#allocation6_spill] sm:$0xff]  ;;  %4480 = vrsqrt.f32 %v2886_v51  ;;  %v3016_v0 = vadd.f32 %v2967_v7, %v9565_v60  ;;  %v9567_v43 = vld [vmem:[#allocation196_spill] sm:$0xff] }
 0x35d   :  { %v3012_v25 = vadd.f32 %v9561_v34, %v9560_v3  ;;  %v9562_v63 = vld [vmem:[#allocation122_spill] sm:$0xff]  ;;  %v3018_v48 = vadd.f32 %v2969_v54, %v9567_v43  ;;  %v9570_v3 = vld [vmem:[#allocation171_spill] sm:$0xff]  ;;  %v9572_v5 = vld [vmem:[#allocation172_spill] sm:$0xff] }
 0x35e   :  { %v3013_v10 = vadd.f32 %v2964_v49, %v9562_v63  ;;  %v9564_v22 = vld [vmem:[#allocation126_spill] sm:$0xff]  ;;  %v3021_v34 = vadd.f32 %v2972_v62, %v9570_v3  ;;  %v9571_v49 = vld [vmem:[#allocation7_spill] sm:$0xff]  ;;  %v3023_v47 = vadd.f32 %v2974_v14, %v9572_v5  ;;  %v9573_v51 = vld [vmem:[#allocation8_spill] sm:$0xff]  ;;  %v3086_v5 = vlaneseq }
 0x35f   :  { %v3015_v20 = vadd.f32 %v2966_v26, %v9564_v22  ;;  %v9566_v15 = vld [vmem:[#allocation130_spill] sm:$0xff]  ;;  %v3022_v63 = vadd.f32 %v2973_v35, %v9571_v49  ;;  %v3024_v22 = vadd.f32 %v2975_v12, %v9573_v51  ;;  %v9574_v26 = vld [vmem:[#allocation173_spill] sm:$0xff]  ;;  %v9577_v54 = vld [vmem:[#allocation11_spill] sm:$0xff]  ;;  %v3036_v49 = vmul.f32 0.25, %v2987_v55 }
 0x360   :  { %v3017_v27 = vadd.f32 %v2968_v23, %v9566_v15  ;;  %v9568_v38 = vld [vmem:[#allocation190_spill] sm:$0xff]  ;;  %v3025_v7 = vadd.f32 %v2976_v32, %v9574_v26  ;;  %v9576_v23 = vld [vmem:[#allocation25_spill] sm:$0xff]  ;;  %v3037_v14 = vmul.f32 0.25, %v2988_v50  ;;  %v3038_v12 = vmul.f32 0.25, %v2989_v4 }
 0x361   :  { %v3019_v52 = vadd.f32 %v2970_v17, %v9568_v38  ;;  %v9569_v36 = vld [vmem:[#allocation50_spill] sm:$0xff]  ;;  %v3028_v43 = vadd.f32 %v2979_v33, %v9576_v23  ;;  %v3029_v17 = vadd.f32 %v2980_v9, %v9577_v54  ;;  %v9578_v38 = vld [vmem:[#allocation27_spill] sm:$0xff]  ;;  %v9580_v62 = vld [vmem:[#allocation29_spill] sm:$0xff]  ;;  %v3039_v51 = vmul.f32 0.25, %v2990_v11 }
 0x362   :  { %v3020_v39 = vadd.f32 %v2971_v46, %v9569_v36  ;;  %v9575_v60 = vld [vmem:[#allocation10_spill] sm:$0xff]  ;;  %v3030_v36 = vadd.f32 %v2981_v21, %v9578_v38  ;;  %v9579_v46 = vld [vmem:[#allocation12_spill] sm:$0xff]  ;;  %v3032_v35 = vadd.f32 %v2983_v1, %v9580_v62  ;;  %v3040_v26 = vmul.f32 0.25, %v2991_v40 }
 0x363   :  { %v3027_v15 = vadd.f32 %v2978_v53, %v9575_v60  ;;  %v3031_v3 = vadd.f32 %v2982_v59, %v9579_v46  ;;  %v3041_v32 = vmul.f32 0.25, %v2992_v45  ;;  %v3042_v53 = vmul.f32 0.25, %v2993_v37 }
 0x364   :  { %v3043_v60 = vmul.f32 0.25, %v2994_v44  ;;  %v3044_v23 = vmul.f32 0.25, %v2995_v31  ;;  %v3045_v33 = vmul.f32 0.25, %v2996_v6  ;;  %v3046_v9 = vmul.f32 0.25, %v2997_v2  ;;  %v2885_v44 = vld [vmem:[%s8270_s2] sm:$0x1] }
 0x365   :  { %v3047_v54 = vmul.f32 0.25, %v2998_v42  ;;  %v3048_v21 = vmul.f32 0.25, %v2999_v41  ;;  %v3049_v38 = vmul.f32 0.25, %v3000_v61  ;;  %v3050_v46 = vmul.f32 0.25, %v3001_v28 }
 0x366   :  { %v3051_v59 = vmul.f32 0.25, %v3002_v57  ;;  %v3087_v1 = vshrl.u32 %v3086_v5, 7  ;;  %v3052_v62 = vmul.f32 0.25, %v3003_v19  ;;  %v3053_v55 = vmul.f32 0.25, %v3004_v24 }
 0x367   :  { %v3054_v50 = vmul.f32 0.25, %v3005_v18  ;;  %v3055_v4 = vmul.f32 0.25, %v3006_v8  ;;  %v3056_v11 = vmul.f32 0.25, %v3007_v29  ;;  %v3057_v40 = vmul.f32 0.25, %v3008_v56 }
 0x368   :  { %v3058_v45 = vmul.f32 0.25, %v3009_v13  ;;  %v3059_v37 = vmul.f32 0.25, %v3010_v30  ;;  %v3060_v31 = vmul.f32 0.25, %v3011_v16  ;;  %v3061_v6 = vmul.f32 0.25, %v3012_v25  ;;  %v9581_v25 = vld [vmem:[#allocation9_spill] sm:$0xff] }
 0x369   :  { %v3062_v2 = vmul.f32 0.25, %v3013_v10  ;;  %v3063_v42 = vmul.f32 0.25, %v3014_v58  ;;  %v3064_v41 = vmul.f32 0.25, %v3015_v20  ;;  %v3065_v61 = vmul.f32 0.25, %v3016_v0  ;;  %v4481_v19 = vpop.eup %4480 }
 0x36a   :  { %v3066_v28 = vmul.f32 0.25, %v3017_v27  ;;  %v3088_v57 = vsub.s32 0, %v3087_v1  ;;  %v3067_v24 = vmul.f32 0.25, %v3018_v48  ;;  %v3068_v18 = vmul.f32 0.25, %v3019_v52 }
 0x36b   :  { %v3069_v8 = vmul.f32 0.25, %v3020_v39  ;;  %v3070_v29 = vmul.f32 0.25, %v3021_v34  ;;  %v2888_v56 = vmul.f32 %v4481_v19, %v2885_v44  ;;  %v3071_v13 = vmul.f32 0.25, %v3022_v63  ;;  %v9582_v39 = vld [vmem:[#allocation132_spill] sm:$0xff]  ;;  %v9583_v19 = vld [vmem:[#allocation197_spill] sm:$0xff]  ;;  %v9584_v63 = vld [vmem:[#allocation174_spill] sm:$0xff] }
 0x36c   :  { %v3072_v30 = vmul.f32 0.25, %v3023_v47  ;;  %v3073_v5 = vmul.f32 0.25, %v3024_v22  ;;  %v3074_v16 = vmul.f32 0.25, %v3025_v7  ;;  %v3075_v10 = vmul.f32 0.25, %v9581_v25 }
 0x36d   :  { %v3076_v58 = vmul.f32 0.25, %v3027_v15  ;;  %v3077_v20 = vmul.f32 0.25, %v3028_v43  ;;  %v3078_v0 = vmul.f32 0.25, %v3029_v17  ;;  %v3079_v27 = vmul.f32 0.25, %v3030_v36 }
 0x36e   :  { %v3080_v1 = vmul.f32 0.25, %v3031_v3  ;;  %v3089_v48 = vrot.slane %v2888_v56, %v3088_v57  ;;  %v3081_v52 = vmul.f32 0.25, %v3032_v35  ;;  %v3082_v34 = vmul.f32 0.25, %v9582_v39 }
 0x36f   :  { %v3083_v44 = vmul.f32 0.25, %v9583_v19  ;;  %v3084_v47 = vmul.f32 0.25, %v9584_v63 }
 0x370   :  { %v3091_v22 = vmul.f32 %v3089_v48, %v3036_v49  ;;  %v3092_v7 = vmul.f32 %v3089_v48, %v3037_v14  ;;  %v3093_v25 = vmul.f32 %v3089_v48, %v3038_v12  ;;  %v3094_v15 = vmul.f32 %v3089_v48, %v3039_v51 }
 0x371   :  { %v3095_v43 = vmul.f32 %v3089_v48, %v3040_v26  ;;  %v3096_v17 = vmul.f32 %v3089_v48, %v3041_v32  ;;  %v3097_v36 = vmul.f32 %v3089_v48, %v3042_v53  ;;  %v3098_v3 = vmul.f32 %v3089_v48, %v3043_v60 }
 0x372   :  { %v3099_v56 = vmul.f32 %v3089_v48, %v3044_v23  ;;  %v3100_v57 = vmul.f32 %v3089_v48, %v3045_v33  ;;  %v3101_v35 = vmul.f32 %v3089_v48, %v3046_v9  ;;  %v3102_v39 = vmul.f32 %v3089_v48, %v3047_v54 }
 0x373   :  { %v3103_v19 = vmul.f32 %v3089_v48, %v3048_v21  ;;  %v3104_v63 = vmul.f32 %v3089_v48, %v3049_v38  ;;  %v3105_v49 = vmul.f32 %v3089_v48, %v3050_v46  ;;  %v3106_v14 = vmul.f32 %v3089_v48, %v3051_v59 }
 0x374   :  { %v3107_v12 = vmul.f32 %v3089_v48, %v3052_v62  ;;  %v3108_v51 = vmul.f32 %v3089_v48, %v3053_v55  ;;  %v3109_v26 = vmul.f32 %v3089_v48, %v3054_v50  ;;  %v3110_v32 = vmul.f32 %v3089_v48, %v3055_v4 }
 0x375   :  { %v3111_v53 = vmul.f32 %v3089_v48, %v3056_v11  ;;  %v3112_v60 = vmul.f32 %v3089_v48, %v3057_v40  ;;  %v3113_v23 = vmul.f32 %v3089_v48, %v3058_v45  ;;  %v3114_v33 = vmul.f32 %v3089_v48, %v3059_v37 }
 0x376   :  { %v3115_v9 = vmul.f32 %v3089_v48, %v3060_v31  ;;  %v3116_v54 = vmul.f32 %v3089_v48, %v3061_v6  ;;  %v3117_v21 = vmul.f32 %v3089_v48, %v3062_v2  ;;  %v3118_v38 = vmul.f32 %v3089_v48, %v3063_v42  ;;  %v3645_v2 = vld [vmem:[%s8271_s3] ss:$0 sm:$0xff] }
 0x377   :  { %v3119_v46 = vmul.f32 %v3089_v48, %v3064_v41  ;;  %v3120_v59 = vmul.f32 %v3089_v48, %v3065_v61  ;;  %v3121_v62 = vmul.f32 %v3089_v48, %v3066_v28  ;;  %v3122_v55 = vmul.f32 %v3089_v48, %v3067_v24 }
 0x378   :  { %v3123_v50 = vmul.f32 %v3089_v48, %v3068_v18  ;;  %v3124_v4 = vmul.f32 %v3089_v48, %v3069_v8  ;;  %v3125_v11 = vmul.f32 %v3089_v48, %v3070_v29  ;;  %v3126_v40 = vmul.f32 %v3089_v48, %v3071_v13 }
 0x379   :  { %v3127_v45 = vmul.f32 %v3089_v48, %v3072_v30  ;;  %v3128_v37 = vmul.f32 %v3089_v48, %v3073_v5  ;;  %v3129_v31 = vmul.f32 %v3089_v48, %v3074_v16  ;;  %v3130_v6 = vmul.f32 %v3089_v48, %v3075_v10 }
 0x37a   :  { %v3131_v42 = vmul.f32 %v3089_v48, %v3076_v58  ;;  %v3132_v41 = vmul.f32 %v3089_v48, %v3077_v20  ;;  %v3133_v61 = vmul.f32 %v3089_v48, %v3078_v0  ;;  %v3134_v28 = vmul.f32 %v3089_v48, %v3079_v27 }
 0x37b   :  { %v3135_v24 = vmul.f32 %v3089_v48, %v3080_v1  ;;  %v3136_v18 = vmul.f32 %v3089_v48, %v3081_v52  ;;  %v3137_v8 = vmul.f32 %v3089_v48, %v3082_v34  ;;  %v3138_v29 = vmul.f32 %v3089_v48, %v3083_v44 }
 0x37c   :  { %v3139_v13 = vmul.f32 %v3089_v48, %v3084_v47  ;;  %v3147_v30 = vadd.f32 %v3645_v2, %v3091_v22  ;;  %v3148_v5 = vadd.f32 %v3645_v2, %v3092_v7  ;;  %v7980_v16 = vadd.f32 %v3645_v2, %v3093_v25 }
 0x37d   :  { %v7982_v10 = vadd.f32 %v3645_v2, %v3094_v15  ;;  %v7984_v58 = vadd.f32 %v3645_v2, %v3095_v43  ;;  %v7986_v20 = vadd.f32 %v3645_v2, %v3096_v17  ;;  %v7988_v0 = vadd.f32 %v3645_v2, %v3097_v36 }
 0x37e   :  { %v7990_v27 = vadd.f32 %v3645_v2, %v3098_v3  ;;  %v7992_v1 = vadd.f32 %v3645_v2, %v3099_v56  ;;  %v7994_v52 = vadd.f32 %v3645_v2, %v3100_v57  ;;  %v7996_v34 = vadd.f32 %v3645_v2, %v3101_v35 }
 0x37f   :  { %v7998_v48 = vadd.f32 %v3645_v2, %v3102_v39  ;;  %v8000_v44 = vadd.f32 %v3645_v2, %v3103_v19  ;;  %v8002_v47 = vadd.f32 %v3645_v2, %v3104_v63  ;;  %v8004_v22 = vadd.f32 %v3645_v2, %v3105_v49 }
 0x380   :  { %v8006_v7 = vadd.f32 %v3645_v2, %v3106_v14  ;;  %v8008_v25 = vadd.f32 %v3645_v2, %v3107_v12  ;;  %v8010_v15 = vadd.f32 %v3645_v2, %v3108_v51  ;;  %v8012_v43 = vadd.f32 %v3645_v2, %v3109_v26 }
 0x381   :  { %v8014_v17 = vadd.f32 %v3645_v2, %v3110_v32  ;;  %v8016_v36 = vadd.f32 %v3645_v2, %v3111_v53  ;;  %v8018_v3 = vadd.f32 %v3645_v2, %v3112_v60  ;;  %v8020_v56 = vadd.f32 %v3645_v2, %v3113_v23 }
 0x382   :  { %v8022_v57 = vadd.f32 %v3645_v2, %v3114_v33  ;;  %v8024_v35 = vadd.f32 %v3645_v2, %v3115_v9  ;;  %v8026_v39 = vadd.f32 %v3645_v2, %v3116_v54  ;;  %v8028_v19 = vadd.f32 %v3645_v2, %v3117_v21 }
 0x383   :  { %v8030_v63 = vadd.f32 %v3645_v2, %v3118_v38  ;;  %v8032_v49 = vadd.f32 %v3645_v2, %v3119_v46  ;;  %v8034_v14 = vadd.f32 %v3645_v2, %v3120_v59  ;;  %v8036_v12 = vadd.f32 %v3645_v2, %v3121_v62 }
 0x384   :  { %v8038_v51 = vadd.f32 %v3645_v2, %v3122_v55  ;;  %v8040_v26 = vadd.f32 %v3645_v2, %v3123_v50  ;;  %v8042_v32 = vadd.f32 %v3645_v2, %v3124_v4  ;;  %v8044_v53 = vadd.f32 %v3645_v2, %v3125_v11 }
 0x385   :  { %v8046_v60 = vadd.f32 %v3645_v2, %v3126_v40  ;;  %v8048_v23 = vadd.f32 %v3645_v2, %v3127_v45  ;;  %v8050_v33 = vadd.f32 %v3645_v2, %v3128_v37  ;;  %v8052_v9 = vadd.f32 %v3645_v2, %v3129_v31 }
 0x386   :  { %v8054_v54 = vadd.f32 %v3645_v2, %v3130_v6  ;;  %v8056_v21 = vadd.f32 %v3645_v2, %v3131_v42  ;;  %v8058_v38 = vadd.f32 %v3645_v2, %v3132_v41  ;;  %v8060_v46 = vadd.f32 %v3645_v2, %v3133_v61 }
 0x387   :  { %v8062_v59 = vadd.f32 %v3645_v2, %v3134_v28  ;;  %v8064_v62 = vadd.f32 %v3645_v2, %v3135_v24  ;;  %v8066_v55 = vadd.f32 %v3645_v2, %v3136_v18  ;;  %v8068_v50 = vadd.f32 %v3645_v2, %v3137_v8 }
 0x388   :  { %v8070_v4 = vadd.f32 %v3645_v2, %v3138_v29  ;;  %v8072_v11 = vadd.f32 %v3645_v2, %v3139_v13  ;;  %v3196_v40 = vmax.f32 %v3147_v30, 0.0  ;;  %v3197_v45 = vmax.f32 %v3148_v5, 0.0 }
 0x389   :  { %v3198_v37 = vmax.f32 %v7980_v16, 0.0  ;;  %v3199_v31 = vmax.f32 %v7982_v10, 0.0  ;;  %v3200_v6 = vmax.f32 %v7984_v58, 0.0  ;;  %v3201_v42 = vmax.f32 %v7986_v20, 0.0 }
 0x38a   :  { %v3202_v41 = vmax.f32 %v7988_v0, 0.0  ;;  %v3203_v61 = vmax.f32 %v7990_v27, 0.0  ;;  %v3204_v28 = vmax.f32 %v7992_v1, 0.0  ;;  %v3205_v24 = vmax.f32 %v7994_v52, 0.0  ;;  %3245 = vst [vmem:[%s8272_s4] sm:$0xff] %v3196_v40  ;;  %3246 = vst [vmem:[%s8272_s4 + $0x8] sm:$0xff] %v3197_v45 }
 0x38b   :  { %v3206_v2 = vmax.f32 %v7996_v34, 0.0  ;;  %v3207_v18 = vmax.f32 %v7998_v48, 0.0  ;;  %v3208_v8 = vmax.f32 %v8000_v44, 0.0  ;;  %v3209_v29 = vmax.f32 %v8002_v47, 0.0  ;;  %3247 = vst [vmem:[%s8272_s4 + $0x10] sm:$0xff] %v3198_v37  ;;  %3248 = vst [vmem:[%s8272_s4 + $0x18] sm:$0xff] %v3199_v31 }
 0x38c   :  { %3249 = vst [vmem:[%s8272_s4 + $0x20] sm:$0xff] %v3200_v6  ;;  %3250 = vst [vmem:[%s8272_s4 + $0x28] sm:$0xff] %v3201_v42  ;;  %v3210_v13 = vmax.f32 %v8004_v22, 0.0  ;;  %v3211_v30 = vmax.f32 %v8006_v7, 0.0  ;;  %v3212_v5 = vmax.f32 %v8008_v25, 0.0  ;;  %v3213_v16 = vmax.f32 %v8010_v15, 0.0 }
 0x38d   :  { %3251 = vst [vmem:[%s8272_s4 + $0x30] sm:$0xff] %v3202_v41  ;;  %3252 = vst [vmem:[%s8272_s4 + $0x38] sm:$0xff] %v3203_v61  ;;  %v3214_v10 = vmax.f32 %v8012_v43, 0.0  ;;  %v3215_v58 = vmax.f32 %v8014_v17, 0.0  ;;  %v3216_v20 = vmax.f32 %v8016_v36, 0.0  ;;  %v3217_v0 = vmax.f32 %v8018_v3, 0.0 }
 0x38e   :  { %3253 = vst [vmem:[%s8272_s4 + $0x40] sm:$0xff] %v3204_v28  ;;  %3254 = vst [vmem:[%s8272_s4 + $0x48] sm:$0xff] %v3205_v24  ;;  %v3218_v27 = vmax.f32 %v8020_v56, 0.0  ;;  %v3219_v1 = vmax.f32 %v8022_v57, 0.0  ;;  %v3220_v52 = vmax.f32 %v8024_v35, 0.0  ;;  %v3221_v34 = vmax.f32 %v8026_v39, 0.0 }
 0x38f   :  { %3255 = vst [vmem:[%s8272_s4 + $0x50] sm:$0xff] %v3206_v2  ;;  %3256 = vst [vmem:[%s8272_s4 + $0x58] sm:$0xff] %v3207_v18  ;;  %v3222_v48 = vmax.f32 %v8028_v19, 0.0  ;;  %v3223_v44 = vmax.f32 %v8030_v63, 0.0  ;;  %v3224_v47 = vmax.f32 %v8032_v49, 0.0  ;;  %v3225_v22 = vmax.f32 %v8034_v14, 0.0 }
 0x390   :  { %3257 = vst [vmem:[%s8272_s4 + $0x60] sm:$0xff] %v3208_v8  ;;  %3258 = vst [vmem:[%s8272_s4 + $0x68] sm:$0xff] %v3209_v29  ;;  %v3226_v7 = vmax.f32 %v8036_v12, 0.0  ;;  %v3227_v25 = vmax.f32 %v8038_v51, 0.0  ;;  %v3228_v15 = vmax.f32 %v8040_v26, 0.0  ;;  %v3229_v43 = vmax.f32 %v8042_v32, 0.0 }
 0x391   :  { %3259 = vst [vmem:[%s8272_s4 + $0x70] sm:$0xff] %v3210_v13  ;;  %3260 = vst [vmem:[%s8272_s4 + $0x78] sm:$0xff] %v3211_v30  ;;  %v3230_v17 = vmax.f32 %v8044_v53, 0.0  ;;  %v3231_v36 = vmax.f32 %v8046_v60, 0.0  ;;  %v3232_v3 = vmax.f32 %v8048_v23, 0.0  ;;  %v3233_v56 = vmax.f32 %v8050_v33, 0.0 }
 0x392   :  { %3261 = vst [vmem:[%s8272_s4 + $0x80] sm:$0xff] %v3212_v5  ;;  %3262 = vst [vmem:[%s8272_s4 + $0x88] sm:$0xff] %v3213_v16  ;;  %v3234_v57 = vmax.f32 %v8052_v9, 0.0  ;;  %v3235_v35 = vmax.f32 %v8054_v54, 0.0  ;;  %v3236_v39 = vmax.f32 %v8056_v21, 0.0  ;;  %v3237_v19 = vmax.f32 %v8058_v38, 0.0 }
 0x393   :  { %3263 = vst [vmem:[%s8272_s4 + $0x90] sm:$0xff] %v3214_v10  ;;  %3264 = vst [vmem:[%s8272_s4 + $0x98] sm:$0xff] %v3215_v58  ;;  %v3238_v63 = vmax.f32 %v8060_v46, 0.0  ;;  %v3239_v49 = vmax.f32 %v8062_v59, 0.0  ;;  %v3240_v14 = vmax.f32 %v8064_v62, 0.0  ;;  %v3241_v12 = vmax.f32 %v8066_v55, 0.0 }
 0x394   :  { %3265 = vst [vmem:[%s8272_s4 + $0xa0] sm:$0xff] %v3216_v20  ;;  %3266 = vst [vmem:[%s8272_s4 + $0xa8] sm:$0xff] %v3217_v0  ;;  %v3242_v51 = vmax.f32 %v8068_v50, 0.0  ;;  %v3243_v26 = vmax.f32 %v8070_v4, 0.0  ;;  %v3244_v32 = vmax.f32 %v8072_v11, 0.0 }
 0x395   :  { %3267 = vst [vmem:[%s8272_s4 + $0xb0] sm:$0xff] %v3218_v27  ;;  %3268 = vst [vmem:[%s8272_s4 + $0xb8] sm:$0xff] %v3219_v1 }
 0x396   :  { %3269 = vst [vmem:[%s8272_s4 + $0xc0] sm:$0xff] %v3220_v52  ;;  %3270 = vst [vmem:[%s8272_s4 + $0xc8] sm:$0xff] %v3221_v34 }
 0x397   :  { %3271 = vst [vmem:[%s8272_s4 + $0xd0] sm:$0xff] %v3222_v48  ;;  %3272 = vst [vmem:[%s8272_s4 + $0xd8] sm:$0xff] %v3223_v44 }
 0x398   :  { %3273 = vst [vmem:[%s8272_s4 + $0xe0] sm:$0xff] %v3224_v47  ;;  %3274 = vst [vmem:[%s8272_s4 + $0xe8] sm:$0xff] %v3225_v22 }
 0x399   :  { %3275 = vst [vmem:[%s8272_s4 + $0xf0] sm:$0xff] %v3226_v7  ;;  %3276 = vst [vmem:[%s8272_s4 + $0xf8] sm:$0xff] %v3227_v25 }
 0x39a   :  { %3277 = vst [vmem:[%s8272_s4 + $0x100] sm:$0xff] %v3228_v15  ;;  %3278 = vst [vmem:[%s8272_s4 + $0x108] sm:$0xff] %v3229_v43 }
 0x39b   :  { %3279 = vst [vmem:[%s8272_s4 + $0x110] sm:$0xff] %v3230_v17  ;;  %3280 = vst [vmem:[%s8272_s4 + $0x118] sm:$0xff] %v3231_v36 }
 0x39c   :  { %3281 = vst [vmem:[%s8272_s4 + $0x120] sm:$0xff] %v3232_v3  ;;  %3282 = vst [vmem:[%s8272_s4 + $0x128] sm:$0xff] %v3233_v56 }
 0x39d   :  { %3283 = vst [vmem:[%s8272_s4 + $0x130] sm:$0xff] %v3234_v57  ;;  %3284 = vst [vmem:[%s8272_s4 + $0x138] sm:$0xff] %v3235_v35 }
 0x39e   :  { %3285 = vst [vmem:[%s8272_s4 + $0x140] sm:$0xff] %v3236_v39  ;;  %3286 = vst [vmem:[%s8272_s4 + $0x148] sm:$0xff] %v3237_v19 }
 0x39f   :  { %3287 = vst [vmem:[%s8272_s4 + $0x150] sm:$0xff] %v3238_v63  ;;  %3288 = vst [vmem:[%s8272_s4 + $0x158] sm:$0xff] %v3239_v49 }
 0x3a0   :  { %3289 = vst [vmem:[%s8272_s4 + $0x160] sm:$0xff] %v3240_v14  ;;  %3290 = vst [vmem:[%s8272_s4 + $0x168] sm:$0xff] %v3241_v12 }
 0x3a1   :  { %3291 = vst [vmem:[%s8272_s4 + $0x170] sm:$0xff] %v3242_v51  ;;  %3292 = vst [vmem:[%s8272_s4 + $0x178] sm:$0xff] %v3243_v26 }
 0x3a2   :  { %3293 = vst [vmem:[%s8272_s4 + $0x180] sm:$0xff] %v3244_v32 }

// kernel: lenet5_forward.4
= control target key start
LH: loop header
LB: loop body
LE: loop exit
PB: predicated region body
PF: predicated region fallthrough
CT: control target
= control target key end

     0   :  { %v908_v0 = vmov 0.0   ;;  %vm72_vm0 = vcmask 1045504   ;;  %vm50_vm1 = vcmask 179200   ;;  %vm589_vm2 = vcmask 1041408   ;;  %s1655_s1 = inlined_call_operand.vmem [shape: f32[150,128], index: 1, kind: input, shape index: {}]   ;;  %s1656_s0 = inlined_call_operand.vmem [shape: f32[4,50,150], index: 0, kind: input, shape index: {}]   ;;  %s1657_s2 = inlined_call_operand.vmem [shape: f32[1,128], index: 2, kind: input, shape index: {}]   ;;  %s1658_s3 = inlined_call_operand.vmem [shape: f32[1,128], index: 3, kind: input, shape index: {}]   ;;  %s1659_s4 = inlined_call_operand.vmem [shape: f32[50,128], index: 4, kind: output, shape index: {}]  }
   0x1   :  { %76 = vmatprep.subr.mxu0 %v908_v0  ;;  %212 = vmatprep.subr.mxu1 %v908_v0  ;;  %v939_v1 = vld [vmem:[%s1655_s1 + $0x78] sm:$0xff]  ;;  %v944_v2 = vld [vmem:[%s1655_s1 + $0x70] sm:$0xff]  ;;  %v953_v3 = vld [vmem:[%s1655_s1 + $0x68] sm:$0xff] }
   0x2   :  { %77 = vmatpush1.msra.mxu0 %v939_v1  ;;  %213 = vmatpush1.msra.mxu1 %v939_v1  ;;  %v962_v4 = vld [vmem:[%s1655_s1 + $0x60] sm:$0xff]  ;;  %v971_v5 = vld [vmem:[%s1655_s1 + $0x58] sm:$0xff]  ;;  %v980_v6 = vld [vmem:[%s1655_s1 + $0x50] sm:$0xff] }
   0x3   :  { %78 = vmatprep.subr.mxu0 %v908_v0  ;;  %214 = vmatprep.subr.mxu1 %v908_v0  ;;  %v989_v7 = vld [vmem:[%s1655_s1 + $0x48] sm:$0xff]  ;;  %v998_v8 = vld [vmem:[%s1655_s1 + $0x40] sm:$0xff]  ;;  %v1007_v9 = vld [vmem:[%s1655_s1 + $0x38] sm:$0xff] }
   0x4   :  { %79 = vmatpush1.msra.mxu0 %v944_v2  ;;  %215 = vmatpush1.msra.mxu1 %v944_v2  ;;  %v1016_v10 = vld [vmem:[%s1655_s1 + $0x30] sm:$0xff]  ;;  %v1025_v11 = vld [vmem:[%s1655_s1 + $0x28] sm:$0xff]  ;;  %v1034_v12 = vld [vmem:[%s1655_s1 + $0x20] sm:$0xff] }
   0x5   :  { %80 = vmatprep.subr.mxu0 %v908_v0  ;;  %216 = vmatprep.subr.mxu1 %v908_v0  ;;  %v1043_v13 = vld [vmem:[%s1655_s1 + $0x18] sm:$0xff]  ;;  %v1052_v14 = vld [vmem:[%s1655_s1 + $0x10] sm:$0xff]  ;;  %v1061_v15 = vld [vmem:[%s1655_s1 + $0x8] sm:$0xff] }
   0x6   :  { %81 = vmatpush1.msra.mxu0 %v953_v3  ;;  %217 = vmatpush1.msra.mxu1 %v953_v3  ;;  %v1070_v16 = vld [vmem:[%s1655_s1] sm:$0xff]  ;;  %v1079_v17 = vld [vmem:[%s1655_s1 + $0x90] sm:$0x3f]  ;;  %v1088_v18 = vld [vmem:[%s1655_s1 + $0x88] sm:$0xff] }
   0x7   :  { %82 = vmatprep.subr.mxu0 %v908_v0  ;;  %218 = vmatprep.subr.mxu1 %v908_v0  ;;  %v1099_v19 = vld [vmem:[%s1655_s1 + $0x80] sm:$0xff]  ;;  %v37_v20 = vld [vmem:[%s1656_s0 + $0x8] sm:$0xff]  ;;  %v839_v21 = vld [vmem:[%s1656_s0 + $0x78] sm:$0xff] }
   0x8   :  { %83 = vmatpush1.msra.mxu0 %v962_v4  ;;  %219 = vmatpush1.msra.mxu1 %v962_v4  ;;  %v36_v22 = vld [vmem:[%s1656_s0] sm:$0xff]  ;;  %v838_v23 = vld [vmem:[%s1656_s0 + $0x70] sm:$0xff]  ;;  %v39_v24 = vld [vmem:[%s1656_s0 + $0x18] sm:$0xff] }
   0x9   :  { %84 = vmatprep.subr.mxu0 %v908_v0  ;;  %220 = vmatprep.subr.mxu1 %v908_v0  ;;  %v841_v25 = vld [vmem:[%s1656_s0 + $0x88] sm:$0xff]  ;;  %v38_v26 = vld [vmem:[%s1656_s0 + $0x10] sm:$0xff]  ;;  %v840_v27 = vld [vmem:[%s1656_s0 + $0x80] sm:$0xff] }
   0xa   :  { %85 = vmatpush1.msra.mxu0 %v971_v5  ;;  %221 = vmatpush1.msra.mxu1 %v971_v5  ;;  %v41_v28 = vld [vmem:[%s1656_s0 + $0x28] sm:$0xff]  ;;  %v843_v29 = vld [vmem:[%s1656_s0 + $0x98] sm:$0xff]  ;;  %v40_v30 = vld [vmem:[%s1656_s0 + $0x20] sm:$0xff] }
   0xb   :  { %86 = vmatprep.subr.mxu0 %v908_v0  ;;  %222 = vmatprep.subr.mxu1 %v908_v0  ;;  %v842_v31 = vld [vmem:[%s1656_s0 + $0x90] sm:$0xff]  ;;  %v43_v32 = vld [vmem:[%s1656_s0 + $0x38] sm:$0xff]  ;;  %v845_v33 = vld [vmem:[%s1656_s0 + $0xa8] sm:$0xff] }
   0xc   :  { %87 = vmatpush1.msra.mxu0 %v980_v6  ;;  %223 = vmatpush1.msra.mxu1 %v980_v6  ;;  %v42_v34 = vld [vmem:[%s1656_s0 + $0x30] sm:$0xff]  ;;  %v844_v35 = vld [vmem:[%s1656_s0 + $0xa0] sm:$0xff]  ;;  %v45_v36 = vld [vmem:[%s1656_s0 + $0x48] sm:$0xff] }
   0xd   :  { %88 = vmatprep.subr.mxu0 %v908_v0  ;;  %224 = vmatprep.subr.mxu1 %v908_v0  ;;  %v847_v37 = vld [vmem:[%s1656_s0 + $0xb8] sm:$0xff]  ;;  %v44_v38 = vld [vmem:[%s1656_s0 + $0x40] sm:$0xff]  ;;  %v846_v39 = vld [vmem:[%s1656_s0 + $0xb0] sm:$0xff] }
   0xe   :  { %89 = vmatpush1.msra.mxu0 %v989_v7  ;;  %225 = vmatpush1.msra.mxu1 %v989_v7  ;;  %v47_v40 = vld [vmem:[%s1656_s0 + $0x58] sm:$0xff]  ;;  %v849_v41 = vld [vmem:[%s1656_s0 + $0xc8] sm:$0xff]  ;;  %v46_v42 = vld [vmem:[%s1656_s0 + $0x50] sm:$0xff] }
   0xf   :  { %90 = vmatprep.subr.mxu0 %v908_v0  ;;  %226 = vmatprep.subr.mxu1 %v908_v0  ;;  %v848_v43 = vld [vmem:[%s1656_s0 + $0xc0] sm:$0xff]  ;;  %v49_v44 = vld [vmem:[%s1656_s0 + $0x68] sm:$0x3]  ;;  %v851_v45 = vld [vmem:[%s1656_s0 + $0xd8] sm:$0x3] }
  0x10   :  { %91 = vmatpush1.msra.mxu0 %v998_v8  ;;  %227 = vmatpush1.msra.mxu1 %v998_v8  ;;  %v48_v46 = vld [vmem:[%s1656_s0 + $0x60] sm:$0x3]  ;;  %v850_v47 = vld [vmem:[%s1656_s0 + $0xd0] sm:$0x3]  ;;  %v861_v48 = vld [vmem:[%s1656_s0 + $0xe8] sm:$0xff] }
  0x11   :  { %92 = vmatprep.subr.mxu0 %v908_v0  ;;  %228 = vmatprep.subr.mxu1 %v908_v0  ;;  %v883_v49 = vld [vmem:[%s1656_s0 + $0x158] sm:$0xff]  ;;  %v860_v50 = vld [vmem:[%s1656_s0 + $0xe0] sm:$0xff]  ;;  %v882_v51 = vld [vmem:[%s1656_s0 + $0x150] sm:$0xff] }
  0x12   :  { %93 = vmatpush1.msra.mxu0 %v1007_v9  ;;  %229 = vmatpush1.msra.mxu1 %v1007_v9  ;;  %v863_v52 = vld [vmem:[%s1656_s0 + $0xf8] sm:$0xff]  ;;  %v885_v53 = vld [vmem:[%s1656_s0 + $0x168] sm:$0xff]  ;;  %v862_v54 = vld [vmem:[%s1656_s0 + $0xf0] sm:$0xff] }
  0x13   :  { %94 = vmatprep.subr.mxu0 %v908_v0  ;;  %230 = vmatprep.subr.mxu1 %v908_v0  ;;  %v884_v55 = vld [vmem:[%s1656_s0 + $0x160] sm:$0xff]  ;;  %v865_v56 = vld [vmem:[%s1656_s0 + $0x108] sm:$0xff]  ;;  %v887_v57 = vld [vmem:[%s1656_s0 + $0x178] sm:$0xff] }
  0x14   :  { %95 = vmatpush1.msra.mxu0 %v1016_v10  ;;  %231 = vmatpush1.msra.mxu1 %v1016_v10  ;;  %v864_v58 = vld [vmem:[%s1656_s0 + $0x100] sm:$0xff]  ;;  %v886_v59 = vld [vmem:[%s1656_s0 + $0x170] sm:$0xff]  ;;  %v867_v60 = vld [vmem:[%s1656_s0 + $0x118] sm:$0xff] }
  0x15   :  { %96 = vmatprep.subr.mxu0 %v908_v0  ;;  %232 = vmatprep.subr.mxu1 %v908_v0  ;;  %v889_v61 = vld [vmem:[%s1656_s0 + $0x188] sm:$0xff]  ;;  %v866_v62 = vld [vmem:[%s1656_s0 + $0x110] sm:$0xff]  ;;  %v888_v63 = vld [vmem:[%s1656_s0 + $0x180] sm:$0xff] }
  0x16   :  { %97 = vmatpush1.msra.mxu0 %v1025_v11  ;;  %233 = vmatpush1.msra.mxu1 %v1025_v11 }
  0x17   :  { %98 = vmatprep.subr.mxu0 %v908_v0  ;;  %234 = vmatprep.subr.mxu1 %v908_v0 }
  0x18   :  { %99 = vmatpush1.msra.mxu0 %v1034_v12  ;;  %235 = vmatpush1.msra.mxu1 %v1034_v12 }
  0x19   :  { %100 = vmatprep.subr.mxu0 %v908_v0  ;;  %236 = vmatprep.subr.mxu1 %v908_v0 }
  0x1a   :  { %101 = vmatpush1.msra.mxu0 %v1043_v13  ;;  %237 = vmatpush1.msra.mxu1 %v1043_v13 }
  0x1b   :  { %102 = vmatprep.subr.mxu0 %v908_v0  ;;  %238 = vmatprep.subr.mxu1 %v908_v0 }
  0x1c   :  { %103 = vmatpush1.msra.mxu0 %v1052_v14  ;;  %239 = vmatpush1.msra.mxu1 %v1052_v14 }
  0x1d   :  { %104 = vmatprep.subr.mxu0 %v908_v0  ;;  %240 = vmatprep.subr.mxu1 %v908_v0 }
  0x1e   :  { %105 = vmatpush1.msra.mxu0 %v1061_v15  ;;  %241 = vmatpush1.msra.mxu1 %v1061_v15 }
  0x1f   :  { %106 = vmatprep.subr.mxu0 %v908_v0  ;;  %242 = vmatprep.subr.mxu1 %v908_v0 }
  0x20   :  { %107 = vmatpush1.msra.mxu0 %v1070_v16  ;;  %243 = vmatpush1.msra.mxu1 %v1070_v16 }
  0x21   :  { %134 = vmatprep.subr.mxu0 %v908_v0  ;;  %270 = vmatprep.subr.mxu1 %v908_v0 }
  0x22   :  { %830 = vmatpush2.msk.msra.mxu0 %vm72_vm0, %v1079_v17  ;;  %852 = vmatpush2.msk.msra.mxu1 %vm72_vm0, %v1079_v17 }
  0x23   :  { %136 = vmatprep.subr.mxu0 %v908_v0  ;;  %272 = vmatprep.subr.mxu1 %v908_v0 }
  0x24   :  { %137 = vmatpush2.msra.mxu0 %v1088_v18  ;;  %273 = vmatpush2.msra.mxu1 %v1088_v18 }
  0x25   :  { %138 = vmatprep.subr.mxu0 %v908_v0  ;;  %274 = vmatprep.subr.mxu1 %v908_v0 }
  0x26   :  { %139 = vmatpush2.msra.mxu0 %v1099_v19  ;;  %831 = vmatprep.mubr.msk.f32.mxu0 %vm50_vm1, %v37_v20 }
  0x27   :  { %275 = vmatpush2.msra.mxu1 %v1099_v19  ;;  %853 = vmatprep.mubr.msk.f32.mxu1 %vm50_vm1, %v839_v21 }
  0x28   :  { %141 = vmatmul.mubr.f32.vlgmr.msra.gmra.mxu0 %v36_v22  ;;  %277 = vmatmul.mubr.f32.vlgmr.msra.gmra.mxu1 %v838_v23 }
  0x29   :  { %348 = vmatprep.subr.mxu0 %v908_v0  ;;  %484 = vmatprep.subr.mxu1 %v908_v0 }
  0x2a   :  { %349 = vmatpush1.msra.mxu0 %v939_v1  ;;  %485 = vmatpush1.msra.mxu1 %v939_v1  ;;  %v891_v1 = vld [vmem:[%s1656_s0 + $0x198] sm:$0xff] }
  0x2b   :  { %350 = vmatprep.subr.mxu0 %v908_v0  ;;  %486 = vmatprep.subr.mxu1 %v908_v0 }
  0x2c   :  { %832 = vmatprep.mubr.msk.f32.mxu0 %vm50_vm1, %v39_v24  ;;  %854 = vmatprep.mubr.msk.f32.mxu1 %vm50_vm1, %v841_v25 }
  0x2d   :  { %351 = vmatpush1.msra.mxu0 %v944_v2  ;;  %487 = vmatpush1.msra.mxu1 %v944_v2  ;;  %v868_v2 = vld [vmem:[%s1656_s0 + $0x120] sm:$0xff] }
  0x2e   :  { %146 = vmatmul.mubr.f32.gmra.mxu0 %v38_v26  ;;  %282 = vmatmul.mubr.f32.gmra.mxu1 %v840_v27 }
  0x2f   :  { %352 = vmatprep.subr.mxu0 %v908_v0  ;;  %488 = vmatprep.subr.mxu1 %v908_v0 }
  0x30   :  { %353 = vmatpush1.msra.mxu0 %v953_v3  ;;  %489 = vmatpush1.msra.mxu1 %v953_v3  ;;  %v890_v3 = vld [vmem:[%s1656_s0 + $0x190] sm:$0xff] }
  0x31   :  { %354 = vmatprep.subr.mxu0 %v908_v0  ;;  %490 = vmatprep.subr.mxu1 %v908_v0 }
  0x32   :  { %833 = vmatprep.mubr.msk.f32.mxu0 %vm50_vm1, %v41_v28  ;;  %855 = vmatprep.mubr.msk.f32.mxu1 %vm50_vm1, %v843_v29 }
  0x33   :  { %355 = vmatpush1.msra.mxu0 %v962_v4  ;;  %491 = vmatpush1.msra.mxu1 %v962_v4  ;;  %v871_v4 = vld [vmem:[%s1656_s0 + $0x138] sm:$0xff] }
  0x34   :  { %151 = vmatmul.mubr.f32.gmra.mxu0 %v40_v30  ;;  %287 = vmatmul.mubr.f32.gmra.mxu1 %v842_v31 }
  0x35   :  { %356 = vmatprep.subr.mxu0 %v908_v0  ;;  %492 = vmatprep.subr.mxu1 %v908_v0 }
  0x36   :  { %357 = vmatpush1.msra.mxu0 %v971_v5  ;;  %493 = vmatpush1.msra.mxu1 %v971_v5  ;;  %v893_v5 = vld [vmem:[%s1656_s0 + $0x1a8] sm:$0xff] }
  0x37   :  { %358 = vmatprep.subr.mxu0 %v908_v0  ;;  %494 = vmatprep.subr.mxu1 %v908_v0 }
  0x38   :  { %834 = vmatprep.mubr.msk.f32.mxu0 %vm50_vm1, %v43_v32  ;;  %856 = vmatprep.mubr.msk.f32.mxu1 %vm50_vm1, %v845_v33 }
  0x39   :  { %359 = vmatpush1.msra.mxu0 %v980_v6  ;;  %495 = vmatpush1.msra.mxu1 %v980_v6  ;;  %v870_v6 = vld [vmem:[%s1656_s0 + $0x130] sm:$0xff] }
  0x3a   :  { %156 = vmatmul.mubr.f32.gmra.mxu0 %v42_v34  ;;  %292 = vmatmul.mubr.f32.gmra.mxu1 %v844_v35 }
  0x3b   :  { %360 = vmatprep.subr.mxu0 %v908_v0  ;;  %496 = vmatprep.subr.mxu1 %v908_v0 }
  0x3c   :  { %361 = vmatpush1.msra.mxu0 %v989_v7  ;;  %497 = vmatpush1.msra.mxu1 %v989_v7  ;;  %v892_v7 = vld [vmem:[%s1656_s0 + $0x1a0] sm:$0xff] }
  0x3d   :  { %362 = vmatprep.subr.mxu0 %v908_v0  ;;  %498 = vmatprep.subr.mxu1 %v908_v0 }
  0x3e   :  { %835 = vmatprep.mubr.msk.f32.mxu0 %vm50_vm1, %v45_v36  ;;  %857 = vmatprep.mubr.msk.f32.mxu1 %vm50_vm1, %v847_v37 }
  0x3f   :  { %363 = vmatpush1.msra.mxu0 %v998_v8  ;;  %499 = vmatpush1.msra.mxu1 %v998_v8  ;;  %v873_v8 = vld [vmem:[%s1656_s0 + $0x148] sm:$0x3] }
  0x40   :  { %161 = vmatmul.mubr.f32.gmra.mxu0 %v44_v38  ;;  %297 = vmatmul.mubr.f32.gmra.mxu1 %v846_v39 }
  0x41   :  { %364 = vmatprep.subr.mxu0 %v908_v0  ;;  %500 = vmatprep.subr.mxu1 %v908_v0 }
  0x42   :  { %365 = vmatpush1.msra.mxu0 %v1007_v9  ;;  %501 = vmatpush1.msra.mxu1 %v1007_v9  ;;  %v895_v9 = vld [vmem:[%s1656_s0 + $0x1b8] sm:$0x3] }
  0x43   :  { %366 = vmatprep.subr.mxu0 %v908_v0  ;;  %502 = vmatprep.subr.mxu1 %v908_v0 }
  0x44   :  { %836 = vmatprep.mubr.msk.f32.mxu0 %vm50_vm1, %v47_v40  ;;  %858 = vmatprep.mubr.msk.f32.mxu1 %vm50_vm1, %v849_v41 }
  0x45   :  { %367 = vmatpush1.msra.mxu0 %v1016_v10  ;;  %503 = vmatpush1.msra.mxu1 %v1016_v10  ;;  %v872_v10 = vld [vmem:[%s1656_s0 + $0x140] sm:$0x3] }
  0x46   :  { %166 = vmatmul.mubr.f32.gmra.mxu0 %v46_v42  ;;  %302 = vmatmul.mubr.f32.gmra.mxu1 %v848_v43 }
  0x47   :  { %368 = vmatprep.subr.mxu0 %v908_v0  ;;  %504 = vmatprep.subr.mxu1 %v908_v0 }
  0x48   :  { %369 = vmatpush1.msra.mxu0 %v1025_v11  ;;  %505 = vmatpush1.msra.mxu1 %v1025_v11  ;;  %v894_v11 = vld [vmem:[%s1656_s0 + $0x1b0] sm:$0x3] }
  0x49   :  { %370 = vmatprep.subr.mxu0 %v908_v0  ;;  %506 = vmatprep.subr.mxu1 %v908_v0 }
  0x4a   :  { %837 = vmatprep.mubr.msk.f32.mxu0 %vm50_vm1, %v49_v44  ;;  %859 = vmatprep.mubr.msk.f32.mxu1 %vm50_vm1, %v851_v45 }
  0x4b   :  { %371 = vmatpush1.msra.mxu0 %v1034_v12  ;;  %507 = vmatpush1.msra.mxu1 %v1034_v12 }
  0x4c   :  { %171 = vmatmul.mubr.f32.gmra.mxu0 %v48_v46  ;;  %307 = vmatmul.mubr.f32.gmra.mxu1 %v850_v47 }
  0x4d   :  { %372 = vmatprep.subr.mxu0 %v908_v0  ;;  %508 = vmatprep.subr.mxu1 %v908_v0 }
  0x4e   :  { %373 = vmatpush1.msra.mxu0 %v1043_v13  ;;  %509 = vmatpush1.msra.mxu1 %v1043_v13 }
  0x4f   :  { %374 = vmatprep.subr.mxu0 %v908_v0  ;;  %510 = vmatprep.subr.mxu1 %v908_v0 }
  0x50   :  { %375 = vmatpush1.msra.mxu0 %v1052_v14  ;;  %511 = vmatpush1.msra.mxu1 %v1052_v14 }
  0x51   :  { %376 = vmatprep.subr.mxu0 %v908_v0  ;;  %512 = vmatprep.subr.mxu1 %v908_v0 }
  0x52   :  { %377 = vmatpush1.msra.mxu0 %v1061_v15  ;;  %513 = vmatpush1.msra.mxu1 %v1061_v15 }
  0x53   :  { %378 = vmatprep.subr.mxu0 %v908_v0  ;;  %514 = vmatprep.subr.mxu1 %v908_v0 }
  0x54   :  { %379 = vmatpush1.msra.mxu0 %v1070_v16  ;;  %515 = vmatpush1.msra.mxu1 %v1070_v16 }
  0x55   :  { %406 = vmatprep.subr.mxu0 %v908_v0  ;;  %542 = vmatprep.subr.mxu1 %v908_v0 }
  0x56   :  { %874 = vmatpush2.msk.msra.mxu0 %vm72_vm0, %v1079_v17  ;;  %896 = vmatpush2.msk.msra.mxu1 %vm72_vm0, %v1079_v17 }
  0x57   :  { %408 = vmatprep.subr.mxu0 %v908_v0  ;;  %544 = vmatprep.subr.mxu1 %v908_v0 }
  0x58   :  { %409 = vmatpush2.msra.mxu0 %v1088_v18  ;;  %545 = vmatpush2.msra.mxu1 %v1088_v18 }
  0x59   :  { %410 = vmatprep.subr.mxu0 %v908_v0  ;;  %546 = vmatprep.subr.mxu1 %v908_v0  ;;  %v869_v0 = vld [vmem:[%s1656_s0 + $0x128] sm:$0xff] }
  0x5a   :  { %411 = vmatpush2.msra.mxu0 %v1099_v19  ;;  %875 = vmatprep.mubr.msk.f32.mxu0 %vm50_vm1, %v861_v48 }
  0x5b   :  { %547 = vmatpush2.msra.mxu1 %v1099_v19  ;;  %897 = vmatprep.mubr.msk.f32.mxu1 %vm50_vm1, %v883_v49 }
  0x5c   :  { %413 = vmatmul.mubr.f32.vlgmr.msra.gmra.mxu0 %v860_v50  ;;  %549 = vmatmul.mubr.f32.vlgmr.msra.gmra.mxu1 %v882_v51 }
  0x5d   :  { %876 = vmatprep.mubr.msk.f32.mxu0 %vm50_vm1, %v863_v52  ;;  %898 = vmatprep.mubr.msk.f32.mxu1 %vm50_vm1, %v885_v53 }
  0x60   :  { %418 = vmatmul.mubr.f32.gmra.mxu0 %v862_v54  ;;  %554 = vmatmul.mubr.f32.gmra.mxu1 %v884_v55 }
  0x61   :  { %877 = vmatprep.mubr.msk.f32.mxu0 %vm50_vm1, %v865_v56  ;;  %899 = vmatprep.mubr.msk.f32.mxu1 %vm50_vm1, %v887_v57 }
  0x64   :  { %423 = vmatmul.mubr.f32.gmra.mxu0 %v864_v58  ;;  %559 = vmatmul.mubr.f32.gmra.mxu1 %v886_v59 }
  0x65   :  { %878 = vmatprep.mubr.msk.f32.mxu0 %vm50_vm1, %v867_v60  ;;  %900 = vmatprep.mubr.msk.f32.mxu1 %vm50_vm1, %v889_v61 }
  0x68   :  { %428 = vmatmul.mubr.f32.gmra.mxu0 %v866_v62  ;;  %564 = vmatmul.mubr.f32.gmra.mxu1 %v888_v63 }
  0x69   :  { %879 = vmatprep.mubr.msk.f32.mxu0 %vm50_vm1, %v869_v0  ;;  %901 = vmatprep.mubr.msk.f32.mxu1 %vm50_vm1, %v891_v1 }
  0x6c   :  { %433 = vmatmul.mubr.f32.gmra.mxu0 %v868_v2  ;;  %569 = vmatmul.mubr.f32.gmra.mxu1 %v890_v3 }
  0x6d   :  { %880 = vmatprep.mubr.msk.f32.mxu0 %vm50_vm1, %v871_v4  ;;  %902 = vmatprep.mubr.msk.f32.mxu1 %vm50_vm1, %v893_v5 }
  0x70   :  { %438 = vmatmul.mubr.f32.gmra.mxu0 %v870_v6  ;;  %574 = vmatmul.mubr.f32.gmra.mxu1 %v892_v7 }
  0x71   :  { %881 = vmatprep.mubr.msk.f32.mxu0 %vm50_vm1, %v873_v8  ;;  %903 = vmatprep.mubr.msk.f32.mxu1 %vm50_vm1, %v895_v9 }
  0x74   :  { %443 = vmatmul.mubr.f32.gmra.mxu0 %v872_v10  ;;  %579 = vmatmul.mubr.f32.gmra.mxu1 %v894_v11 }
  0xe8   :  { %v1381_v12 = vpop.f32.mrf.mxu0  ;;  %v1383_v13 = vpop.f32.mrf.mxu1 }
  0xea   :  { %v144_v14 = vpop.f32.mrf.mxu0  ;;  %v280_v15 = vpop.f32.mrf.mxu1 }
  0xee   :  { %v1385_v16 = vpop.f32.mrf.mxu0  ;;  %v1387_v17 = vpop.f32.mrf.mxu1 }
  0xef   :  { %v584_v40 = vadd.f32 %v1385_v16, %v1381_v12  ;;  %v598_v41 = vadd.f32 %v1387_v17, %v1383_v13 }
  0xf0   :  { %v149_v18 = vpop.f32.mrf.mxu0  ;;  %v285_v19 = vpop.f32.mrf.mxu1 }
  0xf4   :  { %v1389_v20 = vpop.f32.mrf.mxu0  ;;  %v1391_v21 = vpop.f32.mrf.mxu1 }
  0xf5   :  { %v585_v44 = vadd.f32 %v584_v40, %v1389_v20  ;;  %v599_v45 = vadd.f32 %v598_v41, %v1391_v21 }
  0xf6   :  { %v154_v22 = vpop.f32.mrf.mxu0  ;;  %v290_v23 = vpop.f32.mrf.mxu1 }
  0xfa   :  { %v1393_v24 = vpop.f32.mrf.mxu0  ;;  %v1395_v25 = vpop.f32.mrf.mxu1 }
  0xfb   :  { %v586_v48 = vadd.f32 %v585_v44, %v1393_v24  ;;  %v600_v49 = vadd.f32 %v599_v45, %v1395_v25 }
  0xfc   :  { %v159_v26 = vpop.f32.mrf.mxu0  ;;  %v295_v27 = vpop.f32.mrf.mxu1 }
 0x100   :  { %v1397_v28 = vpop.f32.mrf.mxu0  ;;  %v1399_v29 = vpop.f32.mrf.mxu1 }
 0x101   :  { %v587_v52 = vadd.f32 %v586_v48, %v1397_v28  ;;  %v601_v53 = vadd.f32 %v600_v49, %v1399_v29 }
 0x102   :  { %v164_v30 = vpop.f32.mrf.mxu0  ;;  %v300_v31 = vpop.f32.mrf.mxu1 }
 0x106   :  { %v1401_v32 = vpop.f32.mrf.mxu0  ;;  %v1403_v33 = vpop.f32.mrf.mxu1 }
 0x107   :  { %v588_v58 = vadd.f32 %v587_v52, %v1401_v32  ;;  %v602_v59 = vadd.f32 %v601_v53, %v1403_v33 }
 0x108   :  { %v169_v34 = vpop.f32.mrf.mxu0  ;;  %v305_v35 = vpop.f32.mrf.mxu1 }
 0x10c   :  { %v1405_v36 = vpop.f32.mrf.mxu0  ;;  %v1407_v37 = vpop.f32.mrf.mxu1 }
 0x10d   :  { %v590_v56 = vsel %vm589_vm2, %v1405_v36, 0.0  ;;  %v603_v57 = vsel %vm589_vm2, %v1407_v37, 0.0 }
 0x10e   :  { %v174_v38 = vpop.f32.mrf.mxu0  ;;  %v310_v39 = vpop.f32.mrf.mxu1  ;;  %v591_v62 = vadd.f32 %v590_v56, %v588_v58  ;;  %v604_v63 = vadd.f32 %v603_v57, %v602_v59 }
 0x110   :  { %v592_v4 = vrot.slane %v591_v62, 4  ;;  %v605_v5 = vrot.slane %v604_v63, 4 }
 0x112   :  { %v593_v14 = vadd.f32 %v592_v4, %v591_v62  ;;  %v606_v15 = vadd.f32 %v605_v5, %v604_v63 }
 0x114   :  { %v594_v34 = vrot.slane %v593_v14, 2  ;;  %v607_v35 = vrot.slane %v606_v15, 2 }
 0x116   :  { %v595_v52 = vadd.f32 %v594_v34, %v593_v14  ;;  %v608_v53 = vadd.f32 %v607_v35, %v606_v15 }
 0x118   :  { %v596_v62 = vrot.slane %v595_v52, 1  ;;  %v609_v63 = vrot.slane %v608_v53, 1 }
 0x11c   :  { %v1413_v42 = vpop.f32.mrf.mxu0  ;;  %v1415_v43 = vpop.f32.mrf.mxu1 }
 0x11e   :  { %v416_v46 = vpop.f32.mrf.mxu0  ;;  %v552_v47 = vpop.f32.mrf.mxu1 }
 0x120   :  { %v1421_v50 = vpop.f32.mrf.mxu0  ;;  %v1423_v51 = vpop.f32.mrf.mxu1 }
 0x121   :  { %v612_v8 = vadd.f32 %v1421_v50, %v1413_v42  ;;  %v626_v9 = vadd.f32 %v1423_v51, %v1415_v43 }
 0x122   :  { %v421_v54 = vpop.f32.mrf.mxu0  ;;  %v557_v55 = vpop.f32.mrf.mxu1 }
 0x124   :  { %v1433_v60 = vpop.f32.mrf.mxu0  ;;  %v1435_v61 = vpop.f32.mrf.mxu1 }
 0x125   :  { %v613_v18 = vadd.f32 %v612_v8, %v1433_v60  ;;  %v627_v19 = vadd.f32 %v626_v9, %v1435_v61 }
 0x126   :  { %v426_v0 = vpop.f32.mrf.mxu0  ;;  %v562_v1 = vpop.f32.mrf.mxu1 }
 0x128   :  { %v1437_v2 = vpop.f32.mrf.mxu0  ;;  %v1439_v3 = vpop.f32.mrf.mxu1 }
 0x129   :  { %v614_v26 = vadd.f32 %v613_v18, %v1437_v2  ;;  %v628_v27 = vadd.f32 %v627_v19, %v1439_v3 }
 0x12a   :  { %v431_v6 = vpop.f32.mrf.mxu0  ;;  %v567_v7 = vpop.f32.mrf.mxu1 }
 0x12b   :  { %v597_v6 = vadd.f32 %v596_v62, %v595_v52  ;;  %v610_v7 = vadd.f32 %v609_v63, %v608_v53 }
 0x12c   :  { %v1445_v10 = vpop.f32.mrf.mxu0  ;;  %v1447_v11 = vpop.f32.mrf.mxu1 }
 0x12d   :  { %v615_v38 = vadd.f32 %v614_v26, %v1445_v10  ;;  %v629_v39 = vadd.f32 %v628_v27, %v1447_v11  ;;  %v611_v14 = vadd.f32 %v610_v7, %v597_v6 }
 0x12e   :  { %v436_v22 = vpop.f32.mrf.mxu0  ;;  %v572_v23 = vpop.f32.mrf.mxu1 }
 0x130   :  { %v439_v30 = vpop.f32.mrf.mxu0  ;;  %v1453_v31 = vpop.f32.mrf.mxu1 }
 0x131   :  { %v616_v44 = vadd.f32 %v615_v38, %v439_v30  ;;  %v630_v45 = vadd.f32 %v629_v39, %v1453_v31 }
 0x132   :  { %v441_v40 = vpop.f32.mrf.mxu0  ;;  %v577_v41 = vpop.f32.mrf.mxu1 }
 0x134   :  { %v444_v46 = vpop.f32.mrf.mxu0  ;;  %v1458_v47 = vpop.f32.mrf.mxu1 }
 0x135   :  { %v617_v48 = vsel %vm589_vm2, %v444_v46, 0.0  ;;  %v631_v49 = vsel %vm589_vm2, %v1458_v47, 0.0 }
 0x136   :  { %v618_v54 = vadd.f32 %v617_v48, %v616_v44  ;;  %v632_v55 = vadd.f32 %v631_v49, %v630_v45  ;;  %v446_v56 = vpop.f32.mrf.mxu0  ;;  %v582_v57 = vpop.f32.mrf.mxu1 }
 0x138   :  { %v619_v58 = vrot.slane %v618_v54, 4  ;;  %v633_v59 = vrot.slane %v632_v55, 4 }
 0x13a   :  { %v620_v0 = vadd.f32 %v619_v58, %v618_v54  ;;  %v634_v1 = vadd.f32 %v633_v59, %v632_v55 }
 0x13c   :  { %v621_v4 = vrot.slane %v620_v0, 2  ;;  %v635_v5 = vrot.slane %v634_v1, 2 }
 0x13e   :  { %v622_v8 = vadd.f32 %v621_v4, %v620_v0  ;;  %v636_v9 = vadd.f32 %v635_v5, %v634_v1 }
 0x140   :  { %v623_v18 = vrot.slane %v622_v8, 1  ;;  %v637_v19 = vrot.slane %v636_v9, 1 }
 0x142   :  { %v624_v15 = vadd.f32 %v623_v18, %v622_v8  ;;  %v638_v23 = vadd.f32 %v637_v19, %v636_v9 }
 0x144   :  { %v625_v22 = vadd.f32 %v624_v15, %v611_v14 }
 0x146   :  { %v639_v26 = vadd.f32 %v638_v23, %v625_v22 }
 0x148   :  { %v640_v27 = vmul.f32 0.005, %v639_v26 }
 0x14a   :  { %v1464_v34 = vsub.f32 %v1381_v12, %v640_v27  ;;  %v1467_v35 = vsub.f32 %v1385_v16, %v640_v27  ;;  %v1470_v38 = vsub.f32 %v1389_v20, %v640_v27  ;;  %v1473_v39 = vsub.f32 %v1393_v24, %v640_v27 }
 0x14b   :  { %v1476_v40 = vsub.f32 %v1397_v28, %v640_v27  ;;  %v1479_v41 = vsub.f32 %v1401_v32, %v640_v27  ;;  %v1482_v44 = vsub.f32 %v1405_v36, %v640_v27  ;;  %v1485_v12 = vsub.f32 %v1383_v13, %v640_v27 }
 0x14c   :  { %v1488_v16 = vsub.f32 %v1387_v17, %v640_v27  ;;  %v1491_v20 = vsub.f32 %v1391_v21, %v640_v27  ;;  %v1494_v24 = vsub.f32 %v1395_v25, %v640_v27  ;;  %v1497_v28 = vsub.f32 %v1399_v29, %v640_v27 }
 0x14d   :  { %v1500_v32 = vsub.f32 %v1403_v33, %v640_v27  ;;  %v654_v36 = vsub.f32 %v1407_v37, %v640_v27  ;;  %v1504_v13 = vsub.f32 %v1413_v42, %v640_v27  ;;  %v1507_v17 = vsub.f32 %v1421_v50, %v640_v27 }
 0x14e   :  { %v1510_v21 = vsub.f32 %v1433_v60, %v640_v27  ;;  %v1513_v25 = vsub.f32 %v1437_v2, %v640_v27  ;;  %v1516_v29 = vsub.f32 %v1445_v10, %v640_v27  ;;  %v669_v33 = vmul.f32 %v1464_v34, %v1464_v34 }
 0x14f   :  { %v670_v37 = vmul.f32 %v1467_v35, %v1467_v35  ;;  %v1522_v42 = vsub.f32 %v439_v30, %v640_v27  ;;  %v1524_v45 = vsub.f32 %v444_v46, %v640_v27  ;;  %v1527_v50 = vsub.f32 %v1415_v43, %v640_v27 }
 0x150   :  { %v689_v60 = vmul.f32 %v1485_v12, %v1485_v12  ;;  %v1532_v2 = vsub.f32 %v1423_v51, %v640_v27  ;;  %v671_v10 = vmul.f32 %v1470_v38, %v1470_v38  ;;  %v690_v49 = vmul.f32 %v1488_v16, %v1488_v16 }
 0x151   :  { %v676_v48 = vadd.f32 %v670_v37, %v669_v33  ;;  %v1539_v30 = vsub.f32 %v1435_v61, %v640_v27  ;;  %v1542_v46 = vsub.f32 %v1439_v3, %v640_v27  ;;  %v672_v43 = vmul.f32 %v1473_v39, %v1473_v39 }
 0x152   :  { %v691_v51 = vmul.f32 %v1491_v20, %v1491_v20  ;;  %v696_v53 = vadd.f32 %v690_v49, %v689_v60  ;;  %v710_v54 = vmul.f32 %v1504_v13, %v1504_v13  ;;  %v711_v55 = vmul.f32 %v1507_v17, %v1507_v17 }
 0x153   :  { %v677_v52 = vadd.f32 %v676_v48, %v671_v10  ;;  %v1553_v61 = vsub.f32 %v1447_v11, %v640_v27  ;;  %v1556_v3 = vsub.f32 %v1453_v31, %v640_v27  ;;  %v1559_v56 = vsub.f32 %v1458_v47, %v640_v27 }
 0x154   :  { %v673_v57 = vmul.f32 %v1476_v40, %v1476_v40  ;;  %v675_v58 = vmul.f32 %v1482_v44, %v1482_v44  ;;  %v692_v62 = vmul.f32 %v1494_v24, %v1494_v24  ;;  %v697_v63 = vadd.f32 %v696_v53, %v691_v51 }
 0x155   :  { %v678_v59 = vadd.f32 %v677_v52, %v672_v43  ;;  %v712_v11 = vmul.f32 %v1510_v21, %v1510_v21  ;;  %v717_v0 = vadd.f32 %v711_v55, %v710_v54  ;;  %v731_v31 = vmul.f32 %v1527_v50, %v1527_v50 }
 0x156   :  { %v732_v47 = vmul.f32 %v1532_v2, %v1532_v2  ;;  %v674_v1 = vmul.f32 %v1479_v41, %v1479_v41  ;;  %v693_v5 = vmul.f32 %v1497_v28, %v1497_v28  ;;  %v698_v6 = vadd.f32 %v697_v63, %v692_v62 }
 0x157   :  { %v679_v4 = vadd.f32 %v678_v59, %v673_v57  ;;  %v694_v7 = vmul.f32 %v1500_v32, %v1500_v32  ;;  %v695_v8 = vmul.f32 %v654_v36, %v654_v36  ;;  %v713_v9 = vmul.f32 %v1513_v25, %v1513_v25 }
 0x158   :  { %v718_v18 = vadd.f32 %v717_v0, %v712_v11  ;;  %v699_v14 = vadd.f32 %v698_v6, %v693_v5  ;;  %v733_v15 = vmul.f32 %v1539_v30, %v1539_v30  ;;  %v738_v22 = vadd.f32 %v732_v47, %v731_v31 }
 0x159   :  { %v680_v19 = vadd.f32 %v679_v4, %v674_v1  ;;  %v681_v23 = vsel %vm589_vm2, %v675_v58, 0.0  ;;  %v714_v26 = vmul.f32 %v1516_v29, %v1516_v29  ;;  %v716_v27 = vmul.f32 %v1524_v45, %v1524_v45 }
 0x15a   :  { %v719_v33 = vadd.f32 %v718_v18, %v713_v9  ;;  %v700_v60 = vadd.f32 %v699_v14, %v694_v7  ;;  %v734_v10 = vmul.f32 %v1542_v46, %v1542_v46  ;;  %v739_v48 = vadd.f32 %v738_v22, %v733_v15 }
 0x15b   :  { %v682_v37 = vadd.f32 %v681_v23, %v680_v19  ;;  %v701_v49 = vsel %vm589_vm2, %v695_v8, 0.0  ;;  %v715_v43 = vmul.f32 %v1522_v42, %v1522_v42  ;;  %v763_v52 = vadd.f32 %v654_v36, %v1482_v44 }
 0x15c   :  { %v720_v51 = vadd.f32 %v719_v33, %v714_v26  ;;  %v702_v54 = vadd.f32 %v701_v49, %v700_v60  ;;  %v735_v55 = vmul.f32 %v1553_v61, %v1553_v61  ;;  %v740_v57 = vadd.f32 %v739_v48, %v734_v10 }
 0x15d   :  { %v683_v53 = vrot.slane %v682_v37, 4  ;;  %v722_v59 = vsel %vm589_vm2, %v716_v27, 0.0  ;;  %v737_v62 = vmul.f32 %v1559_v56, %v1559_v56  ;;  %v736_v0 = vmul.f32 %v1556_v3, %v1556_v3 }
 0x15e   :  { %v721_v58 = vadd.f32 %v720_v51, %v715_v43  ;;  %v703_v11 = vrot.slane %v702_v54, 4  ;;  %v741_v31 = vadd.f32 %v740_v57, %v735_v55 }
 0x15f   :  { %v684_v63 = vadd.f32 %v683_v53, %v682_v37  ;;  %v743_v5 = vsel %vm589_vm2, %v737_v62, 0.0  ;;  %v759_v62 = vadd.f32 %v1491_v20, %v1470_v38  ;;  %v770_v20 = vadd.f32 %v763_v52, %v1524_v45 }
 0x160   :  { %v723_v47 = vadd.f32 %v722_v59, %v721_v58  ;;  %v704_v36 = vadd.f32 %v703_v11, %v702_v54  ;;  %v742_v1 = vadd.f32 %v741_v31, %v736_v0  ;;  %v757_v58 = vadd.f32 %v1485_v12, %v1464_v34 }
 0x161   :  { %v685_v44 = vrot.slane %v684_v63, 2  ;;  %v758_v59 = vadd.f32 %v1488_v16, %v1467_v35  ;;  %v786_v11 = vlaneseq  ;;  %v761_v0 = vadd.f32 %v1497_v28, %v1476_v40  ;;  %v753_v40 = vld [vmem:[%s1657_s2] sm:$0x1] }
 0x162   :  { %v724_v4 = vrot.slane %v723_v47, 4  ;;  %v705_v7 = vrot.slane %v704_v36, 2  ;;  %v744_v8 = vadd.f32 %v743_v5, %v742_v1  ;;  %v762_v31 = vadd.f32 %v1500_v32, %v1479_v41 }
 0x163   :  { %v686_v6 = vadd.f32 %v685_v44, %v684_v63  ;;  %v760_v63 = vadd.f32 %v1494_v24, %v1473_v39  ;;  %v765_v34 = vadd.f32 %v758_v59, %v1507_v17  ;;  %v766_v12 = vadd.f32 %v759_v62, %v1510_v21 }
 0x164   :  { %v725_v9 = vadd.f32 %v724_v4, %v723_v47  ;;  %v706_v19 = vadd.f32 %v705_v7, %v704_v36  ;;  %v745_v14 = vrot.slane %v744_v8, 4  ;;  %v764_v47 = vadd.f32 %v757_v58, %v1504_v13 }
 0x165   :  { %v687_v18 = vrot.slane %v686_v6, 1  ;;  %v767_v35 = vadd.f32 %v760_v63, %v1513_v25  ;;  %v787_v16 = vshrl.u32 %v786_v11, 7  ;;  %v768_v38 = vadd.f32 %v761_v0, %v1516_v29 }
 0x166   :  { %v726_v15 = vrot.slane %v725_v9, 2  ;;  %v707_v23 = vrot.slane %v706_v19, 1  ;;  %v746_v26 = vadd.f32 %v745_v14, %v744_v8  ;;  %v769_v39 = vadd.f32 %v762_v31, %v1522_v42 }
 0x167   :  { %v688_v22 = vadd.f32 %v687_v18, %v686_v6  ;;  %v771_v41 = vadd.f32 %v764_v47, %v1527_v50  ;;  %v772_v24 = vadd.f32 %v765_v34, %v1532_v2  ;;  %v773_v28 = vadd.f32 %v766_v12, %v1539_v30  ;;  %v904_v30 = vld [vmem:[%s1658_s3] ss:$0 sm:$0xff] }
 0x168   :  { %v727_v27 = vadd.f32 %v726_v15, %v725_v9  ;;  %v708_v33 = vadd.f32 %v707_v23, %v706_v19  ;;  %v747_v37 = vrot.slane %v746_v26, 2  ;;  %v774_v32 = vadd.f32 %v767_v35, %v1542_v46 }
 0x169   :  { %v788_v13 = vsub.s32 0, %v787_v16  ;;  %v775_v21 = vadd.f32 %v768_v38, %v1553_v61  ;;  %v776_v25 = vadd.f32 %v769_v39, %v1556_v3  ;;  %v777_v29 = vadd.f32 %v770_v20, %v1559_v56 }
 0x16a   :  { %v728_v60 = vrot.slane %v727_v27, 1  ;;  %v709_v10 = vadd.f32 %v708_v33, %v688_v22  ;;  %v748_v48 = vadd.f32 %v747_v37, %v746_v26  ;;  %v778_v45 = vmul.f32 0.25, %v771_v41 }
 0x16b   :  { %v779_v52 = vmul.f32 0.25, %v772_v24  ;;  %v780_v44 = vmul.f32 0.25, %v773_v28  ;;  %v781_v36 = vmul.f32 0.25, %v774_v32  ;;  %v782_v1 = vmul.f32 0.25, %v775_v21 }
 0x16c   :  { %v729_v49 = vadd.f32 %v728_v60, %v727_v27  ;;  %v749_v43 = vrot.slane %v748_v48, 1  ;;  %v783_v2 = vmul.f32 0.25, %v776_v25  ;;  %v784_v4 = vmul.f32 0.25, %v777_v29 }
 0x16e   :  { %v730_v51 = vadd.f32 %v729_v49, %v709_v10  ;;  %v750_v53 = vadd.f32 %v749_v43, %v748_v48 }
 0x170   :  { %v751_v54 = vadd.f32 %v750_v53, %v730_v51 }
 0x172   :  { %v752_v55 = vmul.f32 0.005, %v751_v54 }
 0x174   :  { %v754_v57 = vadd.f32 1e-05, %v752_v55 }
 0x176   :  { %906 = vrsqrt.f32 %v754_v57 }
 0x183   :  { %v907_v17 = vpop.eup %906 }
 0x184   :  { %v756_v42 = vmul.f32 %v907_v17, %v753_v40 }
 0x186   :  { %v789_v50 = vrot.slane %v756_v42, %v788_v13 }
 0x188   :  { %v791_v46 = vmul.f32 %v789_v50, %v778_v45  ;;  %v792_v5 = vmul.f32 %v789_v50, %v779_v52  ;;  %v793_v61 = vmul.f32 %v789_v50, %v780_v44  ;;  %v794_v6 = vmul.f32 %v789_v50, %v781_v36 }
 0x189   :  { %v795_v3 = vmul.f32 %v789_v50, %v782_v1  ;;  %v796_v7 = vmul.f32 %v789_v50, %v783_v2  ;;  %v797_v56 = vmul.f32 %v789_v50, %v784_v4 }
 0x18a   :  { %v805_v8 = vadd.f32 %v904_v30, %v791_v46  ;;  %v806_v9 = vadd.f32 %v904_v30, %v792_v5  ;;  %v807_v18 = vadd.f32 %v904_v30, %v793_v61  ;;  %v808_v19 = vadd.f32 %v904_v30, %v794_v6 }
 0x18b   :  { %v809_v14 = vadd.f32 %v904_v30, %v795_v3  ;;  %v810_v15 = vadd.f32 %v904_v30, %v796_v7  ;;  %v811_v22 = vadd.f32 %v904_v30, %v797_v56 }
 0x18c   :  { %v812_v23 = vmax.f32 %v805_v8, 0.0  ;;  %v813_v26 = vmax.f32 %v806_v9, 0.0  ;;  %v814_v27 = vmax.f32 %v807_v18, 0.0  ;;  %v815_v33 = vmax.f32 %v808_v19, 0.0 }
 0x18d   :  { %v816_v37 = vmax.f32 %v809_v14, 0.0  ;;  %v817_v60 = vmax.f32 %v810_v15, 0.0  ;;  %v818_v10 = vmax.f32 %v811_v22, 0.0 }
 0x18e   :  { %819 = vst [vmem:[%s1659_s4] sm:$0xff] %v812_v23  ;;  %820 = vst [vmem:[%s1659_s4 + $0x8] sm:$0xff] %v813_v26 }
 0x18f   :  { %821 = vst [vmem:[%s1659_s4 + $0x10] sm:$0xff] %v814_v27  ;;  %822 = vst [vmem:[%s1659_s4 + $0x18] sm:$0xff] %v815_v33 }
 0x190   :  { %823 = vst [vmem:[%s1659_s4 + $0x20] sm:$0xff] %v816_v37  ;;  %824 = vst [vmem:[%s1659_s4 + $0x28] sm:$0xff] %v817_v60 }
 0x191   :  { %825 = vst [vmem:[%s1659_s4 + $0x30] sm:$0x3] %v818_v10 }

// kernel: lenet5_forward.5
= control target key start
LH: loop header
LB: loop body
LE: loop exit
PB: predicated region body
PF: predicated region fallthrough
CT: control target
= control target key end

     0   :  { %v696_v3 = vmov 0.0   ;;  %v697_v23 = vmov 1983009808   ;;  %v89_v25 = vlaneseq  ;;  %s1073_s0 = inlined_call_operand.vmem [shape: f32[2,400], index: 0, kind: input, shape index: {}]   ;;  %s1074_s1 = inlined_call_operand.vmem [shape: f32[400,128], index: 1, kind: input, shape index: {}]   ;;  %s1075_s2 = inlined_call_operand.vmem [shape: f32[1,128], index: 2, kind: input, shape index: {}]   ;;  %s1076_s3 = inlined_call_operand.vmem [shape: f32[1,128], index: 3, kind: input, shape index: {}]   ;;  %s1077_s4 = inlined_call_operand.vmem [shape: f32[128,128], index: 4, kind: input, shape index: {}]   ;;  %s1078_s5 = inlined_call_operand.vmem [shape: f32[1,128], index: 5, kind: input, shape index: {}]   ;;  %s1079_s6 = inlined_call_operand.vmem [shape: f32[1,128], index: 6, kind: input, shape index: {}]   ;;  %s1080_s7 = inlined_call_operand.vmem [shape: f32[128,128], index: 7, kind: input, shape index: {}]   ;;  %s1081_s8 = inlined_call_operand.vmem [shape: f32[1,128], index: 8, kind: input, shape index: {}]   ;;  %s1082_s9 = inlined_call_operand.hbm [shape: f32[2,128], index: 9, kind: output, shape index: {}]  }
   0x1   :  { %v65_v0 = vld [vmem:[%s1074_s1 + $0xf8] sm:$0xff]  ;;  %178 = vmatprep.subr.mxu1 %v696_v3  ;;  %v64_v4 = vld [vmem:[%s1074_s1 + $0xf0] sm:$0xff]  ;;  %v63_v7 = vld [vmem:[%s1074_s1 + $0xe8] sm:$0xff]  ;;  %v87_v24 = vunpack.c.l.s4 %v697_v23 }
   0x2   :  { %v49_v1 = vld [vmem:[%s1074_s1 + $0x78] sm:$0xff]  ;;  %526 = vmatprep.subr.mxu0 %v65_v0  ;;  %v48_v5 = vld [vmem:[%s1074_s1 + $0x70] sm:$0xff]  ;;  %v47_v8 = vld [vmem:[%s1074_s1 + $0x68] sm:$0xff]  ;;  %v90_v33 = vshrl.u32 %v89_v25, 7 }
   0x3   :  { %v81_v2 = vld [vmem:[%s1074_s1 + $0x178] sm:$0xff]  ;;  %v80_v6 = vld [vmem:[%s1074_s1 + $0x170] sm:$0xff]  ;;  %527 = vmatpush3.msra.mxu0 %v49_v1  ;;  %v79_v9 = vld [vmem:[%s1074_s1 + $0x168] sm:$0xff]  ;;  %v88_v32 = vunpack.c.0.s8 %v87_v24 }
   0x4   :  { %179 = vmatpush1.msra.mxu1 %v81_v2  ;;  %528 = vmatprep.subr.mxu0 %v64_v4  ;;  %v62_v10 = vld [vmem:[%s1074_s1 + $0xe0] sm:$0xff]  ;;  %v61_v13 = vld [vmem:[%s1074_s1 + $0xd8] sm:$0xff]  ;;  %v60_v16 = vld [vmem:[%s1074_s1 + $0xd0] sm:$0xff] }
   0x5   :  { %180 = vmatprep.subr.mxu1 %v696_v3  ;;  %529 = vmatpush3.msra.mxu0 %v48_v5  ;;  %v46_v11 = vld [vmem:[%s1074_s1 + $0x60] sm:$0xff]  ;;  %v45_v14 = vld [vmem:[%s1074_s1 + $0x58] sm:$0xff]  ;;  %v44_v17 = vld [vmem:[%s1074_s1 + $0x50] sm:$0xff] }
   0x6   :  { %181 = vmatpush1.msra.mxu1 %v80_v6  ;;  %530 = vmatprep.subr.mxu0 %v63_v7  ;;  %v78_v12 = vld [vmem:[%s1074_s1 + $0x160] sm:$0xff]  ;;  %v77_v15 = vld [vmem:[%s1074_s1 + $0x158] sm:$0xff]  ;;  %v76_v18 = vld [vmem:[%s1074_s1 + $0x150] sm:$0xff] }
   0x7   :  { %182 = vmatprep.subr.mxu1 %v696_v3  ;;  %531 = vmatpush3.msra.mxu0 %v47_v8  ;;  %v59_v19 = vld [vmem:[%s1074_s1 + $0xc8] sm:$0xff]  ;;  %v58_v22 = vld [vmem:[%s1074_s1 + $0xc0] sm:$0xff]  ;;  %v57_v28 = vld [vmem:[%s1074_s1 + $0xb8] sm:$0xff] }
   0x8   :  { %183 = vmatpush1.msra.mxu1 %v79_v9  ;;  %532 = vmatprep.subr.mxu0 %v62_v10  ;;  %v43_v20 = vld [vmem:[%s1074_s1 + $0x48] sm:$0xff]  ;;  %v42_v26 = vld [vmem:[%s1074_s1 + $0x40] sm:$0xff]  ;;  %v41_v29 = vld [vmem:[%s1074_s1 + $0x38] sm:$0xff] }
   0x9   :  { %184 = vmatprep.subr.mxu1 %v696_v3  ;;  %533 = vmatpush3.msra.mxu0 %v46_v11  ;;  %v75_v21 = vld [vmem:[%s1074_s1 + $0x148] sm:$0xff]  ;;  %v74_v27 = vld [vmem:[%s1074_s1 + $0x140] sm:$0xff]  ;;  %v73_v30 = vld [vmem:[%s1074_s1 + $0x138] sm:$0xff] }
   0xa   :  { %185 = vmatpush1.msra.mxu1 %v78_v12  ;;  %534 = vmatprep.subr.mxu0 %v61_v13  ;;  %v56_v31 = vld [vmem:[%s1074_s1 + $0xb0] sm:$0xff] }
   0xb   :  { %186 = vmatprep.subr.mxu1 %v696_v3  ;;  %535 = vmatpush3.msra.mxu0 %v45_v14  ;;  %v40_v34 = vld [vmem:[%s1074_s1 + $0x30] sm:$0xff] }
   0xc   :  { %187 = vmatpush1.msra.mxu1 %v77_v15  ;;  %536 = vmatprep.subr.mxu0 %v60_v16  ;;  %v72_v35 = vld [vmem:[%s1074_s1 + $0x130] sm:$0xff] }
   0xd   :  { %188 = vmatprep.subr.mxu1 %v696_v3  ;;  %537 = vmatpush3.msra.mxu0 %v44_v17 }
   0xe   :  { %189 = vmatpush1.msra.mxu1 %v76_v18  ;;  %538 = vmatprep.subr.mxu0 %v59_v19 }
   0xf   :  { %190 = vmatprep.subr.mxu1 %v696_v3  ;;  %539 = vmatpush3.msra.mxu0 %v43_v20 }
  0x10   :  { %191 = vmatpush1.msra.mxu1 %v75_v21  ;;  %540 = vmatprep.subr.mxu0 %v58_v22 }
  0x11   :  { %192 = vmatprep.subr.mxu1 %v696_v3  ;;  %541 = vmatpush3.msra.mxu0 %v42_v26 }
  0x12   :  { %193 = vmatpush1.msra.mxu1 %v74_v27  ;;  %542 = vmatprep.subr.mxu0 %v57_v28 }
  0x13   :  { %194 = vmatprep.subr.mxu1 %v696_v3 }
  0x14   :  { %14 = vsyncpa [#allocation3], 0  ;;  %543 = vmatpush3.msra.mxu0 %v41_v29  ;;  %195 = vmatpush1.msra.mxu1 %v73_v30  ;;  %v55_v36 = vld [vmem:[%s1074_s1 + $0xa8] sm:$0xff]  ;;  %v54_v39 = vld [vmem:[%s1074_s1 + $0xa0] sm:$0xff]  ;;  %v91_v40 = vsub.s32 %v88_v32, %v90_v33  ;;  %vm105_vm0 = vcmask 130048   ;;  %vm698_vm1 = vmmov 0  }
  0x15   :  { %544 = vmatprep.subr.mxu0 %v56_v31  ;;  %196 = vmatprep.subr.mxu1 %v696_v3  ;;  %v39_v37 = vld [vmem:[%s1074_s1 + $0x28] sm:$0xff]  ;;  %v38_v41 = vld [vmem:[%s1074_s1 + $0x20] sm:$0xff]  ;;  %v53_v44 = vld [vmem:[%s1074_s1 + $0x98] sm:$0xff]  ;;  %vm250_vm2 = vcmask 1041408   ;;  %s699_s24 = smov [#allocation2]  }
  0x16   :  { %v71_v38 = vld [vmem:[%s1074_s1 + $0x128] sm:$0xff]  ;;  %545 = vmatpush3.msra.mxu0 %v40_v34  ;;  %197 = vmatpush1.msra.mxu1 %v72_v35  ;;  %v70_v42 = vld [vmem:[%s1074_s1 + $0x120] sm:$0xff]  ;;  %v37_v46 = vld [vmem:[%s1074_s1 + $0x18] sm:$0xff]  ;;  %s512_s25 = sshll.u32 %s699_s24, 4  ;;  %s513_s25 = int_to_ptr.vmem [resolvable:$true] %s512_s25 }
  0x17   :  { %546 = vmatprep.subr.mxu0 %v55_v36  ;;  %198 = vmatprep.subr.mxu1 %v696_v3  ;;  %v33_v43 = vld [vmem:[%s1073_s0] sm:$0xff]  ;;  %v69_v47 = vld [vmem:[%s1074_s1 + $0x118] sm:$0xff]  ;;  %v52_v48 = vld [vmem:[%s1074_s1 + $0x90] sm:$0xff]  ;;  %p679_p1 = scmp.lt.s32.totalorder %s513_s25, %s513_s25 }
  0x18   :  { %547 = vmatpush3.msra.mxu0 %v39_v37  ;;  %199 = vmatpush1.msra.mxu1 %v71_v38  ;;  %v85_v45 = vcombine.high %v33_v43, %v33_v43  ;;  %v92_v49 = vrot.slane %v33_v43, %v91_v40  ;;  %v36_v50 = vld [vmem:[%s1074_s1 + $0x10] sm:$0xff]  ;;  %v51_v52 = vld [vmem:[%s1074_s1 + $0x88] sm:$0xff]  ;;  %v50_v56 = vld [vmem:[%s1074_s1 + $0x80] sm:$0xff] }
  0x19   :  { %548 = vmatprep.subr.mxu0 %v54_v39  ;;  %200 = vmatprep.subr.mxu1 %v696_v3  ;;  %v68_v51 = vld [vmem:[%s1074_s1 + $0x110] sm:$0xff]  ;;  %v35_v54 = vld [vmem:[%s1074_s1 + $0x8] sm:$0xff]  ;;  %v34_v58 = vld [vmem:[%s1074_s1] sm:$0xff] }
  0x1a   :  { %549 = vmatpush3.msra.mxu0 %v38_v41  ;;  %201 = vmatpush1.msra.mxu1 %v70_v42  ;;  %v99_v53 = vrot.slane %v85_v45, %v91_v40  ;;  %v67_v55 = vld [vmem:[%s1074_s1 + $0x108] sm:$0xff]  ;;  %v100_v57 = vcombine.high %v92_v49, %v92_v49  ;;  %v66_v59 = vld [vmem:[%s1074_s1 + $0x100] sm:$0xff]  ;;  %v303_v63 = vld [vmem:[%s1077_s4 + $0x78] sm:$0xff] }
  0x1b   :  { %550 = vmatprep.subr.mxu0 %v53_v44  ;;  %202 = vmatprep.subr.mxu1 %v696_v3  ;;  %v83_v61 = vld [vmem:[%s1074_s1 + $0x188] sm:$0xff]  ;;  %v82_v62 = vld [vmem:[%s1074_s1 + $0x180] sm:$0xff]  ;;  %v302_v0 = vld [vmem:[%s1077_s4 + $0x70] sm:$0xff] }
  0x1c   :  { %551 = vmatpush3.msra.mxu0 %v37_v46  ;;  %203 = vmatpush1.msra.mxu1 %v69_v47  ;;  %v101_v60 = vcombine.high %v99_v53, %v99_v53  ;;  %v301_v1 = vld [vmem:[%s1077_s4 + $0x68] sm:$0xff]  ;;  %v300_v2 = vld [vmem:[%s1077_s4 + $0x60] sm:$0xff]  ;;  %v299_v4 = vld [vmem:[%s1077_s4 + $0x58] sm:$0xff] }
  0x1d   :  { %552 = vmatprep.subr.mxu0 %v52_v48  ;;  %204 = vmatprep.subr.mxu1 %v696_v3  ;;  %v298_v5 = vld [vmem:[%s1077_s4 + $0x50] sm:$0xff]  ;;  %v297_v6 = vld [vmem:[%s1077_s4 + $0x48] sm:$0xff]  ;;  %v296_v7 = vld [vmem:[%s1077_s4 + $0x40] sm:$0xff] }
  0x1e   :  { %553 = vmatpush3.msra.mxu0 %v36_v50  ;;  %205 = vmatpush1.msra.mxu1 %v68_v51  ;;  %v295_v8 = vld [vmem:[%s1077_s4 + $0x38] sm:$0xff]  ;;  %v294_v9 = vld [vmem:[%s1077_s4 + $0x30] sm:$0xff]  ;;  %v293_v10 = vld [vmem:[%s1077_s4 + $0x28] sm:$0xff] }
  0x1f   :  { %554 = vmatprep.subr.mxu0 %v51_v52  ;;  %206 = vmatprep.subr.mxu1 %v696_v3  ;;  %v292_v11 = vld [vmem:[%s1077_s4 + $0x20] sm:$0xff]  ;;  %v291_v12 = vld [vmem:[%s1077_s4 + $0x18] sm:$0xff]  ;;  %v290_v13 = vld [vmem:[%s1077_s4 + $0x10] sm:$0xff] }
  0x20   :  { %555 = vmatpush3.msra.mxu0 %v35_v54  ;;  %207 = vmatpush1.msra.mxu1 %v67_v55  ;;  %v289_v14 = vld [vmem:[%s1077_s4 + $0x8] sm:$0xff]  ;;  %v288_v15 = vld [vmem:[%s1077_s4] sm:$0xff]  ;;  %v427_v48 = vld [vmem:[%s1080_s7 + $0x78] sm:$0xff] }
  0x21   :  { %556 = vmatprep.subr.mxu0 %v50_v56  ;;  %208 = vmatprep.subr.mxu1 %v696_v3  ;;  %v521_v42 = vld [vmem:[%s1075_s2] ss:$0 sm:$0xff]  ;;  %v425_v50 = vld [vmem:[%s1080_s7 + $0x68] sm:$0xff]  ;;  %v423_v52 = vld [vmem:[%s1080_s7 + $0x58] sm:$0xff] }
  0x22   :  { %557 = vmatpush3.msra.mxu0 %v34_v58  ;;  %172 = vmatprep.mubr.f32.mxu0 %v100_v57  ;;  %v522_v44 = vld [vmem:[%s1076_s3] ss:$0 sm:$0xff]  ;;  %v421_v54 = vld [vmem:[%s1080_s7 + $0x48] sm:$0xff]  ;;  %v419_v56 = vld [vmem:[%s1080_s7 + $0x38] sm:$0xff] }
  0x23   :  { %209 = vmatpush1.msra.mxu1 %v66_v59  ;;  %173 = vmatmul.mubr.f32.vlgmr.msra.gmra.mxu0 %v92_v49  ;;  %v426_v49 = vld [vmem:[%s1080_s7 + $0x70] sm:$0xff]  ;;  %v424_v51 = vld [vmem:[%s1080_s7 + $0x60] sm:$0xff]  ;;  %v417_v58 = vld [vmem:[%s1080_s7 + $0x28] sm:$0xff] }
  0x24   :  { %238 = vmatprep.subr.mxu1 %v696_v3  ;;  %520 = vmatprep.mubr.msk.f32.mxu1 %vm105_vm0, %v101_v60  ;;  %v420_v55 = vld [vmem:[%s1080_s7 + $0x40] sm:$0xff]  ;;  %v418_v57 = vld [vmem:[%s1080_s7 + $0x30] sm:$0xff]  ;;  %v415_v60 = vld [vmem:[%s1080_s7 + $0x18] sm:$0xff] }
  0x25   :  { %239 = vmatpush2.msra.mxu1 %v83_v61  ;;  %595 = vmatprep.subr.mxu0 %v696_v3  ;;  %v416_v59 = vld [vmem:[%s1080_s7 + $0x20] sm:$0xff]  ;;  %v414_v61 = vld [vmem:[%s1080_s7 + $0x10] sm:$0xff] }
  0x26   :  { %240 = vmatprep.subr.mxu1 %v696_v3  ;;  %596 = vmatpush3.msra.mxu0 %v303_v63  ;;  %v412_v63 = vld [vmem:[%s1080_s7] sm:$0xff] }
  0x27   :  { %241 = vmatpush2.msra.mxu1 %v82_v62  ;;  %597 = vmatprep.subr.mxu0 %v696_v3  ;;  %v413_v62 = vld [vmem:[%s1080_s7 + $0x8] sm:$0xff] }
  0x28   :  { %243 = vmatmul.mubr.f32.vlgmr.msra.gmra.mxu1 %v99_v53  ;;  %630 = vmatprep.subr.mxu1 %v696_v3  ;;  %v422_v53 = vld [vmem:[%s1080_s7 + $0x50] sm:$0xff] }
  0x29   :  { %598 = vmatpush3.msra.mxu0 %v302_v0  ;;  %627 = vmatprep.mubr.msk.f32.mxu0 %vm698_vm1, %v696_v3 }
  0x2a   :  { %599 = vmatprep.subr.mxu0 %v696_v3  ;;  %662 = vmatprep.mubr.msk.f32.mxu1 %vm698_vm1, %v696_v3 }
  0x2b   :  { %600 = vmatpush3.msra.mxu0 %v301_v1  ;;  %631 = vmatpush3.msra.mxu1 %v427_v48 }
  0x2c   :  { %601 = vmatprep.subr.mxu0 %v696_v3  ;;  %632 = vmatprep.subr.mxu1 %v696_v3 }
  0x2d   :  { %602 = vmatpush3.msra.mxu0 %v300_v2  ;;  %633 = vmatpush3.msra.mxu1 %v426_v49 }
  0x2e   :  { %603 = vmatprep.subr.mxu0 %v696_v3  ;;  %634 = vmatprep.subr.mxu1 %v696_v3 }
  0x2f   :  { %604 = vmatpush3.msra.mxu0 %v299_v4  ;;  %635 = vmatpush3.msra.mxu1 %v425_v50 }
  0x30   :  { %605 = vmatprep.subr.mxu0 %v696_v3  ;;  %636 = vmatprep.subr.mxu1 %v696_v3 }
  0x31   :  { %606 = vmatpush3.msra.mxu0 %v298_v5  ;;  %637 = vmatpush3.msra.mxu1 %v424_v51 }
  0x32   :  { %607 = vmatprep.subr.mxu0 %v696_v3  ;;  %638 = vmatprep.subr.mxu1 %v696_v3 }
  0x33   :  { %608 = vmatpush3.msra.mxu0 %v297_v6  ;;  %639 = vmatpush3.msra.mxu1 %v423_v52 }
  0x34   :  { %609 = vmatprep.subr.mxu0 %v696_v3  ;;  %640 = vmatprep.subr.mxu1 %v696_v3 }
  0x35   :  { %610 = vmatpush3.msra.mxu0 %v296_v7  ;;  %641 = vmatpush3.msra.mxu1 %v422_v53 }
  0x36   :  { %611 = vmatprep.subr.mxu0 %v696_v3  ;;  %642 = vmatprep.subr.mxu1 %v696_v3 }
  0x37   :  { %612 = vmatpush3.msra.mxu0 %v295_v8  ;;  %643 = vmatpush3.msra.mxu1 %v421_v54 }
  0x38   :  { %613 = vmatprep.subr.mxu0 %v696_v3  ;;  %644 = vmatprep.subr.mxu1 %v696_v3 }
  0x39   :  { %614 = vmatpush3.msra.mxu0 %v294_v9  ;;  %645 = vmatpush3.msra.mxu1 %v420_v55 }
  0x3a   :  { %615 = vmatprep.subr.mxu0 %v696_v3  ;;  %646 = vmatprep.subr.mxu1 %v696_v3 }
  0x3b   :  { %616 = vmatpush3.msra.mxu0 %v293_v10  ;;  %647 = vmatpush3.msra.mxu1 %v419_v56 }
  0x3c   :  { %617 = vmatprep.subr.mxu0 %v696_v3  ;;  %648 = vmatprep.subr.mxu1 %v696_v3 }
  0x3d   :  { %618 = vmatpush3.msra.mxu0 %v292_v11  ;;  %649 = vmatpush3.msra.mxu1 %v418_v57 }
  0x3e   :  { %619 = vmatprep.subr.mxu0 %v696_v3  ;;  %650 = vmatprep.subr.mxu1 %v696_v3 }
  0x3f   :  { %620 = vmatpush3.msra.mxu0 %v291_v12  ;;  %651 = vmatpush3.msra.mxu1 %v417_v58 }
  0x40   :  { %621 = vmatprep.subr.mxu0 %v696_v3  ;;  %652 = vmatprep.subr.mxu1 %v696_v3 }
  0x41   :  { %622 = vmatpush3.msra.mxu0 %v290_v13  ;;  %653 = vmatpush3.msra.mxu1 %v416_v59 }
  0x42   :  { %623 = vmatprep.subr.mxu0 %v696_v3  ;;  %654 = vmatprep.subr.mxu1 %v696_v3 }
  0x43   :  { %624 = vmatpush3.msra.mxu0 %v289_v14  ;;  %655 = vmatpush3.msra.mxu1 %v415_v60 }
  0x44   :  { %625 = vmatprep.subr.mxu0 %v696_v3  ;;  %656 = vmatprep.subr.mxu1 %v696_v3 }
  0x45   :  { %626 = vmatpush3.msra.mxu0 %v288_v15  ;;  %657 = vmatpush3.msra.mxu1 %v414_v61 }
  0x46   :  { %658 = vmatprep.subr.mxu1 %v696_v3 }
  0x47   :  { %659 = vmatpush3.msra.mxu1 %v413_v62 }
  0x48   :  { %660 = vmatprep.subr.mxu1 %v696_v3 }
  0x49   :  { %661 = vmatpush3.msra.mxu1 %v412_v63 }
  0xe3   :  { %v558_v16 = vpop.f32.mrf.mxu0 }
  0xe5   :  { %v559_v17 = vpop.f32.mrf.mxu0 }
  0xe6   :  { %v560_v18 = vadd.f32 %v559_v17, %v558_v16 }
  0xe8   :  { %v244_v19 = vpop.f32.mrf.mxu1 }
  0xe9   :  { %v245_v20 = vadd.f32 %v560_v18, %v244_v19 }
  0xea   :  { %v246_v21 = vpop.f32.mrf.mxu1 }
  0xeb   :  { %v251_v22 = vsel %vm250_vm2, %v245_v20, 0.0 }
  0xec   :  { %v252_v23 = vrot.slane %v251_v22, 4 }
  0xee   :  { %v253_v24 = vadd.f32 %v252_v23, %v251_v22  ;;  %v523_v22 = vld [vmem:[%s1078_s5] ss:$0 sm:$0xff]  ;;  %s674_s5 = scalar_lea.vmem %s513_s25, 32 }
  0xef   :  { %p675_p0 = scmp.ne.s32.totalorder %s513_s25, %s674_s5  ;;  %p680_p2 = scmp.lt.s32.totalorder %s674_s5, %s674_s5 }
  0xf0   :  { %v254_v25 = vrot.slane %v253_v24, 2 }
  0xf1   :  { %p681_p3 = por %p680_p2, %p679_p1 }
  0xf2   :  { %v255_v26 = vadd.f32 %v254_v25, %v253_v24  ;;  %v524_v24 = vld [vmem:[%s1079_s6] ss:$0 sm:$0xff] }
  0xf3   :  { %p682_p4 = pnand %p681_p3, %p675_p0 }
  0xf4   :  { %v256_v27 = vrot.slane %v255_v26, 1 }
  0xf6   :  { %v257_v28 = vadd.f32 %v256_v27, %v255_v26 }
  0xf8   :  { %v259_v29 = vmul.f32 0.5, %v257_v28  ;;  %v525_v28 = vld [vmem:[%s1081_s8] ss:$0 sm:$0xff] }
  0xfa   :  { %v260_v30 = vsub.f32 %v245_v20, %v259_v29 }
  0xfc   :  { %v261_v31 = vmul.f32 %v260_v30, %v260_v30 }
  0xfe   :  { %v262_v32 = vsel %vm250_vm2, %v261_v31, 0.0 }
  0xff   :  { %v263_v33 = vrot.slane %v262_v32, 4 }
 0x101   :  { %v264_v34 = vadd.f32 %v263_v33, %v262_v32 }
 0x103   :  { %v265_v35 = vrot.slane %v264_v34, 2 }
 0x105   :  { %v266_v36 = vadd.f32 %v265_v35, %v264_v34 }
 0x107   :  { %v267_v37 = vrot.slane %v266_v36, 1 }
 0x109   :  { %v268_v38 = vadd.f32 %v267_v37, %v266_v36 }
 0x10b   :  { %v269_v39 = vmul.f32 0.5, %v268_v38 }
 0x10d   :  { %v270_v40 = vadd.f32 1e-05, %v269_v39 }
 0x10f   :  { %670 = vrsqrt.f32 %v270_v40 }
 0x11c   :  { %v671_v41 = vpop.eup %670 }
 0x11d   :  { %v272_v43 = vmul.f32 %v671_v41, %v260_v30 }
 0x11f   :  { %v279_v45 = vmul.f32 %v521_v42, %v272_v43 }
 0x121   :  { %v286_v46 = vadd.f32 %v522_v44, %v279_v45 }
 0x123   :  { %v287_v47 = vmax.f32 %v286_v46, 0.0 }
 0x125   :  { %628 = vmatmul.mubr.f32.vlgmr.msra.gmra.mxu0 %v287_v47 }
 0x1e5   :  { %v370_v0 = vpop.f32.mrf.mxu0 }
 0x1e6   :  { %v376_v1 = vsel %vm250_vm2, %v370_v0, 0.0 }
 0x1e7   :  { %v377_v2 = vrot.slane %v376_v1, 4  ;;  %v629_v4 = vpop.f32.mrf.mxu0 }
 0x1e9   :  { %v378_v5 = vadd.f32 %v377_v2, %v376_v1 }
 0x1eb   :  { %v379_v6 = vrot.slane %v378_v5, 2 }
 0x1ed   :  { %v380_v7 = vadd.f32 %v379_v6, %v378_v5 }
 0x1ef   :  { %v381_v8 = vrot.slane %v380_v7, 1 }
 0x1f1   :  { %v382_v9 = vadd.f32 %v381_v8, %v380_v7 }
 0x1f3   :  { %v383_v10 = vmul.f32 0.5, %v382_v9 }
 0x1f5   :  { %v384_v11 = vsub.f32 %v370_v0, %v383_v10 }
 0x1f7   :  { %v385_v12 = vmul.f32 %v384_v11, %v384_v11 }
 0x1f9   :  { %v386_v13 = vsel %vm250_vm2, %v385_v12, 0.0 }
 0x1fa   :  { %v387_v14 = vrot.slane %v386_v13, 4 }
 0x1fc   :  { %v388_v15 = vadd.f32 %v387_v14, %v386_v13 }
 0x1fe   :  { %v389_v16 = vrot.slane %v388_v15, 2 }
 0x200   :  { %v390_v3 = vadd.f32 %v389_v16, %v388_v15 }
 0x202   :  { %v391_v17 = vrot.slane %v390_v3, 1 }
 0x204   :  { %v392_v18 = vadd.f32 %v391_v17, %v390_v3 }
 0x206   :  { %v393_v19 = vmul.f32 0.5, %v392_v18 }
 0x208   :  { %v394_v20 = vadd.f32 1e-05, %v393_v19 }
 0x20a   :  { %672 = vrsqrt.f32 %v394_v20 }
 0x217   :  { %v673_v21 = vpop.eup %672 }
 0x218   :  { %v396_v23 = vmul.f32 %v673_v21, %v384_v11 }
 0x21a   :  { %v403_v25 = vmul.f32 %v523_v22, %v396_v23 }
 0x21c   :  { %v410_v26 = vadd.f32 %v524_v24, %v403_v25 }
 0x21e   :  { %v411_v27 = vmax.f32 %v410_v26, 0.0 }
 0x220   :  { %663 = vmatmul.mubr.f32.vlgmr.msra.gmra.mxu1 %v411_v27 }
 0x2e0   :  { %v501_v29 = vpop.f32.mrf.mxu1 }
 0x2e1   :  { %v502_v30 = vadd.f32 %v525_v28, %v501_v29 }
 0x2e2   :  { %v664_v31 = vpop.f32.mrf.mxu1 }
 0x2e3   :  { %505 = vst [vmem:[#allocation2] sm:$0x3] %v502_v30 }
 0x2e4   :  { %685 = shalt.err (!%p682_p4)
}
 0x2e5   :  { %515 = dma.vmem_to_hbm [thread:$0]  %s513_s25, 32, %s1082_s9, [#allocation3]  }
 0x2e6   :  { %694 = dma.done.wait [#allocation3], 32  }
 0x2e7   :  { %695 = vsyncadd [#allocation3], 4294967264 }
 0x2e8   :  { %519 = vsyncpa [#allocation3], 1 }

</bundles_post_ra>
